<compile_context>
chip_gen: v6e
topology: v6e:2x2x1
jax: 0.10.0
libtpu: 0.0.40
codegen_flags: <defaults>
</compile_context>

<pallas_src>
import functools
import math

import jax
import jax.numpy as jnp
import numpy as np
from jax import lax
from jax.experimental import pallas as pl
from jax.experimental.pallas import tpu as pltpu


def _resblock_kernel(x_ref, w1_ref, b1_ref, w2_ref, b2_ref, out_ref, *, depth):
    """One grid step = one (m_tile, L) slab of fused (batch, depth) rows.

    x_ref  : (m_tile, L)  f32   row r <-> (batch b = r//depth, d = r%depth)
    w*_ref : (3, L, L)    bf16  banded conv weights, leading axis = kd tap
    b*_ref : (1, L)       f32   bias broadcast over (h, w), lane-dense
    out_ref: (m_tile, L)  f32
    """
    M, L = x_ref.shape
    x = x_ref[...]                                               # (M, L) f32
    zrow = jnp.zeros((1, L), jnp.float32)
    d_idx = lax.broadcasted_iota(jnp.int32, (M, 1), 0) % depth   # depth of row

    def conv_relu(v, w_ref, b_ref):
        # kd = 0 / 2 taps as sublane row shifts with zero fill; the mask also
        # zeroes sample-boundary rows inside the multi-sample block (D pad).
        up = jnp.where(d_idx == 0, 0.0,
                       jnp.concatenate([zrow, v[:-1]], axis=0))   # v[d-1]
        dn = jnp.where(d_idx == depth - 1, 0.0,
                       jnp.concatenate([v[1:], zrow], axis=0))    # v[d+1]
        # Three accumulating full-height MXU matmuls against static slices of
        # the resident (3, L, L) weight tile; bf16 operands, f32 accumulate.
        acc = jnp.dot(up.astype(jnp.bfloat16), w_ref[0],
                      preferred_element_type=jnp.float32)
        acc += jnp.dot(v.astype(jnp.bfloat16), w_ref[1],
                       preferred_element_type=jnp.float32)
        acc += jnp.dot(dn.astype(jnp.bfloat16), w_ref[2],
                       preferred_element_type=jnp.float32)
        return jnp.maximum(acc + b_ref[...], 0.0)                 # f32

    h = conv_relu(x, w1_ref, b1_ref)                  # Conv3d #1 + ReLU
    r = conv_relu(h, w2_ref, b2_ref)                  # Conv3d #2 + ReLU
    out_ref[...] = (x + r).astype(out_ref.dtype)      # residual add, lane-dense


def _band_weights(w_oidhw, H, W):
    """PyTorch Conv3d weight (Co, Ci, 3, 3, 3) -> banded tensor (3, H*W*Ci, H*W*Co).

    For each kd tap, B[kd][(h', w', ci), (h, w, co)] = w[co, ci, kd, h'-h+1, w'-w+1]
    when both offsets lie in [0, 2], else 0.  This bakes the kh/kw taps, the
    Cin contraction AND the implicit H/W zero-padding into the MXU contraction.
    """
    Co, Ci = w_oidhw.shape[0], w_oidhw.shape[1]
    wt = jnp.transpose(w_oidhw, (2, 3, 4, 1, 0)).astype(jnp.float32)  # (kd,kh,kw,Ci,Co)

    dh = jnp.arange(H)[:, None, None, None] - jnp.arange(H)[None, :, None, None] + 1
    dw = jnp.arange(W)[None, None, :, None] - jnp.arange(W)[None, None, None, :] + 1
    valid = (dh >= 0) & (dh <= 2) & (dw >= 0) & (dw <= 2)             # (H,H,W,W)

    g = wt[:, jnp.clip(dh, 0, 2), jnp.clip(dw, 0, 2), :, :]           # (3,H,H,W,W,Ci,Co)
    g = jnp.where(valid[None, :, :, :, :, None, None], g, 0.0)
    g = jnp.transpose(g, (0, 1, 3, 5, 2, 4, 6))                       # (kd,h',w',ci,h,w,co)
    return g.reshape(3, H * W * Ci, H * W * Co)


def resblock_pallas(x_ncdhw, w1, b1, w2, b2, *, target_m=256):
    """x_ncdhw: (N, C, D, H, W) float32; weights/biases in PyTorch Conv3d layout.

    target_m: max matmul rows per grid step (256 for v6e/v7x MXU, 128 on v5e).
    """
    N, C, D, H, W = x_ncdhw.shape
    L = H * W * C

    # NCDHW -> NDHWC -> (N*D, H*W*C): channels-last, H/W/C fused into lanes,
    # batch and depth fused into matmul rows.
    # TODO(synk): keep activations channels-last across the whole network so
    # these wrapper transposes disappear at production activation sizes.
    x_rows = (jnp.transpose(x_ncdhw, (0, 2, 3, 4, 1))
              .astype(jnp.float32).reshape(N * D, L))

    rows = N * D
    unit = (D * 8) // math.gcd(D, 8)              # block rows: multiple of D and 8
    m_tile = max(unit, (min(target_m, rows) // unit) * unit)
    rows_padded = ((rows + m_tile - 1) // m_tile) * m_tile
    if rows_padded != rows:
        x_rows = jnp.pad(x_rows, ((0, rows_padded - rows), (0, 0)))
    grid = (rows_padded // m_tile,)

    # Banded conv weights as bf16 (MXU-native; halves weight DMA + VMEM).
    w1m = _band_weights(w1, H, W).astype(jnp.bfloat16)
    w2m = _band_weights(w2, H, W).astype(jnp.bfloat16)
    b1v = jnp.tile(b1.astype(jnp.float32), H * W).reshape(1, L)
    b2v = jnp.tile(b2.astype(jnp.float32), H * W).reshape(1, L)

    # TODO(synk): at production U-Net sizes (C >= 128, 32^3 volumes) the (L, L)
    # band matrices no longer fit VMEM; switch to the im2col/D-slab plan
    # (move h into M, realize kh via pltpu.roll lane shifts, contract (kw, Ci)).
    def build(single_buffer_weights):
        wkw = ({"pipeline_mode": pl.Buffered(1)} if single_buffer_weights
               else {})
        return pl.pallas_call(
            functools.partial(_resblock_kernel, depth=D),
            out_shape=jax.ShapeDtypeStruct((rows_padded, L), jnp.float32),
            grid_spec=pltpu.PrefetchScalarGridSpec(
                num_scalar_prefetch=0,
                grid=grid,
                in_specs=[
                    pl.BlockSpec((m_tile, L), lambda i: (i, 0)),
                    pl.BlockSpec((3, L, L), lambda i: (0, 0, 0), **wkw),
                    pl.BlockSpec((1, L), lambda i: (0, 0), **wkw),
                    pl.BlockSpec((3, L, L), lambda i: (0, 0, 0), **wkw),
                    pl.BlockSpec((1, L), lambda i: (0, 0), **wkw),
                ],
                out_specs=pl.BlockSpec((m_tile, L), lambda i: (i, 0)),
            ),
            # TODO(synk): on v7x verify the row axis shards across both
            # TensorCores; if not, switch this axis to pltpu.CORE_PARALLEL.
            compiler_params=pltpu.CompilerParams(
                dimension_semantics=("parallel",),
                vmem_limit_bytes=32 * 1024 * 1024,
            ),
        )

    def run(single_buffer_weights):
        f = build(single_buffer_weights)
        return jax.block_until_ready(f(x_rows, w1m, b1v, w2m, b2v))

    try:
        out_rows = run(True)          # weights/biases single-buffered
    except Exception:                 # pipeline_mode / Buffered(1) unsupported
        out_rows = run(False)

    # (rows, L) -> (N, D, H, W, C) -> NCDHW (match PyTorch output layout)
    out = out_rows[:rows].reshape(N, D, H, W, C)
    return jnp.transpose(out, (0, 4, 1, 2, 3))


def resblock_reference(x, w1, b1, w2, b2):
    """Pure-JAX f32 reference (NCDHW), mirroring the PyTorch module exactly."""
    dn = lax.conv_dimension_numbers(x.shape, w1.shape,
                                    ('NCDHW', 'OIDHW', 'NCDHW'))
    pad = ((1, 1), (1, 1), (1, 1))
    h = lax.conv_general_dilated(x, w1, (1, 1, 1), pad, dimension_numbers=dn,
                                 precision=lax.Precision.HIGHEST)
    h = jnp.maximum(h + b1.reshape(1, -1, 1, 1, 1), 0.0)
    r = lax.conv_general_dilated(h, w2, (1, 1, 1), pad, dimension_numbers=dn,
                                 precision=lax.Precision.HIGHEST)
    r = jnp.maximum(r + b2.reshape(1, -1, 1, 1, 1), 0.0)
    return x + r


if __name__ == "__main__":
    # Small, deterministic problem: dim=8 channels, 8^3 volume, batch 6.
    N, C, D, H, W = 6, 8, 8, 8, 8
    key = jax.random.PRNGKey(0)
    kx, kw1, kb1, kw2, kb2 = jax.random.split(key, 5)

    x = jax.random.normal(kx, (N, C, D, H, W), dtype=jnp.float32)
    # Conv3d(dim, dim, 3) parameter shapes: weight (C, C, 3, 3, 3), bias (C,)
    w1 = jax.random.normal(kw1, (C, C, 3, 3, 3), dtype=jnp.float32) * 0.1
    b1 = jax.random.normal(kb1, (C,), dtype=jnp.float32) * 0.1
    w2 = jax.random.normal(kw2, (C, C, 3, 3, 3), dtype=jnp.float32) * 0.1
    b2 = jax.random.normal(kb2, (C,), dtype=jnp.float32) * 0.1

    ref = jax.block_until_ready(resblock_reference(x, w1, b1, w2, b2))

    # Default config: one full-height block (rows = N*D fused into M).
    out = jax.block_until_ready(resblock_pallas(x, w1, b1, w2, b2))
    assert out.shape == (N, C, D, H, W)
    # Tolerance reflects bf16 MXU operands vs. the HIGHEST-precision f32 ref.
    np.testing.assert_allclose(np.asarray(out), np.asarray(ref),
                               rtol=5e-2, atol=1e-1)

    # Second config exercises multi-step grid + padded tail block (m_tile=40).
    out2 = jax.block_until_ready(resblock_pallas(x, w1, b1, w2, b2, target_m=40))
    np.testing.assert_allclose(np.asarray(out2), np.asarray(ref),
                               rtol=5e-2, atol=1e-1)

    print("KERNEL_OK")
</pallas_src>

<mosaic_0001>
module attributes {stable_mosaic.version = 11 : i64} {
  func.func @_resblock_kernel(%arg0: i32, %arg1: memref<48x512xf32, #tpu.memory_space<vmem>>, %arg2: memref<3x512x512xbf16, #tpu.memory_space<vmem>>, %arg3: memref<1x512xf32, #tpu.memory_space<vmem>>, %arg4: memref<3x512x512xbf16, #tpu.memory_space<vmem>>, %arg5: memref<1x512xf32, #tpu.memory_space<vmem>>, %arg6: memref<48x512xf32, #tpu.memory_space<vmem>>) attributes {dimension_semantics = [#tpu.dimension_semantics<parallel>], iteration_bounds = array<i64: 1>, scalar_prefetch = 0 : i64, scratch_operands = 0 : i64, tpu.core_type = #tpu.core_type<tc>, window_params = [{transform_indices = @transform_0, window_bounds = array<i64: 48, 512>}, {pipeline_mode = #tpu.pipeline_mode<synchronous>, transform_indices = @transform_1, window_bounds = array<i64: 3, 512, 512>}, {pipeline_mode = #tpu.pipeline_mode<synchronous>, transform_indices = @transform_2, window_bounds = array<i64: 1, 512>}, {pipeline_mode = #tpu.pipeline_mode<synchronous>, transform_indices = @transform_3, window_bounds = array<i64: 3, 512, 512>}, {pipeline_mode = #tpu.pipeline_mode<synchronous>, transform_indices = @transform_4, window_bounds = array<i64: 1, 512>}, {transform_indices = @transform_5, window_bounds = array<i64: 48, 512>}]} {
    %c0 = arith.constant 0 : index
    %c0_0 = arith.constant 0 : index
    %0 = vector.load %arg1[%c0, %c0_0] : memref<48x512xf32, #tpu.memory_space<vmem>>, vector<48x512xf32>
    %cst = arith.constant 0.000000e+00 : f32
    %1 = vector.broadcast %cst : f32 to vector<1x512xf32>
    %2 = tpu.iota {dimensions = array<i32: 0>} : vector<48x1xi32>
    %c8_i32 = arith.constant 8 : i32
    %c0_i32 = arith.constant 0 : i32
    %3 = arith.cmpi eq, %c8_i32, %c0_i32 : i32
    %c1_i32 = arith.constant 1 : i32
    %4 = arith.select %3, %c1_i32, %c8_i32 : i32
    %5 = vector.broadcast %4 : i32 to vector<48x1xi32>
    %6 = arith.remsi %2, %5 : vector<48x1xi32>
    %c0_i32_1 = arith.constant 0 : i32
    %7 = vector.broadcast %c0_i32_1 : i32 to vector<48x1xi32>
    %8 = arith.cmpi ne, %6, %7 : vector<48x1xi32>
    %c0_i32_2 = arith.constant 0 : i32
    %9 = vector.broadcast %c0_i32_2 : i32 to vector<48x1xi32>
    %10 = arith.cmpi slt, %6, %9 : vector<48x1xi32>
    %c0_i32_3 = arith.constant 0 : i32
    %11 = arith.cmpi slt, %4, %c0_i32_3 : i32
    %12 = vector.broadcast %11 : i1 to vector<48x1xi1>
    %13 = vector.broadcast %12 : vector<48x1xi1> to vector<48x1xi1>
    %14 = arith.xori %10, %13 : vector<48x1xi1>
    %15 = arith.andi %14, %8 : vector<48x1xi1>
    %16 = vector.broadcast %4 : i32 to vector<48x1xi32>
    %17 = arith.addi %6, %16 : vector<48x1xi32>
    %18 = arith.select %15, %17, %6 : vector<48x1xi1>, vector<48x1xi32>
    %c0_i32_4 = arith.constant 0 : i32
    %19 = vector.broadcast %c0_i32_4 : i32 to vector<48x1xi32>
    %20 = arith.cmpi eq, %18, %19 : vector<48x1xi32>
    %21 = vector.extract_strided_slice %0 {offsets = [0, 0], sizes = [47, 512], strides = [1, 1]} : vector<48x512xf32> to vector<47x512xf32>
    %22 = tpu.concatenate %1, %21 in 0 : vector<1x512xf32>, vector<47x512xf32> -> vector<48x512xf32>
    %cst_5 = arith.constant 0.000000e+00 : f32
    %23 = vector.shape_cast %20 : vector<48x1xi1> to vector<48x1xi1>
    %24 = vector.broadcast %23 : vector<48x1xi1> to vector<48x512xi1>
    %25 = vector.broadcast %cst_5 : f32 to vector<48x512xf32>
    %26 = arith.select %24, %25, %22 : vector<48x512xi1>, vector<48x512xf32>
    %c7_i32 = arith.constant 7 : i32
    %27 = vector.broadcast %c7_i32 : i32 to vector<48x1xi32>
    %28 = arith.cmpi eq, %18, %27 : vector<48x1xi32>
    %29 = vector.extract_strided_slice %0 {offsets = [1, 0], sizes = [47, 512], strides = [1, 1]} : vector<48x512xf32> to vector<47x512xf32>
    %30 = tpu.concatenate %29, %1 in 0 : vector<47x512xf32>, vector<1x512xf32> -> vector<48x512xf32>
    %cst_6 = arith.constant 0.000000e+00 : f32
    %31 = vector.shape_cast %28 : vector<48x1xi1> to vector<48x1xi1>
    %32 = vector.broadcast %31 : vector<48x1xi1> to vector<48x512xi1>
    %33 = vector.broadcast %cst_6 : f32 to vector<48x512xf32>
    %34 = arith.select %32, %33, %30 : vector<48x512xi1>, vector<48x512xf32>
    %35 = arith.truncf %26 : vector<48x512xf32> to vector<48x512xbf16>
    %c0_7 = arith.constant 0 : index
    %c0_8 = arith.constant 0 : index
    %c0_9 = arith.constant 0 : index
    %36 = vector.load %arg2[%c0_7, %c0_8, %c0_9] : memref<3x512x512xbf16, #tpu.memory_space<vmem>>, vector<1x512x512xbf16>
    %37 = vector.shape_cast %36 : vector<1x512x512xbf16> to vector<512x512xbf16>
    %cst_10 = arith.constant dense<0.000000e+00> : vector<48x512xf32>
    %38 = tpu.matmul %35, %37, %cst_10 {dimension_numbers = #tpu.dot_dimension_numbers<[1], [0], [0], [1], [0, 0, 1, 1], [], []>} : vector<48x512xbf16>, vector<512x512xbf16>, vector<48x512xf32> -> vector<48x512xf32>
    %39 = arith.truncf %0 : vector<48x512xf32> to vector<48x512xbf16>
    %c1 = arith.constant 1 : index
    %c0_11 = arith.constant 0 : index
    %c0_12 = arith.constant 0 : index
    %40 = vector.load %arg2[%c1, %c0_11, %c0_12] : memref<3x512x512xbf16, #tpu.memory_space<vmem>>, vector<1x512x512xbf16>
    %41 = vector.shape_cast %40 : vector<1x512x512xbf16> to vector<512x512xbf16>
    %cst_13 = arith.constant dense<0.000000e+00> : vector<48x512xf32>
    %42 = tpu.matmul %39, %41, %cst_13 {dimension_numbers = #tpu.dot_dimension_numbers<[1], [0], [0], [1], [0, 0, 1, 1], [], []>} : vector<48x512xbf16>, vector<512x512xbf16>, vector<48x512xf32> -> vector<48x512xf32>
    %43 = arith.addf %38, %42 : vector<48x512xf32>
    %44 = arith.truncf %34 : vector<48x512xf32> to vector<48x512xbf16>
    %c2 = arith.constant 2 : index
    %c0_14 = arith.constant 0 : index
    %c0_15 = arith.constant 0 : index
    %45 = vector.load %arg2[%c2, %c0_14, %c0_15] : memref<3x512x512xbf16, #tpu.memory_space<vmem>>, vector<1x512x512xbf16>
    %46 = vector.shape_cast %45 : vector<1x512x512xbf16> to vector<512x512xbf16>
    %cst_16 = arith.constant dense<0.000000e+00> : vector<48x512xf32>
    %47 = tpu.matmul %44, %46, %cst_16 {dimension_numbers = #tpu.dot_dimension_numbers<[1], [0], [0], [1], [0, 0, 1, 1], [], []>} : vector<48x512xbf16>, vector<512x512xbf16>, vector<48x512xf32> -> vector<48x512xf32>
    %48 = arith.addf %43, %47 : vector<48x512xf32>
    %c0_17 = arith.constant 0 : index
    %c0_18 = arith.constant 0 : index
    %49 = vector.load %arg3[%c0_17, %c0_18] : memref<1x512xf32, #tpu.memory_space<vmem>>, vector<1x512xf32>
    %50 = vector.broadcast %49 : vector<1x512xf32> to vector<48x512xf32>
    %51 = arith.addf %48, %50 : vector<48x512xf32>
    %cst_19 = arith.constant 0.000000e+00 : f32
    %52 = vector.broadcast %cst_19 : f32 to vector<48x512xf32>
    %53 = arith.maximumf %51, %52 : vector<48x512xf32>
    %c0_i32_20 = arith.constant 0 : i32
    %54 = vector.broadcast %c0_i32_20 : i32 to vector<48x1xi32>
    %55 = arith.cmpi eq, %18, %54 : vector<48x1xi32>
    %56 = vector.extract_strided_slice %53 {offsets = [0, 0], sizes = [47, 512], strides = [1, 1]} : vector<48x512xf32> to vector<47x512xf32>
    %57 = tpu.concatenate %1, %56 in 0 : vector<1x512xf32>, vector<47x512xf32> -> vector<48x512xf32>
    %cst_21 = arith.constant 0.000000e+00 : f32
    %58 = vector.shape_cast %55 : vector<48x1xi1> to vector<48x1xi1>
    %59 = vector.broadcast %58 : vector<48x1xi1> to vector<48x512xi1>
    %60 = vector.broadcast %cst_21 : f32 to vector<48x512xf32>
    %61 = arith.select %59, %60, %57 : vector<48x512xi1>, vector<48x512xf32>
    %c7_i32_22 = arith.constant 7 : i32
    %62 = vector.broadcast %c7_i32_22 : i32 to vector<48x1xi32>
    %63 = arith.cmpi eq, %18, %62 : vector<48x1xi32>
    %64 = vector.extract_strided_slice %53 {offsets = [1, 0], sizes = [47, 512], strides = [1, 1]} : vector<48x512xf32> to vector<47x512xf32>
    %65 = tpu.concatenate %64, %1 in 0 : vector<47x512xf32>, vector<1x512xf32> -> vector<48x512xf32>
    %cst_23 = arith.constant 0.000000e+00 : f32
    %66 = vector.shape_cast %63 : vector<48x1xi1> to vector<48x1xi1>
    %67 = vector.broadcast %66 : vector<48x1xi1> to vector<48x512xi1>
    %68 = vector.broadcast %cst_23 : f32 to vector<48x512xf32>
    %69 = arith.select %67, %68, %65 : vector<48x512xi1>, vector<48x512xf32>
    %70 = arith.truncf %61 : vector<48x512xf32> to vector<48x512xbf16>
    %c0_24 = arith.constant 0 : index
    %c0_25 = arith.constant 0 : index
    %c0_26 = arith.constant 0 : index
    %71 = vector.load %arg4[%c0_24, %c0_25, %c0_26] : memref<3x512x512xbf16, #tpu.memory_space<vmem>>, vector<1x512x512xbf16>
    %72 = vector.shape_cast %71 : vector<1x512x512xbf16> to vector<512x512xbf16>
    %cst_27 = arith.constant dense<0.000000e+00> : vector<48x512xf32>
    %73 = tpu.matmul %70, %72, %cst_27 {dimension_numbers = #tpu.dot_dimension_numbers<[1], [0], [0], [1], [0, 0, 1, 1], [], []>} : vector<48x512xbf16>, vector<512x512xbf16>, vector<48x512xf32> -> vector<48x512xf32>
    %74 = arith.truncf %53 : vector<48x512xf32> to vector<48x512xbf16>
    %c1_28 = arith.constant 1 : index
    %c0_29 = arith.constant 0 : index
    %c0_30 = arith.constant 0 : index
    %75 = vector.load %arg4[%c1_28, %c0_29, %c0_30] : memref<3x512x512xbf16, #tpu.memory_space<vmem>>, vector<1x512x512xbf16>
    %76 = vector.shape_cast %75 : vector<1x512x512xbf16> to vector<512x512xbf16>
    %cst_31 = arith.constant dense<0.000000e+00> : vector<48x512xf32>
    %77 = tpu.matmul %74, %76, %cst_31 {dimension_numbers = #tpu.dot_dimension_numbers<[1], [0], [0], [1], [0, 0, 1, 1], [], []>} : vector<48x512xbf16>, vector<512x512xbf16>, vector<48x512xf32> -> vector<48x512xf32>
    %78 = arith.addf %73, %77 : vector<48x512xf32>
    %79 = arith.truncf %69 : vector<48x512xf32> to vector<48x512xbf16>
    %c2_32 = arith.constant 2 : index
    %c0_33 = arith.constant 0 : index
    %c0_34 = arith.constant 0 : index
    %80 = vector.load %arg4[%c2_32, %c0_33, %c0_34] : memref<3x512x512xbf16, #tpu.memory_space<vmem>>, vector<1x512x512xbf16>
    %81 = vector.shape_cast %80 : vector<1x512x512xbf16> to vector<512x512xbf16>
    %cst_35 = arith.constant dense<0.000000e+00> : vector<48x512xf32>
    %82 = tpu.matmul %79, %81, %cst_35 {dimension_numbers = #tpu.dot_dimension_numbers<[1], [0], [0], [1], [0, 0, 1, 1], [], []>} : vector<48x512xbf16>, vector<512x512xbf16>, vector<48x512xf32> -> vector<48x512xf32>
    %83 = arith.addf %78, %82 : vector<48x512xf32>
    %c0_36 = arith.constant 0 : index
    %c0_37 = arith.constant 0 : index
    %84 = vector.load %arg5[%c0_36, %c0_37] : memref<1x512xf32, #tpu.memory_space<vmem>>, vector<1x512xf32>
    %85 = vector.broadcast %84 : vector<1x512xf32> to vector<48x512xf32>
    %86 = arith.addf %83, %85 : vector<48x512xf32>
    %cst_38 = arith.constant 0.000000e+00 : f32
    %87 = vector.broadcast %cst_38 : f32 to vector<48x512xf32>
    %88 = arith.maximumf %86, %87 : vector<48x512xf32>
    %89 = arith.addf %0, %88 : vector<48x512xf32>
    %c0_39 = arith.constant 0 : index
    %c0_40 = arith.constant 0 : index
    %90 = vector.load %arg6[%c0_39, %c0_40] : memref<48x512xf32, #tpu.memory_space<vmem>>, vector<48x512xf32>
    tpu.vector_store %arg6[%c0_39, %c0_40], %89 {strides = array<i32>} : memref<48x512xf32, #tpu.memory_space<vmem>>, vector<48x512xf32>,
    return
  }
  func.func @transform_0(%arg0: i32) -> (i32, i32) {
    %c0_i32 = arith.constant 0 : i32
    %c0_i32_0 = arith.constant 0 : i32
    return %arg0, %c0_i32 : i32, i32
  }
  func.func @transform_1(%arg0: i32) -> (i32, i32, i32) {
    %c0_i32 = arith.constant 0 : i32
    %c0_i32_0 = arith.constant 0 : i32
    %c0_i32_1 = arith.constant 0 : i32
    %c0_i32_2 = arith.constant 0 : i32
    return %c0_i32, %c0_i32_0, %c0_i32_1 : i32, i32, i32
  }
  func.func @transform_2(%arg0: i32) -> (i32, i32) {
    %c0_i32 = arith.constant 0 : i32
    %c0_i32_0 = arith.constant 0 : i32
    %c0_i32_1 = arith.constant 0 : i32
    return %c0_i32, %c0_i32_0 : i32, i32
  }
  func.func @transform_3(%arg0: i32) -> (i32, i32, i32) {
    %c0_i32 = arith.constant 0 : i32
    %c0_i32_0 = arith.constant 0 : i32
    %c0_i32_1 = arith.constant 0 : i32
    %c0_i32_2 = arith.constant 0 : i32
    return %c0_i32, %c0_i32_0, %c0_i32_1 : i32, i32, i32
  }
  func.func @transform_4(%arg0: i32) -> (i32, i32) {
    %c0_i32 = arith.constant 0 : i32
    %c0_i32_0 = arith.constant 0 : i32
    %c0_i32_1 = arith.constant 0 : i32
    return %c0_i32, %c0_i32_0 : i32, i32
  }
  func.func @transform_5(%arg0: i32) -> (i32, i32) {
    %c0_i32 = arith.constant 0 : i32
    %c0_i32_0 = arith.constant 0 : i32
    return %arg0, %c0_i32 : i32, i32
  }
}

module attributes {stable_mosaic.version = 11 : i64} {
  func.func @_resblock_kernel(%arg0: i32, %arg1: memref<48x512xf32, #tpu.memory_space<vmem>>, %arg2: memref<3x512x512xbf16, #tpu.memory_space<vmem>>, %arg3: memref<1x512xf32, #tpu.memory_space<vmem>>, %arg4: memref<3x512x512xbf16, #tpu.memory_space<vmem>>, %arg5: memref<1x512xf32, #tpu.memory_space<vmem>>, %arg6: memref<48x512xf32, #tpu.memory_space<vmem>>) attributes {dimension_semantics = [#tpu.dimension_semantics<parallel>], iteration_bounds = array<i64: 1>, scalar_prefetch = 0 : i64, scratch_operands = 0 : i64, tpu.core_type = #tpu.core_type<tc>, window_params = [{transform_indices = @transform_0, window_bounds = array<i64: 48, 512>}, {pipeline_mode = #tpu.pipeline_mode<synchronous>, transform_indices = @transform_1, window_bounds = array<i64: 3, 512, 512>}, {pipeline_mode = #tpu.pipeline_mode<synchronous>, transform_indices = @transform_2, window_bounds = array<i64: 1, 512>}, {pipeline_mode = #tpu.pipeline_mode<synchronous>, transform_indices = @transform_3, window_bounds = array<i64: 3, 512, 512>}, {pipeline_mode = #tpu.pipeline_mode<synchronous>, transform_indices = @transform_4, window_bounds = array<i64: 1, 512>}, {transform_indices = @transform_5, window_bounds = array<i64: 48, 512>}]} {
    %c0 = arith.constant 0 : index
    %c0_0 = arith.constant 0 : index
    %0 = vector.load %arg1[%c0, %c0_0] : memref<48x512xf32, #tpu.memory_space<vmem>>, vector<48x512xf32>
    %cst = arith.constant 0.000000e+00 : f32
    %1 = vector.broadcast %cst : f32 to vector<1x512xf32>
    %2 = tpu.iota {dimensions = array<i32: 0>} : vector<48x1xi32>
    %c8_i32 = arith.constant 8 : i32
    %c0_i32 = arith.constant 0 : i32
    %3 = arith.cmpi eq, %c8_i32, %c0_i32 : i32
    %c1_i32 = arith.constant 1 : i32
    %4 = arith.select %3, %c1_i32, %c8_i32 : i32
    %5 = vector.broadcast %4 : i32 to vector<48x1xi32>
    %6 = arith.remsi %2, %5 : vector<48x1xi32>
    %c0_i32_1 = arith.constant 0 : i32
    %7 = vector.broadcast %c0_i32_1 : i32 to vector<48x1xi32>
    %8 = arith.cmpi ne, %6, %7 : vector<48x1xi32>
    %c0_i32_2 = arith.constant 0 : i32
    %9 = vector.broadcast %c0_i32_2 : i32 to vector<48x1xi32>
    %10 = arith.cmpi slt, %6, %9 : vector<48x1xi32>
    %c0_i32_3 = arith.constant 0 : i32
    %11 = arith.cmpi slt, %4, %c0_i32_3 : i32
    %12 = vector.broadcast %11 : i1 to vector<48x1xi1>
    %13 = vector.broadcast %12 : vector<48x1xi1> to vector<48x1xi1>
    %14 = arith.xori %10, %13 : vector<48x1xi1>
    %15 = arith.andi %14, %8 : vector<48x1xi1>
    %16 = vector.broadcast %4 : i32 to vector<48x1xi32>
    %17 = arith.addi %6, %16 : vector<48x1xi32>
    %18 = arith.select %15, %17, %6 : vector<48x1xi1>, vector<48x1xi32>
    %c0_i32_4 = arith.constant 0 : i32
    %19 = vector.broadcast %c0_i32_4 : i32 to vector<48x1xi32>
    %20 = arith.cmpi eq, %18, %19 : vector<48x1xi32>
    %21 = vector.extract_strided_slice %0 {offsets = [0, 0], sizes = [47, 512], strides = [1, 1]} : vector<48x512xf32> to vector<47x512xf32>
    %22 = tpu.concatenate %1, %21 in 0 : vector<1x512xf32>, vector<47x512xf32> -> vector<48x512xf32>
    %cst_5 = arith.constant 0.000000e+00 : f32
    %23 = vector.shape_cast %20 : vector<48x1xi1> to vector<48x1xi1>
    %24 = vector.broadcast %23 : vector<48x1xi1> to vector<48x512xi1>
    %25 = vector.broadcast %cst_5 : f32 to vector<48x512xf32>
    %26 = arith.select %24, %25, %22 : vector<48x512xi1>, vector<48x512xf32>
    %c7_i32 = arith.constant 7 : i32
    %27 = vector.broadcast %c7_i32 : i32 to vector<48x1xi32>
    %28 = arith.cmpi eq, %18, %27 : vector<48x1xi32>
    %29 = vector.extract_strided_slice %0 {offsets = [1, 0], sizes = [47, 512], strides = [1, 1]} : vector<48x512xf32> to vector<47x512xf32>
    %30 = tpu.concatenate %29, %1 in 0 : vector<47x512xf32>, vector<1x512xf32> -> vector<48x512xf32>
    %cst_6 = arith.constant 0.000000e+00 : f32
    %31 = vector.shape_cast %28 : vector<48x1xi1> to vector<48x1xi1>
    %32 = vector.broadcast %31 : vector<48x1xi1> to vector<48x512xi1>
    %33 = vector.broadcast %cst_6 : f32 to vector<48x512xf32>
    %34 = arith.select %32, %33, %30 : vector<48x512xi1>, vector<48x512xf32>
    %35 = arith.truncf %26 : vector<48x512xf32> to vector<48x512xbf16>
    %c0_7 = arith.constant 0 : index
    %c0_8 = arith.constant 0 : index
    %c0_9 = arith.constant 0 : index
    %36 = vector.load %arg2[%c0_7, %c0_8, %c0_9] : memref<3x512x512xbf16, #tpu.memory_space<vmem>>, vector<1x512x512xbf16>
    %37 = vector.shape_cast %36 : vector<1x512x512xbf16> to vector<512x512xbf16>
    %cst_10 = arith.constant dense<0.000000e+00> : vector<48x512xf32>
    %38 = tpu.matmul %35, %37, %cst_10 {dimension_numbers = #tpu.dot_dimension_numbers<[1], [0], [0], [1], [0, 0, 1, 1], [], []>} : vector<48x512xbf16>, vector<512x512xbf16>, vector<48x512xf32> -> vector<48x512xf32>
    %39 = arith.truncf %0 : vector<48x512xf32> to vector<48x512xbf16>
    %c1 = arith.constant 1 : index
    %c0_11 = arith.constant 0 : index
    %c0_12 = arith.constant 0 : index
    %40 = vector.load %arg2[%c1, %c0_11, %c0_12] : memref<3x512x512xbf16, #tpu.memory_space<vmem>>, vector<1x512x512xbf16>
    %41 = vector.shape_cast %40 : vector<1x512x512xbf16> to vector<512x512xbf16>
    %cst_13 = arith.constant dense<0.000000e+00> : vector<48x512xf32>
    %42 = tpu.matmul %39, %41, %cst_13 {dimension_numbers = #tpu.dot_dimension_numbers<[1], [0], [0], [1], [0, 0, 1, 1], [], []>} : vector<48x512xbf16>, vector<512x512xbf16>, vector<48x512xf32> -> vector<48x512xf32>
    %43 = arith.addf %38, %42 : vector<48x512xf32>
    %44 = arith.truncf %34 : vector<48x512xf32> to vector<48x512xbf16>
    %c2 = arith.constant 2 : index
    %c0_14 = arith.constant 0 : index
    %c0_15 = arith.constant 0 : index
    %45 = vector.load %arg2[%c2, %c0_14, %c0_15] : memref<3x512x512xbf16, #tpu.memory_space<vmem>>, vector<1x512x512xbf16>
    %46 = vector.shape_cast %45 : vector<1x512x512xbf16> to vector<512x512xbf16>
    %cst_16 = arith.constant dense<0.000000e+00> : vector<48x512xf32>
    %47 = tpu.matmul %44, %46, %cst_16 {dimension_numbers = #tpu.dot_dimension_numbers<[1], [0], [0], [1], [0, 0, 1, 1], [], []>} : vector<48x512xbf16>, vector<512x512xbf16>, vector<48x512xf32> -> vector<48x512xf32>
    %48 = arith.addf %43, %47 : vector<48x512xf32>
    %c0_17 = arith.constant 0 : index
    %c0_18 = arith.constant 0 : index
    %49 = vector.load %arg3[%c0_17, %c0_18] : memref<1x512xf32, #tpu.memory_space<vmem>>, vector<1x512xf32>
    %50 = vector.broadcast %49 : vector<1x512xf32> to vector<48x512xf32>
    %51 = arith.addf %48, %50 : vector<48x512xf32>
    %cst_19 = arith.constant 0.000000e+00 : f32
    %52 = vector.broadcast %cst_19 : f32 to vector<48x512xf32>
    %53 = arith.maximumf %51, %52 : vector<48x512xf32>
    %c0_i32_20 = arith.constant 0 : i32
    %54 = vector.broadcast %c0_i32_20 : i32 to vector<48x1xi32>
    %55 = arith.cmpi eq, %18, %54 : vector<48x1xi32>
    %56 = vector.extract_strided_slice %53 {offsets = [0, 0], sizes = [47, 512], strides = [1, 1]} : vector<48x512xf32> to vector<47x512xf32>
    %57 = tpu.concatenate %1, %56 in 0 : vector<1x512xf32>, vector<47x512xf32> -> vector<48x512xf32>
    %cst_21 = arith.constant 0.000000e+00 : f32
    %58 = vector.shape_cast %55 : vector<48x1xi1> to vector<48x1xi1>
    %59 = vector.broadcast %58 : vector<48x1xi1> to vector<48x512xi1>
    %60 = vector.broadcast %cst_21 : f32 to vector<48x512xf32>
    %61 = arith.select %59, %60, %57 : vector<48x512xi1>, vector<48x512xf32>
    %c7_i32_22 = arith.constant 7 : i32
    %62 = vector.broadcast %c7_i32_22 : i32 to vector<48x1xi32>
    %63 = arith.cmpi eq, %18, %62 : vector<48x1xi32>
    %64 = vector.extract_strided_slice %53 {offsets = [1, 0], sizes = [47, 512], strides = [1, 1]} : vector<48x512xf32> to vector<47x512xf32>
    %65 = tpu.concatenate %64, %1 in 0 : vector<47x512xf32>, vector<1x512xf32> -> vector<48x512xf32>
    %cst_23 = arith.constant 0.000000e+00 : f32
    %66 = vector.shape_cast %63 : vector<48x1xi1> to vector<48x1xi1>
    %67 = vector.broadcast %66 : vector<48x1xi1> to vector<48x512xi1>
    %68 = vector.broadcast %cst_23 : f32 to vector<48x512xf32>
    %69 = arith.select %67, %68, %65 : vector<48x512xi1>, vector<48x512xf32>
    %70 = arith.truncf %61 : vector<48x512xf32> to vector<48x512xbf16>
    %c0_24 = arith.constant 0 : index
    %c0_25 = arith.constant 0 : index
    %c0_26 = arith.constant 0 : index
    %71 = vector.load %arg4[%c0_24, %c0_25, %c0_26] : memref<3x512x512xbf16, #tpu.memory_space<vmem>>, vector<1x512x512xbf16>
    %72 = vector.shape_cast %71 : vector<1x512x512xbf16> to vector<512x512xbf16>
    %cst_27 = arith.constant dense<0.000000e+00> : vector<48x512xf32>
    %73 = tpu.matmul %70, %72, %cst_27 {dimension_numbers = #tpu.dot_dimension_numbers<[1], [0], [0], [1], [0, 0, 1, 1], [], []>} : vector<48x512xbf16>, vector<512x512xbf16>, vector<48x512xf32> -> vector<48x512xf32>
    %74 = arith.truncf %53 : vector<48x512xf32> to vector<48x512xbf16>
    %c1_28 = arith.constant 1 : index
    %c0_29 = arith.constant 0 : index
    %c0_30 = arith.constant 0 : index
    %75 = vector.load %arg4[%c1_28, %c0_29, %c0_30] : memref<3x512x512xbf16, #tpu.memory_space<vmem>>, vector<1x512x512xbf16>
    %76 = vector.shape_cast %75 : vector<1x512x512xbf16> to vector<512x512xbf16>
    %cst_31 = arith.constant dense<0.000000e+00> : vector<48x512xf32>
    %77 = tpu.matmul %74, %76, %cst_31 {dimension_numbers = #tpu.dot_dimension_numbers<[1], [0], [0], [1], [0, 0, 1, 1], [], []>} : vector<48x512xbf16>, vector<512x512xbf16>, vector<48x512xf32> -> vector<48x512xf32>
    %78 = arith.addf %73, %77 : vector<48x512xf32>
    %79 = arith.truncf %69 : vector<48x512xf32> to vector<48x512xbf16>
    %c2_32 = arith.constant 2 : index
    %c0_33 = arith.constant 0 : index
    %c0_34 = arith.constant 0 : index
    %80 = vector.load %arg4[%c2_32, %c0_33, %c0_34] : memref<3x512x512xbf16, #tpu.memory_space<vmem>>, vector<1x512x512xbf16>
    %81 = vector.shape_cast %80 : vector<1x512x512xbf16> to vector<512x512xbf16>
    %cst_35 = arith.constant dense<0.000000e+00> : vector<48x512xf32>
    %82 = tpu.matmul %79, %81, %cst_35 {dimension_numbers = #tpu.dot_dimension_numbers<[1], [0], [0], [1], [0, 0, 1, 1], [], []>} : vector<48x512xbf16>, vector<512x512xbf16>, vector<48x512xf32> -> vector<48x512xf32>
    %83 = arith.addf %78, %82 : vector<48x512xf32>
    %c0_36 = arith.constant 0 : index
    %c0_37 = arith.constant 0 : index
    %84 = vector.load %arg5[%c0_36, %c0_37] : memref<1x512xf32, #tpu.memory_space<vmem>>, vector<1x512xf32>
    %85 = vector.broadcast %84 : vector<1x512xf32> to vector<48x512xf32>
    %86 = arith.addf %83, %85 : vector<48x512xf32>
    %cst_38 = arith.constant 0.000000e+00 : f32
    %87 = vector.broadcast %cst_38 : f32 to vector<48x512xf32>
    %88 = arith.maximumf %86, %87 : vector<48x512xf32>
    %89 = arith.addf %0, %88 : vector<48x512xf32>
    %c0_39 = arith.constant 0 : index
    %c0_40 = arith.constant 0 : index
    %90 = vector.load %arg6[%c0_39, %c0_40] : memref<48x512xf32, #tpu.memory_space<vmem>>, vector<48x512xf32>
    tpu.vector_store %arg6[%c0_39, %c0_40], %89 {strides = array<i32>} : memref<48x512xf32, #tpu.memory_space<vmem>>, vector<48x512xf32>,
    return
  }
  func.func @transform_0(%arg0: i32) -> (i32, i32) {
    %c0_i32 = arith.constant 0 : i32
    %c0_i32_0 = arith.constant 0 : i32
    return %arg0, %c0_i32 : i32, i32
  }
  func.func @transform_1(%arg0: i32) -> (i32, i32, i32) {
    %c0_i32 = arith.constant 0 : i32
    %c0_i32_0 = arith.constant 0 : i32
    %c0_i32_1 = arith.constant 0 : i32
    %c0_i32_2 = arith.constant 0 : i32
    return %c0_i32, %c0_i32_0, %c0_i32_1 : i32, i32, i32
  }
  func.func @transform_2(%arg0: i32) -> (i32, i32) {
    %c0_i32 = arith.constant 0 : i32
    %c0_i32_0 = arith.constant 0 : i32
    %c0_i32_1 = arith.constant 0 : i32
    return %c0_i32, %c0_i32_0 : i32, i32
  }
  func.func @transform_3(%arg0: i32) -> (i32, i32, i32) {
    %c0_i32 = arith.constant 0 : i32
    %c0_i32_0 = arith.constant 0 : i32
    %c0_i32_1 = arith.constant 0 : i32
    %c0_i32_2 = arith.constant 0 : i32
    return %c0_i32, %c0_i32_0, %c0_i32_1 : i32, i32, i32
  }
  func.func @transform_4(%arg0: i32) -> (i32, i32) {
    %c0_i32 = arith.constant 0 : i32
    %c0_i32_0 = arith.constant 0 : i32
    %c0_i32_1 = arith.constant 0 : i32
    return %c0_i32, %c0_i32_0 : i32, i32
  }
  func.func @transform_5(%arg0: i32) -> (i32, i32) {
    %c0_i32 = arith.constant 0 : i32
    %c0_i32_0 = arith.constant 0 : i32
    return %arg0, %c0_i32 : i32, i32
  }
}

</mosaic_0001>

<bundles_post_ra>
// kernel: tpu_custom_call.1
= control target key start
LH: loop header
LB: loop body
LE: loop exit
PB: predicated region body
PF: predicated region fallthrough
CT: control target
= control target key end

     0   :  { %10 = vsyncpa [#allocation3], 0  ;;  %s11202_s0 = inlined_call_operand.hbm [shape: f32[48,512], index: 0, kind: input, shape index: {}]   ;;  %s11203_s1 = inlined_call_operand.hbm [shape: bf16[3,512,512], index: 1, kind: input, shape index: {}]   ;;  %s11204_s2 = inlined_call_operand.hbm [shape: f32[1,512], index: 2, kind: input, shape index: {}]   ;;  %s11205_s3 = inlined_call_operand.hbm [shape: bf16[3,512,512], index: 3, kind: input, shape index: {}]   ;;  %s11206_s4 = inlined_call_operand.hbm [shape: f32[1,512], index: 4, kind: input, shape index: {}]   ;;  %s11207_s5 = inlined_call_operand.hbm [shape: f32[48,512], index: 5, kind: output, shape index: {}]  }
   0x1   :  { %11 = vsyncpa [#allocation6], 0 }
   0x2   :  { %12 = vsyncpa [#allocation9], 0 }
   0x3   :  { %13 = vsyncpa [#allocation4], 0  ;;  %s9707_s18 = smov [#allocation5]  }
   0x4   :  { %s31_s19 = sshll.u32 %s9707_s18, 4  ;;  %s32_s19 = int_to_ptr.vmem [resolvable:$true] %s31_s19 }
   0x5   :  { %s9587_s20 = scalar_lea.vmem %s32_s19, 49152  ;;  %p9592_p1 = scmp.lt.s32.totalorder %s32_s19, %s32_s19 }
   0x6   :  { %p9588_p0 = scmp.ne.s32.totalorder %s32_s19, %s9587_s20  ;;  %p9593_p2 = scmp.lt.s32.totalorder %s9587_s20, %s9587_s20 }
   0x8   :  { %p9594_p3 = por %p9593_p2, %p9592_p1 }
   0xa   :  { %p9595_p4 = pnand %p9594_p3, %p9588_p0 }
   0xc   :  { %9598 = shalt.err (!%p9595_p4)
}
   0xd   :  { %s9708_s21 = smov 256   ;;  %s9709_s22 = smov 16  }
   0xe   :  { %37 = dma.hbm_to_vmem [thread:$0]  %s11203_s1, 49152, %s32_s19, [#allocation6], %s9708_s21, %s9708_s21, %s9709_s22  }
   0xf   :  { %s9710_s25 = smov [#allocation8]   ;;  %s9711_s27 = smov [#allocation2]  }
  0x10   :  { %s53_s26 = sshll.u32 %s9710_s25, 4  ;;  %s19_s28 = sshll.u32 %s9711_s27, 4  ;;  %s54_s26 = int_to_ptr.vmem [resolvable:$true] %s53_s26  ;;  %s20_s28 = int_to_ptr.vmem [resolvable:$true] %s19_s28 }
  0x11   :  { %s9607_s29 = scalar_lea.vmem %s54_s26, 49152  ;;  %p9612_p6 = scmp.lt.s32.totalorder %s54_s26, %s54_s26 }
  0x12   :  { %p9608_p5 = scmp.ne.s32.totalorder %s54_s26, %s9607_s29  ;;  %p9613_p7 = scmp.lt.s32.totalorder %s9607_s29, %s9607_s29 }
  0x14   :  { %p9614_p8 = por %p9613_p7, %p9612_p6 }
  0x16   :  { %p9615_p9 = pnand %p9614_p8, %p9608_p5 }
  0x18   :  { %9618 = shalt.err (!%p9615_p9)
}
  0x19   :  { %59 = dma.hbm_to_vmem [thread:$0]  %s11205_s3, 49152, %s54_s26, [#allocation9], %s9708_s21, %s9708_s21, %s9709_s22  }
  0x1a   :  { %s9627_s7 = scalar_lea.vmem %s20_s28, 3072  ;;  %p9632_p11 = scmp.lt.s32.totalorder %s20_s28, %s20_s28 }
  0x1b   :  { %p9628_p10 = scmp.ne.s32.totalorder %s20_s28, %s9627_s7  ;;  %p9633_p12 = scmp.lt.s32.totalorder %s9627_s7, %s9627_s7 }
  0x1d   :  { %p9634_p13 = por %p9633_p12, %p9632_p11 }
  0x1f   :  { %p9635_p0 = pnand %p9634_p13, %p9628_p10 }
  0x21   :  { %9638 = shalt.err (!%p9635_p0)
}
  0x22   :  { %s9712_s1 = smov 512   ;;  %s9713_s8 = smov 32  }
  0x23   :  { %25 = dma.hbm_to_vmem [thread:$0]  %s11202_s0, 3072, %s20_s28, [#allocation3], %s9712_s1, %s9712_s1, %s9713_s8  }
  0x24   :  { %s9714_s11 = smov [#allocation7]   ;;  %s9715_s3 = smov [#allocation10]  }
  0x25   :  { %s44_s12 = sshll.u32 %s9714_s11, 4  ;;  %s66_s13 = sshll.u32 %s9715_s3, 4  ;;  %s45_s12 = int_to_ptr.vmem [resolvable:$true] %s44_s12  ;;  %s67_s13 = int_to_ptr.vmem [resolvable:$true] %s66_s13 }
  0x26   :  { %s9647_s14 = scalar_lea.vmem %s45_s12, 64  ;;  %p9652_p2 = scmp.lt.s32.totalorder %s45_s12, %s45_s12 }
  0x27   :  { %p9648_p1 = scmp.ne.s32.totalorder %s45_s12, %s9647_s14  ;;  %p9653_p3 = scmp.lt.s32.totalorder %s9647_s14, %s9647_s14 }
  0x29   :  { %p9654_p4 = por %p9653_p3, %p9652_p2 }
  0x2b   :  { %p9655_p5 = pnand %p9654_p4, %p9648_p1 }
  0x2d   :  { %9658 = shalt.err (!%p9655_p5)
}
  0x2e   :  { %47 = dma.hbm_to_vmem [thread:$0]  %s11204_s2, 64, %s45_s12, [#allocation6]  }
  0x2f   :  { %s9667_s17 = scalar_lea.vmem %s67_s13, 64  ;;  %p9672_p7 = scmp.lt.s32.totalorder %s67_s13, %s67_s13 }
  0x30   :  { %p9668_p6 = scmp.ne.s32.totalorder %s67_s13, %s9667_s17  ;;  %p9673_p8 = scmp.lt.s32.totalorder %s9667_s17, %s9667_s17 }
  0x32   :  { %p9674_p9 = por %p9673_p8, %p9672_p7 }
  0x34   :  { %p9675_p10 = pnand %p9674_p9, %p9668_p6 }
  0x36   :  { %9678 = shalt.err (!%p9675_p10)
}
  0x37   :  { %69 = dma.hbm_to_vmem [thread:$0]  %s11206_s4, 64, %s67_s13, [#allocation9]  }
  0x38   :  { %9699 = dma.done.wait [#allocation3], 3072  }
  0x39   :  { %9700 = vsyncadd [#allocation3], 4294964224 }
  0x3a   :  { %9701 = dma.done.wait [#allocation6], 49216  }
  0x3b   :  { %9702 = vsyncadd [#allocation6], 4294918080 }
  0x3c   :  { %9703 = dma.done.wait [#allocation9], 49216  }
  0x3d   :  { %9704 = vsyncadd [#allocation9], 4294918080  ;;  %v8379_v0 = vld [vmem:[#allocation5 + $0x4e4] ss:$16 sps:$4 sm:$0xff]   ;;  %v8383_v2 = vld [vmem:[#allocation5 + $0x4e0] ss:$16 sps:$4 sm:$0xff]  }
  0x3e   :  { %v8381_v1 = vld [vmem:[#allocation5 + $0x6e4] ss:$16 sps:$4 sm:$0xff]   ;;  %1363 = vmatprep.subr.bf16.mxu0 %v8379_v0  ;;  %v8384_v3 = vld [vmem:[#allocation5 + $0x6e0] ss:$16 sps:$4 sm:$0xff]   ;;  %v9765_v46 = vld [vmem:[#allocation2 + $0x8] sm:$0xff]  ;;  %vm218_vm0 = vcmask 1040384  }
  0x3f   :  { %1426 = vmatprep.subr.bf16.mxu1 %v8381_v1  ;;  %v8385_v4 = vld [vmem:[#allocation5 + $0x4c4] ss:$16 sps:$4 sm:$0xff]   ;;  %1364 = vmatpush1.bf16.msra.mxu0 %v8383_v2  ;;  %v8389_v6 = vld [vmem:[#allocation5 + $0x4c0] ss:$16 sps:$4 sm:$0xff]   ;;  %v9767_v47 = vld [vmem:[#allocation2 + $0x28] sm:$0xff]  ;;  %vm333_vm13 = vcmask 1046528  }
  0x40   :  { %1427 = vmatpush1.bf16.msra.mxu1 %v8384_v3  ;;  %v8387_v5 = vld [vmem:[#allocation5 + $0x6c4] ss:$16 sps:$4 sm:$0xff]   ;;  %1365 = vmatprep.subr.bf16.mxu0 %v8385_v4  ;;  %v8390_v7 = vld [vmem:[#allocation5 + $0x6c0] ss:$16 sps:$4 sm:$0xff]   ;;  %v9769_v48 = vld [vmem:[#allocation2 + $0x18] sm:$0xff]  ;;  %v9775_v53 = vpack.c.bf16 %v9767_v47, %v9765_v46  ;;  %s9716_s2 = smov [#allocation11]  }
  0x41   :  { %1428 = vmatprep.subr.bf16.mxu1 %v8387_v5  ;;  %v8391_v8 = vld [vmem:[#allocation5 + $0x4a4] ss:$16 sps:$4 sm:$0xff]   ;;  %v8395_v10 = vld [vmem:[#allocation5 + $0x4a0] ss:$16 sps:$4 sm:$0xff]   ;;  %v9771_v49 = vld [vmem:[#allocation2 + $0x38] sm:$0xff]  ;;  %s7095_s4 = sshll.u32 %s9716_s2, 4  ;;  %s7096_s4 = int_to_ptr.vmem [resolvable:$true] %s7095_s4 }
  0x42   :  { %v8393_v9 = vld [vmem:[#allocation5 + $0x6a4] ss:$16 sps:$4 sm:$0xff]   ;;  %v8396_v11 = vld [vmem:[#allocation5 + $0x6a0] ss:$16 sps:$4 sm:$0xff]   ;;  %v9779_v55 = vpack.c.bf16 %v9771_v49, %v9769_v48  ;;  %1395 = vmatprep.mubr.bf16.mxu0 %v9775_v53  ;;  %s9679_s19 = scalar_lea.vmem %s7096_s4, 3072  ;;  %p9684_p12 = scmp.lt.s32.totalorder %s7096_s4, %s7096_s4 }
  0x43   :  { %1366 = vmatpush1.bf16.msra.mxu0 %v8389_v6  ;;  %v8397_v12 = vld [vmem:[#allocation5 + $0x484] ss:$16 sps:$4 sm:$0xff]   ;;  %v8401_v14 = vld [vmem:[#allocation5 + $0x480] ss:$16 sps:$4 sm:$0xff]   ;;  %p9680_p11 = scmp.ne.s32.totalorder %s7096_s4, %s9679_s19  ;;  %p9685_p13 = scmp.lt.s32.totalorder %s9679_s19, %s9679_s19 }
  0x44   :  { %1429 = vmatpush1.bf16.msra.mxu1 %v8390_v7  ;;  %1367 = vmatprep.subr.bf16.mxu0 %v8391_v8  ;;  %v8399_v13 = vld [vmem:[#allocation5 + $0x684] ss:$16 sps:$4 sm:$0xff]   ;;  %v8402_v15 = vld [vmem:[#allocation5 + $0x680] ss:$16 sps:$4 sm:$0xff]  }
  0x45   :  { %1430 = vmatprep.subr.bf16.mxu1 %v8393_v9  ;;  %v8403_v16 = vld [vmem:[#allocation5 + $0x464] ss:$16 sps:$4 sm:$0xff]   ;;  %v8407_v18 = vld [vmem:[#allocation5 + $0x460] ss:$16 sps:$4 sm:$0xff]   ;;  %1458 = vmatprep.mubr.bf16.mxu1 %v9779_v55  ;;  %p9686_p0 = por %p9685_p13, %p9684_p12 }
  0x46   :  { %v8405_v17 = vld [vmem:[#allocation5 + $0x664] ss:$16 sps:$4 sm:$0xff]   ;;  %v8408_v19 = vld [vmem:[#allocation5 + $0x660] ss:$16 sps:$4 sm:$0xff]  }
  0x47   :  { %1368 = vmatpush1.bf16.msra.mxu0 %v8395_v10  ;;  %v8409_v20 = vld [vmem:[#allocation5 + $0x444] ss:$16 sps:$4 sm:$0xff]   ;;  %v8413_v22 = vld [vmem:[#allocation5 + $0x440] ss:$16 sps:$4 sm:$0xff]   ;;  %v8477_v10 = vld [vmem:[#allocation5 + $0x4ec] ss:$16 sps:$4 sm:$0xff]   ;;  %p9687_p1 = pnand %p9686_p0, %p9680_p11 }
  0x48   :  { %1431 = vmatpush1.bf16.msra.mxu1 %v8396_v11  ;;  %1369 = vmatprep.subr.bf16.mxu0 %v8397_v12  ;;  %v8411_v21 = vld [vmem:[#allocation5 + $0x644] ss:$16 sps:$4 sm:$0xff]   ;;  %v8414_v23 = vld [vmem:[#allocation5 + $0x640] ss:$16 sps:$4 sm:$0xff]   ;;  %v8480_v11 = vld [vmem:[#allocation5 + $0x6ec] ss:$16 sps:$4 sm:$0xff]  }
  0x49   :  { %1432 = vmatprep.subr.bf16.mxu1 %v8399_v13  ;;  %v8415_v24 = vld [vmem:[#allocation5 + $0x424] ss:$16 sps:$4 sm:$0xff]   ;;  %v8419_v26 = vld [vmem:[#allocation5 + $0x420] ss:$16 sps:$4 sm:$0xff]  }
  0x4a   :  { %v8417_v25 = vld [vmem:[#allocation5 + $0x624] ss:$16 sps:$4 sm:$0xff]   ;;  %v8420_v27 = vld [vmem:[#allocation5 + $0x620] ss:$16 sps:$4 sm:$0xff]  }
  0x4b   :  { %1370 = vmatpush1.bf16.msra.mxu0 %v8401_v14  ;;  %v8421_v28 = vld [vmem:[#allocation5 + $0x404] ss:$16 sps:$4 sm:$0xff]   ;;  %v8425_v30 = vld [vmem:[#allocation5 + $0x400] ss:$16 sps:$4 sm:$0xff]   ;;  %v8475_v14 = vld [vmem:[#allocation5 + $0x4e8] ss:$16 sps:$4 sm:$0xff]  }
  0x4c   :  { %1433 = vmatpush1.bf16.msra.mxu1 %v8402_v15  ;;  %1371 = vmatprep.subr.bf16.mxu0 %v8403_v16  ;;  %v8423_v29 = vld [vmem:[#allocation5 + $0x604] ss:$16 sps:$4 sm:$0xff]   ;;  %v8426_v31 = vld [vmem:[#allocation5 + $0x600] ss:$16 sps:$4 sm:$0xff]   ;;  %v8478_v15 = vld [vmem:[#allocation5 + $0x6e8] ss:$16 sps:$4 sm:$0xff]  }
  0x4d   :  { %1434 = vmatprep.subr.bf16.mxu1 %v8405_v17  ;;  %v8427_v32 = vld [vmem:[#allocation5 + $0x5e4] ss:$16 sps:$4 sm:$0xff]   ;;  %v8431_v34 = vld [vmem:[#allocation5 + $0x5e0] ss:$16 sps:$4 sm:$0xff]   ;;  %v8483_v16 = vld [vmem:[#allocation5 + $0x4cc] ss:$16 sps:$4 sm:$0xff]  }
  0x4e   :  { %v8429_v33 = vld [vmem:[#allocation5 + $0x7e4] ss:$16 sps:$4 sm:$0xff]   ;;  %v8432_v35 = vld [vmem:[#allocation5 + $0x7e0] ss:$16 sps:$4 sm:$0xff]   ;;  %v8486_v17 = vld [vmem:[#allocation5 + $0x6cc] ss:$16 sps:$4 sm:$0xff]  }
  0x4f   :  { %1372 = vmatpush1.bf16.msra.mxu0 %v8407_v18  ;;  %v8433_v36 = vld [vmem:[#allocation5 + $0x5c4] ss:$16 sps:$4 sm:$0xff]   ;;  %v8437_v38 = vld [vmem:[#allocation5 + $0x5c0] ss:$16 sps:$4 sm:$0xff]   ;;  %v8481_v18 = vld [vmem:[#allocation5 + $0x4c8] ss:$16 sps:$4 sm:$0xff]  }
  0x50   :  { %1435 = vmatpush1.bf16.msra.mxu1 %v8408_v19  ;;  %1373 = vmatprep.subr.bf16.mxu0 %v8409_v20  ;;  %v8435_v37 = vld [vmem:[#allocation5 + $0x7c4] ss:$16 sps:$4 sm:$0xff]   ;;  %v8438_v39 = vld [vmem:[#allocation5 + $0x7c0] ss:$16 sps:$4 sm:$0xff]   ;;  %v8484_v19 = vld [vmem:[#allocation5 + $0x6c8] ss:$16 sps:$4 sm:$0xff]  }
  0x51   :  { %1436 = vmatprep.subr.bf16.mxu1 %v8411_v21  ;;  %v8439_v40 = vld [vmem:[#allocation5 + $0x5a4] ss:$16 sps:$4 sm:$0xff]   ;;  %v8443_v42 = vld [vmem:[#allocation5 + $0x5a0] ss:$16 sps:$4 sm:$0xff]   ;;  %v8489_v20 = vld [vmem:[#allocation5 + $0x4ac] ss:$16 sps:$4 sm:$0xff]  }
  0x52   :  { %v8441_v41 = vld [vmem:[#allocation5 + $0x7a4] ss:$16 sps:$4 sm:$0xff]   ;;  %v8444_v43 = vld [vmem:[#allocation5 + $0x7a0] ss:$16 sps:$4 sm:$0xff]   ;;  %v8492_v21 = vld [vmem:[#allocation5 + $0x6ac] ss:$16 sps:$4 sm:$0xff]  }
  0x53   :  { %1374 = vmatpush1.bf16.msra.mxu0 %v8413_v22  ;;  %v8445_v44 = vld [vmem:[#allocation5 + $0x584] ss:$16 sps:$4 sm:$0xff]   ;;  %v8449_v50 = vld [vmem:[#allocation5 + $0x580] ss:$16 sps:$4 sm:$0xff]   ;;  %v8487_v22 = vld [vmem:[#allocation5 + $0x4a8] ss:$16 sps:$4 sm:$0xff]  }
  0x54   :  { %1437 = vmatpush1.bf16.msra.mxu1 %v8414_v23  ;;  %1375 = vmatprep.subr.bf16.mxu0 %v8415_v24  ;;  %v8447_v45 = vld [vmem:[#allocation5 + $0x784] ss:$16 sps:$4 sm:$0xff]   ;;  %v8450_v51 = vld [vmem:[#allocation5 + $0x780] ss:$16 sps:$4 sm:$0xff]   ;;  %v8490_v23 = vld [vmem:[#allocation5 + $0x6a8] ss:$16 sps:$4 sm:$0xff]  }
  0x55   :  { %1438 = vmatprep.subr.bf16.mxu1 %v8417_v25  ;;  %v8451_v52 = vld [vmem:[#allocation5 + $0x564] ss:$16 sps:$4 sm:$0xff]   ;;  %v8455_v56 = vld [vmem:[#allocation5 + $0x560] ss:$16 sps:$4 sm:$0xff]   ;;  %v8495_v24 = vld [vmem:[#allocation5 + $0x48c] ss:$16 sps:$4 sm:$0xff]  }
  0x56   :  { %v8453_v54 = vld [vmem:[#allocation5 + $0x764] ss:$16 sps:$4 sm:$0xff]   ;;  %v8456_v57 = vld [vmem:[#allocation5 + $0x760] ss:$16 sps:$4 sm:$0xff]   ;;  %v8498_v25 = vld [vmem:[#allocation5 + $0x68c] ss:$16 sps:$4 sm:$0xff]  }
  0x57   :  { %1376 = vmatpush1.bf16.msra.mxu0 %v8419_v26  ;;  %v8457_v58 = vld [vmem:[#allocation5 + $0x544] ss:$16 sps:$4 sm:$0xff]   ;;  %v8461_v60 = vld [vmem:[#allocation5 + $0x540] ss:$16 sps:$4 sm:$0xff]   ;;  %v8493_v26 = vld [vmem:[#allocation5 + $0x488] ss:$16 sps:$4 sm:$0xff]  }
  0x58   :  { %1439 = vmatpush1.bf16.msra.mxu1 %v8420_v27  ;;  %1377 = vmatprep.subr.bf16.mxu0 %v8421_v28  ;;  %v8459_v59 = vld [vmem:[#allocation5 + $0x744] ss:$16 sps:$4 sm:$0xff]   ;;  %v8462_v61 = vld [vmem:[#allocation5 + $0x740] ss:$16 sps:$4 sm:$0xff]   ;;  %v8496_v27 = vld [vmem:[#allocation5 + $0x688] ss:$16 sps:$4 sm:$0xff]  }
  0x59   :  { %1440 = vmatprep.subr.bf16.mxu1 %v8423_v29  ;;  %v8463_v62 = vld [vmem:[#allocation5 + $0x524] ss:$16 sps:$4 sm:$0xff]   ;;  %v8467_v0 = vld [vmem:[#allocation5 + $0x520] ss:$16 sps:$4 sm:$0xff]   ;;  %v8501_v28 = vld [vmem:[#allocation5 + $0x46c] ss:$16 sps:$4 sm:$0xff]  }
  0x5a   :  { %v8465_v63 = vld [vmem:[#allocation5 + $0x724] ss:$16 sps:$4 sm:$0xff]   ;;  %v8468_v1 = vld [vmem:[#allocation5 + $0x720] ss:$16 sps:$4 sm:$0xff]   ;;  %v8504_v29 = vld [vmem:[#allocation5 + $0x66c] ss:$16 sps:$4 sm:$0xff]  }
  0x5b   :  { %1378 = vmatpush1.bf16.msra.mxu0 %v8425_v30  ;;  %v8469_v2 = vld [vmem:[#allocation5 + $0x504] ss:$16 sps:$4 sm:$0xff]   ;;  %v8473_v4 = vld [vmem:[#allocation5 + $0x500] ss:$16 sps:$4 sm:$0xff]   ;;  %v9801_v30 = vld [vmem:[#allocation2 + $0x48] sm:$0xff] }
  0x5c   :  { %1441 = vmatpush1.bf16.msra.mxu1 %v8426_v31  ;;  %1379 = vmatprep.subr.bf16.mxu0 %v8427_v32  ;;  %v8471_v3 = vld [vmem:[#allocation5 + $0x704] ss:$16 sps:$4 sm:$0xff]   ;;  %v8474_v5 = vld [vmem:[#allocation5 + $0x700] ss:$16 sps:$4 sm:$0xff]   ;;  %v9803_v31 = vld [vmem:[#allocation2 + $0x68] sm:$0xff] }
  0x5d   :  { %1442 = vmatprep.subr.bf16.mxu1 %v8429_v33  ;;  %v9783_v6 = vld [vmem:[#allocation2] sm:$0xff]  ;;  %v9787_v8 = vld [vmem:[#allocation2 + $0x10] sm:$0xff]  ;;  %v9805_v32 = vld [vmem:[#allocation2 + $0x58] sm:$0xff] }
  0x5e   :  { %v9785_v7 = vld [vmem:[#allocation2 + $0x20] sm:$0xff]  ;;  %v9789_v9 = vld [vmem:[#allocation2 + $0x30] sm:$0xff]  ;;  %v9807_v33 = vld [vmem:[#allocation2 + $0x78] sm:$0xff] }
  0x5f   :  { %1380 = vmatpush2.bf16.msra.mxu0 %v8431_v34  ;;  %v9793_v12 = vpack.c.bf16 %v9785_v7, %v9783_v6  ;;  %v9797_v13 = vpack.c.bf16 %v9789_v9, %v9787_v8  ;;  %v9811_v34 = vpack.c.bf16 %v9803_v31, %v9801_v30 }
  0x60   :  { %1443 = vmatpush2.bf16.msra.mxu1 %v8432_v35  ;;  %1381 = vmatprep.subr.bf16.mxu0 %v8433_v36  ;;  %v9813_v35 = vld [vmem:[#allocation2 + $0x40] sm:$0xff] }
  0x61   :  { %1444 = vmatprep.subr.bf16.mxu1 %v8435_v37  ;;  %v9815_v36 = vld [vmem:[#allocation2 + $0x60] sm:$0xff]  ;;  %v9817_v37 = vld [vmem:[#allocation2 + $0x50] sm:$0xff] }
  0x63   :  { %1382 = vmatpush2.bf16.msra.mxu0 %v8437_v38  ;;  %v9821_v38 = vpack.c.bf16 %v9807_v33, %v9805_v32 }
  0x64   :  { %1445 = vmatpush2.bf16.msra.mxu1 %v8438_v39  ;;  %1383 = vmatprep.subr.bf16.mxu0 %v8439_v40  ;;  %v9823_v39 = vld [vmem:[#allocation2 + $0x70] sm:$0xff]  ;;  %v8499_v40 = vld [vmem:[#allocation5 + $0x468] ss:$16 sps:$4 sm:$0xff]  }
  0x65   :  { %1446 = vmatprep.subr.bf16.mxu1 %v8441_v41  ;;  %v8502_v41 = vld [vmem:[#allocation5 + $0x668] ss:$16 sps:$4 sm:$0xff]  }
  0x67   :  { %1384 = vmatpush2.bf16.msra.mxu0 %v8443_v42  ;;  %v9828_v42 = vpack.c.bf16 %v9815_v36, %v9813_v35 }
  0x68   :  { %1447 = vmatpush2.bf16.msra.mxu1 %v8444_v43  ;;  %1385 = vmatprep.subr.bf16.mxu0 %v8445_v44  ;;  %v8507_v43 = vld [vmem:[#allocation5 + $0x44c] ss:$16 sps:$4 sm:$0xff]  }
  0x69   :  { %1448 = vmatprep.subr.bf16.mxu1 %v8447_v45  ;;  %v8510_v44 = vld [vmem:[#allocation5 + $0x64c] ss:$16 sps:$4 sm:$0xff]   ;;  %v9832_v45 = vpack.c.bf16 %v9823_v39, %v9817_v37 }
  0x6b   :  { %1386 = vmatpush2.bf16.msra.mxu0 %v8449_v50  ;;  %v8505_v50 = vld [vmem:[#allocation5 + $0x448] ss:$16 sps:$4 sm:$0xff]  }
  0x6c   :  { %1449 = vmatpush2.bf16.msra.mxu1 %v8450_v51  ;;  %1387 = vmatprep.subr.bf16.mxu0 %v8451_v52  ;;  %v8508_v51 = vld [vmem:[#allocation5 + $0x648] ss:$16 sps:$4 sm:$0xff]   ;;  %v8513_v52 = vld [vmem:[#allocation5 + $0x42c] ss:$16 sps:$4 sm:$0xff]  }
  0x6d   :  { %1450 = vmatprep.subr.bf16.mxu1 %v8453_v54  ;;  %v8516_v54 = vld [vmem:[#allocation5 + $0x62c] ss:$16 sps:$4 sm:$0xff]  }
  0x6f   :  { %1388 = vmatpush2.bf16.msra.mxu0 %v8455_v56  ;;  %v9837_v56 = vld [vmem:[#allocation2 + $0x88] sm:$0xff] }
  0x70   :  { %1451 = vmatpush2.bf16.msra.mxu1 %v8456_v57  ;;  %1389 = vmatprep.subr.bf16.mxu0 %v8457_v58  ;;  %v9839_v57 = vld [vmem:[#allocation2 + $0xa8] sm:$0xff]  ;;  %v9841_v58 = vld [vmem:[#allocation2 + $0x98] sm:$0xff] }
  0x71   :  { %1452 = vmatprep.subr.bf16.mxu1 %v8459_v59  ;;  %v9843_v59 = vld [vmem:[#allocation2 + $0xb8] sm:$0xff] }
  0x73   :  { %1390 = vmatpush2.bf16.msra.mxu0 %v8461_v60  ;;  %v9847_v60 = vpack.c.bf16 %v9839_v57, %v9837_v56 }
  0x74   :  { %1453 = vmatpush2.bf16.msra.mxu1 %v8462_v61  ;;  %1391 = vmatprep.subr.bf16.mxu0 %v8463_v62  ;;  %v9849_v61 = vld [vmem:[#allocation2 + $0x80] sm:$0xff] }
  0x75   :  { %1454 = vmatprep.subr.bf16.mxu1 %v8465_v63  ;;  %v9851_v62 = vld [vmem:[#allocation2 + $0xa0] sm:$0xff]  ;;  %v9853_v63 = vld [vmem:[#allocation2 + $0x90] sm:$0xff] }
  0x77   :  { %1392 = vmatpush2.bf16.msra.mxu0 %v8467_v0  ;;  %v9857_v0 = vpack.c.bf16 %v9843_v59, %v9841_v58 }
  0x78   :  { %1455 = vmatpush2.bf16.msra.mxu1 %v8468_v1  ;;  %1393 = vmatprep.subr.bf16.mxu0 %v8469_v2  ;;  %v9859_v1 = vld [vmem:[#allocation2 + $0xb0] sm:$0xff]  ;;  %v8511_v2 = vld [vmem:[#allocation5 + $0x428] ss:$16 sps:$4 sm:$0xff]  }
  0x79   :  { %1456 = vmatprep.subr.bf16.mxu1 %v8471_v3  ;;  %v8514_v3 = vld [vmem:[#allocation5 + $0x628] ss:$16 sps:$4 sm:$0xff]  }
  0x7b   :  { %1394 = vmatpush2.bf16.msra.mxu0 %v8473_v4  ;;  %v9863_v4 = vpack.c.bf16 %v9851_v62, %v9849_v61 }
  0x7c   :  { %1457 = vmatpush2.bf16.msra.mxu1 %v8474_v5  ;;  %1489 = vmatprep.subr.bf16.mxu0 %v8477_v10  ;;  %v8519_v5 = vld [vmem:[#allocation5 + $0x40c] ss:$16 sps:$4 sm:$0xff]  }
  0x7d   :  { %1552 = vmatprep.subr.bf16.mxu1 %v8480_v11  ;;  %v8522_v10 = vld [vmem:[#allocation5 + $0x60c] ss:$16 sps:$4 sm:$0xff]   ;;  %v9867_v11 = vpack.c.bf16 %v9859_v1, %v9853_v63 }
  0x7e   :  { %1396 = vmatmul.mubr.bf16.vlgmr.msra.gmra.mxu0 %v9793_v12 }
  0x7f   :  { %1459 = vmatmul.mubr.bf16.vlgmr.msra.gmra.mxu1 %v9797_v13  ;;  %1490 = vmatpush1.bf16.msra.mxu0 %v8475_v14  ;;  %v8517_v14 = vld [vmem:[#allocation5 + $0x408] ss:$16 sps:$4 sm:$0xff]  }
  0x80   :  { %1553 = vmatpush1.bf16.msra.mxu1 %v8478_v15  ;;  %1491 = vmatprep.subr.bf16.mxu0 %v8483_v16  ;;  %v8520_v15 = vld [vmem:[#allocation5 + $0x608] ss:$16 sps:$4 sm:$0xff]   ;;  %v8525_v16 = vld [vmem:[#allocation5 + $0x5ec] ss:$16 sps:$4 sm:$0xff]  }
  0x81   :  { %1554 = vmatprep.subr.bf16.mxu1 %v8486_v17  ;;  %1405 = vmatprep.mubr.bf16.mxu0 %v9811_v34  ;;  %v8528_v17 = vld [vmem:[#allocation5 + $0x7ec] ss:$16 sps:$4 sm:$0xff]  }
  0x82   :  { %1468 = vmatprep.mubr.bf16.mxu1 %v9821_v38 }
  0x83   :  { %1492 = vmatpush1.bf16.msra.mxu0 %v8481_v18  ;;  %v8523_v18 = vld [vmem:[#allocation5 + $0x5e8] ss:$16 sps:$4 sm:$0xff]  }
  0x84   :  { %1555 = vmatpush1.bf16.msra.mxu1 %v8484_v19  ;;  %1493 = vmatprep.subr.bf16.mxu0 %v8489_v20  ;;  %v8526_v19 = vld [vmem:[#allocation5 + $0x7e8] ss:$16 sps:$4 sm:$0xff]   ;;  %v8531_v20 = vld [vmem:[#allocation5 + $0x5cc] ss:$16 sps:$4 sm:$0xff]  }
  0x85   :  { %1556 = vmatprep.subr.bf16.mxu1 %v8492_v21  ;;  %v8534_v21 = vld [vmem:[#allocation5 + $0x7cc] ss:$16 sps:$4 sm:$0xff]  }
  0x86   :  { %1406 = vmatmul.mubr.bf16.gmra.mxu0 %v9828_v42 }
  0x87   :  { %1494 = vmatpush1.bf16.msra.mxu0 %v8487_v22  ;;  %1469 = vmatmul.mubr.bf16.gmra.mxu1 %v9832_v45  ;;  %v8529_v22 = vld [vmem:[#allocation5 + $0x5c8] ss:$16 sps:$4 sm:$0xff]  }
  0x88   :  { %1557 = vmatpush1.bf16.msra.mxu1 %v8490_v23  ;;  %1495 = vmatprep.subr.bf16.mxu0 %v8495_v24  ;;  %v8532_v23 = vld [vmem:[#allocation5 + $0x7c8] ss:$16 sps:$4 sm:$0xff]   ;;  %v8537_v24 = vld [vmem:[#allocation5 + $0x5ac] ss:$16 sps:$4 sm:$0xff]  }
  0x89   :  { %1558 = vmatprep.subr.bf16.mxu1 %v8498_v25  ;;  %1415 = vmatprep.mubr.bf16.mxu0 %v9847_v60  ;;  %v8540_v25 = vld [vmem:[#allocation5 + $0x7ac] ss:$16 sps:$4 sm:$0xff]  }
  0x8a   :  { %1478 = vmatprep.mubr.bf16.mxu1 %v9857_v0 }
  0x8b   :  { %1496 = vmatpush1.bf16.msra.mxu0 %v8493_v26  ;;  %v8535_v26 = vld [vmem:[#allocation5 + $0x5a8] ss:$16 sps:$4 sm:$0xff]  }
  0x8c   :  { %1559 = vmatpush1.bf16.msra.mxu1 %v8496_v27  ;;  %1497 = vmatprep.subr.bf16.mxu0 %v8501_v28  ;;  %v8546_v27 = vld [vmem:[#allocation5 + $0x78c] ss:$16 sps:$4 sm:$0xff]   ;;  %v8541_v28 = vld [vmem:[#allocation5 + $0x588] ss:$16 sps:$4 sm:$0xff]  }
  0x8d   :  { %1560 = vmatprep.subr.bf16.mxu1 %v8504_v29  ;;  %v8544_v29 = vld [vmem:[#allocation5 + $0x788] ss:$16 sps:$4 sm:$0xff]  }
  0x8e   :  { %1416 = vmatmul.mubr.bf16.gmra.mxu0 %v9863_v4 }
  0x8f   :  { %1498 = vmatpush1.bf16.msra.mxu0 %v8499_v40  ;;  %1479 = vmatmul.mubr.bf16.gmra.mxu1 %v9867_v11  ;;  %v8549_v40 = vld [vmem:[#allocation5 + $0x56c] ss:$16 sps:$4 sm:$0xff]  }
  0x90   :  { %1561 = vmatpush1.bf16.msra.mxu1 %v8502_v41  ;;  %1499 = vmatprep.subr.bf16.mxu0 %v8507_v43  ;;  %v8552_v41 = vld [vmem:[#allocation5 + $0x76c] ss:$16 sps:$4 sm:$0xff]   ;;  %v8547_v43 = vld [vmem:[#allocation5 + $0x568] ss:$16 sps:$4 sm:$0xff]  }
  0x91   :  { %1562 = vmatprep.subr.bf16.mxu1 %v8510_v44  ;;  %1521 = vmatprep.mubr.bf16.mxu0 %v9775_v53  ;;  %v8538_v53 = vld [vmem:[#allocation5 + $0x7a8] ss:$16 sps:$4 sm:$0xff]  }
  0x92   :  { %1584 = vmatprep.mubr.bf16.mxu1 %v9779_v55  ;;  %v8543_v55 = vld [vmem:[#allocation5 + $0x58c] ss:$16 sps:$4 sm:$0xff]   ;;  %v8550_v44 = vld [vmem:[#allocation5 + $0x768] ss:$16 sps:$4 sm:$0xff]  }
  0x93   :  { %1500 = vmatpush1.bf16.msra.mxu0 %v8505_v50  ;;  %v8555_v50 = vld [vmem:[#allocation5 + $0x54c] ss:$16 sps:$4 sm:$0xff]  }
  0x94   :  { %1563 = vmatpush1.bf16.msra.mxu1 %v8508_v51  ;;  %1501 = vmatprep.subr.bf16.mxu0 %v8513_v52  ;;  %v8558_v51 = vld [vmem:[#allocation5 + $0x74c] ss:$16 sps:$4 sm:$0xff]   ;;  %v8553_v52 = vld [vmem:[#allocation5 + $0x548] ss:$16 sps:$4 sm:$0xff]  }
  0x95   :  { %1564 = vmatprep.subr.bf16.mxu1 %v8516_v54  ;;  %v8556_v54 = vld [vmem:[#allocation5 + $0x748] ss:$16 sps:$4 sm:$0xff]  }
  0x97   :  { %1502 = vmatpush1.bf16.msra.mxu0 %v8511_v2  ;;  %v8561_v2 = vld [vmem:[#allocation5 + $0x52c] ss:$16 sps:$4 sm:$0xff]  }
  0x98   :  { %1565 = vmatpush1.bf16.msra.mxu1 %v8514_v3  ;;  %1503 = vmatprep.subr.bf16.mxu0 %v8519_v5  ;;  %v8564_v3 = vld [vmem:[#allocation5 + $0x72c] ss:$16 sps:$4 sm:$0xff]   ;;  %v8559_v5 = vld [vmem:[#allocation5 + $0x528] ss:$16 sps:$4 sm:$0xff]  }
  0x99   :  { %1566 = vmatprep.subr.bf16.mxu1 %v8522_v10  ;;  %v8562_v10 = vld [vmem:[#allocation5 + $0x728] ss:$16 sps:$4 sm:$0xff]  }
  0x9b   :  { %1504 = vmatpush1.bf16.msra.mxu0 %v8517_v14  ;;  %v8567_v14 = vld [vmem:[#allocation5 + $0x50c] ss:$16 sps:$4 sm:$0xff]  }
  0x9c   :  { %1567 = vmatpush1.bf16.msra.mxu1 %v8520_v15  ;;  %1505 = vmatprep.subr.bf16.mxu0 %v8525_v16  ;;  %v8570_v15 = vld [vmem:[#allocation5 + $0x70c] ss:$16 sps:$4 sm:$0xff]   ;;  %v8565_v16 = vld [vmem:[#allocation5 + $0x508] ss:$16 sps:$4 sm:$0xff]  }
  0x9d   :  { %1568 = vmatprep.subr.bf16.mxu1 %v8528_v17  ;;  %v8568_v17 = vld [vmem:[#allocation5 + $0x708] ss:$16 sps:$4 sm:$0xff]  }
  0x9f   :  { %1506 = vmatpush2.bf16.msra.mxu0 %v8523_v18  ;;  %v8573_v18 = vld [vmem:[#allocation5 + $0xe4] ss:$16 sps:$4 sm:$0xff]  }
  0xa0   :  { %1569 = vmatpush2.bf16.msra.mxu1 %v8526_v19  ;;  %1507 = vmatprep.subr.bf16.mxu0 %v8531_v20  ;;  %v8576_v19 = vld [vmem:[#allocation5 + $0x2e4] ss:$16 sps:$4 sm:$0xff]   ;;  %v8571_v20 = vld [vmem:[#allocation5 + $0xe0] ss:$16 sps:$4 sm:$0xff]  }
  0xa1   :  { %1570 = vmatprep.subr.bf16.mxu1 %v8534_v21  ;;  %v109_v21 = vlaneseq }
  0xa3   :  { %1508 = vmatpush2.bf16.msra.mxu0 %v8529_v22  ;;  %v8574_v22 = vld [vmem:[#allocation5 + $0x2e0] ss:$16 sps:$4 sm:$0xff]  }
  0xa4   :  { %1571 = vmatpush2.bf16.msra.mxu1 %v8532_v23  ;;  %1509 = vmatprep.subr.bf16.mxu0 %v8537_v24  ;;  %v8579_v23 = vld [vmem:[#allocation5 + $0xc4] ss:$16 sps:$4 sm:$0xff]  }
  0xa5   :  { %1572 = vmatprep.subr.bf16.mxu1 %v8540_v25  ;;  %v8582_v24 = vld [vmem:[#allocation5 + $0x2c4] ss:$16 sps:$4 sm:$0xff]   ;;  %v8577_v25 = vld [vmem:[#allocation5 + $0xc0] ss:$16 sps:$4 sm:$0xff]  }
  0xa7   :  { %1510 = vmatpush2.bf16.msra.mxu0 %v8535_v26  ;;  %v9877_v26 = vshrl.u32 %v109_v21, 7  ;;  %v8615_v21 = vld [vmem:[#allocation5 + $0x4] ss:$16 sps:$4 sm:$0xff]  }
  0xa8   :  { %1573 = vmatpush2.bf16.msra.mxu1 %v8538_v53  ;;  %1511 = vmatprep.subr.bf16.mxu0 %v8543_v55  ;;  %v8580_v53 = vld [vmem:[#allocation5 + $0x2c0] ss:$16 sps:$4 sm:$0xff]   ;;  %v8585_v55 = vld [vmem:[#allocation5 + $0xa4] ss:$16 sps:$4 sm:$0xff]  }
  0xa9   :  { %1574 = vmatprep.subr.bf16.mxu1 %v8546_v27  ;;  %v8588_v27 = vld [vmem:[#allocation5 + $0x2a4] ss:$16 sps:$4 sm:$0xff]  }
  0xab   :  { %1512 = vmatpush2.bf16.msra.mxu0 %v8541_v28  ;;  %v8583_v28 = vld [vmem:[#allocation5 + $0xa0] ss:$16 sps:$4 sm:$0xff]  }
  0xac   :  { %1575 = vmatpush2.bf16.msra.mxu1 %v8544_v29  ;;  %1513 = vmatprep.subr.bf16.mxu0 %v8549_v40  ;;  %v9882_v29 = vadd.s32 8, %v9877_v26  ;;  %v8594_v40 = vld [vmem:[#allocation5 + $0x284] ss:$16 sps:$4 sm:$0xff]  }
  0xad   :  { %1576 = vmatprep.subr.bf16.mxu1 %v8552_v41  ;;  %v220_v41 = vrot.slane %v9765_v46, 7  ;;  %v120_v46 = vand.u32 7, %v9877_v26 }
  0xaf   :  { %1514 = vmatpush2.bf16.msra.mxu0 %v8547_v43  ;;  %v225_v43 = vrot.slane %v9767_v47, 7  ;;  %vm8358_vm2 = vcmp.ne.s32.totalorder %v120_v46, 0  ;;  %vm10114_vm11 = vcmp.ne.s32.totalorder %v120_v46, 7 }
  0xb0   :  { %1577 = vmatpush2.bf16.msra.mxu1 %v8550_v44  ;;  %1515 = vmatprep.subr.bf16.mxu0 %v8555_v50  ;;  %v8589_v44 = vld [vmem:[#allocation5 + $0x80] ss:$16 sps:$4 sm:$0xff]   ;;  %v127_v50 = vand.u32 7, %v9882_v29 }
  0xb1   :  { %1578 = vmatprep.subr.bf16.mxu1 %v8558_v51  ;;  %v8592_v51 = vld [vmem:[#allocation5 + $0x280] ss:$16 sps:$4 sm:$0xff]  }
  0xb2   :  { %vm9900_vm1 = vcmp.ne.s32.totalorder %v127_v50, 0  ;;  %vm10108_vm10 = vcmp.ne.s32.totalorder %v127_v50, 7  ;;  %v8781_v29 = vld [vmem:[#allocation5 + $0x880] ss:$16 sps:$4 sm:$0xff]  }
  0xb3   :  { %1516 = vmatpush2.bf16.msra.mxu0 %v8553_v52  ;;  %v8597_v52 = vld [vmem:[#allocation5 + $0x64] ss:$16 sps:$4 sm:$0xff]   ;;  %vm9918_vm3 = vmpackc.low %vm9900_vm1, %vm8358_vm2  ;;  %v8784_v50 = vld [vmem:[#allocation5 + $0xa80] ss:$16 sps:$4 sm:$0xff]  }
  0xb4   :  { %1579 = vmatpush2.bf16.msra.mxu1 %v8556_v54  ;;  %1517 = vmatprep.subr.bf16.mxu0 %v8561_v2  ;;  %v8600_v54 = vld [vmem:[#allocation5 + $0x264] ss:$16 sps:$4 sm:$0xff]   ;;  %vm10134_vm12 = vmpackc.low %vm10108_vm10, %vm10114_vm11 }
  0xb5   :  { %1580 = vmatprep.subr.bf16.mxu1 %v8564_v3  ;;  %v8648_v2 = vld [vmem:[#allocation5 + $0x364] ss:$16 sps:$4 sm:$0xff]  }
  0xb7   :  { %1518 = vmatpush2.bf16.msra.mxu0 %v8559_v5  ;;  %v8603_v5 = vld [vmem:[#allocation5 + $0x44] ss:$16 sps:$4 sm:$0xff]  }
  0xb8   :  { %1581 = vmatpush2.bf16.msra.mxu1 %v8562_v10  ;;  %1519 = vmatprep.subr.bf16.mxu0 %v8567_v14  ;;  %v8606_v10 = vld [vmem:[#allocation5 + $0x244] ss:$16 sps:$4 sm:$0xff]  }
  0xb9   :  { %1582 = vmatprep.subr.bf16.mxu1 %v8570_v15 }
  0xbb   :  { %1520 = vmatpush2.bf16.msra.mxu0 %v8565_v16  ;;  %v8601_v16 = vld [vmem:[#allocation5 + $0x40] ss:$16 sps:$4 sm:$0xff]  }
  0xbc   :  { %1583 = vmatpush2.bf16.msra.mxu1 %v8568_v17  ;;  %2255 = vmatprep.subr.bf16.mxu0 %v8573_v18  ;;  %v11226_v17 = vmov 0  ;;  %v8604_v18 = vld [vmem:[#allocation5 + $0x240] ss:$16 sps:$4 sm:$0xff]  }
  0xbd   :  { %2318 = vmatprep.subr.bf16.mxu1 %v8576_v19  ;;  %v11227_v17 = vsel %vm9918_vm3, 4294967295, %v11226_v17  ;;  %v8609_v19 = vld [vmem:[#allocation5 + $0x24] ss:$16 sps:$4 sm:$0xff]  }
  0xbe   :  { %1522 = vmatmul.mubr.bf16.vlgmr.msra.gmra.mxu0 %v9793_v12  ;;  %v8586_v12 = vld [vmem:[#allocation5 + $0x2a0] ss:$16 sps:$4 sm:$0xff]   ;;  %11228 = vst [vmem:[#allocation16_spill] sm:$0xff] %v11227_v17 }
  0xbf   :  { %1585 = vmatmul.mubr.bf16.vlgmr.msra.gmra.mxu1 %v9797_v13  ;;  %2256 = vmatpush1.bf16.msra.mxu0 %v8571_v20  ;;  %v8591_v13 = vld [vmem:[#allocation5 + $0x84] ss:$16 sps:$4 sm:$0xff]   ;;  %v9008_v17 = vld [vmem:[#allocation8 + $0x4ec] ss:$16 sps:$4 sm:$0xff]  }
  0xc0   :  { %2319 = vmatpush1.bf16.msra.mxu1 %v8574_v22  ;;  %2257 = vmatprep.subr.bf16.mxu0 %v8579_v23  ;;  %v8612_v20 = vld [vmem:[#allocation5 + $0x224] ss:$16 sps:$4 sm:$0xff]   ;;  %v8613_v23 = vld [vmem:[#allocation5] ss:$16 sps:$4 sm:$0xff]  }
  0xc1   :  { %2320 = vmatprep.subr.bf16.mxu1 %v8582_v24  ;;  %1531 = vmatprep.mubr.bf16.mxu0 %v9811_v34  ;;  %v222_v34 = vrot.slane %v9769_v48, 7  ;;  %v226_v48 = vsel %vm218_vm0, %v220_v41, %v225_v43  ;;  %v8618_v22 = vld [vmem:[#allocation5 + $0x204] ss:$16 sps:$4 sm:$0xff]   ;;  %v8616_v24 = vld [vmem:[#allocation5 + $0x200] ss:$16 sps:$4 sm:$0xff]  }
  0xc2   :  { %1594 = vmatprep.mubr.bf16.mxu1 %v9821_v38  ;;  %v229_v38 = vrot.slane %v9771_v49, 7 }
  0xc3   :  { %2258 = vmatpush1.bf16.msra.mxu0 %v8577_v25  ;;  %v8621_v25 = vld [vmem:[#allocation5 + $0x1e4] ss:$16 sps:$4 sm:$0xff]  }
  0xc4   :  { %2321 = vmatpush1.bf16.msra.mxu1 %v8580_v53  ;;  %2259 = vmatprep.subr.bf16.mxu0 %v8585_v55  ;;  %v230_v3 = vsel %vm218_vm0, %v222_v34, %v229_v38  ;;  %v8624_v53 = vld [vmem:[#allocation5 + $0x3e4] ss:$16 sps:$4 sm:$0xff]   ;;  %v8619_v55 = vld [vmem:[#allocation5 + $0x1e0] ss:$16 sps:$4 sm:$0xff]  }
  0xc5   :  { %2322 = vmatprep.subr.bf16.mxu1 %v8588_v27  ;;  %v8622_v27 = vld [vmem:[#allocation5 + $0x3e0] ss:$16 sps:$4 sm:$0xff]  }
  0xc6   :  { %1532 = vmatmul.mubr.bf16.gmra.mxu0 %v9828_v42  ;;  %v8595_v42 = vld [vmem:[#allocation5 + $0x60] ss:$16 sps:$4 sm:$0xff]  }
  0xc7   :  { %1595 = vmatmul.mubr.bf16.gmra.mxu1 %v9832_v45  ;;  %2260 = vmatpush1.bf16.msra.mxu0 %v8583_v28  ;;  %v288_v45 = vsel %vm218_vm0, 0.0, %v220_v41  ;;  %v8627_v28 = vld [vmem:[#allocation5 + $0x1c4] ss:$16 sps:$4 sm:$0xff]  }
  0xc8   :  { %2323 = vmatpush1.bf16.msra.mxu1 %v8586_v12  ;;  %2261 = vmatprep.subr.bf16.mxu0 %v8591_v13  ;;  %v9910_v14 = vpack.c.bf16 %v226_v48, %v288_v45  ;;  %v8630_v12 = vld [vmem:[#allocation5 + $0x3c4] ss:$16 sps:$4 sm:$0xff]   ;;  %v8625_v13 = vld [vmem:[#allocation5 + $0x1c0] ss:$16 sps:$4 sm:$0xff]  }
  0xc9   :  { %2324 = vmatprep.subr.bf16.mxu1 %v8594_v40  ;;  %1541 = vmatprep.mubr.bf16.mxu0 %v9847_v60  ;;  %v290_v60 = vsel %vm218_vm0, 0.0, %v222_v34  ;;  %v8628_v40 = vld [vmem:[#allocation5 + $0x3c0] ss:$16 sps:$4 sm:$0xff]   ;;  %v8633_v41 = vld [vmem:[#allocation5 + $0x1a4] ss:$16 sps:$4 sm:$0xff]  }
  0xca   :  { %1604 = vmatprep.mubr.bf16.mxu1 %v9857_v0  ;;  %v8598_v0 = vld [vmem:[#allocation5 + $0x260] ss:$16 sps:$4 sm:$0xff]   ;;  %v9912_v15 = vpack.c.bf16 %v230_v3, %v290_v60  ;;  %v8636_v34 = vld [vmem:[#allocation5 + $0x3a4] ss:$16 sps:$4 sm:$0xff]  }
  0xcb   :  { %2262 = vmatpush1.bf16.msra.mxu0 %v8589_v44  ;;  %v8631_v44 = vld [vmem:[#allocation5 + $0x1a0] ss:$16 sps:$4 sm:$0xff]   ;;  %v8645_v45 = vld [vmem:[#allocation5 + $0x164] ss:$16 sps:$4 sm:$0xff]  }
  0xcc   :  { %2325 = vmatpush1.bf16.msra.mxu1 %v8592_v51  ;;  %2263 = vmatprep.subr.bf16.mxu0 %v8597_v52  ;;  %v8634_v51 = vld [vmem:[#allocation5 + $0x3a0] ss:$16 sps:$4 sm:$0xff]   ;;  %v8639_v52 = vld [vmem:[#allocation5 + $0x184] ss:$16 sps:$4 sm:$0xff]  }
  0xcd   :  { %2326 = vmatprep.subr.bf16.mxu1 %v8600_v54  ;;  %v8642_v54 = vld [vmem:[#allocation5 + $0x384] ss:$16 sps:$4 sm:$0xff]   ;;  %v8637_v48 = vld [vmem:[#allocation5 + $0x180] ss:$16 sps:$4 sm:$0xff]  }
  0xce   :  { %1542 = vmatmul.mubr.bf16.gmra.mxu0 %v9863_v4  ;;  %v8607_v4 = vld [vmem:[#allocation5 + $0x20] ss:$16 sps:$4 sm:$0xff]  }
  0xcf   :  { %1605 = vmatmul.mubr.bf16.gmra.mxu1 %v9867_v11  ;;  %2264 = vmatpush1.bf16.msra.mxu0 %v8595_v42  ;;  %v8610_v11 = vld [vmem:[#allocation5 + $0x220] ss:$16 sps:$4 sm:$0xff]  }
  0xd0   :  { %2327 = vmatpush1.bf16.msra.mxu1 %v8598_v0  ;;  %2265 = vmatprep.subr.bf16.mxu0 %v8603_v5  ;;  %v8640_v42 = vld [vmem:[#allocation5 + $0x380] ss:$16 sps:$4 sm:$0xff]   ;;  %v8651_v0 = vld [vmem:[#allocation5 + $0x144] ss:$16 sps:$4 sm:$0xff]  }
  0xd1   :  { %2328 = vmatprep.subr.bf16.mxu1 %v8606_v10  ;;  %7369 = vmatprep.mubr.msk.bf16.mxu0 %vm9918_vm3, %v9910_v14  ;;  %v8643_v3 = vld [vmem:[#allocation5 + $0x160] ss:$16 sps:$4 sm:$0xff]   ;;  %v8654_v5 = vld [vmem:[#allocation5 + $0x344] ss:$16 sps:$4 sm:$0xff]  }
  0xd2   :  { %7399 = vmatprep.mubr.msk.bf16.mxu1 %vm9918_vm3, %v9912_v15  ;;  %v8646_v60 = vld [vmem:[#allocation5 + $0x360] ss:$16 sps:$4 sm:$0xff]  }
  0xd3   :  { %2266 = vmatpush1.bf16.msra.mxu0 %v8601_v16  ;;  %v8649_v10 = vld [vmem:[#allocation5 + $0x140] ss:$16 sps:$4 sm:$0xff]  }
  0xd4   :  { %2329 = vmatpush1.bf16.msra.mxu1 %v8604_v18  ;;  %2267 = vmatprep.subr.bf16.mxu0 %v8609_v19  ;;  %v8652_v16 = vld [vmem:[#allocation5 + $0x340] ss:$16 sps:$4 sm:$0xff]   ;;  %v8657_v18 = vld [vmem:[#allocation5 + $0x124] ss:$16 sps:$4 sm:$0xff]   ;;  %v9929_v19 = vadd.s32 16, %v9877_v26 }
  0xd5   :  { %2330 = vmatprep.subr.bf16.mxu1 %v8612_v20  ;;  %v219_v20 = vrot.slane %v9783_v6, 7 }
  0xd7   :  { %2268 = vmatpush1.bf16.msra.mxu0 %v8607_v4  ;;  %v223_v4 = vrot.slane %v9785_v7, 7  ;;  %v287_v7 = vsel %vm218_vm0, 0.0, %v219_v20 }
  0xd8   :  { %2331 = vmatpush1.bf16.msra.mxu1 %v8610_v11  ;;  %2269 = vmatprep.subr.bf16.mxu0 %v8615_v21  ;;  %v8660_v11 = vld [vmem:[#allocation5 + $0x324] ss:$16 sps:$4 sm:$0xff]   ;;  %v9934_v21 = vadd.s32 24, %v9877_v26 }
  0xd9   :  { %2332 = vmatprep.subr.bf16.mxu1 %v8618_v22  ;;  %v221_v22 = vrot.slane %v9787_v8, 7  ;;  %v224_v6 = vsel %vm218_vm0, %v219_v20, %v223_v4  ;;  %v241_v8 = vrot.slane %v9803_v31, 7  ;;  %v8690_v31 = vld [vmem:[#allocation5 + $0x28c] ss:$16 sps:$4 sm:$0xff]  }
  0xdb   :  { %2270 = vmatpush1.bf16.msra.mxu0 %v8613_v23  ;;  %v8655_v23 = vld [vmem:[#allocation5 + $0x120] ss:$16 sps:$4 sm:$0xff]  }
  0xdc   :  { %2333 = vmatpush1.bf16.msra.mxu1 %v8616_v24  ;;  %2271 = vmatprep.subr.bf16.mxu0 %v8621_v25  ;;  %v8658_v24 = vld [vmem:[#allocation5 + $0x320] ss:$16 sps:$4 sm:$0xff]   ;;  %v227_v25 = vrot.slane %v9789_v9, 7  ;;  %v141_v9 = vand.u32 7, %v9934_v21 }
  0xdd   :  { %2334 = vmatprep.subr.bf16.mxu1 %v8624_v53  ;;  %v8663_v53 = vld [vmem:[#allocation5 + $0x104] ss:$16 sps:$4 sm:$0xff]  }
  0xde   :  { %vm9967_vm5 = vcmp.ne.s32.totalorder %v141_v9, 0  ;;  %vm10196_vm14 = vcmp.ne.s32.totalorder %v141_v9, 7  ;;  %v8853_v9 = vld [vmem:[#allocation5 + $0x900] ss:$16 sps:$4 sm:$0xff]  }
  0xdf   :  { %2272 = vmatpush2.bf16.msra.mxu0 %v8619_v55  ;;  %v134_v55 = vand.u32 7, %v9929_v19 }
  0xe0   :  { %2335 = vmatpush2.bf16.msra.mxu1 %v8622_v27  ;;  %2273 = vmatprep.subr.bf16.mxu0 %v8627_v28  ;;  %v8666_v27 = vld [vmem:[#allocation5 + $0x304] ss:$16 sps:$4 sm:$0xff]   ;;  %v233_v28 = vrot.slane %v9801_v30, 7 }
  0xe1   :  { %2336 = vmatprep.subr.bf16.mxu1 %v8630_v12  ;;  %v237_v12 = vrot.slane %v9805_v32, 7  ;;  %vm9950_vm4 = vcmp.ne.s32.totalorder %v134_v55, 0  ;;  %v9954_v32 = vpack.c.bf16 %v224_v6, %v287_v7  ;;  %v8681_v7 = vld [vmem:[#allocation5 + $0xac] ss:$16 sps:$4 sm:$0xff]   ;;  %vm10202_vm15 = vcmp.ne.s32.totalorder %v134_v55, 7 }
  0xe2   :  { %vm9999_vm6 = vmpackc.low %vm9967_vm5, %vm9950_vm4 }
  0xe3   :  { %2274 = vmatpush2.bf16.msra.mxu0 %v8625_v13  ;;  %v245_v13 = vrot.slane %v9807_v33, 7  ;;  %v238_v47 = vsel %vm218_vm0, %v229_v38, %v237_v12  ;;  %vm10224_vm1 = vmpackc.low %vm10196_vm14, %vm10202_vm15 }
  0xe4   :  { %2337 = vmatpush2.bf16.msra.mxu1 %v8628_v40  ;;  %2275 = vmatprep.subr.bf16.mxu0 %v8633_v41  ;;  %v8661_v40 = vld [vmem:[#allocation5 + $0x100] ss:$16 sps:$4 sm:$0xff]  }
  0xe5   :  { %2338 = vmatprep.subr.bf16.mxu1 %v8636_v34  ;;  %v8664_v41 = vld [vmem:[#allocation5 + $0x300] ss:$16 sps:$4 sm:$0xff]   ;;  %v228_v34 = vsel %vm218_vm0, %v221_v22, %v227_v25 }
  0xe7   :  { %2276 = vmatpush2.bf16.msra.mxu0 %v8631_v44  ;;  %v289_v44 = vsel %vm218_vm0, 0.0, %v221_v22  ;;  %v257_v22 = vrot.slane %v9839_v57, 7  ;;  %v8676_v57 = vld [vmem:[#allocation5 + $0x2c8] ss:$16 sps:$4 sm:$0xff]  }
  0xe8   :  { %2339 = vmatpush2.bf16.msra.mxu1 %v8634_v51  ;;  %2277 = vmatprep.subr.bf16.mxu0 %v8639_v52  ;;  %v8669_v51 = vld [vmem:[#allocation5 + $0xec] ss:$16 sps:$4 sm:$0xff]   ;;  %v231_v52 = vrot.slane %v9813_v35, 7  ;;  %v9971_v35 = vpack.c.bf16 %v228_v34, %v289_v44  ;;  %v259_v34 = vrot.slane %v9859_v1, 7  ;;  %v8679_v44 = vld [vmem:[#allocation5 + $0xa8] ss:$16 sps:$4 sm:$0xff]  }
  0xe9   :  { %2340 = vmatprep.subr.bf16.mxu1 %v8642_v54  ;;  %v239_v54 = vrot.slane %v9815_v36, 7 }
  0xea   :  { %v232_v49 = vsel %vm218_vm0, %v223_v4, %v231_v52  ;;  %v261_v4 = vrot.slane %v9843_v59, 7 }
  0xeb   :  { %2278 = vmatpush2.bf16.msra.mxu0 %v8637_v48  ;;  %v8672_v48 = vld [vmem:[#allocation5 + $0x2ec] ss:$16 sps:$4 sm:$0xff]   ;;  %v240_v38 = vsel %vm218_vm0, %v231_v52, %v239_v54 }
  0xec   :  { %2341 = vmatpush2.bf16.msra.mxu1 %v8640_v42  ;;  %2279 = vmatprep.subr.bf16.mxu0 %v8645_v45  ;;  %v235_v42 = vrot.slane %v9817_v37, 7  ;;  %v234_v45 = vsel %vm218_vm0, %v225_v43, %v233_v28  ;;  %v8670_v37 = vld [vmem:[#allocation5 + $0x2e8] ss:$16 sps:$4 sm:$0xff]   ;;  %v246_v43 = vsel %vm218_vm0, %v237_v12, %v245_v13  ;;  %v10019_v12 = vpack.c.bf16 %v240_v38, %v232_v49  ;;  %v8687_v52 = vld [vmem:[#allocation5 + $0x8c] ss:$16 sps:$4 sm:$0xff]  }
  0xed   :  { %2342 = vmatprep.subr.bf16.mxu1 %v8648_v2  ;;  %v242_v2 = vsel %vm218_vm0, %v233_v28, %v241_v8  ;;  %v247_v28 = vrot.slane %v9849_v61, 7  ;;  %v8700_v49 = vld [vmem:[#allocation5 + $0x248] ss:$16 sps:$4 sm:$0xff]   ;;  %v8705_v38 = vld [vmem:[#allocation5 + $0x2c] ss:$16 sps:$4 sm:$0xff]  }
  0xee   :  { %v9986_v20 = vpack.c.bf16 %v242_v2, %v234_v45 }
  0xef   :  { %2280 = vmatpush2.bf16.msra.mxu0 %v8643_v3  ;;  %v248_v45 = vsel %vm218_vm0, %v239_v54, %v247_v28  ;;  %v8693_v3 = vld [vmem:[#allocation5 + $0x6c] ss:$16 sps:$4 sm:$0xff]   ;;  %v8691_v54 = vld [vmem:[#allocation5 + $0x68] ss:$16 sps:$4 sm:$0xff]  }
  0xf0   :  { %2343 = vmatpush2.bf16.msra.mxu1 %v8646_v60  ;;  %2281 = vmatprep.subr.bf16.mxu0 %v8651_v0  ;;  %v243_v60 = vrot.slane %v9823_v39, 7  ;;  %v8667_v0 = vld [vmem:[#allocation5 + $0xe8] ss:$16 sps:$4 sm:$0xff]  }
  0xf1   :  { %2344 = vmatprep.subr.bf16.mxu1 %v8654_v5  ;;  %v8675_v5 = vld [vmem:[#allocation5 + $0xcc] ss:$16 sps:$4 sm:$0xff]  }
  0xf2   :  { %v244_v6 = vsel %vm218_vm0, %v235_v42, %v243_v60 }
  0xf3   :  { %2282 = vmatpush2.bf16.msra.mxu0 %v8649_v10  ;;  %v9981_v10 = vadd.s32 32, %v9877_v26 }
  0xf4   :  { %2345 = vmatpush2.bf16.msra.mxu1 %v8652_v16  ;;  %2283 = vmatprep.subr.bf16.mxu0 %v8657_v18  ;;  %v9984_v16 = vadd.s32 40, %v9877_v26  ;;  %v8678_v18 = vld [vmem:[#allocation5 + $0x2cc] ss:$16 sps:$4 sm:$0xff]  }
  0xf5   :  { %2346 = vmatprep.subr.bf16.mxu1 %v8660_v11  ;;  %v249_v11 = vrot.slane %v9837_v56, 7  ;;  %v8673_v56 = vld [vmem:[#allocation5 + $0xc8] ss:$16 sps:$4 sm:$0xff]   ;;  %v148_v59 = vand.u32 7, %v9981_v10 }
  0xf7   :  { %2284 = vmatpush2.bf16.msra.mxu0 %v8655_v23  ;;  %v253_v23 = vrot.slane %v9841_v58, 7  ;;  %v236_v58 = vsel %vm218_vm0, %v227_v25, %v235_v42  ;;  %v255_v25 = vrot.slane %v9851_v62, 7  ;;  %v250_v62 = vsel %vm218_vm0, %v241_v8, %v249_v11  ;;  %v8685_v8 = vld [vmem:[#allocation5 + $0x88] ss:$16 sps:$4 sm:$0xff]  }
  0xf8   :  { %2347 = vmatpush2.bf16.msra.mxu1 %v8658_v24  ;;  %2285 = vmatprep.subr.bf16.mxu0 %v8663_v53  ;;  %v11233_v24 = vmov 0  ;;  %v10003_v53 = vpack.c.bf16 %v246_v43, %v238_v47  ;;  %v10030_v61 = vpack.c.bf16 %v244_v6, %v236_v58  ;;  %vm8362_vm8 = vcmp.ne.s32.totalorder %v148_v59, 0  ;;  %v8696_v47 = vld [vmem:[#allocation5 + $0x26c] ss:$16 sps:$4 sm:$0xff]   ;;  %v8694_v43 = vld [vmem:[#allocation5 + $0x268] ss:$16 sps:$4 sm:$0xff]  }
  0xf9   :  { %2348 = vmatprep.subr.bf16.mxu1 %v8666_v27  ;;  %v11234_v24 = vsel %vm9999_vm6, 4294967295, %v11233_v24  ;;  %v155_v27 = vand.u32 7, %v9984_v16  ;;  %v254_v1 = vsel %vm218_vm0, %v245_v13, %v253_v23  ;;  %v262_v30 = vsel %vm218_vm0, %v253_v23, %v261_v4  ;;  %v8688_v13 = vld [vmem:[#allocation5 + $0x288] ss:$16 sps:$4 sm:$0xff]   ;;  %v8711_v4 = vld [vmem:[#allocation5 + $0xc] ss:$16 sps:$4 sm:$0xff]  }
  0xfa   :  { %11235 = vst [vmem:[#allocation17_spill] sm:$0xff] %v11234_v24  ;;  %v10046_v33 = vpack.c.bf16 %v262_v30, %v254_v1  ;;  %v11236_v42 = vmov 0  ;;  %v256_v2 = vsel %vm218_vm0, %v247_v28, %v255_v25  ;;  %v8706_v23 = vld [vmem:[#allocation5 + $0x228] ss:$16 sps:$4 sm:$0xff]   ;;  %v8717_v6 = vld [vmem:[#allocation5 + $0x1ec] ss:$16 sps:$4 sm:$0xff]  }
  0xfb   :  { %2286 = vmatpush2.bf16.msra.mxu0 %v8661_v40  ;;  %v8684_v40 = vld [vmem:[#allocation5 + $0x2ac] ss:$16 sps:$4 sm:$0xff]   ;;  %vm8361_vm7 = vcmp.ne.s32.totalorder %v155_v27, 0  ;;  %v10072_v36 = vpack.c.bf16 %v256_v2, %v248_v45  ;;  %v8712_v58 = vld [vmem:[#allocation5 + $0x208] ss:$16 sps:$4 sm:$0xff]   ;;  %vm10252_vm2 = vcmp.ne.s32.totalorder %v155_v27, 7 }
  0xfc   :  { %2349 = vmatpush2.bf16.msra.mxu1 %v8664_v41  ;;  %2381 = vmatprep.subr.bf16.mxu0 %v8669_v51  ;;  %v251_v41 = vrot.slane %v9853_v63, 7  ;;  %v8682_v51 = vld [vmem:[#allocation5 + $0x2a8] ss:$16 sps:$4 sm:$0xff]   ;;  %v258_v63 = vsel %vm218_vm0, %v249_v11, %v257_v22  ;;  %vm10054_vm9 = vmpackc.low %vm8361_vm7, %vm8362_vm8  ;;  %v8708_v11 = vld [vmem:[#allocation5 + $0x22c] ss:$16 sps:$4 sm:$0xff]   ;;  %vm10258_vm4 = vcmp.ne.s32.totalorder %v148_v59, 7 }
  0xfd   :  { %2444 = vmatprep.subr.bf16.mxu1 %v8672_v48  ;;  %v10044_v48 = vpack.c.bf16 %v258_v63, %v250_v62  ;;  %v11237_v42 = vsel %vm10054_vm9, 4294967295, %v11236_v42  ;;  %v8703_v22 = vld [vmem:[#allocation5 + $0x28] ss:$16 sps:$4 sm:$0xff]   ;;  %v8723_v28 = vld [vmem:[#allocation5 + $0x1cc] ss:$16 sps:$4 sm:$0xff]   ;;  %vm10292_vm5 = vmpackc.low %vm10252_vm2, %vm10258_vm4 }
  0xfe   :  { %7374 = vmatmul.mubr.msk.bf16.vlgmr.msra.gmra.mxu0 %vm9918_vm3, %v9954_v32  ;;  %11238 = vst [vmem:[#allocation18_spill] sm:$0xff] %v11237_v42  ;;  %v8721_v25 = vld [vmem:[#allocation5 + $0x1c8] ss:$16 sps:$4 sm:$0xff]   ;;  %v8735_v63 = vld [vmem:[#allocation5 + $0x18c] ss:$16 sps:$4 sm:$0xff]  }
  0xff   :  { %7404 = vmatmul.mubr.msk.bf16.vlgmr.msra.gmra.mxu1 %vm9918_vm3, %v9971_v35  ;;  %2382 = vmatpush1.bf16.msra.mxu0 %v8667_v0  ;;  %v252_v0 = vsel %vm218_vm0, %v243_v60, %v251_v41  ;;  %v8699_v60 = vld [vmem:[#allocation5 + $0x4c] ss:$16 sps:$4 sm:$0xff]   ;;  %v8730_v62 = vld [vmem:[#allocation5 + $0x3a8] ss:$16 sps:$4 sm:$0xff]  }
 0x100   :  { %2445 = vmatpush1.bf16.msra.mxu1 %v8670_v37  ;;  %2383 = vmatprep.subr.bf16.mxu0 %v8675_v5  ;;  %v260_v37 = vsel %vm218_vm0, %v251_v41, %v259_v34  ;;  %v8702_v5 = vld [vmem:[#allocation5 + $0x24c] ss:$16 sps:$4 sm:$0xff]   ;;  %v8724_v41 = vld [vmem:[#allocation5 + $0x3c8] ss:$16 sps:$4 sm:$0xff]  }
 0x101   :  { %2446 = vmatprep.subr.bf16.mxu1 %v8678_v18  ;;  %7379 = vmatprep.mubr.msk.bf16.mxu0 %vm9999_vm6, %v9986_v20  ;;  %v10074_v39 = vpack.c.bf16 %v260_v37, %v252_v0  ;;  %v8697_v18 = vld [vmem:[#allocation5 + $0x48] ss:$16 sps:$4 sm:$0xff]   ;;  %v8729_v34 = vld [vmem:[#allocation5 + $0x1ac] ss:$16 sps:$4 sm:$0xff]  }
 0x102   :  { %7409 = vmatprep.mubr.msk.bf16.mxu1 %vm9999_vm6, %v10003_v53  ;;  %v8738_v1 = vld [vmem:[#allocation5 + $0x38c] ss:$16 sps:$4 sm:$0xff]   ;;  %v8733_v30 = vld [vmem:[#allocation5 + $0x188] ss:$16 sps:$4 sm:$0xff]  }
 0x103   :  { %2384 = vmatpush1.bf16.msra.mxu0 %v8673_v56  ;;  %v8714_v56 = vld [vmem:[#allocation5 + $0x20c] ss:$16 sps:$4 sm:$0xff]   ;;  %v8742_v45 = vld [vmem:[#allocation5 + $0x368] ss:$16 sps:$4 sm:$0xff]  }
 0x104   :  { %2447 = vmatpush1.bf16.msra.mxu1 %v8676_v57  ;;  %2385 = vmatprep.subr.bf16.mxu0 %v8681_v7  ;;  %v8709_v57 = vld [vmem:[#allocation5 + $0x8] ss:$16 sps:$4 sm:$0xff]   ;;  %v8747_v2 = vld [vmem:[#allocation5 + $0x14c] ss:$16 sps:$4 sm:$0xff]  }
 0x105   :  { %2448 = vmatprep.subr.bf16.mxu1 %v8684_v40  ;;  %v8715_v7 = vld [vmem:[#allocation5 + $0x1e8] ss:$16 sps:$4 sm:$0xff]   ;;  %v8726_v40 = vld [vmem:[#allocation5 + $0x3cc] ss:$16 sps:$4 sm:$0xff]  }
 0x106   :  { %7384 = vmatmul.mubr.msk.bf16.gmra.mxu0 %vm9999_vm6, %v10019_v12  ;;  %v8745_v0 = vld [vmem:[#allocation5 + $0x148] ss:$16 sps:$4 sm:$0xff]  }
 0x107   :  { %7414 = vmatmul.mubr.msk.bf16.gmra.mxu1 %vm9999_vm6, %v10030_v61  ;;  %2386 = vmatpush1.bf16.msra.mxu0 %v8679_v44  ;;  %v8732_v44 = vld [vmem:[#allocation5 + $0x3ac] ss:$16 sps:$4 sm:$0xff]   ;;  %v8748_v37 = vld [vmem:[#allocation5 + $0x348] ss:$16 sps:$4 sm:$0xff]  }
 0x108   :  { %2449 = vmatpush1.bf16.msra.mxu1 %v8682_v51  ;;  %2387 = vmatprep.subr.bf16.mxu0 %v8687_v52  ;;  %v8727_v51 = vld [vmem:[#allocation5 + $0x1a8] ss:$16 sps:$4 sm:$0xff]  }
 0x109   :  { %2450 = vmatprep.subr.bf16.mxu1 %v8690_v31  ;;  %7389 = vmatprep.mubr.msk.bf16.mxu0 %vm10054_vm9, %v10044_v48  ;;  %v8736_v52 = vld [vmem:[#allocation5 + $0x388] ss:$16 sps:$4 sm:$0xff]   ;;  %v8741_v31 = vld [vmem:[#allocation5 + $0x16c] ss:$16 sps:$4 sm:$0xff]  }
 0x10a   :  { %7419 = vmatprep.mubr.msk.bf16.mxu1 %vm10054_vm9, %v10046_v33  ;;  %v9002_v42 = vld [vmem:[#allocation8 + $0x504] ss:$16 sps:$4 sm:$0xff]  }
 0x10b   :  { %2388 = vmatpush1.bf16.msra.mxu0 %v8685_v8  ;;  %v8744_v8 = vld [vmem:[#allocation5 + $0x36c] ss:$16 sps:$4 sm:$0xff]   ;;  %v9065_v24 = vld [vmem:[#allocation8 + $0x7a4] ss:$16 sps:$4 sm:$0xff]  }
 0x10c   :  { %2451 = vmatpush1.bf16.msra.mxu1 %v8688_v13  ;;  %2389 = vmatprep.subr.bf16.mxu0 %v8693_v3  ;;  %v8739_v13 = vld [vmem:[#allocation5 + $0x168] ss:$16 sps:$4 sm:$0xff]   ;;  %v8750_v3 = vld [vmem:[#allocation5 + $0x34c] ss:$16 sps:$4 sm:$0xff]  }
 0x10d   :  { %2452 = vmatprep.subr.bf16.mxu1 %v8696_v47  ;;  %v8753_v47 = vld [vmem:[#allocation5 + $0x12c] ss:$16 sps:$4 sm:$0xff]  }
 0x10e   :  { %7394 = vmatmul.mubr.msk.bf16.gmra.mxu0 %vm10054_vm9, %v10072_v36 }
 0x10f   :  { %7424 = vmatmul.mubr.msk.bf16.gmra.mxu1 %vm10054_vm9, %v10074_v39  ;;  %2390 = vmatpush1.bf16.msra.mxu0 %v8691_v54  ;;  %v8756_v54 = vld [vmem:[#allocation5 + $0x32c] ss:$16 sps:$4 sm:$0xff]  }
 0x110   :  { %2453 = vmatpush1.bf16.msra.mxu1 %v8694_v43  ;;  %2391 = vmatprep.subr.bf16.mxu0 %v8699_v60  ;;  %v8751_v43 = vld [vmem:[#allocation5 + $0x128] ss:$16 sps:$4 sm:$0xff]  }
 0x111   :  { %2454 = vmatprep.subr.bf16.mxu1 %v8702_v5  ;;  %7429 = vmatprep.mubr.msk.bf16.mxu0 %vm9918_vm3, %v9910_v14  ;;  %v8720_v14 = vld [vmem:[#allocation5 + $0x3ec] ss:$16 sps:$4 sm:$0xff]   ;;  %v8754_v60 = vld [vmem:[#allocation5 + $0x328] ss:$16 sps:$4 sm:$0xff]  }
 0x112   :  { %7459 = vmatprep.mubr.msk.bf16.mxu1 %vm9918_vm3, %v9912_v15  ;;  %v8718_v15 = vld [vmem:[#allocation5 + $0x3e8] ss:$16 sps:$4 sm:$0xff]   ;;  %v8759_v5 = vld [vmem:[#allocation5 + $0x10c] ss:$16 sps:$4 sm:$0xff]  }
 0x113   :  { %2392 = vmatpush1.bf16.msra.mxu0 %v8697_v18  ;;  %v8762_v18 = vld [vmem:[#allocation5 + $0x30c] ss:$16 sps:$4 sm:$0xff]  }
 0x114   :  { %2455 = vmatpush1.bf16.msra.mxu1 %v8700_v49  ;;  %2393 = vmatprep.subr.bf16.mxu0 %v8705_v38  ;;  %v8757_v49 = vld [vmem:[#allocation5 + $0x108] ss:$16 sps:$4 sm:$0xff]  }
 0x115   :  { %2456 = vmatprep.subr.bf16.mxu1 %v8708_v11  ;;  %v8760_v38 = vld [vmem:[#allocation5 + $0x308] ss:$16 sps:$4 sm:$0xff]   ;;  %v8765_v11 = vld [vmem:[#allocation5 + $0x8e4] ss:$16 sps:$4 sm:$0xff]  }
 0x117   :  { %2394 = vmatpush1.bf16.msra.mxu0 %v8703_v22  ;;  %v8768_v22 = vld [vmem:[#allocation5 + $0xae4] ss:$16 sps:$4 sm:$0xff]  }
 0x118   :  { %2457 = vmatpush1.bf16.msra.mxu1 %v8706_v23  ;;  %2395 = vmatprep.subr.bf16.mxu0 %v8711_v4  ;;  %v8763_v23 = vld [vmem:[#allocation5 + $0x8e0] ss:$16 sps:$4 sm:$0xff]  }
 0x119   :  { %2458 = vmatprep.subr.bf16.mxu1 %v8714_v56  ;;  %v8766_v4 = vld [vmem:[#allocation5 + $0xae0] ss:$16 sps:$4 sm:$0xff]   ;;  %v8771_v56 = vld [vmem:[#allocation5 + $0x8c4] ss:$16 sps:$4 sm:$0xff]  }
 0x11b   :  { %2396 = vmatpush1.bf16.msra.mxu0 %v8709_v57  ;;  %v8774_v57 = vld [vmem:[#allocation5 + $0xac4] ss:$16 sps:$4 sm:$0xff]  }
 0x11c   :  { %2459 = vmatpush1.bf16.msra.mxu1 %v8712_v58  ;;  %2397 = vmatprep.subr.bf16.mxu0 %v8717_v6 }
 0x11d   :  { %2460 = vmatprep.subr.bf16.mxu1 %v8720_v14  ;;  %v8769_v14 = vld [vmem:[#allocation5 + $0x8c0] ss:$16 sps:$4 sm:$0xff]  }
 0x11f   :  { %2398 = vmatpush2.bf16.msra.mxu0 %v8715_v7 }
 0x120   :  { %2461 = vmatpush2.bf16.msra.mxu1 %v8718_v15  ;;  %2399 = vmatprep.subr.bf16.mxu0 %v8723_v28  ;;  %v8772_v15 = vld [vmem:[#allocation5 + $0xac0] ss:$16 sps:$4 sm:$0xff]   ;;  %v8777_v28 = vld [vmem:[#allocation5 + $0x8a4] ss:$16 sps:$4 sm:$0xff]  }
 0x121   :  { %2462 = vmatprep.subr.bf16.mxu1 %v8726_v40 }
 0x123   :  { %2400 = vmatpush2.bf16.msra.mxu0 %v8721_v25 }
 0x124   :  { %2463 = vmatpush2.bf16.msra.mxu1 %v8724_v41  ;;  %2401 = vmatprep.subr.bf16.mxu0 %v8729_v34  ;;  %v8780_v41 = vld [vmem:[#allocation5 + $0xaa4] ss:$16 sps:$4 sm:$0xff]  }
 0x125   :  { %2464 = vmatprep.subr.bf16.mxu1 %v8732_v44  ;;  %v8775_v44 = vld [vmem:[#allocation5 + $0x8a0] ss:$16 sps:$4 sm:$0xff]  }
 0x127   :  { %2402 = vmatpush2.bf16.msra.mxu0 %v8727_v51  ;;  %v8778_v51 = vld [vmem:[#allocation5 + $0xaa0] ss:$16 sps:$4 sm:$0xff]  }
 0x128   :  { %2465 = vmatpush2.bf16.msra.mxu1 %v8730_v62  ;;  %2403 = vmatprep.subr.bf16.mxu0 %v8735_v63  ;;  %v8783_v63 = vld [vmem:[#allocation5 + $0x884] ss:$16 sps:$4 sm:$0xff]  }
 0x129   :  { %2466 = vmatprep.subr.bf16.mxu1 %v8738_v1 }
 0x12b   :  { %2404 = vmatpush2.bf16.msra.mxu0 %v8733_v30 }
 0x12c   :  { %2467 = vmatpush2.bf16.msra.mxu1 %v8736_v52  ;;  %2405 = vmatprep.subr.bf16.mxu0 %v8741_v31  ;;  %v8786_v52 = vld [vmem:[#allocation5 + $0xa84] ss:$16 sps:$4 sm:$0xff]   ;;  %v9532_v31 = vld [vmem:[#allocation2 + $0x28] sm:$0xff] }
 0x12d   :  { %2468 = vmatprep.subr.bf16.mxu1 %v8744_v8  ;;  %v338_v8 = vrot.slane %v9532_v31, 1  ;;  %v8816_v31 = vld [vmem:[#allocation5 + $0xbe4] ss:$16 sps:$4 sm:$0xff]  }
 0x12f   :  { %2406 = vmatpush2.bf16.msra.mxu0 %v8739_v13  ;;  %v9533_v13 = vld [vmem:[#allocation2 + $0x18] sm:$0xff] }
 0x130   :  { %2469 = vmatpush2.bf16.msra.mxu1 %v8742_v45  ;;  %2407 = vmatprep.subr.bf16.mxu0 %v8747_v2  ;;  %v343_v45 = vrot.slane %v9533_v13, 1  ;;  %v9534_v2 = vld [vmem:[#allocation2 + $0x38] sm:$0xff] }
 0x131   :  { %2470 = vmatprep.subr.bf16.mxu1 %v8750_v3  ;;  %v344_v3 = vrot.slane %v9534_v2, 1  ;;  %v8811_v2 = vld [vmem:[#allocation5 + $0x9e0] ss:$16 sps:$4 sm:$0xff]  }
 0x133   :  { %2408 = vmatpush2.bf16.msra.mxu0 %v8745_v0  ;;  %v10118_v0 = vld [vmem:[#allocation2 + $0x48] sm:$0xff] }
 0x134   :  { %2471 = vmatpush2.bf16.msra.mxu1 %v8748_v37  ;;  %2409 = vmatprep.subr.bf16.mxu0 %v8753_v47  ;;  %v348_v46 = vrot.slane %v10118_v0, 1  ;;  %v10121_v37 = vld [vmem:[#allocation2 + $0x58] sm:$0xff] }
 0x135   :  { %2472 = vmatprep.subr.bf16.mxu1 %v8756_v54  ;;  %v352_v47 = vrot.slane %v10121_v37, 1  ;;  %v8789_v54 = vld [vmem:[#allocation5 + $0x864] ss:$16 sps:$4 sm:$0xff]   ;;  %v8879_v0 = vld [vmem:[#allocation5 + $0x88c] ss:$16 sps:$4 sm:$0xff]  }
 0x137   :  { %2410 = vmatpush2.bf16.msra.mxu0 %v8751_v43  ;;  %v8792_v43 = vld [vmem:[#allocation5 + $0xa64] ss:$16 sps:$4 sm:$0xff]  }
 0x138   :  { %2473 = vmatpush2.bf16.msra.mxu1 %v8754_v60  ;;  %2411 = vmatprep.subr.bf16.mxu0 %v8759_v5  ;;  %v11243_v60 = vmov 0  ;;  %v8795_v5 = vld [vmem:[#allocation5 + $0x844] ss:$16 sps:$4 sm:$0xff]  }
 0x139   :  { %2474 = vmatprep.subr.bf16.mxu1 %v8762_v18  ;;  %v11244_v60 = vsel %vm10134_vm12, 4294967295, %v11243_v60  ;;  %v8798_v18 = vld [vmem:[#allocation5 + $0xa44] ss:$16 sps:$4 sm:$0xff]  }
 0x13a   :  { %11245 = vst [vmem:[#allocation19_spill] sm:$0xff] %v11244_v60  ;;  %v9059_v60 = vld [vmem:[#allocation8 + $0x7c4] ss:$16 sps:$4 sm:$0xff]  }
 0x13b   :  { %2412 = vmatpush2.bf16.msra.mxu0 %v8757_v49 }
 0x13c   :  { %2475 = vmatpush2.bf16.msra.mxu1 %v8760_v38  ;;  %3288 = vmatprep.subr.bf16.mxu0 %v8765_v11  ;;  %v349_v38 = vsel %vm333_vm13, %v338_v8, %v348_v46  ;;  %v345_v11 = vsel %vm333_vm13, %v343_v45, %v344_v3 }
 0x13d   :  { %3351 = vmatprep.subr.bf16.mxu1 %v8768_v22 }
 0x13e   :  { %v1397_v58 = vpop.f32.mrf.mxu0  ;;  %7434 = vmatmul.mubr.msk.bf16.vlgmr.msra.gmra.mxu0 %vm9918_vm3, %v9954_v32 }
 0x13f   :  { %v1460_v6 = vpop.f32.mrf.mxu1  ;;  %7464 = vmatmul.mubr.msk.bf16.vlgmr.msra.gmra.mxu1 %vm9918_vm3, %v9971_v35  ;;  %3289 = vmatpush1.bf16.msra.mxu0 %v8763_v23 }
 0x140   :  { %v10094_v7 = vadd.f32 %v1460_v6, %v1397_v58  ;;  %3352 = vmatpush1.bf16.msra.mxu1 %v8766_v4  ;;  %v1399_v40 = vpop.f32.mrf.mxu0  ;;  %3290 = vmatprep.subr.bf16.mxu0 %v8771_v56  ;;  %v8796_v4 = vld [vmem:[#allocation5 + $0xa40] ss:$16 sps:$4 sm:$0xff]   ;;  %v8801_v6 = vld [vmem:[#allocation5 + $0x824] ss:$16 sps:$4 sm:$0xff]  }
 0x141   :  { %v1462_v25 = vpop.f32.mrf.mxu1  ;;  %3353 = vmatprep.subr.bf16.mxu1 %v8774_v57  ;;  %7439 = vmatprep.mubr.msk.bf16.mxu0 %vm9999_vm6, %v9986_v20 }
 0x142   :  { %v10096_v34 = vadd.f32 %v1462_v25, %v1399_v40  ;;  %7469 = vmatprep.mubr.msk.bf16.mxu1 %vm9999_vm6, %v10003_v53  ;;  %v1401_v32 = vpop.f32.mrf.mxu0  ;;  %v9531_v53 = vld [vmem:[#allocation2 + $0x8] sm:$0xff] }
 0x143   :  { %v1464_v35 = vpop.f32.mrf.mxu1  ;;  %3291 = vmatpush1.bf16.msra.mxu0 %v8769_v14  ;;  %v337_v30 = vrot.slane %v9531_v53, 1  ;;  %v8804_v14 = vld [vmem:[#allocation5 + $0xa24] ss:$16 sps:$4 sm:$0xff]   ;;  %v8805_v53 = vld [vmem:[#allocation5 + $0x800] ss:$16 sps:$4 sm:$0xff]  }
 0x144   :  { %v10104_v62 = vadd.f32 %v1464_v35, %v1401_v32  ;;  %3354 = vmatpush1.bf16.msra.mxu1 %v8772_v15  ;;  %3292 = vmatprep.subr.bf16.mxu0 %v8777_v28  ;;  %v10152_v22 = vpop.f32.mrf.mxu0  ;;  %v8802_v32 = vld [vmem:[#allocation5 + $0xa20] ss:$16 sps:$4 sm:$0xff]  }
 0x145   :  { %3355 = vmatprep.subr.bf16.mxu1 %v8780_v41  ;;  %v339_v49 = vsel %vm333_vm13, %v337_v30, %v338_v8  ;;  %v10154_v23 = vpop.f32.mrf.mxu1  ;;  %v8799_v41 = vld [vmem:[#allocation5 + $0x820] ss:$16 sps:$4 sm:$0xff]  }
 0x146   :  { %7444 = vmatmul.mubr.msk.bf16.gmra.mxu0 %vm9999_vm6, %v10019_v12  ;;  %v8787_v12 = vld [vmem:[#allocation5 + $0x860] ss:$16 sps:$4 sm:$0xff]   ;;  %v1407_v56 = vpop.f32.mrf.mxu0  ;;  %v10156_v57 = vpack.c.bf16 %v349_v38, %v339_v49 }
 0x147   :  { %7474 = vmatmul.mubr.msk.bf16.gmra.mxu1 %vm9999_vm6, %v10030_v61  ;;  %3293 = vmatpush1.bf16.msra.mxu0 %v8775_v44  ;;  %v8790_v61 = vld [vmem:[#allocation5 + $0xa60] ss:$16 sps:$4 sm:$0xff]   ;;  %v1470_v15 = vpop.f32.mrf.mxu1  ;;  %v8810_v44 = vld [vmem:[#allocation5 + $0xa04] ss:$16 sps:$4 sm:$0xff]  }
 0x148   :  { %3356 = vmatpush1.bf16.msra.mxu1 %v8778_v51  ;;  %3294 = vmatprep.subr.bf16.mxu0 %v8783_v63  ;;  %v10166_v28 = vadd.f32 %v1470_v15, %v1407_v56  ;;  %v1409_v40 = vpop.f32.mrf.mxu0  ;;  %v8808_v30 = vld [vmem:[#allocation5 + $0xa00] ss:$16 sps:$4 sm:$0xff]   ;;  %v8831_v56 = vld [vmem:[#allocation5 + $0x984] ss:$16 sps:$4 sm:$0xff]  }
 0x149   :  { %3357 = vmatprep.subr.bf16.mxu1 %v8786_v52  ;;  %7449 = vmatprep.mubr.msk.bf16.mxu0 %vm10054_vm9, %v10044_v48  ;;  %v353_v48 = vsel %vm333_vm13, %v344_v3, %v352_v47  ;;  %v1472_v25 = vpop.f32.mrf.mxu1  ;;  %v8813_v52 = vld [vmem:[#allocation5 + $0x9e4] ss:$16 sps:$4 sm:$0xff]   ;;  %v8814_v3 = vld [vmem:[#allocation5 + $0xbe0] ss:$16 sps:$4 sm:$0xff]  }
 0x14a   :  { %7479 = vmatprep.mubr.msk.bf16.mxu1 %vm10054_vm9, %v10046_v33  ;;  %v8793_v33 = vld [vmem:[#allocation5 + $0x840] ss:$16 sps:$4 sm:$0xff]   ;;  %v10158_v58 = vpack.c.bf16 %v353_v48, %v345_v11  ;;  %v10168_v35 = vadd.f32 %v1472_v25, %v1409_v40  ;;  %v8825_v11 = vld [vmem:[#allocation5 + $0x9a4] ss:$16 sps:$4 sm:$0xff]  }
 0x14b   :  { %3295 = vmatpush1.bf16.msra.mxu0 %v8781_v29  ;;  %v1474_v51 = vpop.f32.mrf.mxu1  ;;  %v8817_v49 = vld [vmem:[#allocation5 + $0x9c0] ss:$16 sps:$4 sm:$0xff]   ;;  %v8828_v48 = vld [vmem:[#allocation5 + $0xba4] ss:$16 sps:$4 sm:$0xff]  }
 0x14c   :  { %3358 = vmatpush1.bf16.msra.mxu1 %v8784_v50  ;;  %3296 = vmatprep.subr.bf16.mxu0 %v8789_v54  ;;  %v8820_v38 = vld [vmem:[#allocation5 + $0xbc0] ss:$16 sps:$4 sm:$0xff]   ;;  %v8837_v40 = vld [vmem:[#allocation5 + $0x964] ss:$16 sps:$4 sm:$0xff]  }
 0x14d   :  { %3359 = vmatprep.subr.bf16.mxu1 %v8792_v43  ;;  %v10180_v20 = vpop.f32.mrf.mxu1  ;;  %v8819_v43 = vld [vmem:[#allocation5 + $0x9c4] ss:$16 sps:$4 sm:$0xff]   ;;  %v8832_v15 = vld [vmem:[#allocation5 + $0xb80] ss:$16 sps:$4 sm:$0xff]  }
 0x14e   :  { %7454 = vmatmul.mubr.msk.bf16.gmra.mxu0 %vm10054_vm9, %v10072_v36  ;;  %v1411_v36 = vpop.f32.mrf.mxu0  ;;  %v8840_v25 = vld [vmem:[#allocation5 + $0xb64] ss:$16 sps:$4 sm:$0xff]  }
 0x14f   :  { %7484 = vmatmul.mubr.msk.bf16.gmra.mxu1 %vm10054_vm9, %v10074_v39  ;;  %3297 = vmatpush1.bf16.msra.mxu0 %v8787_v12  ;;  %v8807_v39 = vld [vmem:[#allocation5 + $0x804] ss:$16 sps:$4 sm:$0xff]   ;;  %v10176_v63 = vadd.f32 %v1474_v51, %v1411_v36  ;;  %v1480_v13 = vpop.f32.mrf.mxu1  ;;  %v8844_v51 = vld [vmem:[#allocation5 + $0xb40] ss:$16 sps:$4 sm:$0xff]  }
 0x150   :  { %3360 = vmatpush1.bf16.msra.mxu1 %v8790_v61  ;;  %3298 = vmatprep.subr.bf16.mxu0 %v8795_v5  ;;  %v10178_v1 = vpop.f32.mrf.mxu0  ;;  %v8822_v12 = vld [vmem:[#allocation5 + $0xbc4] ss:$16 sps:$4 sm:$0xff]  }
 0x151   :  { %3361 = vmatprep.subr.bf16.mxu1 %v8798_v18  ;;  %7617 = vmatprep.mubr.msk.bf16.mxu0 %vm10134_vm12, %v10156_v57  ;;  %v1482_v50 = vpop.f32.mrf.mxu1  ;;  %v8843_v36 = vld [vmem:[#allocation5 + $0x944] ss:$16 sps:$4 sm:$0xff]  }
 0x152   :  { %7647 = vmatprep.mubr.msk.bf16.mxu1 %vm10134_vm12, %v10158_v58  ;;  %v1417_v8 = vpop.f32.mrf.mxu0 }
 0x153   :  { %3299 = vmatpush1.bf16.msra.mxu0 %v8793_v33  ;;  %v10182_v45 = vadd.f32 %v1480_v13, %v1417_v8  ;;  %v1484_v5 = vpop.f32.mrf.mxu1  ;;  %v8823_v33 = vld [vmem:[#allocation5 + $0x9a0] ss:$16 sps:$4 sm:$0xff]  }
 0x154   :  { %3362 = vmatpush1.bf16.msra.mxu1 %v8796_v4  ;;  %3300 = vmatprep.subr.bf16.mxu0 %v8801_v6  ;;  %v1419_v29 = vpop.f32.mrf.mxu0  ;;  %v8826_v4 = vld [vmem:[#allocation5 + $0xba0] ss:$16 sps:$4 sm:$0xff]   ;;  %v8834_v6 = vld [vmem:[#allocation5 + $0xb84] ss:$16 sps:$4 sm:$0xff]  }
 0x155   :  { %3363 = vmatprep.subr.bf16.mxu1 %v8804_v14  ;;  %v10184_v54 = vadd.f32 %v1482_v50, %v1419_v29  ;;  %v8829_v14 = vld [vmem:[#allocation5 + $0x980] ss:$16 sps:$4 sm:$0xff]  }
 0x156   :  { %v1421_v61 = vpop.f32.mrf.mxu0  ;;  %v9538_v8 = vld [vmem:[#allocation2 + $0x20] sm:$0xff]  ;;  %v9539_v29 = vld [vmem:[#allocation2 + $0x10] sm:$0xff] }
 0x157   :  { %3301 = vmatpush1.bf16.msra.mxu0 %v8799_v41  ;;  %v10186_v18 = vadd.f32 %v1484_v5, %v1421_v61  ;;  %v8835_v41 = vld [vmem:[#allocation5 + $0x960] ss:$16 sps:$4 sm:$0xff]   ;;  %v335_v13 = vrot.slane %v9538_v8, 1  ;;  %v340_v50 = vrot.slane %v9539_v29, 1 }
 0x158   :  { %3364 = vmatpush1.bf16.msra.mxu1 %v8802_v32  ;;  %3302 = vmatprep.subr.bf16.mxu0 %v8807_v39  ;;  %v8838_v32 = vld [vmem:[#allocation5 + $0xb60] ss:$16 sps:$4 sm:$0xff]   ;;  %v8846_v39 = vld [vmem:[#allocation5 + $0xb44] ss:$16 sps:$4 sm:$0xff]   ;;  %v10262_v37 = vpop.f32.mrf.mxu0 }
 0x159   :  { %3365 = vmatprep.subr.bf16.mxu1 %v8810_v44  ;;  %v8841_v44 = vld [vmem:[#allocation5 + $0x940] ss:$16 sps:$4 sm:$0xff]  }
 0x15a   :  { %v10188_v61 = vld [vmem:[#allocation2 + $0x40] sm:$0xff] }
 0x15b   :  { %3303 = vmatpush1.bf16.msra.mxu0 %v8805_v53  ;;  %v8849_v53 = vld [vmem:[#allocation5 + $0x924] ss:$16 sps:$4 sm:$0xff]   ;;  %v346_v5 = vrot.slane %v10188_v61, 1 }
 0x15c   :  { %3366 = vmatpush1.bf16.msra.mxu1 %v8808_v30  ;;  %3304 = vmatprep.subr.bf16.mxu0 %v8813_v52  ;;  %v8852_v30 = vld [vmem:[#allocation5 + $0xb24] ss:$16 sps:$4 sm:$0xff]  }
 0x15d   :  { %3367 = vmatprep.subr.bf16.mxu1 %v8816_v31  ;;  %v9537_v52 = vld [vmem:[#allocation2] sm:$0xff]  ;;  %v347_v19 = vsel %vm333_vm13, %v335_v13, %v346_v5 }
 0x15e   :  { %v334_v31 = vrot.slane %v9537_v52, 1 }
 0x15f   :  { %3305 = vmatpush2.bf16.msra.mxu0 %v8811_v2  ;;  %v9540_v2 = vld [vmem:[#allocation2 + $0x30] sm:$0xff] }
 0x160   :  { %3368 = vmatpush2.bf16.msra.mxu1 %v8814_v3  ;;  %3306 = vmatprep.subr.bf16.mxu0 %v8819_v43  ;;  %v341_v3 = vrot.slane %v9540_v2, 1  ;;  %v8847_v43 = vld [vmem:[#allocation5 + $0x920] ss:$16 sps:$4 sm:$0xff]  }
 0x161   :  { %3369 = vmatprep.subr.bf16.mxu1 %v8822_v12  ;;  %v8850_v12 = vld [vmem:[#allocation5 + $0xb20] ss:$16 sps:$4 sm:$0xff]  }
 0x163   :  { %3307 = vmatpush2.bf16.msra.mxu0 %v8817_v49  ;;  %v10191_v49 = vld [vmem:[#allocation2 + $0x50] sm:$0xff] }
 0x164   :  { %3370 = vmatpush2.bf16.msra.mxu1 %v8820_v38  ;;  %3308 = vmatprep.subr.bf16.mxu0 %v8825_v11  ;;  %v350_v38 = vrot.slane %v10191_v49, 1  ;;  %v8855_v11 = vld [vmem:[#allocation5 + $0x904] ss:$16 sps:$4 sm:$0xff]  }
 0x165   :  { %3371 = vmatprep.subr.bf16.mxu1 %v8828_v48  ;;  %v8858_v48 = vld [vmem:[#allocation5 + $0xb04] ss:$16 sps:$4 sm:$0xff]  }
 0x166   :  { %v351_v55 = vsel %vm333_vm13, %v341_v3, %v350_v38 }
 0x167   :  { %3309 = vmatpush2.bf16.msra.mxu0 %v8823_v33 }
 0x168   :  { %3372 = vmatpush2.bf16.msra.mxu1 %v8826_v4  ;;  %3310 = vmatprep.subr.bf16.mxu0 %v8831_v56  ;;  %v336_v56 = vsel %vm333_vm13, %v334_v31, %v335_v13  ;;  %v9548_v31 = vld [vmem:[#allocation2 + $0x70] sm:$0xff]  ;;  %v10228_v13 = vld [vmem:[#allocation2 + $0x80] sm:$0xff]  ;;  %v8867_v4 = vld [vmem:[#allocation5 + $0x8cc] ss:$16 sps:$4 sm:$0xff]  }
 0x169   :  { %3373 = vmatprep.subr.bf16.mxu1 %v8834_v6  ;;  %v342_v6 = vsel %vm333_vm13, %v340_v50, %v341_v3  ;;  %v358_v8 = vrot.slane %v9548_v31, 1  ;;  %v362_v29 = vrot.slane %v10228_v13, 1  ;;  %v10231_v50 = vld [vmem:[#allocation2 + $0x90] sm:$0xff]  ;;  %v10234_v3 = vpack.c.bf16 %v347_v19, %v336_v56  ;;  %v8876_v19 = vld [vmem:[#allocation5 + $0xaac] ss:$16 sps:$4 sm:$0xff]  }
 0x16a   :  { %v366_v2 = vrot.slane %v10231_v50, 1  ;;  %v10236_v33 = vpack.c.bf16 %v351_v55, %v342_v6  ;;  %v8865_v6 = vld [vmem:[#allocation5 + $0x8c8] ss:$16 sps:$4 sm:$0xff]  }
 0x16b   :  { %3311 = vmatpush2.bf16.msra.mxu0 %v8829_v14  ;;  %v9543_v14 = vld [vmem:[#allocation2 + $0x68] sm:$0xff]  ;;  %v359_v61 = vsel %vm333_vm13, %v350_v38, %v358_v8 }
 0x16c   :  { %3374 = vmatpush2.bf16.msra.mxu1 %v8832_v15  ;;  %3312 = vmatprep.subr.bf16.mxu0 %v8837_v40  ;;  %v356_v15 = vrot.slane %v9543_v14, 1  ;;  %v9544_v40 = vld [vmem:[#allocation2 + $0x78] sm:$0xff]  ;;  %v9551_v55 = vld [vmem:[#allocation2 + $0xa8] sm:$0xff] }
 0x16d   :  { %3375 = vmatprep.subr.bf16.mxu1 %v8840_v25  ;;  %v360_v21 = vrot.slane %v9544_v40, 1  ;;  %v8856_v25 = vld [vmem:[#allocation5 + $0xb00] ss:$16 sps:$4 sm:$0xff]   ;;  %v8870_v14 = vld [vmem:[#allocation5 + $0xacc] ss:$16 sps:$4 sm:$0xff]  }
 0x16e   :  { %v8886_v50 = vld [vmem:[#allocation5 + $0xa68] ss:$16 sps:$4 sm:$0xff]  }
 0x16f   :  { %3313 = vmatpush2.bf16.msra.mxu0 %v8835_v41  ;;  %v10214_v41 = vld [vmem:[#allocation2 + $0x88] sm:$0xff]  ;;  %v361_v40 = vsel %vm333_vm13, %v352_v47, %v360_v21  ;;  %v10264_v47 = vpop.f32.mrf.mxu1 }
 0x170   :  { %3376 = vmatpush2.bf16.msra.mxu1 %v8838_v32  ;;  %3314 = vmatprep.subr.bf16.mxu0 %v8843_v36  ;;  %v364_v32 = vrot.slane %v10214_v41, 1  ;;  %v10217_v36 = vld [vmem:[#allocation2 + $0x98] sm:$0xff] }
 0x171   :  { %3377 = vmatprep.subr.bf16.mxu1 %v8846_v39  ;;  %v368_v39 = vrot.slane %v10217_v36, 1  ;;  %v8877_v41 = vld [vmem:[#allocation5 + $0x888] ss:$16 sps:$4 sm:$0xff]  }
 0x173   :  { %3315 = vmatpush2.bf16.msra.mxu0 %v8841_v44  ;;  %v8861_v44 = vld [vmem:[#allocation5 + $0x8ec] ss:$16 sps:$4 sm:$0xff]   ;;  %v369_v56 = vsel %vm333_vm13, %v360_v21, %v368_v39 }
 0x174   :  { %3378 = vmatpush2.bf16.msra.mxu1 %v8844_v51  ;;  %3316 = vmatprep.subr.bf16.mxu0 %v8849_v53  ;;  %v8864_v51 = vld [vmem:[#allocation5 + $0xaec] ss:$16 sps:$4 sm:$0xff]   ;;  %v11250_v53 = vmov 0  ;;  %v10268_v16 = vpack.c.bf16 %v369_v56, %v361_v40  ;;  %v9553_v40 = vld [vmem:[#allocation2 + $0xa0] sm:$0xff] }
 0x175   :  { %3379 = vmatprep.subr.bf16.mxu1 %v8852_v30  ;;  %v11251_v53 = vsel %vm10224_vm1, 4294967295, %v11250_v53  ;;  %v9547_v30 = vld [vmem:[#allocation2 + $0x60] sm:$0xff]  ;;  %v370_v56 = vrot.slane %v9553_v40, 1 }
 0x176   :  { %11252 = vst [vmem:[#allocation20_spill] sm:$0xff] %v11251_v53  ;;  %v354_v52 = vrot.slane %v9547_v30, 1  ;;  %v9552_v30 = vld [vmem:[#allocation2 + $0xb8] sm:$0xff] }
 0x177   :  { %3317 = vmatpush2.bf16.msra.mxu0 %v8847_v43  ;;  %v8859_v43 = vld [vmem:[#allocation5 + $0x8e8] ss:$16 sps:$4 sm:$0xff]   ;;  %v376_v49 = vrot.slane %v9552_v30, 1 }
 0x178   :  { %3380 = vmatpush2.bf16.msra.mxu1 %v8850_v12  ;;  %3318 = vmatprep.subr.bf16.mxu0 %v8855_v11  ;;  %v8862_v12 = vld [vmem:[#allocation5 + $0xae8] ss:$16 sps:$4 sm:$0xff]   ;;  %v357_v11 = vsel %vm333_vm13, %v348_v46, %v356_v15  ;;  %v355_v10 = vsel %vm333_vm13, %v346_v5, %v354_v52  ;;  %v363_v59 = vsel %vm333_vm13, %v354_v52, %v362_v29  ;;  %v8882_v46 = vld [vmem:[#allocation5 + $0xa8c] ss:$16 sps:$4 sm:$0xff]  }
 0x179   :  { %3381 = vmatprep.subr.bf16.mxu1 %v8858_v48  ;;  %v365_v48 = vsel %vm333_vm13, %v356_v15, %v364_v32  ;;  %v8868_v15 = vld [vmem:[#allocation5 + $0xac8] ss:$16 sps:$4 sm:$0xff]   ;;  %v367_v5 = vsel %vm333_vm13, %v358_v8, %v366_v2 }
 0x17a   :  { %v10266_v21 = vpack.c.bf16 %v365_v48, %v357_v11  ;;  %v10306_v11 = vpack.c.bf16 %v363_v59, %v355_v10  ;;  %v10308_v48 = vpack.c.bf16 %v367_v5, %v359_v61  ;;  %v377_v10 = vsel %vm333_vm13, %v368_v39, %v376_v49  ;;  %v9554_v5 = vld [vmem:[#allocation2 + $0xb0] sm:$0xff]  ;;  %v8999_v53 = vld [vmem:[#allocation8 + $0x524] ss:$16 sps:$4 sm:$0xff]  }
 0x17b   :  { %3319 = vmatpush2.bf16.msra.mxu0 %v8853_v9  ;;  %v405_v59 = vsel %vm333_vm13, %v376_v49, 0.0  ;;  %v371_v39 = vsel %vm333_vm13, %v362_v29, %v370_v56  ;;  %v402_v49 = vsel %vm333_vm13, %v370_v56, 0.0 }
 0x17c   :  { %3382 = vmatpush2.bf16.msra.mxu1 %v8856_v25  ;;  %3414 = vmatprep.subr.bf16.mxu0 %v8861_v44  ;;  %v8873_v25 = vld [vmem:[#allocation5 + $0x8ac] ss:$16 sps:$4 sm:$0xff]   ;;  %v372_v44 = vrot.slane %v9551_v55, 1  ;;  %v374_v55 = vrot.slane %v9554_v5, 1  ;;  %v10326_v36 = vpack.c.bf16 %v405_v59, %v377_v10  ;;  %v8889_v5 = vld [vmem:[#allocation5 + $0x848] ss:$16 sps:$4 sm:$0xff]  }
 0x17d   :  { %3477 = vmatprep.subr.bf16.mxu1 %v8864_v51  ;;  %v11257_v51 = vmov 0 }
 0x17e   :  { %v1523_v27 = vpop.f32.mrf.mxu0  ;;  %7622 = vmatmul.mubr.msk.bf16.vlgmr.msra.gmra.mxu0 %vm10134_vm12, %v10234_v3  ;;  %v11258_v51 = vsel %vm10292_vm5, 4294967295, %v11257_v51  ;;  %v404_v40 = vsel %vm333_vm13, %v374_v55, 0.0 }
 0x17f   :  { %v1586_v9 = vpop.f32.mrf.mxu1  ;;  %7652 = vmatmul.mubr.msk.bf16.vlgmr.msra.gmra.mxu1 %vm10134_vm12, %v10236_v33  ;;  %11259 = vst [vmem:[#allocation21_spill] sm:$0xff] %v11258_v51  ;;  %3415 = vmatpush1.bf16.msra.mxu0 %v8859_v43  ;;  %v8871_v43 = vld [vmem:[#allocation5 + $0x8a8] ss:$16 sps:$4 sm:$0xff]  }
 0x180   :  { %v10296_v52 = vadd.f32 %v1586_v9, %v1523_v27  ;;  %3478 = vmatpush1.bf16.msra.mxu1 %v8862_v12  ;;  %v1525_v38 = vpop.f32.mrf.mxu0  ;;  %3416 = vmatprep.subr.bf16.mxu0 %v8867_v4  ;;  %v8874_v12 = vld [vmem:[#allocation5 + $0xaa8] ss:$16 sps:$4 sm:$0xff]   ;;  %v373_v27 = vsel %vm333_vm13, %v364_v32, %v372_v44  ;;  %v403_v9 = vsel %vm333_vm13, %v372_v44, 0.0 }
 0x181   :  { %v1588_v31 = vpop.f32.mrf.mxu1  ;;  %3479 = vmatprep.subr.bf16.mxu1 %v8870_v14  ;;  %7627 = vmatprep.mubr.msk.bf16.mxu0 %vm10224_vm1, %v10266_v21  ;;  %v8880_v32 = vld [vmem:[#allocation5 + $0xa88] ss:$16 sps:$4 sm:$0xff]   ;;  %v10324_v44 = vpack.c.bf16 %v403_v9, %v373_v27 }
 0x182   :  { %v10298_v8 = vadd.f32 %v1588_v31, %v1525_v38  ;;  %7657 = vmatprep.mubr.msk.bf16.mxu1 %vm10224_vm1, %v10268_v16  ;;  %v1527_v4 = vpop.f32.mrf.mxu0  ;;  %v375_v31 = vsel %vm333_vm13, %v366_v2, %v374_v55  ;;  %v10352_v2 = vpack.c.bf16 %v402_v49, %v371_v39  ;;  %v8892_v55 = vld [vmem:[#allocation5 + $0xa48] ss:$16 sps:$4 sm:$0xff]  }
 0x183   :  { %v1590_v14 = vpop.f32.mrf.mxu1  ;;  %3417 = vmatpush1.bf16.msra.mxu0 %v8865_v6  ;;  %v8885_v6 = vld [vmem:[#allocation5 + $0x86c] ss:$16 sps:$4 sm:$0xff]   ;;  %v10354_v56 = vpack.c.bf16 %v404_v40, %v375_v31  ;;  %v8895_v49 = vld [vmem:[#allocation5 + $0x828] ss:$16 sps:$4 sm:$0xff]  }
 0x184   :  { %v10318_v61 = vadd.f32 %v1590_v14, %v1527_v4  ;;  %3480 = vmatpush1.bf16.msra.mxu1 %v8868_v15  ;;  %v10320_v30 = vpop.f32.mrf.mxu0  ;;  %3418 = vmatprep.subr.bf16.mxu0 %v8873_v25  ;;  %v8888_v15 = vld [vmem:[#allocation5 + $0xa6c] ss:$16 sps:$4 sm:$0xff]   ;;  %v8898_v31 = vld [vmem:[#allocation5 + $0xa28] ss:$16 sps:$4 sm:$0xff]  }
 0x185   :  { %v10322_v38 = vpop.f32.mrf.mxu1  ;;  %3481 = vmatprep.subr.bf16.mxu1 %v8876_v19  ;;  %v8891_v14 = vld [vmem:[#allocation5 + $0x84c] ss:$16 sps:$4 sm:$0xff]   ;;  %v9053_v51 = vld [vmem:[#allocation8 + $0x7e4] ss:$16 sps:$4 sm:$0xff]  }
 0x186   :  { %7632 = vmatmul.mubr.msk.bf16.gmra.mxu0 %vm10224_vm1, %v10306_v11  ;;  %v1533_v25 = vpop.f32.mrf.mxu0 }
 0x187   :  { %7662 = vmatmul.mubr.msk.bf16.gmra.mxu1 %vm10224_vm1, %v10308_v48  ;;  %v1596_v19 = vpop.f32.mrf.mxu1  ;;  %3419 = vmatpush1.bf16.msra.mxu0 %v8871_v43  ;;  %v8883_v43 = vld [vmem:[#allocation5 + $0x868] ss:$16 sps:$4 sm:$0xff]  }
 0x188   :  { %3482 = vmatpush1.bf16.msra.mxu1 %v8874_v12  ;;  %v10342_v4 = vadd.f32 %v1596_v19, %v1533_v25  ;;  %3420 = vmatprep.subr.bf16.mxu0 %v8879_v0  ;;  %v1535_v13 = vpop.f32.mrf.mxu0  ;;  %v8894_v0 = vld [vmem:[#allocation5 + $0xa4c] ss:$16 sps:$4 sm:$0xff]  }
 0x189   :  { %3483 = vmatprep.subr.bf16.mxu1 %v8882_v46  ;;  %v1598_v29 = vpop.f32.mrf.mxu1  ;;  %7637 = vmatprep.mubr.msk.bf16.mxu0 %vm10292_vm5, %v10324_v44 }
 0x18a   :  { %7667 = vmatprep.mubr.msk.bf16.mxu1 %vm10292_vm5, %v10326_v36  ;;  %v10350_v12 = vadd.f32 %v1598_v29, %v1535_v13  ;;  %v1537_v46 = vpop.f32.mrf.mxu0  ;;  %v8903_v13 = vld [vmem:[#allocation5 + $0x80c] ss:$16 sps:$4 sm:$0xff]  }
 0x18b   :  { %v1600_v27 = vpop.f32.mrf.mxu1  ;;  %3421 = vmatpush1.bf16.msra.mxu0 %v8877_v41  ;;  %v8897_v41 = vld [vmem:[#allocation5 + $0x82c] ss:$16 sps:$4 sm:$0xff]  }
 0x18c   :  { %3484 = vmatpush1.bf16.msra.mxu1 %v8880_v32  ;;  %v10356_v9 = vadd.f32 %v1600_v27, %v1537_v46  ;;  %3422 = vmatprep.subr.bf16.mxu0 %v8885_v6  ;;  %v10358_v10 = vpop.f32.mrf.mxu0  ;;  %v8900_v32 = vld [vmem:[#allocation5 + $0xa2c] ss:$16 sps:$4 sm:$0xff]   ;;  %v8904_v46 = vld [vmem:[#allocation5 + $0xa08] ss:$16 sps:$4 sm:$0xff]  }
 0x18d   :  { %3485 = vmatprep.subr.bf16.mxu1 %v8888_v15  ;;  %v10360_v59 = vpop.f32.mrf.mxu1  ;;  %v8906_v29 = vld [vmem:[#allocation5 + $0xa0c] ss:$16 sps:$4 sm:$0xff]  }
 0x18e   :  { %7642 = vmatmul.mubr.msk.bf16.gmra.mxu0 %vm10292_vm5, %v10352_v2  ;;  %v1543_v39 = vpop.f32.mrf.mxu0  ;;  %v8912_v27 = vld [vmem:[#allocation5 + $0xbec] ss:$16 sps:$4 sm:$0xff]  }
 0x18f   :  { %7672 = vmatmul.mubr.msk.bf16.gmra.mxu1 %vm10292_vm5, %v10354_v56  ;;  %v1606_v25 = vpop.f32.mrf.mxu1  ;;  %3423 = vmatpush1.bf16.msra.mxu0 %v8883_v43 }
 0x190   :  { %3486 = vmatpush1.bf16.msra.mxu1 %v8886_v50  ;;  %v10368_v6 = vadd.f32 %v1606_v25, %v1543_v39  ;;  %3424 = vmatprep.subr.bf16.mxu0 %v8891_v14  ;;  %v1545_v15 = vpop.f32.mrf.mxu0  ;;  %v8910_v39 = vld [vmem:[#allocation5 + $0xbe8] ss:$16 sps:$4 sm:$0xff]  }
 0x191   :  { %3487 = vmatprep.subr.bf16.mxu1 %v8894_v0  ;;  %v1608_v19 = vpop.f32.mrf.mxu1  ;;  %7677 = vmatprep.mubr.msk.bf16.mxu0 %vm10134_vm12, %v10156_v57  ;;  %v8901_v0 = vld [vmem:[#allocation5 + $0x808] ss:$16 sps:$4 sm:$0xff]   ;;  %v8909_v57 = vld [vmem:[#allocation5 + $0x9ec] ss:$16 sps:$4 sm:$0xff]  }
 0x192   :  { %v10370_v40 = vadd.f32 %v1608_v19, %v1545_v15  ;;  %7707 = vmatprep.mubr.msk.bf16.mxu1 %vm10134_vm12, %v10158_v58  ;;  %v1547_v43 = vpop.f32.mrf.mxu0  ;;  %v8907_v58 = vld [vmem:[#allocation5 + $0x9e8] ss:$16 sps:$4 sm:$0xff]  }
 0x193   :  { %v1610_v50 = vpop.f32.mrf.mxu1  ;;  %3425 = vmatpush1.bf16.msra.mxu0 %v8889_v5  ;;  %v8915_v5 = vld [vmem:[#allocation5 + $0x9cc] ss:$16 sps:$4 sm:$0xff]   ;;  %v8913_v25 = vld [vmem:[#allocation5 + $0x9c8] ss:$16 sps:$4 sm:$0xff]  }
 0x194   :  { %3488 = vmatpush1.bf16.msra.mxu1 %v8892_v55  ;;  %v10378_v14 = vadd.f32 %v1610_v50, %v1547_v43  ;;  %3426 = vmatprep.subr.bf16.mxu0 %v8897_v41  ;;  %v8918_v55 = vld [vmem:[#allocation5 + $0xbcc] ss:$16 sps:$4 sm:$0xff]   ;;  %v8916_v15 = vld [vmem:[#allocation5 + $0xbc8] ss:$16 sps:$4 sm:$0xff]  }
 0x195   :  { %3489 = vmatprep.subr.bf16.mxu1 %v8900_v32  ;;  %v8921_v41 = vld [vmem:[#allocation5 + $0x9ac] ss:$16 sps:$4 sm:$0xff]   ;;  %v8919_v19 = vld [vmem:[#allocation5 + $0x9a8] ss:$16 sps:$4 sm:$0xff]  }
 0x196   :  { %v8924_v32 = vld [vmem:[#allocation5 + $0xbac] ss:$16 sps:$4 sm:$0xff]   ;;  %v8928_v43 = vld [vmem:[#allocation5 + $0xb88] ss:$16 sps:$4 sm:$0xff]  }
 0x197   :  { %3427 = vmatpush1.bf16.msra.mxu0 %v8895_v49  ;;  %v8922_v49 = vld [vmem:[#allocation5 + $0xba8] ss:$16 sps:$4 sm:$0xff]   ;;  %v8933_v50 = vld [vmem:[#allocation5 + $0x96c] ss:$16 sps:$4 sm:$0xff]  }
 0x198   :  { %3490 = vmatpush1.bf16.msra.mxu1 %v8898_v31  ;;  %3428 = vmatprep.subr.bf16.mxu0 %v8903_v13  ;;  %v8927_v31 = vld [vmem:[#allocation5 + $0x98c] ss:$16 sps:$4 sm:$0xff]  }
 0x199   :  { %3491 = vmatprep.subr.bf16.mxu1 %v8906_v29  ;;  %v8930_v13 = vld [vmem:[#allocation5 + $0xb8c] ss:$16 sps:$4 sm:$0xff]   ;;  %v8925_v29 = vld [vmem:[#allocation5 + $0x988] ss:$16 sps:$4 sm:$0xff]  }
 0x19b   :  { %3429 = vmatpush1.bf16.msra.mxu0 %v8901_v0  ;;  %v8936_v0 = vld [vmem:[#allocation5 + $0xb6c] ss:$16 sps:$4 sm:$0xff]  }
 0x19c   :  { %3492 = vmatpush1.bf16.msra.mxu1 %v8904_v46  ;;  %3430 = vmatprep.subr.bf16.mxu0 %v8909_v57  ;;  %v8931_v46 = vld [vmem:[#allocation5 + $0x968] ss:$16 sps:$4 sm:$0xff]  }
 0x19d   :  { %3493 = vmatprep.subr.bf16.mxu1 %v8912_v27  ;;  %v8934_v57 = vld [vmem:[#allocation5 + $0xb68] ss:$16 sps:$4 sm:$0xff]   ;;  %v8939_v27 = vld [vmem:[#allocation5 + $0x94c] ss:$16 sps:$4 sm:$0xff]  }
 0x19f   :  { %3431 = vmatpush2.bf16.msra.mxu0 %v8907_v58  ;;  %v8942_v58 = vld [vmem:[#allocation5 + $0xb4c] ss:$16 sps:$4 sm:$0xff]  }
 0x1a0   :  { %3494 = vmatpush2.bf16.msra.mxu1 %v8910_v39  ;;  %3432 = vmatprep.subr.bf16.mxu0 %v8915_v5  ;;  %v8937_v39 = vld [vmem:[#allocation5 + $0x948] ss:$16 sps:$4 sm:$0xff]  }
 0x1a1   :  { %3495 = vmatprep.subr.bf16.mxu1 %v8918_v55  ;;  %v8940_v5 = vld [vmem:[#allocation5 + $0xb48] ss:$16 sps:$4 sm:$0xff]   ;;  %v8945_v55 = vld [vmem:[#allocation5 + $0x92c] ss:$16 sps:$4 sm:$0xff]  }
 0x1a3   :  { %3433 = vmatpush2.bf16.msra.mxu0 %v8913_v25  ;;  %v8948_v25 = vld [vmem:[#allocation5 + $0xb2c] ss:$16 sps:$4 sm:$0xff]  }
 0x1a4   :  { %3496 = vmatpush2.bf16.msra.mxu1 %v8916_v15  ;;  %3434 = vmatprep.subr.bf16.mxu0 %v8921_v41  ;;  %v8943_v15 = vld [vmem:[#allocation5 + $0x928] ss:$16 sps:$4 sm:$0xff]  }
 0x1a5   :  { %3497 = vmatprep.subr.bf16.mxu1 %v8924_v32  ;;  %v8946_v41 = vld [vmem:[#allocation5 + $0xb28] ss:$16 sps:$4 sm:$0xff]   ;;  %v8951_v32 = vld [vmem:[#allocation5 + $0x90c] ss:$16 sps:$4 sm:$0xff]  }
 0x1a7   :  { %3435 = vmatpush2.bf16.msra.mxu0 %v8919_v19  ;;  %v8954_v19 = vld [vmem:[#allocation5 + $0xb0c] ss:$16 sps:$4 sm:$0xff]  }
 0x1a8   :  { %3498 = vmatpush2.bf16.msra.mxu1 %v8922_v49  ;;  %3436 = vmatprep.subr.bf16.mxu0 %v8927_v31  ;;  %v8949_v49 = vld [vmem:[#allocation5 + $0x908] ss:$16 sps:$4 sm:$0xff]  }
 0x1a9   :  { %3499 = vmatprep.subr.bf16.mxu1 %v8930_v13  ;;  %v8952_v31 = vld [vmem:[#allocation5 + $0xb08] ss:$16 sps:$4 sm:$0xff]  }
 0x1aa   :  { %v8957_v13 = vld [vmem:[#allocation8 + $0x4e4] ss:$16 sps:$4 sm:$0xff]  }
 0x1ab   :  { %3437 = vmatpush2.bf16.msra.mxu0 %v8925_v29  ;;  %v8955_v29 = vld [vmem:[#allocation8 + $0x4e0] ss:$16 sps:$4 sm:$0xff]  }
 0x1ac   :  { %3500 = vmatpush2.bf16.msra.mxu1 %v8928_v43  ;;  %3438 = vmatprep.subr.bf16.mxu0 %v8933_v50  ;;  %v8960_v43 = vld [vmem:[#allocation8 + $0x4c4] ss:$16 sps:$4 sm:$0xff]   ;;  %v8958_v50 = vld [vmem:[#allocation8 + $0x4c0] ss:$16 sps:$4 sm:$0xff]  }
 0x1ad   :  { %3501 = vmatprep.subr.bf16.mxu1 %v8936_v0  ;;  %v8963_v0 = vld [vmem:[#allocation8 + $0x4a4] ss:$16 sps:$4 sm:$0xff]  }
 0x1af   :  { %3439 = vmatpush2.bf16.msra.mxu0 %v8931_v46  ;;  %v8961_v46 = vld [vmem:[#allocation8 + $0x4a0] ss:$16 sps:$4 sm:$0xff]  }
 0x1b0   :  { %3502 = vmatpush2.bf16.msra.mxu1 %v8934_v57  ;;  %3440 = vmatprep.subr.bf16.mxu0 %v8939_v27  ;;  %v8966_v57 = vld [vmem:[#allocation8 + $0x484] ss:$16 sps:$4 sm:$0xff]  }
 0x1b1   :  { %3503 = vmatprep.subr.bf16.mxu1 %v8942_v58  ;;  %v9005_v27 = vld [vmem:[#allocation8 + $0x6e4] ss:$16 sps:$4 sm:$0xff]  }
 0x1b2   :  { %v8975_v58 = vld [vmem:[#allocation8 + $0x424] ss:$16 sps:$4 sm:$0xff]  }
 0x1b3   :  { %3441 = vmatpush2.bf16.msra.mxu0 %v8937_v39  ;;  %v9003_v39 = vld [vmem:[#allocation8 + $0x6e0] ss:$16 sps:$4 sm:$0xff]  }
 0x1b4   :  { %3504 = vmatpush2.bf16.msra.mxu1 %v8940_v5  ;;  %3442 = vmatprep.subr.bf16.mxu0 %v8945_v55 }
 0x1b5   :  { %3505 = vmatprep.subr.bf16.mxu1 %v8948_v25  ;;  %v9011_v25 = vld [vmem:[#allocation8 + $0x6c4] ss:$16 sps:$4 sm:$0xff]  }
 0x1b7   :  { %3443 = vmatpush2.bf16.msra.mxu0 %v8943_v15 }
 0x1b8   :  { %3506 = vmatpush2.bf16.msra.mxu1 %v8946_v41  ;;  %3444 = vmatprep.subr.bf16.mxu0 %v8951_v32  ;;  %v9009_v41 = vld [vmem:[#allocation8 + $0x6c0] ss:$16 sps:$4 sm:$0xff]  }
 0x1b9   :  { %3507 = vmatprep.subr.bf16.mxu1 %v8954_v19  ;;  %v8976_v19 = vld [vmem:[#allocation8 + $0x400] ss:$16 sps:$4 sm:$0xff]  }
 0x1bb   :  { %3445 = vmatpush2.bf16.msra.mxu0 %v8949_v49  ;;  %v8981_v49 = vld [vmem:[#allocation8 + $0x5e4] ss:$16 sps:$4 sm:$0xff]  }
 0x1bc   :  { %3508 = vmatpush2.bf16.msra.mxu1 %v8952_v31  ;;  %4771 = vmatprep.subr.bf16.mxu0 %v8957_v13  ;;  %v9017_v31 = vld [vmem:[#allocation8 + $0x6a4] ss:$16 sps:$4 sm:$0xff]  }
 0x1bd   :  { %4834 = vmatprep.subr.bf16.mxu1 %v9005_v27  ;;  %v9029_v27 = vld [vmem:[#allocation8 + $0x664] ss:$16 sps:$4 sm:$0xff]  }
 0x1be   :  { %7682 = vmatmul.mubr.msk.bf16.vlgmr.msra.gmra.mxu0 %vm10134_vm12, %v10234_v3  ;;  %v8964_v3 = vld [vmem:[#allocation8 + $0x480] ss:$16 sps:$4 sm:$0xff]  }
 0x1bf   :  { %7712 = vmatmul.mubr.msk.bf16.vlgmr.msra.gmra.mxu1 %vm10134_vm12, %v10236_v33  ;;  %7687 = vmatprep.mubr.msk.bf16.mxu0 %vm10224_vm1, %v10266_v21  ;;  %v8969_v33 = vld [vmem:[#allocation8 + $0x464] ss:$16 sps:$4 sm:$0xff]   ;;  %v8967_v21 = vld [vmem:[#allocation8 + $0x460] ss:$16 sps:$4 sm:$0xff]  }
 0x1c0   :  { %7717 = vmatprep.mubr.msk.bf16.mxu1 %vm10224_vm1, %v10268_v16  ;;  %4772 = vmatpush1.bf16.msra.mxu0 %v8955_v29  ;;  %v8972_v16 = vld [vmem:[#allocation8 + $0x444] ss:$16 sps:$4 sm:$0xff]   ;;  %v9015_v29 = vld [vmem:[#allocation8 + $0x6a0] ss:$16 sps:$4 sm:$0xff]  }
 0x1c1   :  { %4773 = vmatprep.subr.bf16.mxu0 %v8960_v43  ;;  %4835 = vmatpush1.bf16.msra.mxu1 %v9003_v39 }
 0x1c2   :  { %4836 = vmatprep.subr.bf16.mxu1 %v9011_v25  ;;  %v9033_v25 = vld [vmem:[#allocation8 + $0x640] ss:$16 sps:$4 sm:$0xff]  }
 0x1c4   :  { %4774 = vmatpush1.bf16.msra.mxu0 %v8958_v50  ;;  %v8979_v50 = vld [vmem:[#allocation8 + $0x5e0] ss:$16 sps:$4 sm:$0xff]  }
 0x1c5   :  { %4775 = vmatprep.subr.bf16.mxu0 %v8963_v0  ;;  %4837 = vmatpush1.bf16.msra.mxu1 %v9009_v41  ;;  %v8984_v0 = vld [vmem:[#allocation8 + $0x5c4] ss:$16 sps:$4 sm:$0xff]  }
 0x1c6   :  { %7692 = vmatmul.mubr.msk.bf16.gmra.mxu0 %vm10224_vm1, %v10306_v11  ;;  %v10404_v11 = vpop.f32.mrf.mxu0  ;;  %4838 = vmatprep.subr.bf16.mxu1 %v9017_v31  ;;  %v9035_v41 = vld [vmem:[#allocation8 + $0x644] ss:$16 sps:$4 sm:$0xff]  }
 0x1c7   :  { %7722 = vmatmul.mubr.msk.bf16.gmra.mxu1 %vm10224_vm1, %v10308_v48  ;;  %7697 = vmatprep.mubr.msk.bf16.mxu0 %vm10292_vm5, %v10324_v44  ;;  %v10412_v48 = vpop.f32.mrf.mxu1 }
 0x1c8   :  { %7727 = vmatprep.mubr.msk.bf16.mxu1 %vm10292_vm5, %v10326_v36  ;;  %4776 = vmatpush1.bf16.msra.mxu0 %v8961_v46  ;;  %v10414_v44 = vpop.f32.mrf.mxu0  ;;  %v8970_v36 = vld [vmem:[#allocation8 + $0x440] ss:$16 sps:$4 sm:$0xff]   ;;  %v9023_v46 = vld [vmem:[#allocation8 + $0x684] ss:$16 sps:$4 sm:$0xff]  }
 0x1c9   :  { %4777 = vmatprep.subr.bf16.mxu0 %v8966_v57  ;;  %v10416_v5 = vpop.f32.mrf.mxu1  ;;  %4839 = vmatpush1.bf16.msra.mxu1 %v9015_v29  ;;  %v8988_v29 = vld [vmem:[#allocation8 + $0x580] ss:$16 sps:$4 sm:$0xff]  }
 0x1ca   :  { %v10418_v55 = vpop.f32.mrf.mxu0  ;;  %4840 = vmatprep.subr.bf16.mxu1 %v9023_v46  ;;  %v8993_v46 = vld [vmem:[#allocation8 + $0x564] ss:$16 sps:$4 sm:$0xff]  }
 0x1cb   :  { %v10420_v15 = vpop.f32.mrf.mxu1 }
 0x1cc   :  { %4778 = vmatpush1.bf16.msra.mxu0 %v8964_v3  ;;  %v10422_v32 = vpop.f32.mrf.mxu0  ;;  %v9021_v3 = vld [vmem:[#allocation8 + $0x680] ss:$16 sps:$4 sm:$0xff]  }
 0x1cd   :  { %4779 = vmatprep.subr.bf16.mxu0 %v8969_v33  ;;  %v10424_v13 = vpop.f32.mrf.mxu1  ;;  %4841 = vmatpush1.bf16.msra.mxu1 %v9021_v3 }
 0x1ce   :  { %7702 = vmatmul.mubr.msk.bf16.gmra.mxu0 %vm10292_vm5, %v10352_v2  ;;  %v8973_v2 = vld [vmem:[#allocation8 + $0x420] ss:$16 sps:$4 sm:$0xff]   ;;  %v10426_v43 = vpop.f32.mrf.mxu0  ;;  %4842 = vmatprep.subr.bf16.mxu1 %v9029_v27 }
 0x1cf   :  { %7732 = vmatmul.mubr.msk.bf16.gmra.mxu1 %vm10292_vm5, %v10354_v56  ;;  %v8978_v56 = vld [vmem:[#allocation8 + $0x404] ss:$16 sps:$4 sm:$0xff]   ;;  %v10428_v57 = vpop.f32.mrf.mxu1  ;;  %v9045_v27 = vld [vmem:[#allocation8 + $0x600] ss:$16 sps:$4 sm:$0xff]  }
 0x1d0   :  { %4780 = vmatpush1.bf16.msra.mxu0 %v8967_v21  ;;  %v10430_v33 = vpop.f32.mrf.mxu0 }
 0x1d1   :  { %4781 = vmatprep.subr.bf16.mxu0 %v8972_v16  ;;  %v10432_v21 = vpop.f32.mrf.mxu1  ;;  %v8982_v16 = vld [vmem:[#allocation8 + $0x5c0] ss:$16 sps:$4 sm:$0xff]  }
 0x1d2   :  { %11260 = vst [vmem:[#allocation22_spill] sm:$0xff] %v10432_v21  ;;  %v10434_v39 = vpop.f32.mrf.mxu0 }
 0x1d4   :  { %4782 = vmatpush1.bf16.msra.mxu0 %v8970_v36  ;;  %v9027_v36 = vld [vmem:[#allocation8 + $0x660] ss:$16 sps:$4 sm:$0xff]  }
 0x1d5   :  { %4783 = vmatprep.subr.bf16.mxu0 %v8975_v58  ;;  %v8987_v58 = vld [vmem:[#allocation8 + $0x5a4] ss:$16 sps:$4 sm:$0xff]   ;;  %4843 = vmatpush1.bf16.msra.mxu1 %v9027_v36  ;;  %v8991_v36 = vld [vmem:[#allocation8 + $0x560] ss:$16 sps:$4 sm:$0xff]  }
 0x1d6   :  { %4844 = vmatprep.subr.bf16.mxu1 %v9035_v41  ;;  %v8996_v41 = vld [vmem:[#allocation8 + $0x544] ss:$16 sps:$4 sm:$0xff]  }
 0x1d8   :  { %4784 = vmatpush1.bf16.msra.mxu0 %v8973_v2  ;;  %v10436_v2 = vpop.f32.mrf.mxu1 }
 0x1d9   :  { %4785 = vmatprep.subr.bf16.mxu0 %v8978_v56  ;;  %11261 = vst [vmem:[#allocation23_spill] sm:$0xff] %v10436_v2  ;;  %v8985_v56 = vld [vmem:[#allocation8 + $0x5a0] ss:$16 sps:$4 sm:$0xff]   ;;  %4845 = vmatpush1.bf16.msra.mxu1 %v9033_v25 }
 0x1da   :  { %v10440_v31 = vpop.f32.mrf.mxu1 }
 0x1db   :  { %11262 = vst [vmem:[#allocation24_spill] sm:$0xff] %v10440_v31 }
 0x1dc   :  { %4786 = vmatpush1.bf16.msra.mxu0 %v8976_v19  ;;  %v8990_v19 = vld [vmem:[#allocation8 + $0x584] ss:$16 sps:$4 sm:$0xff]  }
 0x1dd   :  { %4787 = vmatprep.subr.bf16.mxu0 %v8981_v49  ;;  %v10438_v49 = vpop.f32.mrf.mxu0 }
 0x1df   :  { %v10442_v3 = vpop.f32.mrf.mxu0 }
 0x1e0   :  { %4788 = vmatpush2.bf16.msra.mxu0 %v8979_v50  ;;  %v9039_v50 = vld [vmem:[#allocation8 + $0x620] ss:$16 sps:$4 sm:$0xff]  }
 0x1e1   :  { %4789 = vmatprep.subr.bf16.mxu0 %v8984_v0  ;;  %v9041_v0 = vld [vmem:[#allocation8 + $0x624] ss:$16 sps:$4 sm:$0xff]  }
 0x1e2   :  { %4846 = vmatprep.subr.bf16.mxu1 %v9041_v0  ;;  %v9051_v0 = vld [vmem:[#allocation8 + $0x7e0] ss:$16 sps:$4 sm:$0xff]  }
 0x1e3   :  { %4847 = vmatpush1.bf16.msra.mxu1 %v9039_v50 }
 0x1e4   :  { %4790 = vmatpush2.bf16.msra.mxu0 %v8982_v16  ;;  %v10444_v16 = vpop.f32.mrf.mxu1 }
 0x1e5   :  { %4791 = vmatprep.subr.bf16.mxu0 %v8987_v58  ;;  %11263 = vst [vmem:[#allocation25_spill] sm:$0xff] %v10444_v16  ;;  %v9047_v58 = vld [vmem:[#allocation8 + $0x604] ss:$16 sps:$4 sm:$0xff]  }
 0x1e6   :  { %4848 = vmatprep.subr.bf16.mxu1 %v9047_v58  ;;  %v10448_v25 = vpop.f32.mrf.mxu1  ;;  %v9057_v58 = vld [vmem:[#allocation8 + $0x7c0] ss:$16 sps:$4 sm:$0xff]   ;;  %v9077_v16 = vld [vmem:[#allocation8 + $0x764] ss:$16 sps:$4 sm:$0xff]  }
 0x1e7   :  { %11264 = vst [vmem:[#allocation26_spill] sm:$0xff] %v10448_v25  ;;  %4849 = vmatpush1.bf16.msra.mxu1 %v9045_v27 }
 0x1e8   :  { %4792 = vmatpush2.bf16.msra.mxu0 %v8985_v56  ;;  %v10446_v56 = vpop.f32.mrf.mxu0  ;;  %4850 = vmatprep.subr.bf16.mxu1 %v9053_v51  ;;  %v10452_v50 = vpop.f32.mrf.mxu1  ;;  %v9063_v51 = vld [vmem:[#allocation8 + $0x7a0] ss:$16 sps:$4 sm:$0xff]  }
 0x1e9   :  { %4793 = vmatprep.subr.bf16.mxu0 %v8990_v19  ;;  %v8994_v19 = vld [vmem:[#allocation8 + $0x540] ss:$16 sps:$4 sm:$0xff]   ;;  %11265 = vst [vmem:[#allocation27_spill] sm:$0xff] %v10452_v50 }
 0x1ea   :  { %v10456_v27 = vpop.f32.mrf.mxu1 }
 0x1eb   :  { %4851 = vmatpush2.bf16.msra.mxu1 %v9051_v0  ;;  %11266 = vst [vmem:[#allocation28_spill] sm:$0xff] %v10456_v27 }
 0x1ec   :  { %4794 = vmatpush2.bf16.msra.mxu0 %v8988_v29  ;;  %v10450_v29 = vpop.f32.mrf.mxu0  ;;  %4852 = vmatprep.subr.bf16.mxu1 %v9059_v60  ;;  %v10460_v0 = vpop.f32.mrf.mxu1  ;;  %v9071_v60 = vld [vmem:[#allocation8 + $0x784] ss:$16 sps:$4 sm:$0xff]  }
 0x1ed   :  { %4795 = vmatprep.subr.bf16.mxu0 %v8993_v46  ;;  %v8997_v46 = vld [vmem:[#allocation8 + $0x520] ss:$16 sps:$4 sm:$0xff]   ;;  %11267 = vst [vmem:[#allocation29_spill] sm:$0xff] %v10460_v0 }
 0x1ef   :  { %4853 = vmatpush2.bf16.msra.mxu1 %v9057_v58 }
 0x1f0   :  { %4796 = vmatpush2.bf16.msra.mxu0 %v8991_v36  ;;  %v10454_v36 = vpop.f32.mrf.mxu0  ;;  %4854 = vmatprep.subr.bf16.mxu1 %v9065_v24 }
 0x1f1   :  { %4797 = vmatprep.subr.bf16.mxu0 %v8996_v41  ;;  %v9000_v41 = vld [vmem:[#allocation8 + $0x500] ss:$16 sps:$4 sm:$0xff]  }
 0x1f3   :  { %4855 = vmatpush2.bf16.msra.mxu1 %v9063_v51  ;;  %v1593_v51 = vadd.f32 %v10322_v38, %v10320_v30 }
 0x1f4   :  { %4798 = vmatpush2.bf16.msra.mxu0 %v8994_v19  ;;  %v10458_v19 = vpop.f32.mrf.mxu0  ;;  %4856 = vmatprep.subr.bf16.mxu1 %v9071_v60 }
 0x1f5   :  { %4799 = vmatprep.subr.bf16.mxu0 %v8999_v53  ;;  %v9069_v53 = vld [vmem:[#allocation8 + $0x780] ss:$16 sps:$4 sm:$0xff]  }
 0x1f7   :  { %4857 = vmatpush2.bf16.msra.mxu1 %v9069_v53 }
 0x1f8   :  { %4800 = vmatpush2.bf16.msra.mxu0 %v8997_v46  ;;  %4858 = vmatprep.subr.bf16.mxu1 %v9077_v16  ;;  %v9089_v16 = vld [vmem:[#allocation8 + $0x724] ss:$16 sps:$4 sm:$0xff]  }
 0x1f9   :  { %4801 = vmatprep.subr.bf16.mxu0 %v9002_v42 }
 0x1fc   :  { %4802 = vmatpush2.bf16.msra.mxu0 %v9000_v41  ;;  %v9075_v41 = vld [vmem:[#allocation8 + $0x760] ss:$16 sps:$4 sm:$0xff]  }
 0x1fd   :  { %4897 = vmatprep.subr.bf16.mxu0 %v9008_v17  ;;  %4859 = vmatpush2.bf16.msra.mxu1 %v9075_v41  ;;  %v1603_v41 = vadd.f32 %v10360_v59, %v10358_v10 }
 0x1fe   :  { %v2415_v50 = vpop.f32.mrf.mxu0 }
 0x1ff   :  { %v2478_v25 = vpop.f32.mrf.mxu1  ;;  %v2416_v46 = vadd.f32 %v2415_v50, %v10296_v52 }
 0x200   :  { %v2417_v58 = vpop.f32.mrf.mxu0 }
 0x201   :  { %v2480_v27 = vpop.f32.mrf.mxu1  ;;  %v10463_v42 = vadd.f32 %v2478_v25, %v2416_v46  ;;  %v2418_v24 = vadd.f32 %v2417_v58, %v10298_v8  ;;  %v9083_v46 = vld [vmem:[#allocation8 + $0x744] ss:$16 sps:$4 sm:$0xff]  }
 0x202   :  { %v2419_v31 = vpop.f32.mrf.mxu0  ;;  %4860 = vmatprep.subr.bf16.mxu1 %v9083_v46  ;;  %v9093_v46 = vld [vmem:[#allocation8 + $0x700] ss:$16 sps:$4 sm:$0xff]  }
 0x203   :  { %11268 = vst [vmem:[#allocation30_spill] sm:$0xff] %v10463_v42  ;;  %v2482_v0 = vpop.f32.mrf.mxu1  ;;  %v10468_v17 = vadd.f32 %v2480_v27, %v2418_v24  ;;  %v2420_v60 = vadd.f32 %v2419_v31, %v10318_v61  ;;  %v9081_v42 = vld [vmem:[#allocation8 + $0x740] ss:$16 sps:$4 sm:$0xff]  }
 0x204   :  { %v2421_v52 = vpop.f32.mrf.mxu0  ;;  %4861 = vmatpush2.bf16.msra.mxu1 %v9081_v42  ;;  %v9087_v24 = vld [vmem:[#allocation8 + $0x720] ss:$16 sps:$4 sm:$0xff]  }
 0x205   :  { %v2484_v50 = vpop.f32.mrf.mxu1  ;;  %v10471_v53 = vadd.f32 %v2482_v0, %v2420_v60  ;;  %v2422_v25 = vadd.f32 %v2421_v52, %v1593_v51  ;;  %4862 = vmatprep.subr.bf16.mxu1 %v9089_v16 }
 0x206   :  { %v2425_v8 = vpop.f32.mrf.mxu0 }
 0x207   :  { %v2488_v58 = vpop.f32.mrf.mxu1  ;;  %v10473_v2 = vadd.f32 %v2484_v50, %v2422_v25  ;;  %v2426_v21 = vadd.f32 %v2425_v8, %v10342_v4 }
 0x208   :  { %v2427_v30 = vpop.f32.mrf.mxu0  ;;  %4863 = vmatpush2.bf16.msra.mxu1 %v9087_v24 }
 0x209   :  { %v2490_v38 = vpop.f32.mrf.mxu1  ;;  %v2428_v61 = vadd.f32 %v2427_v30, %v10350_v12  ;;  %v10477_v31 = vadd.f32 %v2488_v58, %v2426_v21  ;;  %v9095_v12 = vld [vmem:[#allocation8 + $0x704] ss:$16 sps:$4 sm:$0xff]  }
 0x20a   :  { %v2429_v27 = vpop.f32.mrf.mxu0  ;;  %4864 = vmatprep.subr.bf16.mxu1 %v9095_v12  ;;  %v11222_v12 = vsub.s32 1, %v9877_v26 }
 0x20b   :  { %v2492_v0 = vpop.f32.mrf.mxu1  ;;  %v2430_v51 = vadd.f32 %v2429_v27, %v10356_v9  ;;  %v10482_v60 = vadd.f32 %v2490_v38, %v2428_v61  ;;  %v9101_v38 = vld [vmem:[#allocation8 + $0x6ec] ss:$16 sps:$4 sm:$0xff]   ;;  %v1613_v27 = vadd.f32 %v10412_v48, %v10404_v11  ;;  %v2292_v11 = vadd.f32 %v10418_v55, %v10096_v34 }
 0x20c   :  { %v2431_v4 = vpop.f32.mrf.mxu0  ;;  %4865 = vmatpush2.bf16.msra.mxu1 %v9093_v46  ;;  %v10506_v48 = vld [vmem:[#allocation7] sm:$0xf]  ;;  %v1477_v34 = vadd.f32 %v10180_v20, %v10178_v1  ;;  %v2300_v1 = vadd.f32 %v10430_v33, %v10166_v28  ;;  %v2302_v20 = vadd.f32 %v10434_v39, %v10168_v35  ;;  %v2312_v28 = vadd.f32 %v10450_v29, %v10184_v54 }
 0x20d   :  { %v2494_v52 = vpop.f32.mrf.mxu1  ;;  %v2432_v42 = vadd.f32 %v2431_v4, %v1603_v41  ;;  %v10484_v50 = vadd.f32 %v2492_v0, %v2430_v51  ;;  %4960 = vmatprep.subr.bf16.mxu1 %v9101_v38  ;;  %v2355_v55 = vadd.f32 %v10420_v15, %v2292_v11  ;;  %v2314_v35 = vadd.f32 %v10454_v36, %v10186_v18  ;;  %v11272_v11 = vld [vmem:[#allocation25_spill] sm:$0xff]  ;;  %v11273_v18 = vld [vmem:[#allocation26_spill] sm:$0xff] }
 0x20e   :  { %v2435_v21 = vpop.f32.mrf.mxu0 }
 0x20f   :  { %v2498_v25 = vpop.f32.mrf.mxu1  ;;  %v2436_v8 = vadd.f32 %v2435_v21, %v10368_v6  ;;  %v10487_v58 = vadd.f32 %v2494_v52, %v2432_v42  ;;  %v11223_v42 = vsub.s32 0, %v9877_v26  ;;  %v1467_v21 = vadd.f32 %v10154_v23, %v10152_v22 }
 0x210   :  { %v2437_v10 = vpop.f32.mrf.mxu0 }
 0x211   :  { %v2500_v9 = vpop.f32.mrf.mxu1  ;;  %v2438_v59 = vadd.f32 %v2437_v10, %v10370_v40  ;;  %v10490_v30 = vadd.f32 %v2498_v25, %v2436_v8  ;;  %v2290_v40 = vadd.f32 %v10414_v44, %v10094_v7  ;;  %v10517_v44 = vrot.slane %v10506_v48, %v11223_v42 }
 0x212   :  { %v2439_v61 = vpop.f32.mrf.mxu0  ;;  %v2296_v22 = vadd.f32 %v10426_v43, %v1467_v21  ;;  %v2310_v43 = vadd.f32 %v10446_v56, %v10182_v45 }
 0x213   :  { %v2502_v16 = vpop.f32.mrf.mxu1  ;;  %v2440_v0 = vadd.f32 %v2439_v61, %v10378_v14  ;;  %v10495_v24 = vadd.f32 %v2500_v9, %v2438_v59  ;;  %v2294_v14 = vadd.f32 %v10422_v32, %v10104_v62  ;;  %v2353_v8 = vadd.f32 %v10416_v5, %v2290_v40 }
 0x214   :  { %v2441_v6 = vpop.f32.mrf.mxu0  ;;  %v1487_v62 = vadd.f32 %v10264_v47, %v10262_v37  ;;  %v10529_v59 = vrot.slane %v10506_v48, %v11222_v12  ;;  %v2304_v37 = vadd.f32 %v10438_v49, %v10176_v63  ;;  %v2306_v47 = vadd.f32 %v10442_v3, %v1477_v34 }
 0x215   :  { %v2504_v41 = vpop.f32.mrf.mxu1  ;;  %v2442_v51 = vadd.f32 %v2441_v6, %v1613_v27  ;;  %v10497_v4 = vadd.f32 %v2502_v16, %v2440_v0  ;;  %v2357_v5 = vadd.f32 %v10424_v13, %v2294_v14  ;;  %v2359_v27 = vadd.f32 %v10428_v57, %v2296_v22  ;;  %v11269_v0 = vld [vmem:[#allocation22_spill] sm:$0xff]  ;;  %v11271_v57 = vld [vmem:[#allocation24_spill] sm:$0xff] }
 0x216   :  { %v2316_v63 = vadd.f32 %v10458_v19, %v1487_v62  ;;  %v2363_v6 = vadd.f32 %v11269_v0, %v2300_v1  ;;  %v2367_v40 = vadd.f32 %v11271_v57, %v2304_v37  ;;  %v2369_v54 = vadd.f32 %v11272_v11, %v2306_v47 }
 0x217   :  { %v10499_v52 = vadd.f32 %v2504_v41, %v2442_v51  ;;  %v11270_v41 = vld [vmem:[#allocation23_spill] sm:$0xff]  ;;  %v2373_v36 = vadd.f32 %v11273_v18, %v2310_v43 }
 0x218   :  { %v2365_v51 = vadd.f32 %v11270_v41, %v2302_v20 }
 0x23e   :  { %v3322_v25 = vpop.f32.mrf.mxu0 }
 0x23f   :  { %v3385_v46 = vpop.f32.mrf.mxu1 }
 0x240   :  { %v3386_v7 = vadd.f32 %v3385_v46, %v3322_v25  ;;  %v3324_v23 = vpop.f32.mrf.mxu0  ;;  %v11274_v46 = vld [vmem:[#allocation27_spill] sm:$0xff] }
 0x241   :  { %v3387_v32 = vpop.f32.mrf.mxu1 }
 0x242   :  { %v3540_v10 = vadd.f32 %v3386_v7, %v2353_v8  ;;  %v3388_v9 = vadd.f32 %v3387_v32, %v3324_v23  ;;  %v3326_v15 = vpop.f32.mrf.mxu0  ;;  %v10557_v8 = vadd.f32 %v11274_v46, %v2312_v28  ;;  %v11275_v7 = vld [vmem:[#allocation28_spill] sm:$0xff]  ;;  %v11276_v32 = vld [vmem:[#allocation29_spill] sm:$0xff] }
 0x243   :  { %v3389_v13 = vpop.f32.mrf.mxu1  ;;  %v10560_v34 = vadd.f32 %v11275_v7, %v2314_v35 }
 0x244   :  { %v3586_v38 = vadd.f32 %v10517_v44, %v3540_v10  ;;  %v3541_v61 = vadd.f32 %v3388_v9, %v2355_v55  ;;  %v3390_v16 = vadd.f32 %v3389_v13, %v3326_v15  ;;  %v3328_v33 = vpop.f32.mrf.mxu0 }
 0x245   :  { %v3391_v39 = vpop.f32.mrf.mxu1 }
 0x246   :  { %v3610_v49 = vmax.f32 %v3586_v38, 0.0  ;;  %v3587_v3 = vadd.f32 %v10529_v59, %v3541_v61  ;;  %v3544_v45 = vadd.f32 %v3390_v16, %v2357_v5  ;;  %v3392_v56 = vadd.f32 %v3391_v39, %v3328_v33  ;;  %v3332_v29 = vpop.f32.mrf.mxu0 }
 0x247   :  { %v3395_v14 = vpop.f32.mrf.mxu1  ;;  %v10563_v5 = vadd.f32 %v11276_v32, %v2316_v63 }
 0x248   :  { %v3658_v19 = vrot.slane %v3610_v49, 7  ;;  %v10553_v21 = vmax.f32 %v3587_v3, 0.0  ;;  %v3590_v25 = vadd.f32 %v10517_v44, %v3544_v45  ;;  %v3545_v62 = vadd.f32 %v3392_v56, %v2359_v27  ;;  %v3334_v22 = vpop.f32.mrf.mxu0 }
 0x249   :  { %v3396_v55 = vadd.f32 %v3395_v14, %v3332_v29  ;;  %v3397_v23 = vpop.f32.mrf.mxu1  ;;  %v3754_v9 = vrot.slane %v3610_v49, 1 }
 0x24a   :  { %v3726_v10 = vsel %vm218_vm0, 0.0, %v3658_v19  ;;  %v3614_v1 = vmax.f32 %v3590_v25, 0.0  ;;  %v3659_v20 = vrot.slane %v10553_v21, 7  ;;  %v3591_v37 = vadd.f32 %v10529_v59, %v3545_v62  ;;  %v3336_v13 = vpop.f32.mrf.mxu0  ;;  %v9006_v62 = vld [vmem:[#allocation8 + $0x4e8] ss:$16 sps:$4 sm:$0xff]  }
 0x24b   :  { %v3548_v47 = vadd.f32 %v3396_v55, %v2363_v6  ;;  %v3398_v15 = vadd.f32 %v3397_v23, %v3334_v22  ;;  %v3399_v43 = vpop.f32.mrf.mxu1  ;;  %v3757_v28 = vrot.slane %v10553_v21, 1 }
 0x24c   :  { %v3662_v38 = vrot.slane %v3614_v1, 7  ;;  %v3755_v61 = vrot.slane %v3614_v1, 1  ;;  %v10568_v16 = vpack.c.bf16 %v3614_v1, %v3610_v49  ;;  %v3400_v27 = vadd.f32 %v3399_v43, %v3336_v13  ;;  %v3338_v39 = vpop.f32.mrf.mxu0  ;;  %v9014_v1 = vld [vmem:[#allocation8 + $0x4cc] ss:$16 sps:$4 sm:$0xff]  }
 0x24d   :  { %v10571_v35 = vmax.f32 %v3591_v37, 0.0  ;;  %v3594_v63 = vadd.f32 %v10517_v44, %v3548_v47  ;;  %v3549_v33 = vadd.f32 %v3398_v15, %v2365_v51  ;;  %v3401_v3 = vpop.f32.mrf.mxu1  ;;  %v3727_v14 = vsel %vm218_vm0, 0.0, %v3659_v20 }
 0x24e   :  { %v3663_v45 = vsel %vm218_vm0, %v3658_v19, %v3662_v38  ;;  %v3756_v56 = vsel %vm333_vm13, %v3754_v9, %v3755_v61  ;;  %v3552_v0 = vadd.f32 %v3400_v27, %v2367_v40  ;;  %v3402_v6 = vadd.f32 %v3401_v3, %v3338_v39  ;;  %v3342_v11 = vpop.f32.mrf.mxu0 }
 0x24f   :  { %v10576_v41 = vpack.c.bf16 %v3663_v45, %v3726_v10  ;;  %v3664_v49 = vrot.slane %v10571_v35, 7  ;;  %v10579_v57 = vmax.f32 %v3594_v63, 0.0  ;;  %v3405_v29 = vpop.f32.mrf.mxu1  ;;  %v3595_v51 = vadd.f32 %v10529_v59, %v3549_v33 }
 0x250   :  { %v3598_v18 = vadd.f32 %v10517_v44, %v3552_v0  ;;  %v3553_v25 = vadd.f32 %v3402_v6, %v2369_v54  ;;  %v3406_v19 = vadd.f32 %v3405_v29, %v3342_v11  ;;  %v10588_v7 = vpack.c.bf16 %v10571_v35, %v10553_v21  ;;  %v3344_v55 = vpop.f32.mrf.mxu0  ;;  %v9012_v0 = vld [vmem:[#allocation8 + $0x4c8] ss:$16 sps:$4 sm:$0xff]   ;;  %v9020_v11 = vld [vmem:[#allocation8 + $0x4ac] ss:$16 sps:$4 sm:$0xff]  }
 0x251   :  { %v3670_v46 = vrot.slane %v10579_v57, 7  ;;  %v3766_v40 = vrot.slane %v10579_v57, 1  ;;  %v3407_v22 = vpop.f32.mrf.mxu1  ;;  %v3665_v23 = vsel %vm218_vm0, %v3659_v20, %v3664_v49  ;;  %v10591_v32 = vmax.f32 %v3595_v51, 0.0  ;;  %v9032_v21 = vld [vmem:[#allocation8 + $0x46c] ss:$16 sps:$4 sm:$0xff]  }
 0x252   :  { %v10593_v10 = vmax.f32 %v3598_v18, 0.0  ;;  %v3599_v54 = vadd.f32 %v10529_v59, %v3553_v25  ;;  %v3556_v9 = vadd.f32 %v3406_v19, %v2373_v36  ;;  %4803 = vmatprep.mubr.bf16.mxu0 %v10588_v7  ;;  %v3408_v47 = vadd.f32 %v3407_v22, %v3344_v55  ;;  %v3346_v15 = vpop.f32.mrf.mxu0 }
 0x253   :  { %v3767_v37 = vsel %vm333_vm13, %v3755_v61, %v3766_v40  ;;  %v3409_v13 = vpop.f32.mrf.mxu1  ;;  %v10600_v43 = vpack.c.bf16 %v3665_v23, %v3727_v14  ;;  %v3671_v20 = vsel %vm218_vm0, %v3662_v38, %v3670_v46  ;;  %v3758_v27 = vrot.slane %v10571_v35, 1  ;;  %4804 = vmatmul.mubr.bf16.vlgmr.msra.gmra.mxu0 %v10568_v16 }
 0x254   :  { %v10604_v63 = vpack.c.bf16 %v3767_v37, %v3756_v56  ;;  %v3672_v36 = vrot.slane %v10591_v32, 7  ;;  %v3678_v33 = vrot.slane %v10593_v10, 7  ;;  %v3768_v61 = vrot.slane %v10591_v32, 1  ;;  %4898 = vmatpush1.bf16.msra.mxu0 %v9006_v62  ;;  %v3348_v38 = vpop.f32.mrf.mxu0 }
 0x255   :  { %v3623_v39 = vmax.f32 %v3599_v54, 0.0  ;;  %v3602_v3 = vadd.f32 %v10517_v44, %v3556_v9  ;;  %v3557_v45 = vadd.f32 %v3408_v47, %v10557_v8  ;;  %v3411_v6 = vpop.f32.mrf.mxu1  ;;  %v3410_v35 = vadd.f32 %v3409_v13, %v3346_v15  ;;  %4899 = vmatprep.subr.bf16.mxu0 %v9014_v1 }
 0x256   :  { %v3412_v56 = vadd.f32 %v3411_v6, %v3348_v38  ;;  %v10614_v29 = vpack.c.bf16 %v10593_v10, %v10579_v57  ;;  %v3673_v14 = vsel %vm218_vm0, %v3664_v49, %v3672_v36  ;;  %v3774_v51 = vrot.slane %v10593_v10, 1  ;;  %v9018_v49 = vld [vmem:[#allocation8 + $0x4a8] ss:$16 sps:$4 sm:$0xff]  }
 0x257   :  { %v3680_v18 = vrot.slane %v3623_v39, 7  ;;  %v3626_v25 = vmax.f32 %v3602_v3, 0.0  ;;  %v3603_v8 = vadd.f32 %v10529_v59, %v3557_v45  ;;  %v3560_v19 = vadd.f32 %v3410_v35, %v10560_v34  ;;  %v9026_v34 = vld [vmem:[#allocation8 + $0x48c] ss:$16 sps:$4 sm:$0xff]  }
 0x258   :  { %v3561_v62 = vadd.f32 %v3412_v56, %v10563_v5  ;;  %v10622_v55 = vpack.c.bf16 %v3623_v39, %v10591_v32  ;;  %v3679_v22 = vsel %vm218_vm0, %v3670_v46, %v3678_v33  ;;  %v3776_v23 = vrot.slane %v3623_v39, 1  ;;  %4900 = vmatpush1.bf16.msra.mxu0 %v9012_v0 }
 0x259   :  { %v3686_v54 = vrot.slane %v3626_v25, 7  ;;  %v3627_v9 = vmax.f32 %v3603_v8, 0.0  ;;  %v3681_v10 = vsel %vm218_vm0, %v3672_v36, %v3680_v18  ;;  %v3782_v1 = vrot.slane %v3626_v25, 1  ;;  %4901 = vmatprep.subr.bf16.mxu0 %v9020_v11  ;;  %v9024_v36 = vld [vmem:[#allocation8 + $0x488] ss:$16 sps:$4 sm:$0xff]  }
 0x25a   :  { %v3606_v37 = vadd.f32 %v10517_v44, %v3560_v19  ;;  %v3607_v47 = vadd.f32 %v10529_v59, %v3561_v62  ;;  %4813 = vmatprep.mubr.bf16.mxu0 %v10622_v55  ;;  %v10629_v5 = vpack.c.bf16 %v3681_v10, %v3673_v14  ;;  %v10631_v15 = vpack.c.bf16 %v3679_v22, %v3671_v20  ;;  %v9030_v62 = vld [vmem:[#allocation8 + $0x468] ss:$16 sps:$4 sm:$0xff]  }
 0x25b   :  { %v3688_v32 = vrot.slane %v3627_v9, 7  ;;  %v3784_v46 = vrot.slane %v3627_v9, 1  ;;  %v3687_v13 = vsel %vm218_vm0, %v3678_v33, %v3686_v54  ;;  %4814 = vmatmul.mubr.bf16.gmra.mxu0 %v10614_v29  ;;  %v3759_v44 = vsel %vm333_vm13, %v3757_v28, %v3758_v27  ;;  %v9036_v10 = vld [vmem:[#allocation8 + $0x448] ss:$16 sps:$4 sm:$0xff]  }
 0x25c   :  { %v3630_v39 = vmax.f32 %v3606_v37, 0.0  ;;  %v3631_v3 = vmax.f32 %v3607_v47, 0.0  ;;  %v3769_v59 = vsel %vm333_vm13, %v3758_v27, %v3768_v61  ;;  %4902 = vmatpush1.bf16.msra.mxu0 %v9018_v49  ;;  %v3777_v20 = vsel %vm333_vm13, %v3768_v61, %v3776_v23  ;;  %v9044_v37 = vld [vmem:[#allocation8 + $0x42c] ss:$16 sps:$4 sm:$0xff]   ;;  %v9042_v47 = vld [vmem:[#allocation8 + $0x428] ss:$16 sps:$4 sm:$0xff]  }
 0x25d   :  { %v3689_v45 = vsel %vm218_vm0, %v3680_v18, %v3688_v32  ;;  %v10640_v0 = vpack.c.bf16 %v3769_v59, %v3759_v44  ;;  %v3785_v33 = vsel %vm333_vm13, %v3776_v23, %v3784_v46  ;;  %4903 = vmatprep.subr.bf16.mxu0 %v9026_v34  ;;  %v3775_v14 = vsel %vm333_vm13, %v3766_v40, %v3774_v51  ;;  %v9038_v40 = vld [vmem:[#allocation8 + $0x44c] ss:$16 sps:$4 sm:$0xff]  }
 0x25e   :  { %v3694_v38 = vrot.slane %v3630_v39, 7  ;;  %v3790_v6 = vrot.slane %v3630_v39, 1  ;;  %v3696_v35 = vrot.slane %v3631_v3, 7  ;;  %v3792_v56 = vrot.slane %v3631_v3, 1  ;;  %v9050_v34 = vld [vmem:[#allocation8 + $0x40c] ss:$16 sps:$4 sm:$0xff]  }
 0x25f   :  { %v10644_v11 = vpack.c.bf16 %v3631_v3, %v3627_v9  ;;  %v10646_v28 = vpack.c.bf16 %v3630_v39, %v3626_v25  ;;  %v10648_v27 = vpack.c.bf16 %v3785_v33, %v3777_v20  ;;  %v3783_v19 = vsel %vm333_vm13, %v3774_v51, %v3782_v1  ;;  %v9060_v39 = vld [vmem:[#allocation8 + $0x5c8] ss:$16 sps:$4 sm:$0xff]   ;;  %v9068_v3 = vld [vmem:[#allocation8 + $0x5ac] ss:$16 sps:$4 sm:$0xff]  }
 0x260   :  { %v3822_v61 = vsel %vm333_vm13, %v3790_v6, 0.0  ;;  %v3697_v18 = vsel %vm218_vm0, %v3688_v32, %v3696_v35  ;;  %v3695_v8 = vsel %vm218_vm0, %v3686_v54, %v3694_v38  ;;  %4904 = vmatpush1.bf16.msra.mxu0 %v9024_v36  ;;  %v10662_v23 = vpack.c.bf16 %v3783_v19, %v3775_v14  ;;  %v9048_v32 = vld [vmem:[#allocation8 + $0x408] ss:$16 sps:$4 sm:$0xff]   ;;  %v9074_v44 = vld [vmem:[#allocation8 + $0x58c] ss:$16 sps:$4 sm:$0xff]  }
 0x261   :  { %4823 = vmatprep.mubr.bf16.mxu0 %v10644_v11  ;;  %v10658_v25 = vpack.c.bf16 %v3697_v18, %v3689_v45  ;;  %v10660_v22 = vpack.c.bf16 %v3695_v8, %v3687_v13  ;;  %v3823_v57 = vsel %vm333_vm13, %v3792_v56, 0.0  ;;  %4905 = vmatprep.subr.bf16.mxu0 %v9032_v21  ;;  %v3793_v9 = vsel %vm333_vm13, %v3784_v46, %v3792_v56  ;;  %v9054_v46 = vld [vmem:[#allocation8 + $0x5e8] ss:$16 sps:$4 sm:$0xff]   ;;  %v9062_v13 = vld [vmem:[#allocation8 + $0x5cc] ss:$16 sps:$4 sm:$0xff]  }
 0x262   :  { %v3791_v54 = vsel %vm333_vm13, %v3782_v1, %v3790_v6  ;;  %v10667_v49 = vpack.c.bf16 %v3823_v57, %v3793_v9  ;;  %v9056_v1 = vld [vmem:[#allocation8 + $0x5ec] ss:$16 sps:$4 sm:$0xff]   ;;  %v11221_v59 = vsub.s32 2, %v9877_v26  ;;  %v9072_v36 = vld [vmem:[#allocation8 + $0x588] ss:$16 sps:$4 sm:$0xff]   ;;  %v11220_v20 = vsub.s32 3, %v9877_v26 }
 0x263   :  { %v10669_v51 = vpack.c.bf16 %v3822_v61, %v3791_v54  ;;  %4824 = vmatmul.mubr.bf16.gmra.mxu0 %v10646_v28  ;;  %v9080_v45 = vld [vmem:[#allocation8 + $0x56c] ss:$16 sps:$4 sm:$0xff]   ;;  %v9078_v56 = vld [vmem:[#allocation8 + $0x568] ss:$16 sps:$4 sm:$0xff]  }
 0x264   :  { %4906 = vmatpush1.bf16.msra.mxu0 %v9030_v62  ;;  %4929 = vmatprep.mubr.bf16.mxu0 %v10588_v7  ;;  %v9066_v7 = vld [vmem:[#allocation8 + $0x5a8] ss:$16 sps:$4 sm:$0xff]   ;;  %v10678_v35 = vrot.slane %v10506_v48, %v11221_v59  ;;  %v10684_v19 = vrot.slane %v10506_v48, %v11220_v20  ;;  %v9086_v62 = vld [vmem:[#allocation8 + $0x54c] ss:$16 sps:$4 sm:$0xff]  }
 0x265   :  { %4907 = vmatprep.subr.bf16.mxu0 %v9038_v40  ;;  %v11277_v61 = vld [vmem:[#allocation30_spill] sm:$0xff] }
 0x268   :  { %4908 = vmatpush1.bf16.msra.mxu0 %v9036_v10 }
 0x269   :  { %4909 = vmatprep.subr.bf16.mxu0 %v9044_v37  ;;  %v9084_v37 = vld [vmem:[#allocation8 + $0x548] ss:$16 sps:$4 sm:$0xff]  }
 0x26c   :  { %4910 = vmatpush1.bf16.msra.mxu0 %v9042_v47 }
 0x26d   :  { %4911 = vmatprep.subr.bf16.mxu0 %v9050_v34 }
 0x270   :  { %4912 = vmatpush1.bf16.msra.mxu0 %v9048_v32 }
 0x271   :  { %4913 = vmatprep.subr.bf16.mxu0 %v9056_v1 }
 0x274   :  { %4914 = vmatpush2.bf16.msra.mxu0 %v9054_v46 }
 0x275   :  { %4915 = vmatprep.subr.bf16.mxu0 %v9062_v13  ;;  %v9092_v13 = vld [vmem:[#allocation8 + $0x52c] ss:$16 sps:$4 sm:$0xff]  }
 0x278   :  { %4916 = vmatpush2.bf16.msra.mxu0 %v9060_v39 }
 0x279   :  { %4917 = vmatprep.subr.bf16.mxu0 %v9068_v3 }
 0x27c   :  { %4918 = vmatpush2.bf16.msra.mxu0 %v9066_v7 }
 0x27d   :  { %4919 = vmatprep.subr.bf16.mxu0 %v9074_v44 }
 0x27e   :  { %v3448_v33 = vpop.f32.mrf.mxu0 }
 0x27f   :  { %v3511_v38 = vpop.f32.mrf.mxu1 }
 0x280   :  { %v3512_v6 = vadd.f32 %v3511_v38, %v3448_v33  ;;  %4920 = vmatpush2.bf16.msra.mxu0 %v9072_v36  ;;  %v3450_v21 = vpop.f32.mrf.mxu0  ;;  %v9090_v33 = vld [vmem:[#allocation8 + $0x528] ss:$16 sps:$4 sm:$0xff]  }
 0x281   :  { %v3513_v14 = vpop.f32.mrf.mxu1  ;;  %4921 = vmatprep.subr.bf16.mxu0 %v9080_v45 }
 0x282   :  { %v3542_v18 = vadd.f32 %v3512_v6, %v11277_v61  ;;  %v3514_v8 = vadd.f32 %v3513_v14, %v3450_v21  ;;  %v3452_v57 = vpop.f32.mrf.mxu0 }
 0x283   :  { %v3515_v40 = vpop.f32.mrf.mxu1 }
 0x284   :  { %v3588_v9 = vadd.f32 %v10678_v35, %v3542_v18  ;;  %v3543_v54 = vadd.f32 %v3514_v8, %v10468_v17  ;;  %v3516_v10 = vadd.f32 %v3515_v40, %v3452_v57  ;;  %4922 = vmatpush2.bf16.msra.mxu0 %v9078_v56  ;;  %v3454_v47 = vpop.f32.mrf.mxu0 }
 0x285   :  { %v3517_v34 = vpop.f32.mrf.mxu1  ;;  %4923 = vmatprep.subr.bf16.mxu0 %v9086_v62 }
 0x286   :  { %v3612_v32 = vmax.f32 %v3588_v9, 0.0  ;;  %v3589_v1 = vadd.f32 %v10684_v19, %v3543_v54  ;;  %v3546_v46 = vadd.f32 %v3516_v10, %v10471_v53  ;;  %v3518_v48 = vadd.f32 %v3517_v34, %v3454_v47  ;;  %v3458_v39 = vpop.f32.mrf.mxu0  ;;  %v9098_v53 = vld [vmem:[#allocation8 + $0x50c] ss:$16 sps:$4 sm:$0xff]  }
 0x287   :  { %v3521_v3 = vpop.f32.mrf.mxu1 }
 0x288   :  { %v10690_v7 = vmax.f32 %v3589_v1, 0.0  ;;  %v3592_v44 = vadd.f32 %v10678_v35, %v3546_v46  ;;  %v3660_v17 = vrot.slane %v3612_v32, 7  ;;  %v3547_v36 = vadd.f32 %v3518_v48, %v10473_v2  ;;  %4924 = vmatpush2.bf16.msra.mxu0 %v9084_v37  ;;  %v3460_v38 = vpop.f32.mrf.mxu0  ;;  %v9096_v1 = vld [vmem:[#allocation8 + $0x508] ss:$16 sps:$4 sm:$0xff]  }
 0x289   :  { %v3522_v45 = vadd.f32 %v3521_v3, %v3458_v39  ;;  %v3523_v6 = vpop.f32.mrf.mxu1  ;;  %v3760_v56 = vrot.slane %v3612_v32, 1  ;;  %4925 = vmatprep.subr.bf16.mxu0 %v9092_v13  ;;  %v9104_v3 = vld [vmem:[#allocation8 + $0xe4] ss:$16 sps:$4 sm:$0xff]  }
 0x28a   :  { %v3616_v21 = vmax.f32 %v3592_v44, 0.0  ;;  %v3661_v14 = vrot.slane %v10690_v7, 7  ;;  %v3593_v61 = vadd.f32 %v10684_v19, %v3547_v36  ;;  %v3524_v8 = vadd.f32 %v3523_v6, %v3460_v38  ;;  %v3462_v62 = vpop.f32.mrf.mxu0 }
 0x28b   :  { %v3550_v18 = vadd.f32 %v3522_v45, %v10477_v31  ;;  %v3525_v57 = vpop.f32.mrf.mxu1  ;;  %v3728_v10 = vsel %vm218_vm0, 0.0, %v3660_v17 }
 0x28c   :  { %v3666_v40 = vrot.slane %v3616_v21, 7  ;;  %v3761_v2 = vrot.slane %v3616_v21, 1  ;;  %v10697_v9 = vpack.c.bf16 %v3616_v21, %v3612_v32  ;;  %v3526_v54 = vadd.f32 %v3525_v57, %v3462_v62  ;;  %4926 = vmatpush2.bf16.msra.mxu0 %v9090_v33  ;;  %v3464_v46 = vpop.f32.mrf.mxu0 }
 0x28d   :  { %v10700_v37 = vmax.f32 %v3593_v61, 0.0  ;;  %v3596_v47 = vadd.f32 %v10678_v35, %v3550_v18  ;;  %v3551_v34 = vadd.f32 %v3524_v8, %v10482_v60  ;;  %v3527_v31 = vpop.f32.mrf.mxu1  ;;  %4927 = vmatprep.subr.bf16.mxu0 %v9098_v53  ;;  %v3729_v38 = vsel %vm218_vm0, 0.0, %v3661_v14  ;;  %v9099_v18 = vld [vmem:[#allocation8 + $0x6e8] ss:$16 sps:$4 sm:$0xff]  }
 0x28e   :  { %v3667_v48 = vsel %vm218_vm0, %v3660_v17, %v3666_v40  ;;  %v3762_v13 = vsel %vm333_vm13, %v3760_v56, %v3761_v2  ;;  %v3554_v32 = vadd.f32 %v3526_v54, %v10484_v50  ;;  %v3528_v39 = vadd.f32 %v3527_v31, %v3464_v46  ;;  %v3468_v60 = vpop.f32.mrf.mxu0 }
 0x28f   :  { %v10707_v44 = vpack.c.bf16 %v3667_v48, %v3728_v10  ;;  %v3668_v36 = vrot.slane %v10700_v37, 7  ;;  %v10710_v45 = vmax.f32 %v3596_v47, 0.0  ;;  %v3531_v33 = vpop.f32.mrf.mxu1  ;;  %v3597_v6 = vadd.f32 %v10684_v19, %v3551_v34  ;;  %v9102_v34 = vld [vmem:[#allocation8 + $0xe0] ss:$16 sps:$4 sm:$0xff]  }
 0x290   :  { %v3600_v17 = vadd.f32 %v10678_v35, %v3554_v32  ;;  %v3555_v56 = vadd.f32 %v3528_v39, %v10487_v58  ;;  %v3532_v50 = vadd.f32 %v3531_v33, %v3468_v60  ;;  %4928 = vmatpush2.bf16.msra.mxu0 %v9096_v1  ;;  %v10720_v61 = vpack.c.bf16 %v10700_v37, %v10690_v7  ;;  %v3470_v8 = vpop.f32.mrf.mxu0  ;;  %v9107_v1 = vld [vmem:[#allocation8 + $0x6cc] ss:$16 sps:$4 sm:$0xff]   ;;  %v9110_v32 = vld [vmem:[#allocation8 + $0xc4] ss:$16 sps:$4 sm:$0xff]  }
 0x291   :  { %v3674_v21 = vrot.slane %v10710_v45, 7  ;;  %v3770_v53 = vrot.slane %v10710_v45, 1  ;;  %v3533_v62 = vpop.f32.mrf.mxu1  ;;  %v3669_v57 = vsel %vm218_vm0, %v3661_v14, %v3668_v36  ;;  %v10725_v54 = vmax.f32 %v3597_v6, 0.0  ;;  %5663 = vmatprep.subr.bf16.mxu0 %v9104_v3 }
 0x292   :  { %v10727_v58 = vmax.f32 %v3600_v17, 0.0  ;;  %v3601_v10 = vadd.f32 %v10684_v19, %v3555_v56  ;;  %v3558_v47 = vadd.f32 %v3532_v50, %v10490_v30  ;;  %4866 = vmatprep.mubr.bf16.mxu1 %v10720_v61  ;;  %v3534_v31 = vadd.f32 %v3533_v62, %v3470_v8  ;;  %v3472_v48 = vpop.f32.mrf.mxu0  ;;  %v9108_v50 = vld [vmem:[#allocation8 + $0xc0] ss:$16 sps:$4 sm:$0xff]   ;;  %v9113_v62 = vld [vmem:[#allocation8 + $0x6ac] ss:$16 sps:$4 sm:$0xff]  }
 0x293   :  { %v3771_v46 = vsel %vm333_vm13, %v3761_v2, %v3770_v53  ;;  %v3535_v14 = vpop.f32.mrf.mxu1  ;;  %v10735_v39 = vpack.c.bf16 %v3669_v57, %v3729_v38  ;;  %v3675_v60 = vsel %vm218_vm0, %v3666_v40, %v3674_v21  ;;  %v3763_v30 = vrot.slane %v10690_v7, 1  ;;  %4930 = vmatmul.mubr.bf16.vlgmr.msra.gmra.mxu0 %v10568_v16  ;;  %4867 = vmatmul.mubr.bf16.vlgmr.msra.gmra.mxu1 %v10697_v9  ;;  %v9105_v7 = vld [vmem:[#allocation8 + $0x6c8] ss:$16 sps:$4 sm:$0xff]  }
 0x294   :  { %v10741_v3 = vpack.c.bf16 %v3771_v46, %v3762_v13  ;;  %v3676_v33 = vrot.slane %v10725_v54, 7  ;;  %v3764_v2 = vrot.slane %v10700_v37, 1  ;;  %v10747_v6 = vmax.f32 %v3601_v10, 0.0  ;;  %4939 = vmatprep.mubr.bf16.mxu0 %v10622_v55  ;;  %4961 = vmatpush1.bf16.msra.mxu1 %v9099_v18  ;;  %v3474_v40 = vpop.f32.mrf.mxu0  ;;  %v9114_v37 = vld [vmem:[#allocation8 + $0xa0] ss:$16 sps:$4 sm:$0xff]  }
 0x295   :  { %v3604_v38 = vadd.f32 %v10678_v35, %v3558_v47  ;;  %v3559_v17 = vadd.f32 %v3534_v31, %v10495_v24  ;;  %v3537_v13 = vpop.f32.mrf.mxu1  ;;  %v3772_v56 = vrot.slane %v10725_v54, 1  ;;  %5664 = vmatpush1.bf16.msra.mxu0 %v9102_v34  ;;  %v3536_v16 = vadd.f32 %v3535_v14, %v3472_v48  ;;  %4962 = vmatprep.subr.bf16.mxu1 %v9107_v1  ;;  %v9116_v47 = vld [vmem:[#allocation8 + $0xa4] ss:$16 sps:$4 sm:$0xff]  }
 0x296   :  { %v3538_v8 = vadd.f32 %v3537_v13, %v3474_v40  ;;  %v10755_v57 = vpack.c.bf16 %v10727_v58, %v10710_v45  ;;  %v3682_v24 = vrot.slane %v10727_v58, 7  ;;  %v3684_v55 = vrot.slane %v10747_v6, 7  ;;  %5665 = vmatprep.subr.bf16.mxu0 %v9110_v32  ;;  %v9111_v32 = vld [vmem:[#allocation8 + $0x6a8] ss:$16 sps:$4 sm:$0xff]  }
 0x297   :  { %v10759_v18 = vmax.f32 %v3604_v38, 0.0  ;;  %v3605_v10 = vadd.f32 %v10684_v19, %v3559_v17  ;;  %v3562_v34 = vadd.f32 %v3536_v16, %v10497_v4  ;;  %v10766_v46 = vpack.c.bf16 %v10747_v6, %v10725_v54 }
 0x298   :  { %v3563_v1 = vadd.f32 %v3538_v8, %v10499_v52  ;;  %v3677_v31 = vsel %vm218_vm0, %v3668_v36, %v3676_v33  ;;  %v3780_v48 = vrot.slane %v10747_v6, 1  ;;  %4963 = vmatpush1.bf16.msra.mxu1 %v9105_v7  ;;  %v3685_v4 = vsel %vm218_vm0, %v3676_v33, %v3684_v55  ;;  %v9119_v36 = vld [vmem:[#allocation8 + $0x68c] ss:$16 sps:$4 sm:$0xff]   ;;  %v9122_v33 = vld [vmem:[#allocation8 + $0x84] ss:$16 sps:$4 sm:$0xff]  }
 0x299   :  { %v3690_v14 = vrot.slane %v10759_v18, 7  ;;  %v10773_v38 = vmax.f32 %v3605_v10, 0.0  ;;  %v3778_v52 = vrot.slane %v10727_v58, 1  ;;  %v3608_v17 = vadd.f32 %v10678_v35, %v3562_v34  ;;  %5666 = vmatpush1.bf16.msra.mxu0 %v9108_v50  ;;  %4876 = vmatprep.mubr.bf16.mxu1 %v10766_v46  ;;  %v9120_v10 = vld [vmem:[#allocation8 + $0x80] ss:$16 sps:$4 sm:$0xff]  }
 0x29a   :  { %v3609_v54 = vadd.f32 %v10684_v19, %v3563_v1  ;;  %v10780_v6 = vpack.c.bf16 %v3685_v4, %v3677_v31  ;;  %4964 = vmatprep.subr.bf16.mxu1 %v9113_v62  ;;  %5667 = vmatprep.subr.bf16.mxu0 %v9116_v47  ;;  %v3683_v35 = vsel %vm218_vm0, %v3674_v21, %v3682_v24  ;;  %v3786_v8 = vrot.slane %v10759_v18, 1  ;;  %v9117_v62 = vld [vmem:[#allocation8 + $0x688] ss:$16 sps:$4 sm:$0xff]  }
 0x29b   :  { %v3692_v40 = vrot.slane %v10773_v38, 7  ;;  %v3788_v7 = vrot.slane %v10773_v38, 1  ;;  %v3691_v19 = vsel %vm218_vm0, %v3682_v24, %v3690_v14  ;;  %v3632_v58 = vmax.f32 %v3608_v17, 0.0  ;;  %4940 = vmatmul.mubr.bf16.gmra.mxu0 %v10614_v29  ;;  %4877 = vmatmul.mubr.bf16.gmra.mxu1 %v10755_v57 }
 0x29c   :  { %v3633_v13 = vmax.f32 %v3609_v54, 0.0  ;;  %v10790_v16 = vpack.c.bf16 %v3683_v35, %v3675_v60  ;;  %v3765_v50 = vsel %vm333_vm13, %v3763_v30, %v3764_v2  ;;  %4949 = vmatprep.mubr.bf16.mxu0 %v10644_v11  ;;  %4965 = vmatpush1.bf16.msra.mxu1 %v9111_v32  ;;  %v3773_v24 = vsel %vm333_vm13, %v3764_v2, %v3772_v56  ;;  %v9125_v30 = vld [vmem:[#allocation8 + $0x66c] ss:$16 sps:$4 sm:$0xff]   ;;  %v9128_v11 = vld [vmem:[#allocation8 + $0x64] ss:$16 sps:$4 sm:$0xff]  }
 0x29d   :  { %v3693_v21 = vsel %vm218_vm0, %v3684_v55, %v3692_v40  ;;  %v3781_v47 = vsel %vm333_vm13, %v3772_v56, %v3780_v48  ;;  %v3698_v29 = vrot.slane %v3632_v58, 7  ;;  %v3794_v34 = vrot.slane %v3632_v58, 1  ;;  %5668 = vmatpush1.bf16.msra.mxu0 %v9114_v37  ;;  %4966 = vmatprep.subr.bf16.mxu1 %v9119_v36 }
 0x29e   :  { %v3700_v1 = vrot.slane %v3633_v13, 7  ;;  %v3796_v60 = vrot.slane %v3633_v13, 1  ;;  %5669 = vmatprep.subr.bf16.mxu0 %v9122_v33  ;;  %v10799_v31 = vpack.c.bf16 %v3633_v13, %v10773_v38  ;;  %v10802_v32 = vpack.c.bf16 %v3632_v58, %v10759_v18  ;;  %v9123_v38 = vld [vmem:[#allocation8 + $0x668] ss:$16 sps:$4 sm:$0xff]   ;;  %v9131_v58 = vld [vmem:[#allocation8 + $0x64c] ss:$16 sps:$4 sm:$0xff]  }
 0x29f   :  { %v10804_v55 = vpack.c.bf16 %v3773_v24, %v3765_v50  ;;  %v3789_v2 = vsel %vm333_vm13, %v3780_v48, %v3788_v7  ;;  %v3824_v56 = vsel %vm333_vm13, %v3794_v34, 0.0  ;;  %v3699_v17 = vsel %vm218_vm0, %v3690_v14, %v3698_v29  ;;  %v9134_v13 = vld [vmem:[#allocation8 + $0x44] ss:$16 sps:$4 sm:$0xff]   ;;  %v9144_v29 = vld [vmem:[#allocation8] ss:$16 sps:$4 sm:$0xff]  }
 0x2a0   :  { %v3701_v4 = vsel %vm218_vm0, %v3692_v40, %v3700_v1  ;;  %v10810_v54 = vpack.c.bf16 %v3789_v2, %v3781_v47  ;;  %4967 = vmatpush1.bf16.msra.mxu1 %v9117_v62  ;;  %4886 = vmatprep.mubr.bf16.mxu1 %v10799_v31  ;;  %v10815_v18 = vpack.c.bf16 %v3699_v17, %v3691_v19  ;;  %v3825_v36 = vsel %vm333_vm13, %v3796_v60, 0.0  ;;  %v9126_v40 = vld [vmem:[#allocation8 + $0x60] ss:$16 sps:$4 sm:$0xff]   ;;  %v9140_v62 = vld [vmem:[#allocation8 + $0x24] ss:$16 sps:$4 sm:$0xff]  }
 0x2a1   :  { %v10813_v37 = vpack.c.bf16 %v3701_v4, %v3693_v21  ;;  %v3779_v48 = vsel %vm333_vm13, %v3770_v53, %v3778_v52  ;;  %5670 = vmatpush1.bf16.msra.mxu0 %v9120_v10  ;;  %4968 = vmatprep.subr.bf16.mxu1 %v9125_v30  ;;  %v3787_v14 = vsel %vm333_vm13, %v3778_v52, %v3786_v8  ;;  %v9129_v52 = vld [vmem:[#allocation8 + $0x648] ss:$16 sps:$4 sm:$0xff]   ;;  %v9143_v21 = vld [vmem:[#allocation8 + $0x60c] ss:$16 sps:$4 sm:$0xff]   ;;  %v9146_v24 = vld [vmem:[#allocation8 + $0x4] ss:$16 sps:$4 sm:$0xff]  }
 0x2a2   :  { %v3797_v33 = vsel %vm333_vm13, %v3788_v7, %v3796_v60  ;;  %v3795_v35 = vsel %vm333_vm13, %v3786_v8, %v3794_v34  ;;  %5671 = vmatprep.subr.bf16.mxu0 %v9128_v11  ;;  %v10824_v19 = vpack.c.bf16 %v3787_v14, %v3779_v48  ;;  %v9132_v7 = vld [vmem:[#allocation8 + $0x40] ss:$16 sps:$4 sm:$0xff]   ;;  %v9137_v8 = vld [vmem:[#allocation8 + $0x62c] ss:$16 sps:$4 sm:$0xff]   ;;  %v9135_v10 = vld [vmem:[#allocation8 + $0x628] ss:$16 sps:$4 sm:$0xff]  }
 0x2a3   :  { %v10826_v50 = vpack.c.bf16 %v3825_v36, %v3797_v33  ;;  %v10828_v45 = vpack.c.bf16 %v3824_v56, %v3795_v35  ;;  %4950 = vmatmul.mubr.bf16.gmra.mxu0 %v10646_v28  ;;  %4887 = vmatmul.mubr.bf16.gmra.mxu1 %v10802_v32  ;;  %v9138_v28 = vld [vmem:[#allocation8 + $0x20] ss:$16 sps:$4 sm:$0xff]   ;;  %v9141_v47 = vld [vmem:[#allocation8 + $0x608] ss:$16 sps:$4 sm:$0xff]   ;;  %v9149_v34 = vld [vmem:[#allocation8 + $0x7ec] ss:$16 sps:$4 sm:$0xff]  }
 0x2a4   :  { %4969 = vmatpush1.bf16.msra.mxu1 %v9123_v38  ;;  %7993 = vmatprep.mubr.msk.bf16.mxu0 %vm9918_vm3, %v10600_v43  ;;  %v9147_v1 = vld [vmem:[#allocation8 + $0x7e8] ss:$16 sps:$4 sm:$0xff]   ;;  %v9150_v60 = vld [vmem:[#allocation8 + $0x1e0] ss:$16 sps:$4 sm:$0xff]   ;;  %v9155_v30 = vld [vmem:[#allocation8 + $0x7cc] ss:$16 sps:$4 sm:$0xff]  }
 0x2a5   :  { %5672 = vmatpush1.bf16.msra.mxu0 %v9126_v40  ;;  %4992 = vmatprep.mubr.bf16.mxu1 %v10720_v61  ;;  %v9152_v61 = vld [vmem:[#allocation8 + $0x1e4] ss:$16 sps:$4 sm:$0xff]   ;;  %v9153_v2 = vld [vmem:[#allocation8 + $0x7c8] ss:$16 sps:$4 sm:$0xff]   ;;  %v9156_v56 = vld [vmem:[#allocation8 + $0x1c0] ss:$16 sps:$4 sm:$0xff]  }
 0x2a6   :  { %4970 = vmatprep.subr.bf16.mxu1 %v9131_v58  ;;  %5673 = vmatprep.subr.bf16.mxu0 %v9134_v13  ;;  %v9158_v11 = vld [vmem:[#allocation8 + $0x1c4] ss:$16 sps:$4 sm:$0xff]   ;;  %v9161_v4 = vld [vmem:[#allocation8 + $0x7ac] ss:$16 sps:$4 sm:$0xff]   ;;  %v9159_v38 = vld [vmem:[#allocation8 + $0x7a8] ss:$16 sps:$4 sm:$0xff]  }
 0x2a7   :  { %v9164_v17 = vld [vmem:[#allocation8 + $0x1a4] ss:$16 sps:$4 sm:$0xff]   ;;  %v9162_v48 = vld [vmem:[#allocation8 + $0x1a0] ss:$16 sps:$4 sm:$0xff]   ;;  %v9167_v36 = vld [vmem:[#allocation8 + $0x78c] ss:$16 sps:$4 sm:$0xff]  }
 0x2a8   :  { %4971 = vmatpush1.bf16.msra.mxu1 %v9129_v52  ;;  %v9170_v40 = vld [vmem:[#allocation8 + $0x184] ss:$16 sps:$4 sm:$0xff]   ;;  %v9165_v14 = vld [vmem:[#allocation8 + $0x788] ss:$16 sps:$4 sm:$0xff]   ;;  %v9168_v33 = vld [vmem:[#allocation8 + $0x180] ss:$16 sps:$4 sm:$0xff]  }
 0x2a9   :  { %5674 = vmatpush1.bf16.msra.mxu0 %v9132_v7  ;;  %4972 = vmatprep.subr.bf16.mxu1 %v9137_v8  ;;  %v9173_v35 = vld [vmem:[#allocation8 + $0x76c] ss:$16 sps:$4 sm:$0xff]   ;;  %v9176_v58 = vld [vmem:[#allocation8 + $0x164] ss:$16 sps:$4 sm:$0xff]   ;;  %v9171_v13 = vld [vmem:[#allocation8 + $0x768] ss:$16 sps:$4 sm:$0xff]  }
 0x2aa   :  { %5675 = vmatprep.subr.bf16.mxu0 %v9140_v62  ;;  %v9174_v52 = vld [vmem:[#allocation8 + $0x160] ss:$16 sps:$4 sm:$0xff]   ;;  %v9179_v7 = vld [vmem:[#allocation8 + $0x74c] ss:$16 sps:$4 sm:$0xff]   ;;  %v9182_v8 = vld [vmem:[#allocation8 + $0x144] ss:$16 sps:$4 sm:$0xff]  }
 0x2ab   :  { %v9177_v62 = vld [vmem:[#allocation8 + $0x748] ss:$16 sps:$4 sm:$0xff]  }
 0x2ac   :  { %4973 = vmatpush1.bf16.msra.mxu1 %v9135_v10  ;;  %v9180_v10 = vld [vmem:[#allocation8 + $0x140] ss:$16 sps:$4 sm:$0xff]  }
 0x2ad   :  { %5676 = vmatpush1.bf16.msra.mxu0 %v9138_v28  ;;  %4974 = vmatprep.subr.bf16.mxu1 %v9143_v21  ;;  %v9185_v28 = vld [vmem:[#allocation8 + $0x72c] ss:$16 sps:$4 sm:$0xff]   ;;  %v9188_v21 = vld [vmem:[#allocation8 + $0x124] ss:$16 sps:$4 sm:$0xff]  }
 0x2ae   :  { %5677 = vmatprep.subr.bf16.mxu0 %v9146_v24  ;;  %v9183_v24 = vld [vmem:[#allocation8 + $0x728] ss:$16 sps:$4 sm:$0xff]  }
 0x2b0   :  { %4975 = vmatpush1.bf16.msra.mxu1 %v9141_v47  ;;  %v9186_v47 = vld [vmem:[#allocation8 + $0x120] ss:$16 sps:$4 sm:$0xff]  }
 0x2b1   :  { %5678 = vmatpush1.bf16.msra.mxu0 %v9144_v29  ;;  %4976 = vmatprep.subr.bf16.mxu1 %v9149_v34  ;;  %v9191_v29 = vld [vmem:[#allocation8 + $0x70c] ss:$16 sps:$4 sm:$0xff]   ;;  %v9194_v34 = vld [vmem:[#allocation8 + $0x104] ss:$16 sps:$4 sm:$0xff]  }
 0x2b2   :  { %5679 = vmatprep.subr.bf16.mxu0 %v9152_v61  ;;  %v9189_v61 = vld [vmem:[#allocation8 + $0x708] ss:$16 sps:$4 sm:$0xff]  }
 0x2b4   :  { %4977 = vmatpush2.bf16.msra.mxu1 %v9147_v1  ;;  %v9192_v1 = vld [vmem:[#allocation8 + $0x100] ss:$16 sps:$4 sm:$0xff]  }
 0x2b5   :  { %5680 = vmatpush2.bf16.msra.mxu0 %v9150_v60  ;;  %4978 = vmatprep.subr.bf16.mxu1 %v9155_v30  ;;  %v9197_v60 = vld [vmem:[#allocation8 + $0x2e4] ss:$16 sps:$4 sm:$0xff]   ;;  %v9200_v30 = vld [vmem:[#allocation8 + $0xec] ss:$16 sps:$4 sm:$0xff]  }
 0x2b6   :  { %5681 = vmatprep.subr.bf16.mxu0 %v9158_v11  ;;  %v9195_v11 = vld [vmem:[#allocation8 + $0x2e0] ss:$16 sps:$4 sm:$0xff]  }
 0x2b8   :  { %4979 = vmatpush2.bf16.msra.mxu1 %v9153_v2  ;;  %v9198_v2 = vld [vmem:[#allocation8 + $0xe8] ss:$16 sps:$4 sm:$0xff]  }
 0x2b9   :  { %5682 = vmatpush2.bf16.msra.mxu0 %v9156_v56  ;;  %4980 = vmatprep.subr.bf16.mxu1 %v9161_v4  ;;  %v9203_v56 = vld [vmem:[#allocation8 + $0x2c4] ss:$16 sps:$4 sm:$0xff]   ;;  %v9206_v4 = vld [vmem:[#allocation8 + $0xcc] ss:$16 sps:$4 sm:$0xff]  }
 0x2ba   :  { %5683 = vmatprep.subr.bf16.mxu0 %v9164_v17  ;;  %v9405_v17 = vld [vmem:[#allocation8 + $0xa80] ss:$16 sps:$4 sm:$0xff]  }
 0x2bc   :  { %4981 = vmatpush2.bf16.msra.mxu1 %v9159_v38  ;;  %v9201_v38 = vld [vmem:[#allocation8 + $0x2c0] ss:$16 sps:$4 sm:$0xff]  }
 0x2bd   :  { %5684 = vmatpush2.bf16.msra.mxu0 %v9162_v48  ;;  %4982 = vmatprep.subr.bf16.mxu1 %v9167_v36  ;;  %v9204_v48 = vld [vmem:[#allocation8 + $0xc8] ss:$16 sps:$4 sm:$0xff]   ;;  %v9209_v36 = vld [vmem:[#allocation8 + $0x2a4] ss:$16 sps:$4 sm:$0xff]  }
 0x2be   :  { %5685 = vmatprep.subr.bf16.mxu0 %v9170_v40  ;;  %v9212_v40 = vld [vmem:[#allocation8 + $0xac] ss:$16 sps:$4 sm:$0xff]  }
 0x2c0   :  { %4983 = vmatpush2.bf16.msra.mxu1 %v9165_v14  ;;  %v9210_v14 = vld [vmem:[#allocation8 + $0xa8] ss:$16 sps:$4 sm:$0xff]  }
 0x2c1   :  { %5686 = vmatpush2.bf16.msra.mxu0 %v9168_v33  ;;  %4984 = vmatprep.subr.bf16.mxu1 %v9173_v35  ;;  %v9215_v33 = vld [vmem:[#allocation8 + $0x284] ss:$16 sps:$4 sm:$0xff]   ;;  %v9417_v35 = vld [vmem:[#allocation8 + $0xa40] ss:$16 sps:$4 sm:$0xff]  }
 0x2c2   :  { %5687 = vmatprep.subr.bf16.mxu0 %v9176_v58  ;;  %v9213_v58 = vld [vmem:[#allocation8 + $0x280] ss:$16 sps:$4 sm:$0xff]  }
 0x2c4   :  { %4985 = vmatpush2.bf16.msra.mxu1 %v9171_v13  ;;  %v9216_v13 = vld [vmem:[#allocation8 + $0x88] ss:$16 sps:$4 sm:$0xff]  }
 0x2c5   :  { %5688 = vmatpush2.bf16.msra.mxu0 %v9174_v52  ;;  %4986 = vmatprep.subr.bf16.mxu1 %v9179_v7  ;;  %v9221_v52 = vld [vmem:[#allocation8 + $0x264] ss:$16 sps:$4 sm:$0xff]   ;;  %v9219_v7 = vld [vmem:[#allocation8 + $0x260] ss:$16 sps:$4 sm:$0xff]  }
 0x2c6   :  { %5689 = vmatprep.subr.bf16.mxu0 %v9182_v8  ;;  %v9222_v8 = vld [vmem:[#allocation8 + $0x68] ss:$16 sps:$4 sm:$0xff]  }
 0x2c8   :  { %4987 = vmatpush2.bf16.msra.mxu1 %v9177_v62  ;;  %v9227_v62 = vld [vmem:[#allocation8 + $0x244] ss:$16 sps:$4 sm:$0xff]  }
 0x2c9   :  { %5690 = vmatpush2.bf16.msra.mxu0 %v9180_v10  ;;  %4988 = vmatprep.subr.bf16.mxu1 %v9185_v28  ;;  %v9225_v10 = vld [vmem:[#allocation8 + $0x240] ss:$16 sps:$4 sm:$0xff]   ;;  %v9228_v28 = vld [vmem:[#allocation8 + $0x48] ss:$16 sps:$4 sm:$0xff]  }
 0x2ca   :  { %5691 = vmatprep.subr.bf16.mxu0 %v9188_v21  ;;  %v9236_v21 = vld [vmem:[#allocation8 + $0x2c] ss:$16 sps:$4 sm:$0xff]  }
 0x2cc   :  { %4989 = vmatpush2.bf16.msra.mxu1 %v9183_v24  ;;  %v9231_v24 = vld [vmem:[#allocation8 + $0x220] ss:$16 sps:$4 sm:$0xff]  }
 0x2cd   :  { %5692 = vmatpush2.bf16.msra.mxu0 %v9186_v47  ;;  %4990 = vmatprep.subr.bf16.mxu1 %v9191_v29  ;;  %v9234_v47 = vld [vmem:[#allocation8 + $0x28] ss:$16 sps:$4 sm:$0xff]   ;;  %v9239_v29 = vld [vmem:[#allocation8 + $0x204] ss:$16 sps:$4 sm:$0xff]  }
 0x2ce   :  { %5693 = vmatprep.subr.bf16.mxu0 %v9194_v34  ;;  %v9242_v34 = vld [vmem:[#allocation8 + $0xc] ss:$16 sps:$4 sm:$0xff]  }
 0x2d0   :  { %4991 = vmatpush2.bf16.msra.mxu1 %v9189_v61  ;;  %v9237_v61 = vld [vmem:[#allocation8 + $0x200] ss:$16 sps:$4 sm:$0xff]  }
 0x2d1   :  { %5694 = vmatpush2.bf16.msra.mxu0 %v9192_v1  ;;  %5726 = vmatprep.subr.bf16.mxu1 %v9197_v60  ;;  %v9245_v1 = vld [vmem:[#allocation8 + $0x3e4] ss:$16 sps:$4 sm:$0xff]   ;;  %v9248_v60 = vld [vmem:[#allocation8 + $0x1ec] ss:$16 sps:$4 sm:$0xff]  }
 0x2d2   :  { %5789 = vmatprep.subr.bf16.mxu0 %v9200_v30  ;;  %v9243_v30 = vld [vmem:[#allocation8 + $0x3e0] ss:$16 sps:$4 sm:$0xff]  }
 0x2d3   :  { %4993 = vmatmul.mubr.bf16.vlgmr.msra.gmra.mxu1 %v10697_v9  ;;  %v9207_v9 = vld [vmem:[#allocation8 + $0x2a0] ss:$16 sps:$4 sm:$0xff]  }
 0x2d4   :  { %7998 = vmatmul.mubr.msk.bf16.vlgmr.msra.gmra.mxu0 %vm9918_vm3, %v10576_v41  ;;  %5002 = vmatprep.mubr.bf16.mxu1 %v10766_v46  ;;  %v9218_v46 = vld [vmem:[#allocation8 + $0x8c] ss:$16 sps:$4 sm:$0xff]  }
 0x2d5   :  { %8003 = vmatprep.mubr.msk.bf16.mxu0 %vm9999_vm6, %v10629_v5  ;;  %5727 = vmatpush1.bf16.msra.mxu1 %v9195_v11  ;;  %v9246_v11 = vld [vmem:[#allocation8 + $0x1e8] ss:$16 sps:$4 sm:$0xff]  }
 0x2d6   :  { %5790 = vmatpush1.bf16.msra.mxu0 %v9198_v2  ;;  %5728 = vmatprep.subr.bf16.mxu1 %v9203_v56  ;;  %v9251_v2 = vld [vmem:[#allocation8 + $0x3c4] ss:$16 sps:$4 sm:$0xff]   ;;  %v9254_v56 = vld [vmem:[#allocation8 + $0x1cc] ss:$16 sps:$4 sm:$0xff]  }
 0x2d7   :  { %5791 = vmatprep.subr.bf16.mxu0 %v9206_v4  ;;  %v9249_v4 = vld [vmem:[#allocation8 + $0x3c0] ss:$16 sps:$4 sm:$0xff]  }
 0x2d9   :  { %5729 = vmatpush1.bf16.msra.mxu1 %v9201_v38  ;;  %v9252_v38 = vld [vmem:[#allocation8 + $0x1c8] ss:$16 sps:$4 sm:$0xff]  }
 0x2da   :  { %5792 = vmatpush1.bf16.msra.mxu0 %v9204_v48  ;;  %5730 = vmatprep.subr.bf16.mxu1 %v9209_v36  ;;  %v9257_v48 = vld [vmem:[#allocation8 + $0x3a4] ss:$16 sps:$4 sm:$0xff]   ;;  %v9260_v36 = vld [vmem:[#allocation8 + $0x1ac] ss:$16 sps:$4 sm:$0xff]  }
 0x2db   :  { %5003 = vmatmul.mubr.bf16.gmra.mxu1 %v10755_v57  ;;  %5793 = vmatprep.subr.bf16.mxu0 %v9212_v40  ;;  %v9224_v57 = vld [vmem:[#allocation8 + $0x6c] ss:$16 sps:$4 sm:$0xff]   ;;  %v9255_v40 = vld [vmem:[#allocation8 + $0x3a0] ss:$16 sps:$4 sm:$0xff]  }
 0x2dc   :  { %8008 = vmatmul.mubr.msk.bf16.gmra.mxu0 %vm9999_vm6, %v10631_v15  ;;  %5012 = vmatprep.mubr.bf16.mxu1 %v10799_v31  ;;  %v9230_v31 = vld [vmem:[#allocation8 + $0x4c] ss:$16 sps:$4 sm:$0xff]  }
 0x2dd   :  { %8013 = vmatprep.mubr.msk.bf16.mxu0 %vm10054_vm9, %v10658_v25  ;;  %5731 = vmatpush1.bf16.msra.mxu1 %v9207_v9  ;;  %v9258_v9 = vld [vmem:[#allocation8 + $0x1a8] ss:$16 sps:$4 sm:$0xff]  }
 0x2de   :  { %5794 = vmatpush1.bf16.msra.mxu0 %v9210_v14  ;;  %5732 = vmatprep.subr.bf16.mxu1 %v9215_v33  ;;  %v9263_v14 = vld [vmem:[#allocation8 + $0x384] ss:$16 sps:$4 sm:$0xff]   ;;  %v9266_v33 = vld [vmem:[#allocation8 + $0x18c] ss:$16 sps:$4 sm:$0xff]  }
 0x2df   :  { %5795 = vmatprep.subr.bf16.mxu0 %v9218_v46  ;;  %v9261_v46 = vld [vmem:[#allocation8 + $0x380] ss:$16 sps:$4 sm:$0xff]  }
 0x2e1   :  { %5733 = vmatpush1.bf16.msra.mxu1 %v9213_v58  ;;  %v9264_v58 = vld [vmem:[#allocation8 + $0x188] ss:$16 sps:$4 sm:$0xff]  }
 0x2e2   :  { %5796 = vmatpush1.bf16.msra.mxu0 %v9216_v13  ;;  %5734 = vmatprep.subr.bf16.mxu1 %v9221_v52  ;;  %v9269_v13 = vld [vmem:[#allocation8 + $0x364] ss:$16 sps:$4 sm:$0xff]   ;;  %v9272_v52 = vld [vmem:[#allocation8 + $0x16c] ss:$16 sps:$4 sm:$0xff]  }
 0x2e3   :  { %5013 = vmatmul.mubr.bf16.gmra.mxu1 %v10802_v32  ;;  %5797 = vmatprep.subr.bf16.mxu0 %v9224_v57  ;;  %v9233_v32 = vld [vmem:[#allocation8 + $0x224] ss:$16 sps:$4 sm:$0xff]   ;;  %v9267_v57 = vld [vmem:[#allocation8 + $0x360] ss:$16 sps:$4 sm:$0xff]  }
 0x2e4   :  { %8018 = vmatmul.mubr.msk.bf16.gmra.mxu0 %vm10054_vm9, %v10660_v22  ;;  %8023 = vmatprep.mubr.msk.bf16.mxu1 %vm9918_vm3, %v10735_v39 }
 0x2e5   :  { %5735 = vmatpush1.bf16.msra.mxu1 %v9219_v7  ;;  %8053 = vmatprep.mubr.msk.bf16.mxu0 %vm9918_vm3, %v10600_v43  ;;  %v9240_v43 = vld [vmem:[#allocation8 + $0x8] ss:$16 sps:$4 sm:$0xff]  }
 0x2e6   :  { %5798 = vmatpush1.bf16.msra.mxu0 %v9222_v8  ;;  %5736 = vmatprep.subr.bf16.mxu1 %v9227_v62  ;;  %v9270_v7 = vld [vmem:[#allocation8 + $0x168] ss:$16 sps:$4 sm:$0xff]   ;;  %v9275_v8 = vld [vmem:[#allocation8 + $0x344] ss:$16 sps:$4 sm:$0xff]   ;;  %v9278_v62 = vld [vmem:[#allocation8 + $0x14c] ss:$16 sps:$4 sm:$0xff]  }
 0x2e7   :  { %5799 = vmatprep.subr.bf16.mxu0 %v9230_v31  ;;  %v9273_v31 = vld [vmem:[#allocation8 + $0x340] ss:$16 sps:$4 sm:$0xff]  }
 0x2e9   :  { %5737 = vmatpush1.bf16.msra.mxu1 %v9225_v10  ;;  %v9276_v10 = vld [vmem:[#allocation8 + $0x148] ss:$16 sps:$4 sm:$0xff]  }
 0x2ea   :  { %5800 = vmatpush1.bf16.msra.mxu0 %v9228_v28  ;;  %5738 = vmatprep.subr.bf16.mxu1 %v9233_v32  ;;  %v9281_v28 = vld [vmem:[#allocation8 + $0x324] ss:$16 sps:$4 sm:$0xff]   ;;  %v9284_v32 = vld [vmem:[#allocation8 + $0x12c] ss:$16 sps:$4 sm:$0xff]  }
 0x2eb   :  { %5801 = vmatprep.subr.bf16.mxu0 %v9236_v21  ;;  %v9279_v21 = vld [vmem:[#allocation8 + $0x320] ss:$16 sps:$4 sm:$0xff]  }
 0x2ed   :  { %5739 = vmatpush1.bf16.msra.mxu1 %v9231_v24  ;;  %v9282_v24 = vld [vmem:[#allocation8 + $0x128] ss:$16 sps:$4 sm:$0xff]  }
 0x2ee   :  { %5802 = vmatpush1.bf16.msra.mxu0 %v9234_v47  ;;  %5740 = vmatprep.subr.bf16.mxu1 %v9239_v29  ;;  %v9287_v47 = vld [vmem:[#allocation8 + $0x304] ss:$16 sps:$4 sm:$0xff]   ;;  %v9290_v29 = vld [vmem:[#allocation8 + $0x10c] ss:$16 sps:$4 sm:$0xff]  }
 0x2ef   :  { %5803 = vmatprep.subr.bf16.mxu0 %v9242_v34  ;;  %v9285_v34 = vld [vmem:[#allocation8 + $0x300] ss:$16 sps:$4 sm:$0xff]  }
 0x2f1   :  { %5741 = vmatpush1.bf16.msra.mxu1 %v9237_v61  ;;  %v9288_v61 = vld [vmem:[#allocation8 + $0x108] ss:$16 sps:$4 sm:$0xff]  }
 0x2f2   :  { %5804 = vmatpush1.bf16.msra.mxu0 %v9240_v43  ;;  %5742 = vmatprep.subr.bf16.mxu1 %v9245_v1  ;;  %v9293_v43 = vld [vmem:[#allocation8 + $0x2ec] ss:$16 sps:$4 sm:$0xff]   ;;  %v9296_v1 = vld [vmem:[#allocation8 + $0x8e4] ss:$16 sps:$4 sm:$0xff]  }
 0x2f3   :  { %5805 = vmatprep.subr.bf16.mxu0 %v9248_v60  ;;  %v9291_v60 = vld [vmem:[#allocation8 + $0x2e8] ss:$16 sps:$4 sm:$0xff]  }
 0x2f5   :  { %5743 = vmatpush2.bf16.msra.mxu1 %v9243_v30  ;;  %v9294_v30 = vld [vmem:[#allocation8 + $0x8e0] ss:$16 sps:$4 sm:$0xff]  }
 0x2f6   :  { %5806 = vmatpush2.bf16.msra.mxu0 %v9246_v11  ;;  %5744 = vmatprep.subr.bf16.mxu1 %v9251_v2  ;;  %v9299_v11 = vld [vmem:[#allocation8 + $0x2cc] ss:$16 sps:$4 sm:$0xff]   ;;  %v9302_v2 = vld [vmem:[#allocation8 + $0x8c4] ss:$16 sps:$4 sm:$0xff]  }
 0x2f7   :  { %5807 = vmatprep.subr.bf16.mxu0 %v9254_v56  ;;  %v9297_v56 = vld [vmem:[#allocation8 + $0x2c8] ss:$16 sps:$4 sm:$0xff]  }
 0x2f9   :  { %5745 = vmatpush2.bf16.msra.mxu1 %v9249_v4  ;;  %v9300_v4 = vld [vmem:[#allocation8 + $0x8c0] ss:$16 sps:$4 sm:$0xff]  }
 0x2fa   :  { %5808 = vmatpush2.bf16.msra.mxu0 %v9252_v38  ;;  %5746 = vmatprep.subr.bf16.mxu1 %v9257_v48  ;;  %v9305_v38 = vld [vmem:[#allocation8 + $0x2ac] ss:$16 sps:$4 sm:$0xff]   ;;  %v9308_v48 = vld [vmem:[#allocation8 + $0x8a4] ss:$16 sps:$4 sm:$0xff]  }
 0x2fb   :  { %5809 = vmatprep.subr.bf16.mxu0 %v9260_v36  ;;  %v9303_v36 = vld [vmem:[#allocation8 + $0x2a8] ss:$16 sps:$4 sm:$0xff]  }
 0x2fd   :  { %5747 = vmatpush2.bf16.msra.mxu1 %v9255_v40  ;;  %v9311_v40 = vld [vmem:[#allocation8 + $0x28c] ss:$16 sps:$4 sm:$0xff]  }
 0x2fe   :  { %5810 = vmatpush2.bf16.msra.mxu0 %v9258_v9  ;;  %5748 = vmatprep.subr.bf16.mxu1 %v9263_v14  ;;  %v9309_v9 = vld [vmem:[#allocation8 + $0x288] ss:$16 sps:$4 sm:$0xff]   ;;  %v9312_v14 = vld [vmem:[#allocation8 + $0x880] ss:$16 sps:$4 sm:$0xff]  }
 0x2ff   :  { %5811 = vmatprep.subr.bf16.mxu0 %v9266_v33  ;;  %v9317_v33 = vld [vmem:[#allocation8 + $0x26c] ss:$16 sps:$4 sm:$0xff]  }
 0x301   :  { %5749 = vmatpush2.bf16.msra.mxu1 %v9261_v46  ;;  %v9320_v46 = vld [vmem:[#allocation8 + $0x864] ss:$16 sps:$4 sm:$0xff]  }
 0x302   :  { %5812 = vmatpush2.bf16.msra.mxu0 %v9264_v58  ;;  %5750 = vmatprep.subr.bf16.mxu1 %v9269_v13  ;;  %v9315_v58 = vld [vmem:[#allocation8 + $0x268] ss:$16 sps:$4 sm:$0xff]   ;;  %v9323_v13 = vld [vmem:[#allocation8 + $0x24c] ss:$16 sps:$4 sm:$0xff]  }
 0x303   :  { %5813 = vmatprep.subr.bf16.mxu0 %v9272_v52 }
 0x305   :  { %5751 = vmatpush2.bf16.msra.mxu1 %v9267_v57  ;;  %v9321_v57 = vld [vmem:[#allocation8 + $0x248] ss:$16 sps:$4 sm:$0xff]  }
 0x306   :  { %5814 = vmatpush2.bf16.msra.mxu0 %v9270_v7  ;;  %5752 = vmatprep.subr.bf16.mxu1 %v9275_v8  ;;  %v9324_v7 = vld [vmem:[#allocation8 + $0x840] ss:$16 sps:$4 sm:$0xff]   ;;  %v9329_v8 = vld [vmem:[#allocation8 + $0x22c] ss:$16 sps:$4 sm:$0xff]  }
 0x307   :  { %5815 = vmatprep.subr.bf16.mxu0 %v9278_v62  ;;  %v9332_v62 = vld [vmem:[#allocation8 + $0x824] ss:$16 sps:$4 sm:$0xff]  }
 0x309   :  { %5753 = vmatpush2.bf16.msra.mxu1 %v9273_v31  ;;  %v9327_v31 = vld [vmem:[#allocation8 + $0x228] ss:$16 sps:$4 sm:$0xff]  }
 0x30a   :  { %5816 = vmatpush2.bf16.msra.mxu0 %v9276_v10  ;;  %5754 = vmatprep.subr.bf16.mxu1 %v9281_v28  ;;  %v9335_v10 = vld [vmem:[#allocation8 + $0x20c] ss:$16 sps:$4 sm:$0xff]   ;;  %v9333_v28 = vld [vmem:[#allocation8 + $0x208] ss:$16 sps:$4 sm:$0xff]  }
 0x30b   :  { %5817 = vmatprep.subr.bf16.mxu0 %v9284_v32  ;;  %v9336_v32 = vld [vmem:[#allocation8 + $0x800] ss:$16 sps:$4 sm:$0xff]  }
 0x30d   :  { %5755 = vmatpush2.bf16.msra.mxu1 %v9279_v21  ;;  %v9341_v21 = vld [vmem:[#allocation8 + $0x3ec] ss:$16 sps:$4 sm:$0xff]  }
 0x30e   :  { %5818 = vmatpush2.bf16.msra.mxu0 %v9282_v24  ;;  %5756 = vmatprep.subr.bf16.mxu1 %v9287_v47  ;;  %v9344_v24 = vld [vmem:[#allocation8 + $0x9e4] ss:$16 sps:$4 sm:$0xff]   ;;  %v9339_v47 = vld [vmem:[#allocation8 + $0x3e8] ss:$16 sps:$4 sm:$0xff]  }
 0x30f   :  { %5819 = vmatprep.subr.bf16.mxu0 %v9290_v29  ;;  %v9342_v29 = vld [vmem:[#allocation8 + $0x9e0] ss:$16 sps:$4 sm:$0xff]  }
 0x311   :  { %5757 = vmatpush2.bf16.msra.mxu1 %v9285_v34  ;;  %v9347_v34 = vld [vmem:[#allocation8 + $0x3cc] ss:$16 sps:$4 sm:$0xff]  }
 0x312   :  { %5820 = vmatpush2.bf16.msra.mxu0 %v9288_v61  ;;  %5852 = vmatprep.subr.bf16.mxu1 %v9293_v43  ;;  %v9350_v61 = vld [vmem:[#allocation8 + $0x9c4] ss:$16 sps:$4 sm:$0xff]   ;;  %v9345_v43 = vld [vmem:[#allocation8 + $0x3c8] ss:$16 sps:$4 sm:$0xff]  }
 0x313   :  { %6696 = vmatprep.subr.bf16.mxu0 %v9296_v1  ;;  %v9348_v1 = vld [vmem:[#allocation8 + $0x9c0] ss:$16 sps:$4 sm:$0xff]  }
 0x314   :  { %8028 = vmatmul.mubr.msk.bf16.vlgmr.msra.gmra.mxu1 %vm9918_vm3, %v10707_v44 }
 0x315   :  { %8058 = vmatmul.mubr.msk.bf16.vlgmr.msra.gmra.mxu0 %vm9918_vm3, %v10576_v41  ;;  %8033 = vmatprep.mubr.msk.bf16.mxu1 %vm9999_vm6, %v10780_v6  ;;  %v9306_v41 = vld [vmem:[#allocation8 + $0x8a0] ss:$16 sps:$4 sm:$0xff]  }
 0x316   :  { %8063 = vmatprep.mubr.msk.bf16.mxu0 %vm9999_vm6, %v10629_v5  ;;  %5853 = vmatpush1.bf16.msra.mxu1 %v9291_v60  ;;  %v9314_v5 = vld [vmem:[#allocation8 + $0x884] ss:$16 sps:$4 sm:$0xff]   ;;  %v9353_v60 = vld [vmem:[#allocation8 + $0x3ac] ss:$16 sps:$4 sm:$0xff]  }
 0x317   :  { %6697 = vmatpush1.bf16.msra.mxu0 %v9294_v30  ;;  %5854 = vmatprep.subr.bf16.mxu1 %v9299_v11  ;;  %v9356_v30 = vld [vmem:[#allocation8 + $0x9a4] ss:$16 sps:$4 sm:$0xff]   ;;  %v9351_v11 = vld [vmem:[#allocation8 + $0x3a8] ss:$16 sps:$4 sm:$0xff]  }
 0x318   :  { %6698 = vmatprep.subr.bf16.mxu0 %v9302_v2  ;;  %v9354_v2 = vld [vmem:[#allocation8 + $0x9a0] ss:$16 sps:$4 sm:$0xff]  }
 0x31a   :  { %5855 = vmatpush1.bf16.msra.mxu1 %v9297_v56  ;;  %v9359_v56 = vld [vmem:[#allocation8 + $0x38c] ss:$16 sps:$4 sm:$0xff]  }
 0x31b   :  { %6699 = vmatpush1.bf16.msra.mxu0 %v9300_v4  ;;  %5856 = vmatprep.subr.bf16.mxu1 %v9305_v38  ;;  %v9362_v4 = vld [vmem:[#allocation8 + $0x984] ss:$16 sps:$4 sm:$0xff]   ;;  %v4805_v38 = vpop.f32.mrf.mxu0 }
 0x31c   :  { %8038 = vmatmul.mubr.msk.bf16.gmra.mxu1 %vm9999_vm6, %v10790_v16  ;;  %6700 = vmatprep.subr.bf16.mxu0 %v9308_v48  ;;  %v9357_v48 = vld [vmem:[#allocation8 + $0x388] ss:$16 sps:$4 sm:$0xff]  }
 0x31d   :  { %8068 = vmatmul.mubr.msk.bf16.gmra.mxu0 %vm9999_vm6, %v10631_v15  ;;  %8043 = vmatprep.mubr.msk.bf16.mxu1 %vm10054_vm9, %v10813_v37  ;;  %v9318_v15 = vld [vmem:[#allocation8 + $0x860] ss:$16 sps:$4 sm:$0xff]  }
 0x31e   :  { %8073 = vmatprep.mubr.msk.bf16.mxu0 %vm10054_vm9, %v10658_v25  ;;  %5857 = vmatpush1.bf16.msra.mxu1 %v9303_v36  ;;  %v9326_v25 = vld [vmem:[#allocation8 + $0x844] ss:$16 sps:$4 sm:$0xff]   ;;  %v9360_v36 = vld [vmem:[#allocation8 + $0x980] ss:$16 sps:$4 sm:$0xff]  }
 0x31f   :  { %6701 = vmatpush1.bf16.msra.mxu0 %v9306_v41  ;;  %5858 = vmatprep.subr.bf16.mxu1 %v9311_v40  ;;  %v9365_v41 = vld [vmem:[#allocation8 + $0x36c] ss:$16 sps:$4 sm:$0xff]   ;;  %v9368_v40 = vld [vmem:[#allocation8 + $0x964] ss:$16 sps:$4 sm:$0xff]  }
 0x320   :  { %6702 = vmatprep.subr.bf16.mxu0 %v9314_v5  ;;  %v4807_v5 = vpop.f32.mrf.mxu0 }
 0x322   :  { %5859 = vmatpush1.bf16.msra.mxu1 %v9309_v9  ;;  %v9363_v9 = vld [vmem:[#allocation8 + $0x368] ss:$16 sps:$4 sm:$0xff]  }
 0x323   :  { %6703 = vmatpush1.bf16.msra.mxu0 %v9312_v14  ;;  %5860 = vmatprep.subr.bf16.mxu1 %v9317_v33  ;;  %v9366_v14 = vld [vmem:[#allocation8 + $0x960] ss:$16 sps:$4 sm:$0xff]   ;;  %v9371_v33 = vld [vmem:[#allocation8 + $0x34c] ss:$16 sps:$4 sm:$0xff]  }
 0x324   :  { %8048 = vmatmul.mubr.msk.bf16.gmra.mxu1 %vm10054_vm9, %v10815_v18  ;;  %6704 = vmatprep.subr.bf16.mxu0 %v9320_v46  ;;  %v9374_v46 = vld [vmem:[#allocation8 + $0x944] ss:$16 sps:$4 sm:$0xff]  }
 0x325   :  { %8078 = vmatmul.mubr.msk.bf16.gmra.mxu0 %vm10054_vm9, %v10660_v22  ;;  %8083 = vmatprep.mubr.msk.bf16.mxu1 %vm9918_vm3, %v10735_v39  ;;  %v9330_v22 = vld [vmem:[#allocation8 + $0x820] ss:$16 sps:$4 sm:$0xff]   ;;  %v9338_v39 = vld [vmem:[#allocation8 + $0x804] ss:$16 sps:$4 sm:$0xff]  }
 0x326   :  { %5861 = vmatpush1.bf16.msra.mxu1 %v9315_v58  ;;  %8241 = vmatprep.mubr.msk.bf16.mxu0 %vm10134_vm12, %v10640_v0  ;;  %v4809_v58 = vpop.f32.mrf.mxu0 }
 0x327   :  { %6705 = vmatpush1.bf16.msra.mxu0 %v9318_v15  ;;  %5862 = vmatprep.subr.bf16.mxu1 %v9323_v13  ;;  %v9369_v15 = vld [vmem:[#allocation8 + $0x348] ss:$16 sps:$4 sm:$0xff]   ;;  %v9372_v13 = vld [vmem:[#allocation8 + $0x940] ss:$16 sps:$4 sm:$0xff]  }
 0x328   :  { %6706 = vmatprep.subr.bf16.mxu0 %v9326_v25  ;;  %v9377_v25 = vld [vmem:[#allocation8 + $0x32c] ss:$16 sps:$4 sm:$0xff]  }
 0x32a   :  { %5863 = vmatpush1.bf16.msra.mxu1 %v9321_v57  ;;  %v9380_v57 = vld [vmem:[#allocation8 + $0x924] ss:$16 sps:$4 sm:$0xff]  }
 0x32b   :  { %6707 = vmatpush1.bf16.msra.mxu0 %v9324_v7  ;;  %5864 = vmatprep.subr.bf16.mxu1 %v9329_v8  ;;  %v4811_v7 = vpop.f32.mrf.mxu0  ;;  %v9375_v8 = vld [vmem:[#allocation8 + $0x328] ss:$16 sps:$4 sm:$0xff]  }
 0x32c   :  { %6708 = vmatprep.subr.bf16.mxu0 %v9332_v62  ;;  %v9378_v62 = vld [vmem:[#allocation8 + $0x920] ss:$16 sps:$4 sm:$0xff]  }
 0x32e   :  { %5865 = vmatpush1.bf16.msra.mxu1 %v9327_v31  ;;  %v9383_v31 = vld [vmem:[#allocation8 + $0x30c] ss:$16 sps:$4 sm:$0xff]  }
 0x32f   :  { %6709 = vmatpush1.bf16.msra.mxu0 %v9330_v22  ;;  %5866 = vmatprep.subr.bf16.mxu1 %v9335_v10  ;;  %v9386_v22 = vld [vmem:[#allocation8 + $0x904] ss:$16 sps:$4 sm:$0xff]   ;;  %v4815_v10 = vpop.f32.mrf.mxu0 }
 0x330   :  { %6710 = vmatprep.subr.bf16.mxu0 %v9338_v39  ;;  %v9381_v39 = vld [vmem:[#allocation8 + $0x308] ss:$16 sps:$4 sm:$0xff]  }
 0x332   :  { %5867 = vmatpush1.bf16.msra.mxu1 %v9333_v28  ;;  %v9384_v28 = vld [vmem:[#allocation8 + $0x900] ss:$16 sps:$4 sm:$0xff]  }
 0x333   :  { %6711 = vmatpush1.bf16.msra.mxu0 %v9336_v32  ;;  %5868 = vmatprep.subr.bf16.mxu1 %v9341_v21  ;;  %v9389_v32 = vld [vmem:[#allocation8 + $0xae4] ss:$16 sps:$4 sm:$0xff]   ;;  %v9392_v21 = vld [vmem:[#allocation8 + $0x8ec] ss:$16 sps:$4 sm:$0xff]  }
 0x334   :  { %6712 = vmatprep.subr.bf16.mxu0 %v9344_v24  ;;  %v4817_v24 = vpop.f32.mrf.mxu0 }
 0x336   :  { %5869 = vmatpush2.bf16.msra.mxu1 %v9339_v47  ;;  %v9387_v47 = vld [vmem:[#allocation8 + $0xae0] ss:$16 sps:$4 sm:$0xff]  }
 0x337   :  { %6713 = vmatpush2.bf16.msra.mxu0 %v9342_v29  ;;  %5870 = vmatprep.subr.bf16.mxu1 %v9347_v34  ;;  %v9390_v34 = vld [vmem:[#allocation8 + $0x8e8] ss:$16 sps:$4 sm:$0xff]  }
 0x338   :  { %6714 = vmatprep.subr.bf16.mxu0 %v9350_v61 }
 0x33a   :  { %5871 = vmatpush2.bf16.msra.mxu1 %v9345_v43  ;;  %v9395_v43 = vld [vmem:[#allocation8 + $0xac4] ss:$16 sps:$4 sm:$0xff]  }
 0x33b   :  { %6715 = vmatpush2.bf16.msra.mxu0 %v9348_v1  ;;  %5872 = vmatprep.subr.bf16.mxu1 %v9353_v60  ;;  %v4819_v1 = vpop.f32.mrf.mxu0 }
 0x33c   :  { %6716 = vmatprep.subr.bf16.mxu0 %v9356_v30  ;;  %v9398_v30 = vld [vmem:[#allocation8 + $0x8cc] ss:$16 sps:$4 sm:$0xff]  }
 0x33e   :  { %5873 = vmatpush2.bf16.msra.mxu1 %v9351_v11 }
 0x33f   :  { %6717 = vmatpush2.bf16.msra.mxu0 %v9354_v2  ;;  %5874 = vmatprep.subr.bf16.mxu1 %v9359_v56  ;;  %v9393_v56 = vld [vmem:[#allocation8 + $0xac0] ss:$16 sps:$4 sm:$0xff]  }
 0x340   :  { %6718 = vmatprep.subr.bf16.mxu0 %v9362_v4 }
 0x342   :  { %5875 = vmatpush2.bf16.msra.mxu1 %v9357_v48  ;;  %v4821_v48 = vpop.f32.mrf.mxu0 }
 0x343   :  { %6719 = vmatpush2.bf16.msra.mxu0 %v9360_v36  ;;  %5876 = vmatprep.subr.bf16.mxu1 %v9365_v41  ;;  %v9404_v41 = vld [vmem:[#allocation8 + $0x8ac] ss:$16 sps:$4 sm:$0xff]  }
 0x344   :  { %6720 = vmatprep.subr.bf16.mxu0 %v9368_v40  ;;  %v9399_v40 = vld [vmem:[#allocation8 + $0xaa0] ss:$16 sps:$4 sm:$0xff]  }
 0x346   :  { %5877 = vmatpush2.bf16.msra.mxu1 %v9363_v9  ;;  %v9402_v9 = vld [vmem:[#allocation8 + $0x8a8] ss:$16 sps:$4 sm:$0xff]  }
 0x347   :  { %6721 = vmatpush2.bf16.msra.mxu0 %v9366_v14  ;;  %5878 = vmatprep.subr.bf16.mxu1 %v9371_v33  ;;  %v9407_v33 = vld [vmem:[#allocation8 + $0xa84] ss:$16 sps:$4 sm:$0xff]  }
 0x348   :  { %6722 = vmatprep.subr.bf16.mxu0 %v9374_v46  ;;  %v4825_v46 = vpop.f32.mrf.mxu0 }
 0x34a   :  { %5879 = vmatpush2.bf16.msra.mxu1 %v9369_v15  ;;  %v9410_v15 = vld [vmem:[#allocation8 + $0x88c] ss:$16 sps:$4 sm:$0xff]  }
 0x34b   :  { %6723 = vmatpush2.bf16.msra.mxu0 %v9372_v13  ;;  %5880 = vmatprep.subr.bf16.mxu1 %v9377_v25 }
 0x34c   :  { %6724 = vmatprep.subr.bf16.mxu0 %v9380_v57  ;;  %v9408_v57 = vld [vmem:[#allocation8 + $0x888] ss:$16 sps:$4 sm:$0xff]  }
 0x34e   :  { %5881 = vmatpush2.bf16.msra.mxu1 %v9375_v8  ;;  %v9413_v8 = vld [vmem:[#allocation8 + $0xa64] ss:$16 sps:$4 sm:$0xff]  }
 0x34f   :  { %6725 = vmatpush2.bf16.msra.mxu0 %v9378_v62  ;;  %5882 = vmatprep.subr.bf16.mxu1 %v9383_v31  ;;  %v4827_v62 = vpop.f32.mrf.mxu0 }
 0x350   :  { %6726 = vmatprep.subr.bf16.mxu0 %v9386_v22  ;;  %v9416_v22 = vld [vmem:[#allocation8 + $0x86c] ss:$16 sps:$4 sm:$0xff]  }
 0x352   :  { %5883 = vmatpush2.bf16.msra.mxu1 %v9381_v39 }
 0x353   :  { %6727 = vmatpush2.bf16.msra.mxu0 %v9384_v28  ;;  %6759 = vmatprep.subr.bf16.mxu1 %v9389_v32  ;;  %v4868_v29 = vpop.f32.mrf.mxu1  ;;  %v9414_v28 = vld [vmem:[#allocation8 + $0x868] ss:$16 sps:$4 sm:$0xff]  }
 0x354   :  { %6822 = vmatprep.subr.bf16.mxu0 %v9392_v21  ;;  %v10898_v61 = vadd.f32 %v4868_v29, %v4805_v38  ;;  %v9401_v38 = vld [vmem:[#allocation8 + $0xaa4] ss:$16 sps:$4 sm:$0xff]   ;;  %v9422_v29 = vld [vmem:[#allocation8 + $0x84c] ss:$16 sps:$4 sm:$0xff]  }
 0x355   :  { %8088 = vmatmul.mubr.msk.bf16.vlgmr.msra.gmra.mxu1 %vm9918_vm3, %v10707_v44  ;;  %v4870_v60 = vpop.f32.mrf.mxu1  ;;  %v9396_v44 = vld [vmem:[#allocation8 + $0x8c8] ss:$16 sps:$4 sm:$0xff]   ;;  %v9419_v21 = vld [vmem:[#allocation8 + $0xa44] ss:$16 sps:$4 sm:$0xff]  }
 0x356   :  { %8246 = vmatmul.mubr.msk.bf16.vlgmr.msra.gmra.mxu0 %vm10134_vm12, %v10604_v63  ;;  %8093 = vmatprep.mubr.msk.bf16.mxu1 %vm9999_vm6, %v10780_v6  ;;  %v10909_v11 = vadd.f32 %v4870_v60, %v4807_v5  ;;  %v9425_v60 = vld [vmem:[#allocation8 + $0xa24] ss:$16 sps:$4 sm:$0xff]  }
 0x357   :  { %8251 = vmatprep.mubr.msk.bf16.mxu0 %vm10224_vm1, %v10648_v27  ;;  %6760 = vmatpush1.bf16.msra.mxu1 %v9387_v47  ;;  %v4872_v53 = vpop.f32.mrf.mxu1 }
 0x358   :  { %6823 = vmatpush1.bf16.msra.mxu0 %v9390_v34  ;;  %6761 = vmatprep.subr.bf16.mxu1 %v9395_v43  ;;  %v10914_v4 = vadd.f32 %v4872_v53, %v4809_v58  ;;  %v9420_v43 = vld [vmem:[#allocation8 + $0x848] ss:$16 sps:$4 sm:$0xff]   ;;  %v9428_v53 = vld [vmem:[#allocation8 + $0x82c] ss:$16 sps:$4 sm:$0xff]  }
 0x359   :  { %6824 = vmatprep.subr.bf16.mxu0 %v9398_v30  ;;  %v4874_v36 = vpop.f32.mrf.mxu1 }
 0x35a   :  { %v10916_v6 = vadd.f32 %v4874_v36, %v4811_v7  ;;  %v9434_v36 = vld [vmem:[#allocation8 + $0x80c] ss:$16 sps:$4 sm:$0xff]  }
 0x35b   :  { %6762 = vmatpush1.bf16.msra.mxu1 %v9393_v56  ;;  %v4878_v5 = vpop.f32.mrf.mxu1 }
 0x35c   :  { %6825 = vmatpush1.bf16.msra.mxu0 %v9396_v44  ;;  %6763 = vmatprep.subr.bf16.mxu1 %v9401_v38  ;;  %v10918_v14 = vadd.f32 %v4878_v5, %v4815_v10  ;;  %v9411_v10 = vld [vmem:[#allocation8 + $0xa60] ss:$16 sps:$4 sm:$0xff]   ;;  %v9437_v5 = vld [vmem:[#allocation8 + $0xbe4] ss:$16 sps:$4 sm:$0xff]  }
 0x35d   :  { %8098 = vmatmul.mubr.msk.bf16.gmra.mxu1 %vm9999_vm6, %v10790_v16  ;;  %6826 = vmatprep.subr.bf16.mxu0 %v9404_v41  ;;  %v4880_v58 = vpop.f32.mrf.mxu1  ;;  %v9423_v38 = vld [vmem:[#allocation8 + $0xa20] ss:$16 sps:$4 sm:$0xff]  }
 0x35e   :  { %8256 = vmatmul.mubr.msk.bf16.gmra.mxu0 %vm10224_vm1, %v10662_v23  ;;  %8103 = vmatprep.mubr.msk.bf16.mxu1 %vm10054_vm9, %v10813_v37  ;;  %v10929_v13 = vadd.f32 %v4880_v58, %v4817_v24  ;;  %v4829_v24 = vpop.f32.mrf.mxu0  ;;  %v9429_v41 = vld [vmem:[#allocation8 + $0xa00] ss:$16 sps:$4 sm:$0xff]   ;;  %v9443_v58 = vld [vmem:[#allocation8 + $0xbc4] ss:$16 sps:$4 sm:$0xff]  }
 0x35f   :  { %8261 = vmatprep.mubr.msk.bf16.mxu0 %vm10292_vm5, %v10667_v49  ;;  %6764 = vmatpush1.bf16.msra.mxu1 %v9399_v40  ;;  %v4882_v16 = vpop.f32.mrf.mxu1  ;;  %v9432_v40 = vld [vmem:[#allocation8 + $0x808] ss:$16 sps:$4 sm:$0xff]  }
 0x360   :  { %6827 = vmatpush1.bf16.msra.mxu0 %v9402_v9  ;;  %6765 = vmatprep.subr.bf16.mxu1 %v9407_v33  ;;  %v10934_v7 = vadd.f32 %v4882_v16, %v4819_v1  ;;  %v4831_v30 = vpop.f32.mrf.mxu0  ;;  %v9440_v9 = vld [vmem:[#allocation8 + $0x9ec] ss:$16 sps:$4 sm:$0xff]   ;;  %v9435_v33 = vld [vmem:[#allocation8 + $0xbe0] ss:$16 sps:$4 sm:$0xff]   ;;  %v9444_v16 = vld [vmem:[#allocation8 + $0x9c8] ss:$16 sps:$4 sm:$0xff]  }
 0x361   :  { %6828 = vmatprep.subr.bf16.mxu0 %v9410_v15  ;;  %v4884_v31 = vpop.f32.mrf.mxu1  ;;  %v9446_v15 = vld [vmem:[#allocation8 + $0x9cc] ss:$16 sps:$4 sm:$0xff]  }
 0x362   :  { %v10936_v37 = vadd.f32 %v4884_v31, %v4821_v48  ;;  %v9426_v48 = vld [vmem:[#allocation8 + $0x828] ss:$16 sps:$4 sm:$0xff]   ;;  %v9447_v31 = vld [vmem:[#allocation8 + $0xba0] ss:$16 sps:$4 sm:$0xff]  }
 0x363   :  { %6766 = vmatpush1.bf16.msra.mxu1 %v9405_v17  ;;  %v4888_v39 = vpop.f32.mrf.mxu1  ;;  %v9441_v17 = vld [vmem:[#allocation8 + $0xbc0] ss:$16 sps:$4 sm:$0xff]  }
 0x364   :  { %6829 = vmatpush1.bf16.msra.mxu0 %v9408_v57  ;;  %6767 = vmatprep.subr.bf16.mxu1 %v9413_v8  ;;  %v10938_v32 = vadd.f32 %v4888_v39, %v4825_v46  ;;  %v9438_v46 = vld [vmem:[#allocation8 + $0x9e8] ss:$16 sps:$4 sm:$0xff]   ;;  %v9449_v57 = vld [vmem:[#allocation8 + $0xba4] ss:$16 sps:$4 sm:$0xff]   ;;  %v4931_v8 = vpop.f32.mrf.mxu0 }
 0x365   :  { %8108 = vmatmul.mubr.msk.bf16.gmra.mxu1 %vm10054_vm9, %v10815_v18  ;;  %6830 = vmatprep.subr.bf16.mxu0 %v9416_v22  ;;  %v4890_v47 = vpop.f32.mrf.mxu1  ;;  %v9450_v22 = vld [vmem:[#allocation8 + $0x9a8] ss:$16 sps:$4 sm:$0xff]  }
 0x366   :  { %8266 = vmatmul.mubr.msk.bf16.gmra.mxu0 %vm10292_vm5, %v10669_v51  ;;  %8271 = vmatprep.mubr.msk.bf16.mxu1 %vm10134_vm12, %v10804_v55  ;;  %v10949_v34 = vadd.f32 %v4890_v47, %v4827_v62  ;;  %v9452_v62 = vld [vmem:[#allocation8 + $0x9ac] ss:$16 sps:$4 sm:$0xff]   ;;  %v4933_v39 = vpop.f32.mrf.mxu0  ;;  %v9461_v47 = vld [vmem:[#allocation8 + $0xb64] ss:$16 sps:$4 sm:$0xff]  }
 0x367   :  { %6768 = vmatpush1.bf16.msra.mxu1 %v9411_v10  ;;  %8301 = vmatprep.mubr.msk.bf16.mxu0 %vm10134_vm12, %v10640_v0  ;;  %v4892_v18 = vpop.f32.mrf.mxu1  ;;  %v9431_v0 = vld [vmem:[#allocation8 + $0xa04] ss:$16 sps:$4 sm:$0xff]  }
 0x368   :  { %6831 = vmatpush1.bf16.msra.mxu0 %v9414_v28  ;;  %6769 = vmatprep.subr.bf16.mxu1 %v9419_v21  ;;  %v10954_v1 = vadd.f32 %v4892_v18, %v4829_v24  ;;  %v9455_v10 = vld [vmem:[#allocation8 + $0xb84] ss:$16 sps:$4 sm:$0xff]   ;;  %v9458_v28 = vld [vmem:[#allocation8 + $0x98c] ss:$16 sps:$4 sm:$0xff]   ;;  %v9453_v21 = vld [vmem:[#allocation8 + $0xb80] ss:$16 sps:$4 sm:$0xff]  }
 0x369   :  { %6832 = vmatprep.subr.bf16.mxu0 %v9422_v29  ;;  %v4894_v56 = vpop.f32.mrf.mxu1  ;;  %v9456_v24 = vld [vmem:[#allocation8 + $0x988] ss:$16 sps:$4 sm:$0xff]   ;;  %v4935_v29 = vpop.f32.mrf.mxu0  ;;  %v9459_v18 = vld [vmem:[#allocation8 + $0xb60] ss:$16 sps:$4 sm:$0xff]  }
 0x36a   :  { %v10956_v44 = vadd.f32 %v4894_v56, %v4831_v30  ;;  %v9470_v56 = vld [vmem:[#allocation8 + $0x94c] ss:$16 sps:$4 sm:$0xff]  }
 0x36b   :  { %6770 = vmatpush1.bf16.msra.mxu1 %v9417_v35  ;;  %v9464_v35 = vld [vmem:[#allocation8 + $0x96c] ss:$16 sps:$4 sm:$0xff]   ;;  %v4937_v30 = vpop.f32.mrf.mxu0 }
 0x36c   :  { %6833 = vmatpush1.bf16.msra.mxu0 %v9420_v43  ;;  %6771 = vmatprep.subr.bf16.mxu1 %v9425_v60  ;;  %v9462_v43 = vld [vmem:[#allocation8 + $0x968] ss:$16 sps:$4 sm:$0xff]   ;;  %v9467_v60 = vld [vmem:[#allocation8 + $0xb44] ss:$16 sps:$4 sm:$0xff]  }
 0x36d   :  { %6834 = vmatprep.subr.bf16.mxu0 %v9428_v53  ;;  %v9465_v53 = vld [vmem:[#allocation8 + $0xb40] ss:$16 sps:$4 sm:$0xff]  }
 0x36f   :  { %6772 = vmatpush1.bf16.msra.mxu1 %v9423_v38  ;;  %v9468_v38 = vld [vmem:[#allocation8 + $0x948] ss:$16 sps:$4 sm:$0xff]  }
 0x370   :  { %6835 = vmatpush1.bf16.msra.mxu0 %v9426_v48  ;;  %6773 = vmatprep.subr.bf16.mxu1 %v9431_v0  ;;  %v9473_v48 = vld [vmem:[#allocation8 + $0xb24] ss:$16 sps:$4 sm:$0xff]   ;;  %v4941_v0 = vpop.f32.mrf.mxu0 }
 0x371   :  { %6836 = vmatprep.subr.bf16.mxu0 %v9434_v36  ;;  %v9476_v36 = vld [vmem:[#allocation8 + $0x92c] ss:$16 sps:$4 sm:$0xff]  }
 0x373   :  { %6774 = vmatpush1.bf16.msra.mxu1 %v9429_v41  ;;  %v9471_v41 = vld [vmem:[#allocation8 + $0xb20] ss:$16 sps:$4 sm:$0xff]  }
 0x374   :  { %6837 = vmatpush1.bf16.msra.mxu0 %v9432_v40  ;;  %6775 = vmatprep.subr.bf16.mxu1 %v9437_v5  ;;  %v9474_v40 = vld [vmem:[#allocation8 + $0x928] ss:$16 sps:$4 sm:$0xff]   ;;  %v9479_v5 = vld [vmem:[#allocation8 + $0xb04] ss:$16 sps:$4 sm:$0xff]  }
 0x375   :  { %6838 = vmatprep.subr.bf16.mxu0 %v9440_v9  ;;  %v4943_v9 = vpop.f32.mrf.mxu0 }
 0x377   :  { %6776 = vmatpush2.bf16.msra.mxu1 %v9435_v33  ;;  %v9482_v33 = vld [vmem:[#allocation8 + $0x90c] ss:$16 sps:$4 sm:$0xff]  }
 0x378   :  { %6839 = vmatpush2.bf16.msra.mxu0 %v9438_v46  ;;  %6777 = vmatprep.subr.bf16.mxu1 %v9443_v58  ;;  %v9477_v46 = vld [vmem:[#allocation8 + $0xb00] ss:$16 sps:$4 sm:$0xff]   ;;  %v9480_v58 = vld [vmem:[#allocation8 + $0x908] ss:$16 sps:$4 sm:$0xff]  }
 0x379   :  { %6840 = vmatprep.subr.bf16.mxu0 %v9446_v15  ;;  %v9485_v15 = vld [vmem:[#allocation8 + $0xaec] ss:$16 sps:$4 sm:$0xff]  }
 0x37b   :  { %6778 = vmatpush2.bf16.msra.mxu1 %v9441_v17  ;;  %v4945_v17 = vpop.f32.mrf.mxu0 }
 0x37c   :  { %6841 = vmatpush2.bf16.msra.mxu0 %v9444_v16  ;;  %6779 = vmatprep.subr.bf16.mxu1 %v9449_v57 }
 0x37d   :  { %6842 = vmatprep.subr.bf16.mxu0 %v9452_v62  ;;  %v9483_v62 = vld [vmem:[#allocation8 + $0xae8] ss:$16 sps:$4 sm:$0xff]  }
 0x37f   :  { %6780 = vmatpush2.bf16.msra.mxu1 %v9447_v31  ;;  %v4947_v31 = vpop.f32.mrf.mxu0 }
 0x380   :  { %6843 = vmatpush2.bf16.msra.mxu0 %v9450_v22  ;;  %6781 = vmatprep.subr.bf16.mxu1 %v9455_v10  ;;  %v9488_v10 = vld [vmem:[#allocation8 + $0xacc] ss:$16 sps:$4 sm:$0xff]  }
 0x381   :  { %6844 = vmatprep.subr.bf16.mxu0 %v9458_v28 }
 0x383   :  { %6782 = vmatpush2.bf16.msra.mxu1 %v9453_v21 }
 0x384   :  { %6845 = vmatpush2.bf16.msra.mxu0 %v9456_v24  ;;  %6783 = vmatprep.subr.bf16.mxu1 %v9461_v47  ;;  %v9486_v24 = vld [vmem:[#allocation8 + $0xac8] ss:$16 sps:$4 sm:$0xff]   ;;  %v4951_v47 = vpop.f32.mrf.mxu0 }
 0x385   :  { %6846 = vmatprep.subr.bf16.mxu0 %v9464_v35  ;;  %v9491_v35 = vld [vmem:[#allocation8 + $0xaac] ss:$16 sps:$4 sm:$0xff]  }
 0x387   :  { %6784 = vmatpush2.bf16.msra.mxu1 %v9459_v18 }
 0x388   :  { %6847 = vmatpush2.bf16.msra.mxu0 %v9462_v43  ;;  %6785 = vmatprep.subr.bf16.mxu1 %v9467_v60  ;;  %v9489_v60 = vld [vmem:[#allocation8 + $0xaa8] ss:$16 sps:$4 sm:$0xff]  }
 0x389   :  { %6848 = vmatprep.subr.bf16.mxu0 %v9470_v56  ;;  %v4953_v56 = vpop.f32.mrf.mxu0 }
 0x38b   :  { %6786 = vmatpush2.bf16.msra.mxu1 %v9465_v53 }
 0x38c   :  { %6849 = vmatpush2.bf16.msra.mxu0 %v9468_v38  ;;  %6787 = vmatprep.subr.bf16.mxu1 %v9473_v48  ;;  %v9494_v38 = vld [vmem:[#allocation8 + $0xa8c] ss:$16 sps:$4 sm:$0xff]   ;;  %v9492_v48 = vld [vmem:[#allocation8 + $0xa88] ss:$16 sps:$4 sm:$0xff]  }
 0x38d   :  { %6850 = vmatprep.subr.bf16.mxu0 %v9476_v36 }
 0x38f   :  { %6788 = vmatpush2.bf16.msra.mxu1 %v9471_v41  ;;  %v9497_v41 = vld [vmem:[#allocation8 + $0xa6c] ss:$16 sps:$4 sm:$0xff]  }
 0x390   :  { %6851 = vmatpush2.bf16.msra.mxu0 %v9474_v40  ;;  %6789 = vmatprep.subr.bf16.mxu1 %v9479_v5 }
 0x391   :  { %6852 = vmatprep.subr.bf16.mxu0 %v9482_v33 }
 0x393   :  { %6790 = vmatpush2.bf16.msra.mxu1 %v9477_v46  ;;  %v4994_v16 = vpop.f32.mrf.mxu1 }
 0x394   :  { %6853 = vmatpush2.bf16.msra.mxu0 %v9480_v58  ;;  %v10958_v57 = vadd.f32 %v4994_v16, %v4931_v8  ;;  %6885 = vmatprep.subr.bf16.mxu1 %v9485_v15  ;;  %v9500_v58 = vld [vmem:[#allocation8 + $0xa4c] ss:$16 sps:$4 sm:$0xff]  }
 0x395   :  { %v4996_v22 = vpop.f32.mrf.mxu1 }
 0x396   :  { %8276 = vmatmul.mubr.msk.bf16.vlgmr.msra.gmra.mxu1 %vm10134_vm12, %v10741_v3  ;;  %v10963_v28 = vadd.f32 %v4996_v22, %v4933_v39  ;;  %v9503_v22 = vld [vmem:[#allocation8 + $0xa2c] ss:$16 sps:$4 sm:$0xff]  }
 0x397   :  { %8306 = vmatmul.mubr.msk.bf16.vlgmr.msra.gmra.mxu0 %vm10134_vm12, %v10604_v63  ;;  %8281 = vmatprep.mubr.msk.bf16.mxu1 %vm10224_vm1, %v10810_v54  ;;  %v4998_v8 = vpop.f32.mrf.mxu1 }
 0x398   :  { %8311 = vmatprep.mubr.msk.bf16.mxu0 %vm10224_vm1, %v10648_v27  ;;  %6886 = vmatpush1.bf16.msra.mxu1 %v9483_v62  ;;  %v10974_v21 = vadd.f32 %v4998_v8, %v4935_v29  ;;  %v9498_v62 = vld [vmem:[#allocation8 + $0xa48] ss:$16 sps:$4 sm:$0xff]  }
 0x399   :  { %6887 = vmatprep.subr.bf16.mxu1 %v9488_v10  ;;  %v5000_v39 = vpop.f32.mrf.mxu1 }
 0x39a   :  { %v10976_v18 = vadd.f32 %v5000_v39, %v4937_v30  ;;  %v9509_v39 = vld [vmem:[#allocation8 + $0xbec] ss:$16 sps:$4 sm:$0xff]  }
 0x39b   :  { %v5004_v63 = vpop.f32.mrf.mxu1 }
 0x39c   :  { %6888 = vmatpush1.bf16.msra.mxu1 %v9486_v24  ;;  %v10978_v43 = vadd.f32 %v5004_v63, %v4941_v0  ;;  %v4955_v0 = vpop.f32.mrf.mxu0  ;;  %v9501_v24 = vld [vmem:[#allocation8 + $0xa28] ss:$16 sps:$4 sm:$0xff]  }
 0x39d   :  { %6889 = vmatprep.subr.bf16.mxu1 %v9491_v35  ;;  %v5006_v53 = vpop.f32.mrf.mxu1  ;;  %v9507_v63 = vld [vmem:[#allocation8 + $0xbe8] ss:$16 sps:$4 sm:$0xff]  }
 0x39e   :  { %8286 = vmatmul.mubr.msk.bf16.gmra.mxu1 %vm10224_vm1, %v10824_v19  ;;  %v10983_v27 = vadd.f32 %v5006_v53, %v4943_v9  ;;  %v9495_v9 = vld [vmem:[#allocation8 + $0xa68] ss:$16 sps:$4 sm:$0xff]   ;;  %v4957_v33 = vpop.f32.mrf.mxu0 }
 0x39f   :  { %8316 = vmatmul.mubr.msk.bf16.gmra.mxu0 %vm10224_vm1, %v10662_v23  ;;  %8291 = vmatprep.mubr.msk.bf16.mxu1 %vm10292_vm5, %v10826_v50  ;;  %v5008_v29 = vpop.f32.mrf.mxu1  ;;  %v9510_v53 = vld [vmem:[#allocation8 + $0xbc8] ss:$16 sps:$4 sm:$0xff]  }
 0x3a0   :  { %8321 = vmatprep.mubr.msk.bf16.mxu0 %vm10292_vm5, %v10667_v49  ;;  %6890 = vmatpush1.bf16.msra.mxu1 %v9489_v60  ;;  %v10994_v30 = vadd.f32 %v5008_v29, %v4945_v17  ;;  %v11005_v15 = vpop.f32.mrf.mxu0  ;;  %v9512_v60 = vld [vmem:[#allocation8 + $0xbcc] ss:$16 sps:$4 sm:$0xff]  }
 0x3a1   :  { %6891 = vmatprep.subr.bf16.mxu1 %v9494_v38  ;;  %v5010_v36 = vpop.f32.mrf.mxu1  ;;  %v9515_v38 = vld [vmem:[#allocation8 + $0xbac] ss:$16 sps:$4 sm:$0xff]  }
 0x3a2   :  { %v10996_v40 = vadd.f32 %v5010_v36, %v4947_v31  ;;  %v11017_v8 = vpop.f32.mrf.mxu0 }
 0x3a3   :  { %v5014_v23 = vpop.f32.mrf.mxu1 }
 0x3a4   :  { %6892 = vmatpush1.bf16.msra.mxu1 %v9492_v48  ;;  %v10998_v5 = vadd.f32 %v5014_v23, %v4951_v47  ;;  %v11019_v47 = vpop.f32.mrf.mxu0  ;;  %v9513_v48 = vld [vmem:[#allocation8 + $0xba8] ss:$16 sps:$4 sm:$0xff]   ;;  %v9521_v23 = vld [vmem:[#allocation8 + $0xb6c] ss:$16 sps:$4 sm:$0xff]  }
 0x3a5   :  { %6893 = vmatprep.subr.bf16.mxu1 %v9497_v41  ;;  %v5016_v46 = vpop.f32.mrf.mxu1  ;;  %v9516_v41 = vld [vmem:[#allocation8 + $0xb88] ss:$16 sps:$4 sm:$0xff]  }
 0x3a6   :  { %8296 = vmatmul.mubr.msk.bf16.gmra.mxu1 %vm10292_vm5, %v10828_v45  ;;  %v11003_v49 = vadd.f32 %v5016_v46, %v4953_v56  ;;  %v11021_v35 = vpop.f32.mrf.mxu0  ;;  %v9524_v46 = vld [vmem:[#allocation8 + $0xb4c] ss:$16 sps:$4 sm:$0xff]  }
 0x3a7   :  { %8326 = vmatmul.mubr.msk.bf16.gmra.mxu0 %vm10292_vm5, %v10669_v51  ;;  %8331 = vmatprep.mubr.msk.bf16.mxu1 %vm10134_vm12, %v10804_v55  ;;  %v5018_v17 = vpop.f32.mrf.mxu1  ;;  %v9506_v51 = vld [vmem:[#allocation8 + $0xa0c] ss:$16 sps:$4 sm:$0xff]   ;;  %v9504_v55 = vld [vmem:[#allocation8 + $0xa08] ss:$16 sps:$4 sm:$0xff]  }
 0x3a8   :  { %6894 = vmatpush1.bf16.msra.mxu1 %v9495_v9  ;;  %v11013_v16 = vadd.f32 %v5018_v17, %v4955_v0  ;;  %v11023_v56 = vpop.f32.mrf.mxu0  ;;  %v9518_v0 = vld [vmem:[#allocation8 + $0xb8c] ss:$16 sps:$4 sm:$0xff]   ;;  %v9522_v17 = vld [vmem:[#allocation8 + $0xb48] ss:$16 sps:$4 sm:$0xff]  }
 0x3a9   :  { %6895 = vmatprep.subr.bf16.mxu1 %v9500_v58  ;;  %v5020_v31 = vpop.f32.mrf.mxu1 }
 0x3aa   :  { %v11015_v10 = vadd.f32 %v5020_v31, %v4957_v33  ;;  %v11025_v29 = vpop.f32.mrf.mxu0  ;;  %v9519_v33 = vld [vmem:[#allocation8 + $0xb68] ss:$16 sps:$4 sm:$0xff]  }
 0x3ac   :  { %6896 = vmatpush1.bf16.msra.mxu1 %v9498_v62  ;;  %v11027_v36 = vpop.f32.mrf.mxu0  ;;  %v9527_v62 = vld [vmem:[#allocation8 + $0xb2c] ss:$16 sps:$4 sm:$0xff]  }
 0x3ad   :  { %6897 = vmatprep.subr.bf16.mxu1 %v9503_v22  ;;  %v9525_v22 = vld [vmem:[#allocation8 + $0xb28] ss:$16 sps:$4 sm:$0xff]  }
 0x3ae   :  { %v11029_v9 = vpop.f32.mrf.mxu0 }
 0x3b0   :  { %6898 = vmatpush1.bf16.msra.mxu1 %v9501_v24  ;;  %v11031_v58 = vpop.f32.mrf.mxu0  ;;  %v9530_v24 = vld [vmem:[#allocation8 + $0xb0c] ss:$16 sps:$4 sm:$0xff]  }
 0x3b1   :  { %6899 = vmatprep.subr.bf16.mxu1 %v9506_v51 }
 0x3b2   :  { %v11033_v31 = vpop.f32.mrf.mxu0 }
 0x3b4   :  { %6900 = vmatpush1.bf16.msra.mxu1 %v9504_v55  ;;  %v11035_v51 = vpop.f32.mrf.mxu0  ;;  %v9528_v55 = vld [vmem:[#allocation8 + $0xb08] ss:$16 sps:$4 sm:$0xff]  }
 0x3b5   :  { %6901 = vmatprep.subr.bf16.mxu1 %v9509_v39 }
 0x3b6   :  { %v11037_v39 = vpop.f32.mrf.mxu0 }
 0x3b8   :  { %6902 = vmatpush2.bf16.msra.mxu1 %v9507_v63 }
 0x3b9   :  { %6903 = vmatprep.subr.bf16.mxu1 %v9512_v60 }
 0x3bc   :  { %6904 = vmatpush2.bf16.msra.mxu1 %v9510_v53 }
 0x3bd   :  { %6905 = vmatprep.subr.bf16.mxu1 %v9515_v38 }
 0x3c0   :  { %6906 = vmatpush2.bf16.msra.mxu1 %v9513_v48 }
 0x3c1   :  { %6907 = vmatprep.subr.bf16.mxu1 %v9518_v0 }
 0x3c4   :  { %6908 = vmatpush2.bf16.msra.mxu1 %v9516_v41 }
 0x3c5   :  { %6909 = vmatprep.subr.bf16.mxu1 %v9521_v23 }
 0x3c8   :  { %6910 = vmatpush2.bf16.msra.mxu1 %v9519_v33 }
 0x3c9   :  { %6911 = vmatprep.subr.bf16.mxu1 %v9524_v46 }
 0x3cc   :  { %6912 = vmatpush2.bf16.msra.mxu1 %v9522_v17 }
 0x3cd   :  { %6913 = vmatprep.subr.bf16.mxu1 %v9527_v62 }
 0x3d0   :  { %6914 = vmatpush2.bf16.msra.mxu1 %v9525_v22 }
 0x3d1   :  { %6915 = vmatprep.subr.bf16.mxu1 %v9530_v24 }
 0x3d4   :  { %6916 = vmatpush2.bf16.msra.mxu1 %v9528_v55  ;;  %v5760_v17 = vpop.f32.mrf.mxu1 }
 0x3d5   :  { %v5823_v63 = vpop.f32.mrf.mxu0 }
 0x3d6   :  { %v5824_v60 = vadd.f32 %v5823_v63, %v10958_v57  ;;  %v5762_v62 = vpop.f32.mrf.mxu1 }
 0x3d7   :  { %8336 = vmatmul.mubr.msk.bf16.vlgmr.msra.gmra.mxu1 %vm10134_vm12, %v10741_v3  ;;  %v5825_v53 = vpop.f32.mrf.mxu0 }
 0x3d8   :  { %8341 = vmatprep.mubr.msk.bf16.mxu1 %vm10224_vm1, %v10810_v54  ;;  %v5826_v38 = vadd.f32 %v5825_v53, %v10963_v28  ;;  %v5764_v24 = vpop.f32.mrf.mxu1 }
 0x3d9   :  { %v5827_v48 = vpop.f32.mrf.mxu0 }
 0x3da   :  { %v5828_v0 = vadd.f32 %v5827_v48, %v10974_v21 }
 0x3db   :  { %v5829_v41 = vpop.f32.mrf.mxu0 }
 0x3dc   :  { %v5830_v23 = vadd.f32 %v5829_v41, %v10976_v18 }
 0x3dd   :  { %v5833_v33 = vpop.f32.mrf.mxu0 }
 0x3de   :  { %v5834_v57 = vadd.f32 %v5833_v33, %v10978_v43 }
 0x3df   :  { %8346 = vmatmul.mubr.msk.bf16.gmra.mxu1 %vm10224_vm1, %v10824_v19  ;;  %v5835_v3 = vpop.f32.mrf.mxu0 }
 0x3e0   :  { %8351 = vmatprep.mubr.msk.bf16.mxu1 %vm10292_vm5, %v10826_v50  ;;  %v5836_v54 = vadd.f32 %v5835_v3, %v10983_v27 }
 0x3e1   :  { %v5837_v52 = vpop.f32.mrf.mxu0 }
 0x3e2   :  { %v5838_v28 = vadd.f32 %v5837_v52, %v10994_v30 }
 0x3e3   :  { %v5839_v21 = vpop.f32.mrf.mxu0 }
 0x3e4   :  { %v5840_v18 = vadd.f32 %v5839_v21, %v10996_v40  ;;  %v5766_v40 = vpop.f32.mrf.mxu1 }
 0x3e5   :  { %v5843_v46 = vpop.f32.mrf.mxu0 }
 0x3e6   :  { %v5844_v43 = vadd.f32 %v5843_v46, %v10998_v5  ;;  %v11066_v55 = vpop.f32.mrf.mxu1 }
 0x3e7   :  { %8356 = vmatmul.mubr.msk.bf16.gmra.mxu1 %vm10292_vm5, %v10828_v45  ;;  %v5845_v19 = vpop.f32.mrf.mxu0 }
 0x3e8   :  { %v5846_v2 = vadd.f32 %v5845_v19, %v11003_v49  ;;  %v11068_v5 = vpop.f32.mrf.mxu1 }
 0x3e9   :  { %v5847_v50 = vpop.f32.mrf.mxu0 }
 0x3ea   :  { %v5848_v27 = vadd.f32 %v5847_v50, %v11013_v16  ;;  %v11070_v63 = vpop.f32.mrf.mxu1 }
 0x3eb   :  { %v5849_v22 = vpop.f32.mrf.mxu0 }
 0x3ec   :  { %v5850_v30 = vadd.f32 %v5849_v22, %v11015_v10  ;;  %v11072_v25 = vpop.f32.mrf.mxu1 }
 0x3ee   :  { %v11074_v45 = vpop.f32.mrf.mxu1 }
 0x3f0   :  { %v11076_v49 = vpop.f32.mrf.mxu1 }
 0x3f2   :  { %v11078_v53 = vpop.f32.mrf.mxu1 }
 0x3f4   :  { %v11080_v16 = vpop.f32.mrf.mxu1 }
 0x415   :  { %v5886_v48 = vpop.f32.mrf.mxu1 }
 0x416   :  { %v11082_v10 = vadd.f32 %v5886_v48, %v5824_v60 }
 0x417   :  { %v5888_v41 = vpop.f32.mrf.mxu1 }
 0x418   :  { %v11084_v33 = vadd.f32 %v5888_v41, %v5826_v38 }
 0x419   :  { %v5890_v3 = vpop.f32.mrf.mxu1 }
 0x41a   :  { %v11086_v52 = vadd.f32 %v5890_v3, %v5828_v0 }
 0x41b   :  { %v5892_v21 = vpop.f32.mrf.mxu1 }
 0x41c   :  { %v11088_v46 = vadd.f32 %v5892_v21, %v5830_v23 }
 0x41d   :  { %v5896_v19 = vpop.f32.mrf.mxu1 }
 0x41e   :  { %v11090_v50 = vadd.f32 %v5896_v19, %v5834_v57 }
 0x41f   :  { %v5898_v22 = vpop.f32.mrf.mxu1 }
 0x420   :  { %v11092_v20 = vadd.f32 %v5898_v22, %v5836_v54  ;;  %v6730_v54 = vpop.f32.mrf.mxu0 }
 0x421   :  { %v5900_v59 = vpop.f32.mrf.mxu1 }
 0x422   :  { %v11094_v12 = vadd.f32 %v5900_v59, %v5838_v28  ;;  %v6732_v22 = vpop.f32.mrf.mxu0 }
 0x423   :  { %v5902_v60 = vpop.f32.mrf.mxu1 }
 0x424   :  { %11284 = vst [vmem:[#allocation22_spill] sm:$0xff] %v11094_v12  ;;  %v11096_v48 = vadd.f32 %v5902_v60, %v5840_v18  ;;  %v6734_v42 = vpop.f32.mrf.mxu0  ;;  %v11106_v18 = vld [vmem:[#allocation10] sm:$0xf] }
 0x425   :  { %v5906_v38 = vpop.f32.mrf.mxu1 }
 0x426   :  { %v11098_v41 = vadd.f32 %v5906_v38, %v5844_v43  ;;  %v6736_v59 = vpop.f32.mrf.mxu0  ;;  %v5698_v43 = vadd.f32 %v11005_v15, %v10898_v61  ;;  %v11290_v61 = vsub.s32 1, %v9877_v26 }
 0x427   :  { %v5908_v0 = vpop.f32.mrf.mxu1 }
 0x428   :  { %11285 = vst [vmem:[#allocation23_spill] sm:$0xff] %v11098_v41  ;;  %v11100_v3 = vadd.f32 %v5908_v0, %v5846_v2  ;;  %v6740_v28 = vpop.f32.mrf.mxu0  ;;  %v5700_v2 = vadd.f32 %v11017_v8, %v10909_v11  ;;  %v11122_v15 = vrot.slane %v11106_v18, %v11290_v61  ;;  %v5704_v11 = vadd.f32 %v11021_v35, %v10916_v6 }
 0x429   :  { %v5910_v23 = vpop.f32.mrf.mxu1  ;;  %v5710_v6 = vadd.f32 %v11025_v29, %v10929_v13 }
 0x42a   :  { %11286 = vst [vmem:[#allocation24_spill] sm:$0xff] %v11100_v3  ;;  %v11102_v21 = vadd.f32 %v5910_v23, %v5848_v27  ;;  %v6742_v12 = vpop.f32.mrf.mxu0  ;;  %v5761_v27 = vadd.f32 %v5760_v17, %v5698_v43  ;;  %v5702_v23 = vadd.f32 %v11019_v47, %v10914_v4  ;;  %v5767_v4 = vadd.f32 %v5766_v40, %v5704_v11 }
 0x42b   :  { %v5912_v57 = vpop.f32.mrf.mxu1 }
 0x42c   :  { %11287 = vst [vmem:[#allocation25_spill] sm:$0xff] %v11102_v21  ;;  %v11104_v19 = vadd.f32 %v5912_v57, %v5850_v30  ;;  %v11289_v30 = vsub.s32 0, %v9877_v26  ;;  %v6744_v57 = vpop.f32.mrf.mxu0  ;;  %v5763_v21 = vadd.f32 %v5762_v62, %v5700_v2  ;;  %v5765_v17 = vadd.f32 %v5764_v24, %v5702_v23  ;;  %v9555_v24 = vld [vmem:[#allocation2] sm:$0xff] }
 0x42e   :  { %11288 = vst [vmem:[#allocation26_spill] sm:$0xff] %v11104_v19  ;;  %v11115_v0 = vrot.slane %v11106_v18, %v11289_v30  ;;  %v6746_v47 = vpop.f32.mrf.mxu0 }
 0x430   :  { %v6750_v23 = vpop.f32.mrf.mxu0 }
 0x456   :  { %v6793_v60 = vpop.f32.mrf.mxu1 }
 0x457   :  { %v6794_v38 = vadd.f32 %v6793_v60, %v6730_v54 }
 0x458   :  { %v6795_v19 = vpop.f32.mrf.mxu1 }
 0x459   :  { %v6948_v3 = vadd.f32 %v6794_v38, %v5761_v27  ;;  %v6796_v41 = vadd.f32 %v6795_v19, %v6732_v22  ;;  %v5708_v27 = vadd.f32 %v11023_v56, %v10918_v14  ;;  %v9556_v56 = vld [vmem:[#allocation2 + $0x8] sm:$0xff] }
 0x45a   :  { %v6797_v8 = vpop.f32.mrf.mxu1 }
 0x45b   :  { %v6994_v54 = vadd.f32 %v11115_v0, %v6948_v3  ;;  %v6949_v43 = vadd.f32 %v6796_v41, %v5763_v21  ;;  %v6798_v60 = vadd.f32 %v6797_v8, %v6734_v42  ;;  %v5712_v41 = vadd.f32 %v11027_v36, %v10934_v7 }
 0x45c   :  { %v6799_v30 = vpop.f32.mrf.mxu1  ;;  %v5771_v21 = vadd.f32 %v11066_v55, %v5708_v27  ;;  %v9557_v55 = vld [vmem:[#allocation2 + $0x20] sm:$0xff] }
 0x45d   :  { %v7018_v62 = vmax.f32 %v6994_v54, 0.0  ;;  %v6995_v19 = vadd.f32 %v11122_v15, %v6949_v43  ;;  %v6952_v22 = vadd.f32 %v6798_v60, %v5765_v17  ;;  %v6800_v2 = vadd.f32 %v6799_v30, %v6736_v59 }
 0x45e   :  { %v6803_v35 = vpop.f32.mrf.mxu1  ;;  %v5773_v59 = vadd.f32 %v11068_v5, %v5710_v6  ;;  %v5714_v17 = vadd.f32 %v11029_v9, %v10936_v37  ;;  %v5775_v54 = vadd.f32 %v11070_v63, %v5712_v41  ;;  %v9558_v37 = vld [vmem:[#allocation2 + $0x28] sm:$0xff] }
 0x45f   :  { %v7042_v38 = vadd.f32 %v9555_v24, %v7018_v62  ;;  %v7019_v3 = vmax.f32 %v6995_v19, 0.0  ;;  %v6998_v42 = vadd.f32 %v11115_v0, %v6952_v22  ;;  %v6953_v40 = vadd.f32 %v6800_v2, %v5767_v4  ;;  %v6752_v62 = vpop.f32.mrf.mxu0  ;;  %v9560_v41 = vld [vmem:[#allocation2 + $0x48] sm:$0xff] }
 0x460   :  { %v6804_v61 = vadd.f32 %v6803_v35, %v6740_v28  ;;  %v6805_v14 = vpop.f32.mrf.mxu1  ;;  %v5718_v4 = vadd.f32 %v11031_v58, %v10938_v32  ;;  %v5777_v30 = vadd.f32 %v11072_v25, %v5714_v17  ;;  %v5720_v24 = vadd.f32 %v11033_v31, %v10949_v34 }
 0x461   :  { %7066 = vst [vmem:[#allocation11] sm:$0xff] %v7042_v38  ;;  %v7043_v13 = vadd.f32 %v9556_v56, %v7019_v3  ;;  %v7022_v29 = vmax.f32 %v6998_v42, 0.0  ;;  %v6999_v11 = vadd.f32 %v11122_v15, %v6953_v40  ;;  %v6806_v8 = vadd.f32 %v6805_v14, %v6742_v12  ;;  %v6754_v3 = vpop.f32.mrf.mxu0  ;;  %v9559_v42 = vld [vmem:[#allocation2 + $0x40] sm:$0xff] }
 0x462   :  { %v6956_v7 = vadd.f32 %v6804_v61, %v5771_v21  ;;  %v6807_v36 = vpop.f32.mrf.mxu1  ;;  %v5781_v27 = vadd.f32 %v11074_v45, %v5718_v4  ;;  %v5722_v38 = vadd.f32 %v11035_v51, %v10954_v1  ;;  %v5724_v14 = vadd.f32 %v11037_v39, %v10956_v44  ;;  %v9561_v51 = vld [vmem:[#allocation2 + $0x60] sm:$0xff]  ;;  %v9562_v44 = vld [vmem:[#allocation2 + $0x68] sm:$0xff] }
 0x463   :  { %7067 = vst [vmem:[#allocation11 + $0x8] sm:$0xff] %v7043_v13  ;;  %v7046_v5 = vadd.f32 %v9557_v55, %v7022_v29  ;;  %v7023_v43 = vmax.f32 %v6999_v11, 0.0  ;;  %v6957_v28 = vadd.f32 %v6806_v8, %v5773_v59  ;;  %v6808_v60 = vadd.f32 %v6807_v36, %v6744_v57  ;;  %v6756_v17 = vpop.f32.mrf.mxu0 }
 0x464   :  { %v7002_v12 = vadd.f32 %v11115_v0, %v6956_v7  ;;  %v6809_v19 = vpop.f32.mrf.mxu1  ;;  %v5785_v34 = vadd.f32 %v11078_v53, %v5722_v38  ;;  %v5787_v8 = vadd.f32 %v11080_v16, %v5724_v14 }
 0x465   :  { %7070 = vst [vmem:[#allocation11 + $0x20] sm:$0xff] %v7046_v5  ;;  %v7047_v9 = vadd.f32 %v9558_v37, %v7023_v43  ;;  %v7003_v63 = vadd.f32 %v11122_v15, %v6957_v28  ;;  %v6960_v22 = vadd.f32 %v6808_v60, %v5775_v54  ;;  %v6810_v2 = vadd.f32 %v6809_v19, %v6746_v47  ;;  %v9563_v5 = vld [vmem:[#allocation2 + $0x80] sm:$0xff] }
 0x466   :  { %v7026_v6 = vmax.f32 %v7002_v12, 0.0  ;;  %v6813_v57 = vpop.f32.mrf.mxu1  ;;  %v9565_v19 = vld [vmem:[#allocation2 + $0xa0] sm:$0xff] }
 0x467   :  { %7071 = vst [vmem:[#allocation11 + $0x28] sm:$0xff] %v7047_v9  ;;  %v7027_v35 = vmax.f32 %v7003_v63, 0.0  ;;  %v7006_v32 = vadd.f32 %v11115_v0, %v6960_v22  ;;  %v6961_v58 = vadd.f32 %v6810_v2, %v5777_v30  ;;  %v6814_v25 = vadd.f32 %v6813_v57, %v6750_v23  ;;  %v9566_v63 = vld [vmem:[#allocation2 + $0xa8] sm:$0xff]  ;;  %v6856_v2 = vpop.f32.mrf.mxu0 }
 0x468   :  { %v7050_v40 = vadd.f32 %v9559_v42, %v7026_v6  ;;  %v6815_v47 = vpop.f32.mrf.mxu1  ;;  %v5783_v23 = vadd.f32 %v11076_v49, %v5720_v24 }
 0x469   :  { %v7051_v45 = vadd.f32 %v9560_v41, %v7027_v35  ;;  %v7030_v21 = vmax.f32 %v7006_v32, 0.0  ;;  %v7007_v59 = vadd.f32 %v11122_v15, %v6961_v58  ;;  %v6964_v61 = vadd.f32 %v6814_v25, %v5781_v27  ;;  %v6858_v27 = vpop.f32.mrf.mxu0 }
 0x46a   :  { %7074 = vst [vmem:[#allocation11 + $0x40] sm:$0xff] %v7050_v40  ;;  %v6816_v31 = vadd.f32 %v6815_v47, %v6752_v62  ;;  %v6817_v1 = vpop.f32.mrf.mxu1  ;;  %v9564_v62 = vld [vmem:[#allocation2 + $0x88] sm:$0xff]  ;;  %v11292_v40 = vsub.s32 3, %v9877_v26 }
 0x46b   :  { %7075 = vst [vmem:[#allocation11 + $0x48] sm:$0xff] %v7051_v45  ;;  %v7054_v56 = vadd.f32 %v9561_v51, %v7030_v21  ;;  %v7031_v13 = vmax.f32 %v7007_v59, 0.0  ;;  %v7010_v29 = vadd.f32 %v11115_v0, %v6964_v61  ;;  %v6818_v11 = vadd.f32 %v6817_v1, %v6754_v3  ;;  %v6860_v6 = vpop.f32.mrf.mxu0  ;;  %v9567_v51 = vld [vmem:[#allocation2 + $0x10] sm:$0xff] }
 0x46c   :  { %v6965_v54 = vadd.f32 %v6816_v31, %v5783_v23  ;;  %v6819_v7 = vpop.f32.mrf.mxu1  ;;  %v11171_v47 = vrot.slane %v11106_v18, %v11292_v40 }
 0x46d   :  { %7078 = vst [vmem:[#allocation11 + $0x60] sm:$0xff] %v7054_v56  ;;  %v7055_v39 = vadd.f32 %v9562_v44, %v7031_v13  ;;  %v7034_v49 = vmax.f32 %v7010_v29, 0.0  ;;  %v6968_v53 = vadd.f32 %v6818_v11, %v5785_v34  ;;  %v6820_v36 = vadd.f32 %v6819_v7, %v6756_v17 }
 0x46e   :  { %v7011_v55 = vadd.f32 %v11122_v15, %v6965_v54 }
 0x46f   :  { %7079 = vst [vmem:[#allocation11 + $0x68] sm:$0xff] %v7055_v39  ;;  %v7058_v43 = vadd.f32 %v9563_v5, %v7034_v49  ;;  %v7014_v28 = vadd.f32 %v11115_v0, %v6968_v53  ;;  %v6969_v60 = vadd.f32 %v6820_v36, %v5787_v8  ;;  %v6862_v0 = vpop.f32.mrf.mxu0  ;;  %v9568_v8 = vld [vmem:[#allocation2 + $0x18] sm:$0xff]  ;;  %v9569_v49 = vld [vmem:[#allocation2 + $0x30] sm:$0xff] }
 0x470   :  { %v7035_v4 = vmax.f32 %v7011_v55, 0.0 }
 0x471   :  { %7082 = vst [vmem:[#allocation11 + $0x80] sm:$0xff] %v7058_v43  ;;  %v7038_v16 = vmax.f32 %v7014_v28, 0.0  ;;  %v7015_v30 = vadd.f32 %v11122_v15, %v6969_v60  ;;  %v6866_v57 = vpop.f32.mrf.mxu0  ;;  %v11291_v15 = vsub.s32 2, %v9877_v26  ;;  %v9570_v60 = vld [vmem:[#allocation2 + $0x38] sm:$0xff] }
 0x472   :  { %v7059_v12 = vadd.f32 %v9564_v62, %v7035_v4 }
 0x473   :  { %v7062_v37 = vadd.f32 %v9565_v19, %v7038_v16  ;;  %v7039_v9 = vmax.f32 %v7015_v30, 0.0  ;;  %v6868_v35 = vpop.f32.mrf.mxu0  ;;  %v11165_v25 = vrot.slane %v11106_v18, %v11291_v15  ;;  %v11293_v30 = vld [vmem:[#allocation22_spill] sm:$0xff] }
 0x474   :  { %7083 = vst [vmem:[#allocation11 + $0x88] sm:$0xff] %v7059_v12 }
 0x475   :  { %7086 = vst [vmem:[#allocation11 + $0xa0] sm:$0xff] %v7062_v37  ;;  %v7063_v22 = vadd.f32 %v9566_v63, %v7039_v9  ;;  %v6870_v24 = vpop.f32.mrf.mxu0 }
 0x477   :  { %7087 = vst [vmem:[#allocation11 + $0xa8] sm:$0xff] %v7063_v22  ;;  %v6872_v61 = vpop.f32.mrf.mxu0 }
 0x479   :  { %v6876_v29 = vpop.f32.mrf.mxu0 }
 0x47b   :  { %v6878_v5 = vpop.f32.mrf.mxu0 }
 0x47d   :  { %v6880_v22 = vpop.f32.mrf.mxu0 }
 0x497   :  { %v6919_v32 = vpop.f32.mrf.mxu1 }
 0x498   :  { %v6920_v58 = vadd.f32 %v6919_v32, %v6856_v2  ;;  %v9571_v2 = vld [vmem:[#allocation2 + $0x50] sm:$0xff] }
 0x499   :  { %v6921_v38 = vpop.f32.mrf.mxu1 }
 0x49a   :  { %v6950_v3 = vadd.f32 %v6920_v58, %v11082_v10  ;;  %v6922_v42 = vadd.f32 %v6921_v38, %v6858_v27  ;;  %v11294_v58 = vld [vmem:[#allocation23_spill] sm:$0xff] }
 0x49b   :  { %v6923_v41 = vpop.f32.mrf.mxu1 }
 0x49c   :  { %v6996_v45 = vadd.f32 %v11165_v25, %v6950_v3  ;;  %v6951_v21 = vadd.f32 %v6922_v42, %v11084_v33  ;;  %v6924_v59 = vadd.f32 %v6923_v41, %v6860_v6  ;;  %v9573_v3 = vld [vmem:[#allocation2 + $0x70] sm:$0xff] }
 0x49d   :  { %v6925_v14 = vpop.f32.mrf.mxu1 }
 0x49e   :  { %v7020_v23 = vmax.f32 %v6996_v45, 0.0  ;;  %v6997_v34 = vadd.f32 %v11171_v47, %v6951_v21  ;;  %v6954_v31 = vadd.f32 %v6924_v59, %v11086_v52  ;;  %v6926_v10 = vadd.f32 %v6925_v14, %v6862_v0  ;;  %v9572_v0 = vld [vmem:[#allocation2 + $0x58] sm:$0xff]  ;;  %v6882_v45 = vpop.f32.mrf.mxu0  ;;  %v11295_v21 = vld [vmem:[#allocation24_spill] sm:$0xff] }
 0x49f   :  { %v6929_v1 = vpop.f32.mrf.mxu1  ;;  %v9574_v14 = vld [vmem:[#allocation2 + $0x78] sm:$0xff] }
 0x4a0   :  { %v7044_v26 = vadd.f32 %v9567_v51, %v7020_v23  ;;  %v7021_v56 = vmax.f32 %v6997_v34, 0.0  ;;  %v7000_v18 = vadd.f32 %v11165_v25, %v6954_v31  ;;  %v6955_v13 = vadd.f32 %v6926_v10, %v11088_v46  ;;  %v11296_v31 = vld [vmem:[#allocation25_spill] sm:$0xff] }
 0x4a1   :  { %v6930_v11 = vadd.f32 %v6929_v1, %v6866_v57  ;;  %v6931_v33 = vpop.f32.mrf.mxu1 }
 0x4a2   :  { %7068 = vst [vmem:[#allocation11 + $0x10] sm:$0xff] %v7044_v26  ;;  %v7045_v17 = vadd.f32 %v9568_v8, %v7021_v56  ;;  %v7024_v54 = vmax.f32 %v7000_v18, 0.0  ;;  %v7001_v7 = vadd.f32 %v11171_v47, %v6955_v13  ;;  %v6932_v44 = vadd.f32 %v6931_v33, %v6868_v35  ;;  %v9575_v26 = vld [vmem:[#allocation2 + $0x90] sm:$0xff]  ;;  %v11297_v13 = vld [vmem:[#allocation26_spill] sm:$0xff] }
 0x4a3   :  { %v6958_v52 = vadd.f32 %v6930_v11, %v11090_v50  ;;  %v6933_v39 = vpop.f32.mrf.mxu1 }
 0x4a4   :  { %7069 = vst [vmem:[#allocation11 + $0x18] sm:$0xff] %v7045_v17  ;;  %v7048_v53 = vadd.f32 %v9569_v49, %v7024_v54  ;;  %v7025_v36 = vmax.f32 %v7001_v7, 0.0  ;;  %v6959_v55 = vadd.f32 %v6932_v44, %v11092_v20  ;;  %v6934_v46 = vadd.f32 %v6933_v39, %v6870_v24  ;;  %v9576_v17 = vld [vmem:[#allocation2 + $0x98] sm:$0xff]  ;;  %v9577_v7 = vld [vmem:[#allocation2 + $0xb0] sm:$0xff] }
 0x4a5   :  { %v7004_v43 = vadd.f32 %v11165_v25, %v6958_v52  ;;  %v6935_v28 = vpop.f32.mrf.mxu1  ;;  %v9578_v39 = vld [vmem:[#allocation2 + $0xb8] sm:$0xff] }
 0x4a6   :  { %7072 = vst [vmem:[#allocation11 + $0x30] sm:$0xff] %v7048_v53  ;;  %v7049_v4 = vadd.f32 %v9570_v60, %v7025_v36  ;;  %v7005_v16 = vadd.f32 %v11171_v47, %v6959_v55  ;;  %v6962_v62 = vadd.f32 %v6934_v46, %v11293_v30  ;;  %v6936_v50 = vadd.f32 %v6935_v28, %v6872_v61 }
 0x4a7   :  { %v7028_v12 = vmax.f32 %v7004_v43, 0.0  ;;  %v6939_v19 = vpop.f32.mrf.mxu1 }
 0x4a8   :  { %7073 = vst [vmem:[#allocation11 + $0x38] sm:$0xff] %v7049_v4  ;;  %v7029_v37 = vmax.f32 %v7005_v16, 0.0  ;;  %v7008_v9 = vadd.f32 %v11165_v25, %v6962_v62  ;;  %v6963_v20 = vadd.f32 %v6936_v50, %v11096_v48  ;;  %v6940_v63 = vadd.f32 %v6939_v19, %v6876_v29 }
 0x4a9   :  { %v7052_v27 = vadd.f32 %v9571_v2, %v7028_v12  ;;  %v6941_v6 = vpop.f32.mrf.mxu1 }
 0x4aa   :  { %v7053_v57 = vadd.f32 %v9572_v0, %v7029_v37  ;;  %v7032_v35 = vmax.f32 %v7008_v9, 0.0  ;;  %v7009_v32 = vadd.f32 %v11171_v47, %v6963_v20  ;;  %v6966_v15 = vadd.f32 %v6940_v63, %v11294_v58 }
 0x4ab   :  { %7076 = vst [vmem:[#allocation11 + $0x50] sm:$0xff] %v7052_v27  ;;  %v6942_v24 = vadd.f32 %v6941_v6, %v6878_v5  ;;  %v6943_v38 = vpop.f32.mrf.mxu1 }
 0x4ac   :  { %7077 = vst [vmem:[#allocation11 + $0x58] sm:$0xff] %v7053_v57  ;;  %v7056_v42 = vadd.f32 %v9573_v3, %v7032_v35  ;;  %v7033_v40 = vmax.f32 %v7009_v32, 0.0  ;;  %v7012_v48 = vadd.f32 %v11165_v25, %v6966_v15  ;;  %v6944_v41 = vadd.f32 %v6943_v38, %v6880_v22 }
 0x4ad   :  { %v6967_v59 = vadd.f32 %v6942_v24, %v11295_v21  ;;  %v6945_v61 = vpop.f32.mrf.mxu1 }
 0x4ae   :  { %7080 = vst [vmem:[#allocation11 + $0x70] sm:$0xff] %v7056_v42  ;;  %v7057_v23 = vadd.f32 %v9574_v14, %v7033_v40  ;;  %v7036_v34 = vmax.f32 %v7012_v48, 0.0  ;;  %v6970_v10 = vadd.f32 %v6944_v41, %v11296_v31  ;;  %v6946_v1 = vadd.f32 %v6945_v61, %v6882_v45 }
 0x4af   :  { %v7013_v51 = vadd.f32 %v11171_v47, %v6967_v59 }
 0x4b0   :  { %7081 = vst [vmem:[#allocation11 + $0x78] sm:$0xff] %v7057_v23  ;;  %v7060_v56 = vadd.f32 %v9575_v26, %v7036_v34  ;;  %v7016_v18 = vadd.f32 %v11165_v25, %v6970_v10  ;;  %v6971_v29 = vadd.f32 %v6946_v1, %v11297_v13 }
 0x4b1   :  { %v7037_v11 = vmax.f32 %v7013_v51, 0.0 }
 0x4b2   :  { %7084 = vst [vmem:[#allocation11 + $0x90] sm:$0xff] %v7060_v56  ;;  %v7040_v33 = vmax.f32 %v7016_v18, 0.0  ;;  %v7017_v8 = vadd.f32 %v11171_v47, %v6971_v29 }
 0x4b3   :  { %v7061_v54 = vadd.f32 %v9576_v17, %v7037_v11 }
 0x4b4   :  { %v7064_v44 = vadd.f32 %v9577_v7, %v7040_v33  ;;  %v7041_v52 = vmax.f32 %v7017_v8, 0.0 }
 0x4b5   :  { %7085 = vst [vmem:[#allocation11 + $0x98] sm:$0xff] %v7061_v54 }
 0x4b6   :  { %7088 = vst [vmem:[#allocation11 + $0xb0] sm:$0xff] %v7064_v44  ;;  %v7065_v49 = vadd.f32 %v9578_v39, %v7041_v52 }
 0x4b8   :  { %7089 = vst [vmem:[#allocation11 + $0xb8] sm:$0xff] %v7065_v49 }
 0x4b9   :  { %9690 = shalt.err (!%p9687_p1)
}
 0x4ba   :  { %7101 = dma.vmem_to_hbm [thread:$0]  %s7096_s4, 3072, %s11207_s5, [#allocation4], %s9712_s1, %s9712_s1, %s9713_s8  }
 0x4bb   :  { %9705 = dma.done.wait [#allocation4], 3072  }
 0x4bc   :  { %9706 = vsyncadd [#allocation4], 4294964224 }
 0x4bd   :  { %7105 = vsyncpa [#allocation3], 1 }
 0x4be   :  { %7106 = vsyncpa [#allocation6], 1 }
 0x4bf   :  { %7107 = vsyncpa [#allocation9], 1 }
 0x4c0   :  { %7108 = vsyncpa [#allocation4], 1 }

// kernel: tpu_custom_call.1
= control target key start
LH: loop header
LB: loop body
LE: loop exit
PB: predicated region body
PF: predicated region fallthrough
CT: control target
= control target key end

     0   :  { %10 = vsyncpa [#allocation3], 0  ;;  %s11202_s0 = inlined_call_operand.hbm [shape: f32[48,512], index: 0, kind: input, shape index: {}]   ;;  %s11203_s1 = inlined_call_operand.hbm [shape: bf16[3,512,512], index: 1, kind: input, shape index: {}]   ;;  %s11204_s2 = inlined_call_operand.hbm [shape: f32[1,512], index: 2, kind: input, shape index: {}]   ;;  %s11205_s3 = inlined_call_operand.hbm [shape: bf16[3,512,512], index: 3, kind: input, shape index: {}]   ;;  %s11206_s4 = inlined_call_operand.hbm [shape: f32[1,512], index: 4, kind: input, shape index: {}]   ;;  %s11207_s5 = inlined_call_operand.hbm [shape: f32[48,512], index: 5, kind: output, shape index: {}]  }
   0x1   :  { %11 = vsyncpa [#allocation6], 0 }
   0x2   :  { %12 = vsyncpa [#allocation9], 0 }
   0x3   :  { %13 = vsyncpa [#allocation4], 0  ;;  %s9707_s18 = smov [#allocation5]  }
   0x4   :  { %s31_s19 = sshll.u32 %s9707_s18, 4  ;;  %s32_s19 = int_to_ptr.vmem [resolvable:$true] %s31_s19 }
   0x5   :  { %s9587_s20 = scalar_lea.vmem %s32_s19, 49152  ;;  %p9592_p1 = scmp.lt.s32.totalorder %s32_s19, %s32_s19 }
   0x6   :  { %p9588_p0 = scmp.ne.s32.totalorder %s32_s19, %s9587_s20  ;;  %p9593_p2 = scmp.lt.s32.totalorder %s9587_s20, %s9587_s20 }
   0x8   :  { %p9594_p3 = por %p9593_p2, %p9592_p1 }
   0xa   :  { %p9595_p4 = pnand %p9594_p3, %p9588_p0 }
   0xc   :  { %9598 = shalt.err (!%p9595_p4)
}
   0xd   :  { %s9708_s21 = smov 256   ;;  %s9709_s22 = smov 16  }
   0xe   :  { %37 = dma.hbm_to_vmem [thread:$0]  %s11203_s1, 49152, %s32_s19, [#allocation6], %s9708_s21, %s9708_s21, %s9709_s22  }
   0xf   :  { %s9710_s25 = smov [#allocation8]   ;;  %s9711_s27 = smov [#allocation2]  }
  0x10   :  { %s53_s26 = sshll.u32 %s9710_s25, 4  ;;  %s19_s28 = sshll.u32 %s9711_s27, 4  ;;  %s54_s26 = int_to_ptr.vmem [resolvable:$true] %s53_s26  ;;  %s20_s28 = int_to_ptr.vmem [resolvable:$true] %s19_s28 }
  0x11   :  { %s9607_s29 = scalar_lea.vmem %s54_s26, 49152  ;;  %p9612_p6 = scmp.lt.s32.totalorder %s54_s26, %s54_s26 }
  0x12   :  { %p9608_p5 = scmp.ne.s32.totalorder %s54_s26, %s9607_s29  ;;  %p9613_p7 = scmp.lt.s32.totalorder %s9607_s29, %s9607_s29 }
  0x14   :  { %p9614_p8 = por %p9613_p7, %p9612_p6 }
  0x16   :  { %p9615_p9 = pnand %p9614_p8, %p9608_p5 }
  0x18   :  { %9618 = shalt.err (!%p9615_p9)
}
  0x19   :  { %59 = dma.hbm_to_vmem [thread:$0]  %s11205_s3, 49152, %s54_s26, [#allocation9], %s9708_s21, %s9708_s21, %s9709_s22  }
  0x1a   :  { %s9627_s7 = scalar_lea.vmem %s20_s28, 3072  ;;  %p9632_p11 = scmp.lt.s32.totalorder %s20_s28, %s20_s28 }
  0x1b   :  { %p9628_p10 = scmp.ne.s32.totalorder %s20_s28, %s9627_s7  ;;  %p9633_p12 = scmp.lt.s32.totalorder %s9627_s7, %s9627_s7 }
  0x1d   :  { %p9634_p13 = por %p9633_p12, %p9632_p11 }
  0x1f   :  { %p9635_p0 = pnand %p9634_p13, %p9628_p10 }
  0x21   :  { %9638 = shalt.err (!%p9635_p0)
}
  0x22   :  { %s9712_s1 = smov 512   ;;  %s9713_s8 = smov 32  }
  0x23   :  { %25 = dma.hbm_to_vmem [thread:$0]  %s11202_s0, 3072, %s20_s28, [#allocation3], %s9712_s1, %s9712_s1, %s9713_s8  }
  0x24   :  { %s9714_s11 = smov [#allocation7]   ;;  %s9715_s3 = smov [#allocation10]  }
  0x25   :  { %s44_s12 = sshll.u32 %s9714_s11, 4  ;;  %s66_s13 = sshll.u32 %s9715_s3, 4  ;;  %s45_s12 = int_to_ptr.vmem [resolvable:$true] %s44_s12  ;;  %s67_s13 = int_to_ptr.vmem [resolvable:$true] %s66_s13 }
  0x26   :  { %s9647_s14 = scalar_lea.vmem %s45_s12, 64  ;;  %p9652_p2 = scmp.lt.s32.totalorder %s45_s12, %s45_s12 }
  0x27   :  { %p9648_p1 = scmp.ne.s32.totalorder %s45_s12, %s9647_s14  ;;  %p9653_p3 = scmp.lt.s32.totalorder %s9647_s14, %s9647_s14 }
  0x29   :  { %p9654_p4 = por %p9653_p3, %p9652_p2 }
  0x2b   :  { %p9655_p5 = pnand %p9654_p4, %p9648_p1 }
  0x2d   :  { %9658 = shalt.err (!%p9655_p5)
}
  0x2e   :  { %47 = dma.hbm_to_vmem [thread:$0]  %s11204_s2, 64, %s45_s12, [#allocation6]  }
  0x2f   :  { %s9667_s17 = scalar_lea.vmem %s67_s13, 64  ;;  %p9672_p7 = scmp.lt.s32.totalorder %s67_s13, %s67_s13 }
  0x30   :  { %p9668_p6 = scmp.ne.s32.totalorder %s67_s13, %s9667_s17  ;;  %p9673_p8 = scmp.lt.s32.totalorder %s9667_s17, %s9667_s17 }
  0x32   :  { %p9674_p9 = por %p9673_p8, %p9672_p7 }
  0x34   :  { %p9675_p10 = pnand %p9674_p9, %p9668_p6 }
  0x36   :  { %9678 = shalt.err (!%p9675_p10)
}
  0x37   :  { %69 = dma.hbm_to_vmem [thread:$0]  %s11206_s4, 64, %s67_s13, [#allocation9]  }
  0x38   :  { %9699 = dma.done.wait [#allocation3], 3072  }
  0x39   :  { %9700 = vsyncadd [#allocation3], 4294964224 }
  0x3a   :  { %9701 = dma.done.wait [#allocation6], 49216  }
  0x3b   :  { %9702 = vsyncadd [#allocation6], 4294918080 }
  0x3c   :  { %9703 = dma.done.wait [#allocation9], 49216  }
  0x3d   :  { %9704 = vsyncadd [#allocation9], 4294918080  ;;  %v8379_v0 = vld [vmem:[#allocation5 + $0x4e4] ss:$16 sps:$4 sm:$0xff]   ;;  %v8383_v2 = vld [vmem:[#allocation5 + $0x4e0] ss:$16 sps:$4 sm:$0xff]  }
  0x3e   :  { %v8381_v1 = vld [vmem:[#allocation5 + $0x6e4] ss:$16 sps:$4 sm:$0xff]   ;;  %1363 = vmatprep.subr.bf16.mxu0 %v8379_v0  ;;  %v8384_v3 = vld [vmem:[#allocation5 + $0x6e0] ss:$16 sps:$4 sm:$0xff]   ;;  %v9765_v46 = vld [vmem:[#allocation2 + $0x8] sm:$0xff]  ;;  %vm218_vm0 = vcmask 1040384  }
  0x3f   :  { %1426 = vmatprep.subr.bf16.mxu1 %v8381_v1  ;;  %v8385_v4 = vld [vmem:[#allocation5 + $0x4c4] ss:$16 sps:$4 sm:$0xff]   ;;  %1364 = vmatpush1.bf16.msra.mxu0 %v8383_v2  ;;  %v8389_v6 = vld [vmem:[#allocation5 + $0x4c0] ss:$16 sps:$4 sm:$0xff]   ;;  %v9767_v47 = vld [vmem:[#allocation2 + $0x28] sm:$0xff]  ;;  %vm333_vm13 = vcmask 1046528  }
  0x40   :  { %1427 = vmatpush1.bf16.msra.mxu1 %v8384_v3  ;;  %v8387_v5 = vld [vmem:[#allocation5 + $0x6c4] ss:$16 sps:$4 sm:$0xff]   ;;  %1365 = vmatprep.subr.bf16.mxu0 %v8385_v4  ;;  %v8390_v7 = vld [vmem:[#allocation5 + $0x6c0] ss:$16 sps:$4 sm:$0xff]   ;;  %v9769_v48 = vld [vmem:[#allocation2 + $0x18] sm:$0xff]  ;;  %v9775_v53 = vpack.c.bf16 %v9767_v47, %v9765_v46  ;;  %s9716_s2 = smov [#allocation11]  }
  0x41   :  { %1428 = vmatprep.subr.bf16.mxu1 %v8387_v5  ;;  %v8391_v8 = vld [vmem:[#allocation5 + $0x4a4] ss:$16 sps:$4 sm:$0xff]   ;;  %v8395_v10 = vld [vmem:[#allocation5 + $0x4a0] ss:$16 sps:$4 sm:$0xff]   ;;  %v9771_v49 = vld [vmem:[#allocation2 + $0x38] sm:$0xff]  ;;  %s7095_s4 = sshll.u32 %s9716_s2, 4  ;;  %s7096_s4 = int_to_ptr.vmem [resolvable:$true] %s7095_s4 }
  0x42   :  { %v8393_v9 = vld [vmem:[#allocation5 + $0x6a4] ss:$16 sps:$4 sm:$0xff]   ;;  %v8396_v11 = vld [vmem:[#allocation5 + $0x6a0] ss:$16 sps:$4 sm:$0xff]   ;;  %v9779_v55 = vpack.c.bf16 %v9771_v49, %v9769_v48  ;;  %1395 = vmatprep.mubr.bf16.mxu0 %v9775_v53  ;;  %s9679_s19 = scalar_lea.vmem %s7096_s4, 3072  ;;  %p9684_p12 = scmp.lt.s32.totalorder %s7096_s4, %s7096_s4 }
  0x43   :  { %1366 = vmatpush1.bf16.msra.mxu0 %v8389_v6  ;;  %v8397_v12 = vld [vmem:[#allocation5 + $0x484] ss:$16 sps:$4 sm:$0xff]   ;;  %v8401_v14 = vld [vmem:[#allocation5 + $0x480] ss:$16 sps:$4 sm:$0xff]   ;;  %p9680_p11 = scmp.ne.s32.totalorder %s7096_s4, %s9679_s19  ;;  %p9685_p13 = scmp.lt.s32.totalorder %s9679_s19, %s9679_s19 }
  0x44   :  { %1429 = vmatpush1.bf16.msra.mxu1 %v8390_v7  ;;  %1367 = vmatprep.subr.bf16.mxu0 %v8391_v8  ;;  %v8399_v13 = vld [vmem:[#allocation5 + $0x684] ss:$16 sps:$4 sm:$0xff]   ;;  %v8402_v15 = vld [vmem:[#allocation5 + $0x680] ss:$16 sps:$4 sm:$0xff]  }
  0x45   :  { %1430 = vmatprep.subr.bf16.mxu1 %v8393_v9  ;;  %v8403_v16 = vld [vmem:[#allocation5 + $0x464] ss:$16 sps:$4 sm:$0xff]   ;;  %v8407_v18 = vld [vmem:[#allocation5 + $0x460] ss:$16 sps:$4 sm:$0xff]   ;;  %1458 = vmatprep.mubr.bf16.mxu1 %v9779_v55  ;;  %p9686_p0 = por %p9685_p13, %p9684_p12 }
  0x46   :  { %v8405_v17 = vld [vmem:[#allocation5 + $0x664] ss:$16 sps:$4 sm:$0xff]   ;;  %v8408_v19 = vld [vmem:[#allocation5 + $0x660] ss:$16 sps:$4 sm:$0xff]  }
  0x47   :  { %1368 = vmatpush1.bf16.msra.mxu0 %v8395_v10  ;;  %v8409_v20 = vld [vmem:[#allocation5 + $0x444] ss:$16 sps:$4 sm:$0xff]   ;;  %v8413_v22 = vld [vmem:[#allocation5 + $0x440] ss:$16 sps:$4 sm:$0xff]   ;;  %v8477_v10 = vld [vmem:[#allocation5 + $0x4ec] ss:$16 sps:$4 sm:$0xff]   ;;  %p9687_p1 = pnand %p9686_p0, %p9680_p11 }
  0x48   :  { %1431 = vmatpush1.bf16.msra.mxu1 %v8396_v11  ;;  %1369 = vmatprep.subr.bf16.mxu0 %v8397_v12  ;;  %v8411_v21 = vld [vmem:[#allocation5 + $0x644] ss:$16 sps:$4 sm:$0xff]   ;;  %v8414_v23 = vld [vmem:[#allocation5 + $0x640] ss:$16 sps:$4 sm:$0xff]   ;;  %v8480_v11 = vld [vmem:[#allocation5 + $0x6ec] ss:$16 sps:$4 sm:$0xff]  }
  0x49   :  { %1432 = vmatprep.subr.bf16.mxu1 %v8399_v13  ;;  %v8415_v24 = vld [vmem:[#allocation5 + $0x424] ss:$16 sps:$4 sm:$0xff]   ;;  %v8419_v26 = vld [vmem:[#allocation5 + $0x420] ss:$16 sps:$4 sm:$0xff]  }
  0x4a   :  { %v8417_v25 = vld [vmem:[#allocation5 + $0x624] ss:$16 sps:$4 sm:$0xff]   ;;  %v8420_v27 = vld [vmem:[#allocation5 + $0x620] ss:$16 sps:$4 sm:$0xff]  }
  0x4b   :  { %1370 = vmatpush1.bf16.msra.mxu0 %v8401_v14  ;;  %v8421_v28 = vld [vmem:[#allocation5 + $0x404] ss:$16 sps:$4 sm:$0xff]   ;;  %v8425_v30 = vld [vmem:[#allocation5 + $0x400] ss:$16 sps:$4 sm:$0xff]   ;;  %v8475_v14 = vld [vmem:[#allocation5 + $0x4e8] ss:$16 sps:$4 sm:$0xff]  }
  0x4c   :  { %1433 = vmatpush1.bf16.msra.mxu1 %v8402_v15  ;;  %1371 = vmatprep.subr.bf16.mxu0 %v8403_v16  ;;  %v8423_v29 = vld [vmem:[#allocation5 + $0x604] ss:$16 sps:$4 sm:$0xff]   ;;  %v8426_v31 = vld [vmem:[#allocation5 + $0x600] ss:$16 sps:$4 sm:$0xff]   ;;  %v8478_v15 = vld [vmem:[#allocation5 + $0x6e8] ss:$16 sps:$4 sm:$0xff]  }
  0x4d   :  { %1434 = vmatprep.subr.bf16.mxu1 %v8405_v17  ;;  %v8427_v32 = vld [vmem:[#allocation5 + $0x5e4] ss:$16 sps:$4 sm:$0xff]   ;;  %v8431_v34 = vld [vmem:[#allocation5 + $0x5e0] ss:$16 sps:$4 sm:$0xff]   ;;  %v8483_v16 = vld [vmem:[#allocation5 + $0x4cc] ss:$16 sps:$4 sm:$0xff]  }
  0x4e   :  { %v8429_v33 = vld [vmem:[#allocation5 + $0x7e4] ss:$16 sps:$4 sm:$0xff]   ;;  %v8432_v35 = vld [vmem:[#allocation5 + $0x7e0] ss:$16 sps:$4 sm:$0xff]   ;;  %v8486_v17 = vld [vmem:[#allocation5 + $0x6cc] ss:$16 sps:$4 sm:$0xff]  }
  0x4f   :  { %1372 = vmatpush1.bf16.msra.mxu0 %v8407_v18  ;;  %v8433_v36 = vld [vmem:[#allocation5 + $0x5c4] ss:$16 sps:$4 sm:$0xff]   ;;  %v8437_v38 = vld [vmem:[#allocation5 + $0x5c0] ss:$16 sps:$4 sm:$0xff]   ;;  %v8481_v18 = vld [vmem:[#allocation5 + $0x4c8] ss:$16 sps:$4 sm:$0xff]  }
  0x50   :  { %1435 = vmatpush1.bf16.msra.mxu1 %v8408_v19  ;;  %1373 = vmatprep.subr.bf16.mxu0 %v8409_v20  ;;  %v8435_v37 = vld [vmem:[#allocation5 + $0x7c4] ss:$16 sps:$4 sm:$0xff]   ;;  %v8438_v39 = vld [vmem:[#allocation5 + $0x7c0] ss:$16 sps:$4 sm:$0xff]   ;;  %v8484_v19 = vld [vmem:[#allocation5 + $0x6c8] ss:$16 sps:$4 sm:$0xff]  }
  0x51   :  { %1436 = vmatprep.subr.bf16.mxu1 %v8411_v21  ;;  %v8439_v40 = vld [vmem:[#allocation5 + $0x5a4] ss:$16 sps:$4 sm:$0xff]   ;;  %v8443_v42 = vld [vmem:[#allocation5 + $0x5a0] ss:$16 sps:$4 sm:$0xff]   ;;  %v8489_v20 = vld [vmem:[#allocation5 + $0x4ac] ss:$16 sps:$4 sm:$0xff]  }
  0x52   :  { %v8441_v41 = vld [vmem:[#allocation5 + $0x7a4] ss:$16 sps:$4 sm:$0xff]   ;;  %v8444_v43 = vld [vmem:[#allocation5 + $0x7a0] ss:$16 sps:$4 sm:$0xff]   ;;  %v8492_v21 = vld [vmem:[#allocation5 + $0x6ac] ss:$16 sps:$4 sm:$0xff]  }
  0x53   :  { %1374 = vmatpush1.bf16.msra.mxu0 %v8413_v22  ;;  %v8445_v44 = vld [vmem:[#allocation5 + $0x584] ss:$16 sps:$4 sm:$0xff]   ;;  %v8449_v50 = vld [vmem:[#allocation5 + $0x580] ss:$16 sps:$4 sm:$0xff]   ;;  %v8487_v22 = vld [vmem:[#allocation5 + $0x4a8] ss:$16 sps:$4 sm:$0xff]  }
  0x54   :  { %1437 = vmatpush1.bf16.msra.mxu1 %v8414_v23  ;;  %1375 = vmatprep.subr.bf16.mxu0 %v8415_v24  ;;  %v8447_v45 = vld [vmem:[#allocation5 + $0x784] ss:$16 sps:$4 sm:$0xff]   ;;  %v8450_v51 = vld [vmem:[#allocation5 + $0x780] ss:$16 sps:$4 sm:$0xff]   ;;  %v8490_v23 = vld [vmem:[#allocation5 + $0x6a8] ss:$16 sps:$4 sm:$0xff]  }
  0x55   :  { %1438 = vmatprep.subr.bf16.mxu1 %v8417_v25  ;;  %v8451_v52 = vld [vmem:[#allocation5 + $0x564] ss:$16 sps:$4 sm:$0xff]   ;;  %v8455_v56 = vld [vmem:[#allocation5 + $0x560] ss:$16 sps:$4 sm:$0xff]   ;;  %v8495_v24 = vld [vmem:[#allocation5 + $0x48c] ss:$16 sps:$4 sm:$0xff]  }
  0x56   :  { %v8453_v54 = vld [vmem:[#allocation5 + $0x764] ss:$16 sps:$4 sm:$0xff]   ;;  %v8456_v57 = vld [vmem:[#allocation5 + $0x760] ss:$16 sps:$4 sm:$0xff]   ;;  %v8498_v25 = vld [vmem:[#allocation5 + $0x68c] ss:$16 sps:$4 sm:$0xff]  }
  0x57   :  { %1376 = vmatpush1.bf16.msra.mxu0 %v8419_v26  ;;  %v8457_v58 = vld [vmem:[#allocation5 + $0x544] ss:$16 sps:$4 sm:$0xff]   ;;  %v8461_v60 = vld [vmem:[#allocation5 + $0x540] ss:$16 sps:$4 sm:$0xff]   ;;  %v8493_v26 = vld [vmem:[#allocation5 + $0x488] ss:$16 sps:$4 sm:$0xff]  }
  0x58   :  { %1439 = vmatpush1.bf16.msra.mxu1 %v8420_v27  ;;  %1377 = vmatprep.subr.bf16.mxu0 %v8421_v28  ;;  %v8459_v59 = vld [vmem:[#allocation5 + $0x744] ss:$16 sps:$4 sm:$0xff]   ;;  %v8462_v61 = vld [vmem:[#allocation5 + $0x740] ss:$16 sps:$4 sm:$0xff]   ;;  %v8496_v27 = vld [vmem:[#allocation5 + $0x688] ss:$16 sps:$4 sm:$0xff]  }
  0x59   :  { %1440 = vmatprep.subr.bf16.mxu1 %v8423_v29  ;;  %v8463_v62 = vld [vmem:[#allocation5 + $0x524] ss:$16 sps:$4 sm:$0xff]   ;;  %v8467_v0 = vld [vmem:[#allocation5 + $0x520] ss:$16 sps:$4 sm:$0xff]   ;;  %v8501_v28 = vld [vmem:[#allocation5 + $0x46c] ss:$16 sps:$4 sm:$0xff]  }
  0x5a   :  { %v8465_v63 = vld [vmem:[#allocation5 + $0x724] ss:$16 sps:$4 sm:$0xff]   ;;  %v8468_v1 = vld [vmem:[#allocation5 + $0x720] ss:$16 sps:$4 sm:$0xff]   ;;  %v8504_v29 = vld [vmem:[#allocation5 + $0x66c] ss:$16 sps:$4 sm:$0xff]  }
  0x5b   :  { %1378 = vmatpush1.bf16.msra.mxu0 %v8425_v30  ;;  %v8469_v2 = vld [vmem:[#allocation5 + $0x504] ss:$16 sps:$4 sm:$0xff]   ;;  %v8473_v4 = vld [vmem:[#allocation5 + $0x500] ss:$16 sps:$4 sm:$0xff]   ;;  %v9801_v30 = vld [vmem:[#allocation2 + $0x48] sm:$0xff] }
  0x5c   :  { %1441 = vmatpush1.bf16.msra.mxu1 %v8426_v31  ;;  %1379 = vmatprep.subr.bf16.mxu0 %v8427_v32  ;;  %v8471_v3 = vld [vmem:[#allocation5 + $0x704] ss:$16 sps:$4 sm:$0xff]   ;;  %v8474_v5 = vld [vmem:[#allocation5 + $0x700] ss:$16 sps:$4 sm:$0xff]   ;;  %v9803_v31 = vld [vmem:[#allocation2 + $0x68] sm:$0xff] }
  0x5d   :  { %1442 = vmatprep.subr.bf16.mxu1 %v8429_v33  ;;  %v9783_v6 = vld [vmem:[#allocation2] sm:$0xff]  ;;  %v9787_v8 = vld [vmem:[#allocation2 + $0x10] sm:$0xff]  ;;  %v9805_v32 = vld [vmem:[#allocation2 + $0x58] sm:$0xff] }
  0x5e   :  { %v9785_v7 = vld [vmem:[#allocation2 + $0x20] sm:$0xff]  ;;  %v9789_v9 = vld [vmem:[#allocation2 + $0x30] sm:$0xff]  ;;  %v9807_v33 = vld [vmem:[#allocation2 + $0x78] sm:$0xff] }
  0x5f   :  { %1380 = vmatpush2.bf16.msra.mxu0 %v8431_v34  ;;  %v9793_v12 = vpack.c.bf16 %v9785_v7, %v9783_v6  ;;  %v9797_v13 = vpack.c.bf16 %v9789_v9, %v9787_v8  ;;  %v9811_v34 = vpack.c.bf16 %v9803_v31, %v9801_v30 }
  0x60   :  { %1443 = vmatpush2.bf16.msra.mxu1 %v8432_v35  ;;  %1381 = vmatprep.subr.bf16.mxu0 %v8433_v36  ;;  %v9813_v35 = vld [vmem:[#allocation2 + $0x40] sm:$0xff] }
  0x61   :  { %1444 = vmatprep.subr.bf16.mxu1 %v8435_v37  ;;  %v9815_v36 = vld [vmem:[#allocation2 + $0x60] sm:$0xff]  ;;  %v9817_v37 = vld [vmem:[#allocation2 + $0x50] sm:$0xff] }
  0x63   :  { %1382 = vmatpush2.bf16.msra.mxu0 %v8437_v38  ;;  %v9821_v38 = vpack.c.bf16 %v9807_v33, %v9805_v32 }
  0x64   :  { %1445 = vmatpush2.bf16.msra.mxu1 %v8438_v39  ;;  %1383 = vmatprep.subr.bf16.mxu0 %v8439_v40  ;;  %v9823_v39 = vld [vmem:[#allocation2 + $0x70] sm:$0xff]  ;;  %v8499_v40 = vld [vmem:[#allocation5 + $0x468] ss:$16 sps:$4 sm:$0xff]  }
  0x65   :  { %1446 = vmatprep.subr.bf16.mxu1 %v8441_v41  ;;  %v8502_v41 = vld [vmem:[#allocation5 + $0x668] ss:$16 sps:$4 sm:$0xff]  }
  0x67   :  { %1384 = vmatpush2.bf16.msra.mxu0 %v8443_v42  ;;  %v9828_v42 = vpack.c.bf16 %v9815_v36, %v9813_v35 }
  0x68   :  { %1447 = vmatpush2.bf16.msra.mxu1 %v8444_v43  ;;  %1385 = vmatprep.subr.bf16.mxu0 %v8445_v44  ;;  %v8507_v43 = vld [vmem:[#allocation5 + $0x44c] ss:$16 sps:$4 sm:$0xff]  }
  0x69   :  { %1448 = vmatprep.subr.bf16.mxu1 %v8447_v45  ;;  %v8510_v44 = vld [vmem:[#allocation5 + $0x64c] ss:$16 sps:$4 sm:$0xff]   ;;  %v9832_v45 = vpack.c.bf16 %v9823_v39, %v9817_v37 }
  0x6b   :  { %1386 = vmatpush2.bf16.msra.mxu0 %v8449_v50  ;;  %v8505_v50 = vld [vmem:[#allocation5 + $0x448] ss:$16 sps:$4 sm:$0xff]  }
  0x6c   :  { %1449 = vmatpush2.bf16.msra.mxu1 %v8450_v51  ;;  %1387 = vmatprep.subr.bf16.mxu0 %v8451_v52  ;;  %v8508_v51 = vld [vmem:[#allocation5 + $0x648] ss:$16 sps:$4 sm:$0xff]   ;;  %v8513_v52 = vld [vmem:[#allocation5 + $0x42c] ss:$16 sps:$4 sm:$0xff]  }
  0x6d   :  { %1450 = vmatprep.subr.bf16.mxu1 %v8453_v54  ;;  %v8516_v54 = vld [vmem:[#allocation5 + $0x62c] ss:$16 sps:$4 sm:$0xff]  }
  0x6f   :  { %1388 = vmatpush2.bf16.msra.mxu0 %v8455_v56  ;;  %v9837_v56 = vld [vmem:[#allocation2 + $0x88] sm:$0xff] }
  0x70   :  { %1451 = vmatpush2.bf16.msra.mxu1 %v8456_v57  ;;  %1389 = vmatprep.subr.bf16.mxu0 %v8457_v58  ;;  %v9839_v57 = vld [vmem:[#allocation2 + $0xa8] sm:$0xff]  ;;  %v9841_v58 = vld [vmem:[#allocation2 + $0x98] sm:$0xff] }
  0x71   :  { %1452 = vmatprep.subr.bf16.mxu1 %v8459_v59  ;;  %v9843_v59 = vld [vmem:[#allocation2 + $0xb8] sm:$0xff] }
  0x73   :  { %1390 = vmatpush2.bf16.msra.mxu0 %v8461_v60  ;;  %v9847_v60 = vpack.c.bf16 %v9839_v57, %v9837_v56 }
  0x74   :  { %1453 = vmatpush2.bf16.msra.mxu1 %v8462_v61  ;;  %1391 = vmatprep.subr.bf16.mxu0 %v8463_v62  ;;  %v9849_v61 = vld [vmem:[#allocation2 + $0x80] sm:$0xff] }
  0x75   :  { %1454 = vmatprep.subr.bf16.mxu1 %v8465_v63  ;;  %v9851_v62 = vld [vmem:[#allocation2 + $0xa0] sm:$0xff]  ;;  %v9853_v63 = vld [vmem:[#allocation2 + $0x90] sm:$0xff] }
  0x77   :  { %1392 = vmatpush2.bf16.msra.mxu0 %v8467_v0  ;;  %v9857_v0 = vpack.c.bf16 %v9843_v59, %v9841_v58 }
  0x78   :  { %1455 = vmatpush2.bf16.msra.mxu1 %v8468_v1  ;;  %1393 = vmatprep.subr.bf16.mxu0 %v8469_v2  ;;  %v9859_v1 = vld [vmem:[#allocation2 + $0xb0] sm:$0xff]  ;;  %v8511_v2 = vld [vmem:[#allocation5 + $0x428] ss:$16 sps:$4 sm:$0xff]  }
  0x79   :  { %1456 = vmatprep.subr.bf16.mxu1 %v8471_v3  ;;  %v8514_v3 = vld [vmem:[#allocation5 + $0x628] ss:$16 sps:$4 sm:$0xff]  }
  0x7b   :  { %1394 = vmatpush2.bf16.msra.mxu0 %v8473_v4  ;;  %v9863_v4 = vpack.c.bf16 %v9851_v62, %v9849_v61 }
  0x7c   :  { %1457 = vmatpush2.bf16.msra.mxu1 %v8474_v5  ;;  %1489 = vmatprep.subr.bf16.mxu0 %v8477_v10  ;;  %v8519_v5 = vld [vmem:[#allocation5 + $0x40c] ss:$16 sps:$4 sm:$0xff]  }
  0x7d   :  { %1552 = vmatprep.subr.bf16.mxu1 %v8480_v11  ;;  %v8522_v10 = vld [vmem:[#allocation5 + $0x60c] ss:$16 sps:$4 sm:$0xff]   ;;  %v9867_v11 = vpack.c.bf16 %v9859_v1, %v9853_v63 }
  0x7e   :  { %1396 = vmatmul.mubr.bf16.vlgmr.msra.gmra.mxu0 %v9793_v12 }
  0x7f   :  { %1459 = vmatmul.mubr.bf16.vlgmr.msra.gmra.mxu1 %v9797_v13  ;;  %1490 = vmatpush1.bf16.msra.mxu0 %v8475_v14  ;;  %v8517_v14 = vld [vmem:[#allocation5 + $0x408] ss:$16 sps:$4 sm:$0xff]  }
  0x80   :  { %1553 = vmatpush1.bf16.msra.mxu1 %v8478_v15  ;;  %1491 = vmatprep.subr.bf16.mxu0 %v8483_v16  ;;  %v8520_v15 = vld [vmem:[#allocation5 + $0x608] ss:$16 sps:$4 sm:$0xff]   ;;  %v8525_v16 = vld [vmem:[#allocation5 + $0x5ec] ss:$16 sps:$4 sm:$0xff]  }
  0x81   :  { %1554 = vmatprep.subr.bf16.mxu1 %v8486_v17  ;;  %1405 = vmatprep.mubr.bf16.mxu0 %v9811_v34  ;;  %v8528_v17 = vld [vmem:[#allocation5 + $0x7ec] ss:$16 sps:$4 sm:$0xff]  }
  0x82   :  { %1468 = vmatprep.mubr.bf16.mxu1 %v9821_v38 }
  0x83   :  { %1492 = vmatpush1.bf16.msra.mxu0 %v8481_v18  ;;  %v8523_v18 = vld [vmem:[#allocation5 + $0x5e8] ss:$16 sps:$4 sm:$0xff]  }
  0x84   :  { %1555 = vmatpush1.bf16.msra.mxu1 %v8484_v19  ;;  %1493 = vmatprep.subr.bf16.mxu0 %v8489_v20  ;;  %v8526_v19 = vld [vmem:[#allocation5 + $0x7e8] ss:$16 sps:$4 sm:$0xff]   ;;  %v8531_v20 = vld [vmem:[#allocation5 + $0x5cc] ss:$16 sps:$4 sm:$0xff]  }
  0x85   :  { %1556 = vmatprep.subr.bf16.mxu1 %v8492_v21  ;;  %v8534_v21 = vld [vmem:[#allocation5 + $0x7cc] ss:$16 sps:$4 sm:$0xff]  }
  0x86   :  { %1406 = vmatmul.mubr.bf16.gmra.mxu0 %v9828_v42 }
  0x87   :  { %1494 = vmatpush1.bf16.msra.mxu0 %v8487_v22  ;;  %1469 = vmatmul.mubr.bf16.gmra.mxu1 %v9832_v45  ;;  %v8529_v22 = vld [vmem:[#allocation5 + $0x5c8] ss:$16 sps:$4 sm:$0xff]  }
  0x88   :  { %1557 = vmatpush1.bf16.msra.mxu1 %v8490_v23  ;;  %1495 = vmatprep.subr.bf16.mxu0 %v8495_v24  ;;  %v8532_v23 = vld [vmem:[#allocation5 + $0x7c8] ss:$16 sps:$4 sm:$0xff]   ;;  %v8537_v24 = vld [vmem:[#allocation5 + $0x5ac] ss:$16 sps:$4 sm:$0xff]  }
  0x89   :  { %1558 = vmatprep.subr.bf16.mxu1 %v8498_v25  ;;  %1415 = vmatprep.mubr.bf16.mxu0 %v9847_v60  ;;  %v8540_v25 = vld [vmem:[#allocation5 + $0x7ac] ss:$16 sps:$4 sm:$0xff]  }
  0x8a   :  { %1478 = vmatprep.mubr.bf16.mxu1 %v9857_v0 }
  0x8b   :  { %1496 = vmatpush1.bf16.msra.mxu0 %v8493_v26  ;;  %v8535_v26 = vld [vmem:[#allocation5 + $0x5a8] ss:$16 sps:$4 sm:$0xff]  }
  0x8c   :  { %1559 = vmatpush1.bf16.msra.mxu1 %v8496_v27  ;;  %1497 = vmatprep.subr.bf16.mxu0 %v8501_v28  ;;  %v8546_v27 = vld [vmem:[#allocation5 + $0x78c] ss:$16 sps:$4 sm:$0xff]   ;;  %v8541_v28 = vld [vmem:[#allocation5 + $0x588] ss:$16 sps:$4 sm:$0xff]  }
  0x8d   :  { %1560 = vmatprep.subr.bf16.mxu1 %v8504_v29  ;;  %v8544_v29 = vld [vmem:[#allocation5 + $0x788] ss:$16 sps:$4 sm:$0xff]  }
  0x8e   :  { %1416 = vmatmul.mubr.bf16.gmra.mxu0 %v9863_v4 }
  0x8f   :  { %1498 = vmatpush1.bf16.msra.mxu0 %v8499_v40  ;;  %1479 = vmatmul.mubr.bf16.gmra.mxu1 %v9867_v11  ;;  %v8549_v40 = vld [vmem:[#allocation5 + $0x56c] ss:$16 sps:$4 sm:$0xff]  }
  0x90   :  { %1561 = vmatpush1.bf16.msra.mxu1 %v8502_v41  ;;  %1499 = vmatprep.subr.bf16.mxu0 %v8507_v43  ;;  %v8552_v41 = vld [vmem:[#allocation5 + $0x76c] ss:$16 sps:$4 sm:$0xff]   ;;  %v8547_v43 = vld [vmem:[#allocation5 + $0x568] ss:$16 sps:$4 sm:$0xff]  }
  0x91   :  { %1562 = vmatprep.subr.bf16.mxu1 %v8510_v44  ;;  %1521 = vmatprep.mubr.bf16.mxu0 %v9775_v53  ;;  %v8538_v53 = vld [vmem:[#allocation5 + $0x7a8] ss:$16 sps:$4 sm:$0xff]  }
  0x92   :  { %1584 = vmatprep.mubr.bf16.mxu1 %v9779_v55  ;;  %v8543_v55 = vld [vmem:[#allocation5 + $0x58c] ss:$16 sps:$4 sm:$0xff]   ;;  %v8550_v44 = vld [vmem:[#allocation5 + $0x768] ss:$16 sps:$4 sm:$0xff]  }
  0x93   :  { %1500 = vmatpush1.bf16.msra.mxu0 %v8505_v50  ;;  %v8555_v50 = vld [vmem:[#allocation5 + $0x54c] ss:$16 sps:$4 sm:$0xff]  }
  0x94   :  { %1563 = vmatpush1.bf16.msra.mxu1 %v8508_v51  ;;  %1501 = vmatprep.subr.bf16.mxu0 %v8513_v52  ;;  %v8558_v51 = vld [vmem:[#allocation5 + $0x74c] ss:$16 sps:$4 sm:$0xff]   ;;  %v8553_v52 = vld [vmem:[#allocation5 + $0x548] ss:$16 sps:$4 sm:$0xff]  }
  0x95   :  { %1564 = vmatprep.subr.bf16.mxu1 %v8516_v54  ;;  %v8556_v54 = vld [vmem:[#allocation5 + $0x748] ss:$16 sps:$4 sm:$0xff]  }
  0x97   :  { %1502 = vmatpush1.bf16.msra.mxu0 %v8511_v2  ;;  %v8561_v2 = vld [vmem:[#allocation5 + $0x52c] ss:$16 sps:$4 sm:$0xff]  }
  0x98   :  { %1565 = vmatpush1.bf16.msra.mxu1 %v8514_v3  ;;  %1503 = vmatprep.subr.bf16.mxu0 %v8519_v5  ;;  %v8564_v3 = vld [vmem:[#allocation5 + $0x72c] ss:$16 sps:$4 sm:$0xff]   ;;  %v8559_v5 = vld [vmem:[#allocation5 + $0x528] ss:$16 sps:$4 sm:$0xff]  }
  0x99   :  { %1566 = vmatprep.subr.bf16.mxu1 %v8522_v10  ;;  %v8562_v10 = vld [vmem:[#allocation5 + $0x728] ss:$16 sps:$4 sm:$0xff]  }
  0x9b   :  { %1504 = vmatpush1.bf16.msra.mxu0 %v8517_v14  ;;  %v8567_v14 = vld [vmem:[#allocation5 + $0x50c] ss:$16 sps:$4 sm:$0xff]  }
  0x9c   :  { %1567 = vmatpush1.bf16.msra.mxu1 %v8520_v15  ;;  %1505 = vmatprep.subr.bf16.mxu0 %v8525_v16  ;;  %v8570_v15 = vld [vmem:[#allocation5 + $0x70c] ss:$16 sps:$4 sm:$0xff]   ;;  %v8565_v16 = vld [vmem:[#allocation5 + $0x508] ss:$16 sps:$4 sm:$0xff]  }
  0x9d   :  { %1568 = vmatprep.subr.bf16.mxu1 %v8528_v17  ;;  %v8568_v17 = vld [vmem:[#allocation5 + $0x708] ss:$16 sps:$4 sm:$0xff]  }
  0x9f   :  { %1506 = vmatpush2.bf16.msra.mxu0 %v8523_v18  ;;  %v8573_v18 = vld [vmem:[#allocation5 + $0xe4] ss:$16 sps:$4 sm:$0xff]  }
  0xa0   :  { %1569 = vmatpush2.bf16.msra.mxu1 %v8526_v19  ;;  %1507 = vmatprep.subr.bf16.mxu0 %v8531_v20  ;;  %v8576_v19 = vld [vmem:[#allocation5 + $0x2e4] ss:$16 sps:$4 sm:$0xff]   ;;  %v8571_v20 = vld [vmem:[#allocation5 + $0xe0] ss:$16 sps:$4 sm:$0xff]  }
  0xa1   :  { %1570 = vmatprep.subr.bf16.mxu1 %v8534_v21  ;;  %v109_v21 = vlaneseq }
  0xa3   :  { %1508 = vmatpush2.bf16.msra.mxu0 %v8529_v22  ;;  %v8574_v22 = vld [vmem:[#allocation5 + $0x2e0] ss:$16 sps:$4 sm:$0xff]  }
  0xa4   :  { %1571 = vmatpush2.bf16.msra.mxu1 %v8532_v23  ;;  %1509 = vmatprep.subr.bf16.mxu0 %v8537_v24  ;;  %v8579_v23 = vld [vmem:[#allocation5 + $0xc4] ss:$16 sps:$4 sm:$0xff]  }
  0xa5   :  { %1572 = vmatprep.subr.bf16.mxu1 %v8540_v25  ;;  %v8582_v24 = vld [vmem:[#allocation5 + $0x2c4] ss:$16 sps:$4 sm:$0xff]   ;;  %v8577_v25 = vld [vmem:[#allocation5 + $0xc0] ss:$16 sps:$4 sm:$0xff]  }
  0xa7   :  { %1510 = vmatpush2.bf16.msra.mxu0 %v8535_v26  ;;  %v9877_v26 = vshrl.u32 %v109_v21, 7  ;;  %v8615_v21 = vld [vmem:[#allocation5 + $0x4] ss:$16 sps:$4 sm:$0xff]  }
  0xa8   :  { %1573 = vmatpush2.bf16.msra.mxu1 %v8538_v53  ;;  %1511 = vmatprep.subr.bf16.mxu0 %v8543_v55  ;;  %v8580_v53 = vld [vmem:[#allocation5 + $0x2c0] ss:$16 sps:$4 sm:$0xff]   ;;  %v8585_v55 = vld [vmem:[#allocation5 + $0xa4] ss:$16 sps:$4 sm:$0xff]  }
  0xa9   :  { %1574 = vmatprep.subr.bf16.mxu1 %v8546_v27  ;;  %v8588_v27 = vld [vmem:[#allocation5 + $0x2a4] ss:$16 sps:$4 sm:$0xff]  }
  0xab   :  { %1512 = vmatpush2.bf16.msra.mxu0 %v8541_v28  ;;  %v8583_v28 = vld [vmem:[#allocation5 + $0xa0] ss:$16 sps:$4 sm:$0xff]  }
  0xac   :  { %1575 = vmatpush2.bf16.msra.mxu1 %v8544_v29  ;;  %1513 = vmatprep.subr.bf16.mxu0 %v8549_v40  ;;  %v9882_v29 = vadd.s32 8, %v9877_v26  ;;  %v8594_v40 = vld [vmem:[#allocation5 + $0x284] ss:$16 sps:$4 sm:$0xff]  }
  0xad   :  { %1576 = vmatprep.subr.bf16.mxu1 %v8552_v41  ;;  %v220_v41 = vrot.slane %v9765_v46, 7  ;;  %v120_v46 = vand.u32 7, %v9877_v26 }
  0xaf   :  { %1514 = vmatpush2.bf16.msra.mxu0 %v8547_v43  ;;  %v225_v43 = vrot.slane %v9767_v47, 7  ;;  %vm8358_vm2 = vcmp.ne.s32.totalorder %v120_v46, 0  ;;  %vm10114_vm11 = vcmp.ne.s32.totalorder %v120_v46, 7 }
  0xb0   :  { %1577 = vmatpush2.bf16.msra.mxu1 %v8550_v44  ;;  %1515 = vmatprep.subr.bf16.mxu0 %v8555_v50  ;;  %v8589_v44 = vld [vmem:[#allocation5 + $0x80] ss:$16 sps:$4 sm:$0xff]   ;;  %v127_v50 = vand.u32 7, %v9882_v29 }
  0xb1   :  { %1578 = vmatprep.subr.bf16.mxu1 %v8558_v51  ;;  %v8592_v51 = vld [vmem:[#allocation5 + $0x280] ss:$16 sps:$4 sm:$0xff]  }
  0xb2   :  { %vm9900_vm1 = vcmp.ne.s32.totalorder %v127_v50, 0  ;;  %vm10108_vm10 = vcmp.ne.s32.totalorder %v127_v50, 7  ;;  %v8781_v29 = vld [vmem:[#allocation5 + $0x880] ss:$16 sps:$4 sm:$0xff]  }
  0xb3   :  { %1516 = vmatpush2.bf16.msra.mxu0 %v8553_v52  ;;  %v8597_v52 = vld [vmem:[#allocation5 + $0x64] ss:$16 sps:$4 sm:$0xff]   ;;  %vm9918_vm3 = vmpackc.low %vm9900_vm1, %vm8358_vm2  ;;  %v8784_v50 = vld [vmem:[#allocation5 + $0xa80] ss:$16 sps:$4 sm:$0xff]  }
  0xb4   :  { %1579 = vmatpush2.bf16.msra.mxu1 %v8556_v54  ;;  %1517 = vmatprep.subr.bf16.mxu0 %v8561_v2  ;;  %v8600_v54 = vld [vmem:[#allocation5 + $0x264] ss:$16 sps:$4 sm:$0xff]   ;;  %vm10134_vm12 = vmpackc.low %vm10108_vm10, %vm10114_vm11 }
  0xb5   :  { %1580 = vmatprep.subr.bf16.mxu1 %v8564_v3  ;;  %v8648_v2 = vld [vmem:[#allocation5 + $0x364] ss:$16 sps:$4 sm:$0xff]  }
  0xb7   :  { %1518 = vmatpush2.bf16.msra.mxu0 %v8559_v5  ;;  %v8603_v5 = vld [vmem:[#allocation5 + $0x44] ss:$16 sps:$4 sm:$0xff]  }
  0xb8   :  { %1581 = vmatpush2.bf16.msra.mxu1 %v8562_v10  ;;  %1519 = vmatprep.subr.bf16.mxu0 %v8567_v14  ;;  %v8606_v10 = vld [vmem:[#allocation5 + $0x244] ss:$16 sps:$4 sm:$0xff]  }
  0xb9   :  { %1582 = vmatprep.subr.bf16.mxu1 %v8570_v15 }
  0xbb   :  { %1520 = vmatpush2.bf16.msra.mxu0 %v8565_v16  ;;  %v8601_v16 = vld [vmem:[#allocation5 + $0x40] ss:$16 sps:$4 sm:$0xff]  }
  0xbc   :  { %1583 = vmatpush2.bf16.msra.mxu1 %v8568_v17  ;;  %2255 = vmatprep.subr.bf16.mxu0 %v8573_v18  ;;  %v11226_v17 = vmov 0  ;;  %v8604_v18 = vld [vmem:[#allocation5 + $0x240] ss:$16 sps:$4 sm:$0xff]  }
  0xbd   :  { %2318 = vmatprep.subr.bf16.mxu1 %v8576_v19  ;;  %v11227_v17 = vsel %vm9918_vm3, 4294967295, %v11226_v17  ;;  %v8609_v19 = vld [vmem:[#allocation5 + $0x24] ss:$16 sps:$4 sm:$0xff]  }
  0xbe   :  { %1522 = vmatmul.mubr.bf16.vlgmr.msra.gmra.mxu0 %v9793_v12  ;;  %v8586_v12 = vld [vmem:[#allocation5 + $0x2a0] ss:$16 sps:$4 sm:$0xff]   ;;  %11228 = vst [vmem:[#allocation16_spill] sm:$0xff] %v11227_v17 }
  0xbf   :  { %1585 = vmatmul.mubr.bf16.vlgmr.msra.gmra.mxu1 %v9797_v13  ;;  %2256 = vmatpush1.bf16.msra.mxu0 %v8571_v20  ;;  %v8591_v13 = vld [vmem:[#allocation5 + $0x84] ss:$16 sps:$4 sm:$0xff]   ;;  %v9008_v17 = vld [vmem:[#allocation8 + $0x4ec] ss:$16 sps:$4 sm:$0xff]  }
  0xc0   :  { %2319 = vmatpush1.bf16.msra.mxu1 %v8574_v22  ;;  %2257 = vmatprep.subr.bf16.mxu0 %v8579_v23  ;;  %v8612_v20 = vld [vmem:[#allocation5 + $0x224] ss:$16 sps:$4 sm:$0xff]   ;;  %v8613_v23 = vld [vmem:[#allocation5] ss:$16 sps:$4 sm:$0xff]  }
  0xc1   :  { %2320 = vmatprep.subr.bf16.mxu1 %v8582_v24  ;;  %1531 = vmatprep.mubr.bf16.mxu0 %v9811_v34  ;;  %v222_v34 = vrot.slane %v9769_v48, 7  ;;  %v226_v48 = vsel %vm218_vm0, %v220_v41, %v225_v43  ;;  %v8618_v22 = vld [vmem:[#allocation5 + $0x204] ss:$16 sps:$4 sm:$0xff]   ;;  %v8616_v24 = vld [vmem:[#allocation5 + $0x200] ss:$16 sps:$4 sm:$0xff]  }
  0xc2   :  { %1594 = vmatprep.mubr.bf16.mxu1 %v9821_v38  ;;  %v229_v38 = vrot.slane %v9771_v49, 7 }
  0xc3   :  { %2258 = vmatpush1.bf16.msra.mxu0 %v8577_v25  ;;  %v8621_v25 = vld [vmem:[#allocation5 + $0x1e4] ss:$16 sps:$4 sm:$0xff]  }
  0xc4   :  { %2321 = vmatpush1.bf16.msra.mxu1 %v8580_v53  ;;  %2259 = vmatprep.subr.bf16.mxu0 %v8585_v55  ;;  %v230_v3 = vsel %vm218_vm0, %v222_v34, %v229_v38  ;;  %v8624_v53 = vld [vmem:[#allocation5 + $0x3e4] ss:$16 sps:$4 sm:$0xff]   ;;  %v8619_v55 = vld [vmem:[#allocation5 + $0x1e0] ss:$16 sps:$4 sm:$0xff]  }
  0xc5   :  { %2322 = vmatprep.subr.bf16.mxu1 %v8588_v27  ;;  %v8622_v27 = vld [vmem:[#allocation5 + $0x3e0] ss:$16 sps:$4 sm:$0xff]  }
  0xc6   :  { %1532 = vmatmul.mubr.bf16.gmra.mxu0 %v9828_v42  ;;  %v8595_v42 = vld [vmem:[#allocation5 + $0x60] ss:$16 sps:$4 sm:$0xff]  }
  0xc7   :  { %1595 = vmatmul.mubr.bf16.gmra.mxu1 %v9832_v45  ;;  %2260 = vmatpush1.bf16.msra.mxu0 %v8583_v28  ;;  %v288_v45 = vsel %vm218_vm0, 0.0, %v220_v41  ;;  %v8627_v28 = vld [vmem:[#allocation5 + $0x1c4] ss:$16 sps:$4 sm:$0xff]  }
  0xc8   :  { %2323 = vmatpush1.bf16.msra.mxu1 %v8586_v12  ;;  %2261 = vmatprep.subr.bf16.mxu0 %v8591_v13  ;;  %v9910_v14 = vpack.c.bf16 %v226_v48, %v288_v45  ;;  %v8630_v12 = vld [vmem:[#allocation5 + $0x3c4] ss:$16 sps:$4 sm:$0xff]   ;;  %v8625_v13 = vld [vmem:[#allocation5 + $0x1c0] ss:$16 sps:$4 sm:$0xff]  }
  0xc9   :  { %2324 = vmatprep.subr.bf16.mxu1 %v8594_v40  ;;  %1541 = vmatprep.mubr.bf16.mxu0 %v9847_v60  ;;  %v290_v60 = vsel %vm218_vm0, 0.0, %v222_v34  ;;  %v8628_v40 = vld [vmem:[#allocation5 + $0x3c0] ss:$16 sps:$4 sm:$0xff]   ;;  %v8633_v41 = vld [vmem:[#allocation5 + $0x1a4] ss:$16 sps:$4 sm:$0xff]  }
  0xca   :  { %1604 = vmatprep.mubr.bf16.mxu1 %v9857_v0  ;;  %v8598_v0 = vld [vmem:[#allocation5 + $0x260] ss:$16 sps:$4 sm:$0xff]   ;;  %v9912_v15 = vpack.c.bf16 %v230_v3, %v290_v60  ;;  %v8636_v34 = vld [vmem:[#allocation5 + $0x3a4] ss:$16 sps:$4 sm:$0xff]  }
  0xcb   :  { %2262 = vmatpush1.bf16.msra.mxu0 %v8589_v44  ;;  %v8631_v44 = vld [vmem:[#allocation5 + $0x1a0] ss:$16 sps:$4 sm:$0xff]   ;;  %v8645_v45 = vld [vmem:[#allocation5 + $0x164] ss:$16 sps:$4 sm:$0xff]  }
  0xcc   :  { %2325 = vmatpush1.bf16.msra.mxu1 %v8592_v51  ;;  %2263 = vmatprep.subr.bf16.mxu0 %v8597_v52  ;;  %v8634_v51 = vld [vmem:[#allocation5 + $0x3a0] ss:$16 sps:$4 sm:$0xff]   ;;  %v8639_v52 = vld [vmem:[#allocation5 + $0x184] ss:$16 sps:$4 sm:$0xff]  }
  0xcd   :  { %2326 = vmatprep.subr.bf16.mxu1 %v8600_v54  ;;  %v8642_v54 = vld [vmem:[#allocation5 + $0x384] ss:$16 sps:$4 sm:$0xff]   ;;  %v8637_v48 = vld [vmem:[#allocation5 + $0x180] ss:$16 sps:$4 sm:$0xff]  }
  0xce   :  { %1542 = vmatmul.mubr.bf16.gmra.mxu0 %v9863_v4  ;;  %v8607_v4 = vld [vmem:[#allocation5 + $0x20] ss:$16 sps:$4 sm:$0xff]  }
  0xcf   :  { %1605 = vmatmul.mubr.bf16.gmra.mxu1 %v9867_v11  ;;  %2264 = vmatpush1.bf16.msra.mxu0 %v8595_v42  ;;  %v8610_v11 = vld [vmem:[#allocation5 + $0x220] ss:$16 sps:$4 sm:$0xff]  }
  0xd0   :  { %2327 = vmatpush1.bf16.msra.mxu1 %v8598_v0  ;;  %2265 = vmatprep.subr.bf16.mxu0 %v8603_v5  ;;  %v8640_v42 = vld [vmem:[#allocation5 + $0x380] ss:$16 sps:$4 sm:$0xff]   ;;  %v8651_v0 = vld [vmem:[#allocation5 + $0x144] ss:$16 sps:$4 sm:$0xff]  }
  0xd1   :  { %2328 = vmatprep.subr.bf16.mxu1 %v8606_v10  ;;  %7369 = vmatprep.mubr.msk.bf16.mxu0 %vm9918_vm3, %v9910_v14  ;;  %v8643_v3 = vld [vmem:[#allocation5 + $0x160] ss:$16 sps:$4 sm:$0xff]   ;;  %v8654_v5 = vld [vmem:[#allocation5 + $0x344] ss:$16 sps:$4 sm:$0xff]  }
  0xd2   :  { %7399 = vmatprep.mubr.msk.bf16.mxu1 %vm9918_vm3, %v9912_v15  ;;  %v8646_v60 = vld [vmem:[#allocation5 + $0x360] ss:$16 sps:$4 sm:$0xff]  }
  0xd3   :  { %2266 = vmatpush1.bf16.msra.mxu0 %v8601_v16  ;;  %v8649_v10 = vld [vmem:[#allocation5 + $0x140] ss:$16 sps:$4 sm:$0xff]  }
  0xd4   :  { %2329 = vmatpush1.bf16.msra.mxu1 %v8604_v18  ;;  %2267 = vmatprep.subr.bf16.mxu0 %v8609_v19  ;;  %v8652_v16 = vld [vmem:[#allocation5 + $0x340] ss:$16 sps:$4 sm:$0xff]   ;;  %v8657_v18 = vld [vmem:[#allocation5 + $0x124] ss:$16 sps:$4 sm:$0xff]   ;;  %v9929_v19 = vadd.s32 16, %v9877_v26 }
  0xd5   :  { %2330 = vmatprep.subr.bf16.mxu1 %v8612_v20  ;;  %v219_v20 = vrot.slane %v9783_v6, 7 }
  0xd7   :  { %2268 = vmatpush1.bf16.msra.mxu0 %v8607_v4  ;;  %v223_v4 = vrot.slane %v9785_v7, 7  ;;  %v287_v7 = vsel %vm218_vm0, 0.0, %v219_v20 }
  0xd8   :  { %2331 = vmatpush1.bf16.msra.mxu1 %v8610_v11  ;;  %2269 = vmatprep.subr.bf16.mxu0 %v8615_v21  ;;  %v8660_v11 = vld [vmem:[#allocation5 + $0x324] ss:$16 sps:$4 sm:$0xff]   ;;  %v9934_v21 = vadd.s32 24, %v9877_v26 }
  0xd9   :  { %2332 = vmatprep.subr.bf16.mxu1 %v8618_v22  ;;  %v221_v22 = vrot.slane %v9787_v8, 7  ;;  %v224_v6 = vsel %vm218_vm0, %v219_v20, %v223_v4  ;;  %v241_v8 = vrot.slane %v9803_v31, 7  ;;  %v8690_v31 = vld [vmem:[#allocation5 + $0x28c] ss:$16 sps:$4 sm:$0xff]  }
  0xdb   :  { %2270 = vmatpush1.bf16.msra.mxu0 %v8613_v23  ;;  %v8655_v23 = vld [vmem:[#allocation5 + $0x120] ss:$16 sps:$4 sm:$0xff]  }
  0xdc   :  { %2333 = vmatpush1.bf16.msra.mxu1 %v8616_v24  ;;  %2271 = vmatprep.subr.bf16.mxu0 %v8621_v25  ;;  %v8658_v24 = vld [vmem:[#allocation5 + $0x320] ss:$16 sps:$4 sm:$0xff]   ;;  %v227_v25 = vrot.slane %v9789_v9, 7  ;;  %v141_v9 = vand.u32 7, %v9934_v21 }
  0xdd   :  { %2334 = vmatprep.subr.bf16.mxu1 %v8624_v53  ;;  %v8663_v53 = vld [vmem:[#allocation5 + $0x104] ss:$16 sps:$4 sm:$0xff]  }
  0xde   :  { %vm9967_vm5 = vcmp.ne.s32.totalorder %v141_v9, 0  ;;  %vm10196_vm14 = vcmp.ne.s32.totalorder %v141_v9, 7  ;;  %v8853_v9 = vld [vmem:[#allocation5 + $0x900] ss:$16 sps:$4 sm:$0xff]  }
  0xdf   :  { %2272 = vmatpush2.bf16.msra.mxu0 %v8619_v55  ;;  %v134_v55 = vand.u32 7, %v9929_v19 }
  0xe0   :  { %2335 = vmatpush2.bf16.msra.mxu1 %v8622_v27  ;;  %2273 = vmatprep.subr.bf16.mxu0 %v8627_v28  ;;  %v8666_v27 = vld [vmem:[#allocation5 + $0x304] ss:$16 sps:$4 sm:$0xff]   ;;  %v233_v28 = vrot.slane %v9801_v30, 7 }
  0xe1   :  { %2336 = vmatprep.subr.bf16.mxu1 %v8630_v12  ;;  %v237_v12 = vrot.slane %v9805_v32, 7  ;;  %vm9950_vm4 = vcmp.ne.s32.totalorder %v134_v55, 0  ;;  %v9954_v32 = vpack.c.bf16 %v224_v6, %v287_v7  ;;  %v8681_v7 = vld [vmem:[#allocation5 + $0xac] ss:$16 sps:$4 sm:$0xff]   ;;  %vm10202_vm15 = vcmp.ne.s32.totalorder %v134_v55, 7 }
  0xe2   :  { %vm9999_vm6 = vmpackc.low %vm9967_vm5, %vm9950_vm4 }
  0xe3   :  { %2274 = vmatpush2.bf16.msra.mxu0 %v8625_v13  ;;  %v245_v13 = vrot.slane %v9807_v33, 7  ;;  %v238_v47 = vsel %vm218_vm0, %v229_v38, %v237_v12  ;;  %vm10224_vm1 = vmpackc.low %vm10196_vm14, %vm10202_vm15 }
  0xe4   :  { %2337 = vmatpush2.bf16.msra.mxu1 %v8628_v40  ;;  %2275 = vmatprep.subr.bf16.mxu0 %v8633_v41  ;;  %v8661_v40 = vld [vmem:[#allocation5 + $0x100] ss:$16 sps:$4 sm:$0xff]  }
  0xe5   :  { %2338 = vmatprep.subr.bf16.mxu1 %v8636_v34  ;;  %v8664_v41 = vld [vmem:[#allocation5 + $0x300] ss:$16 sps:$4 sm:$0xff]   ;;  %v228_v34 = vsel %vm218_vm0, %v221_v22, %v227_v25 }
  0xe7   :  { %2276 = vmatpush2.bf16.msra.mxu0 %v8631_v44  ;;  %v289_v44 = vsel %vm218_vm0, 0.0, %v221_v22  ;;  %v257_v22 = vrot.slane %v9839_v57, 7  ;;  %v8676_v57 = vld [vmem:[#allocation5 + $0x2c8] ss:$16 sps:$4 sm:$0xff]  }
  0xe8   :  { %2339 = vmatpush2.bf16.msra.mxu1 %v8634_v51  ;;  %2277 = vmatprep.subr.bf16.mxu0 %v8639_v52  ;;  %v8669_v51 = vld [vmem:[#allocation5 + $0xec] ss:$16 sps:$4 sm:$0xff]   ;;  %v231_v52 = vrot.slane %v9813_v35, 7  ;;  %v9971_v35 = vpack.c.bf16 %v228_v34, %v289_v44  ;;  %v259_v34 = vrot.slane %v9859_v1, 7  ;;  %v8679_v44 = vld [vmem:[#allocation5 + $0xa8] ss:$16 sps:$4 sm:$0xff]  }
  0xe9   :  { %2340 = vmatprep.subr.bf16.mxu1 %v8642_v54  ;;  %v239_v54 = vrot.slane %v9815_v36, 7 }
  0xea   :  { %v232_v49 = vsel %vm218_vm0, %v223_v4, %v231_v52  ;;  %v261_v4 = vrot.slane %v9843_v59, 7 }
  0xeb   :  { %2278 = vmatpush2.bf16.msra.mxu0 %v8637_v48  ;;  %v8672_v48 = vld [vmem:[#allocation5 + $0x2ec] ss:$16 sps:$4 sm:$0xff]   ;;  %v240_v38 = vsel %vm218_vm0, %v231_v52, %v239_v54 }
  0xec   :  { %2341 = vmatpush2.bf16.msra.mxu1 %v8640_v42  ;;  %2279 = vmatprep.subr.bf16.mxu0 %v8645_v45  ;;  %v235_v42 = vrot.slane %v9817_v37, 7  ;;  %v234_v45 = vsel %vm218_vm0, %v225_v43, %v233_v28  ;;  %v8670_v37 = vld [vmem:[#allocation5 + $0x2e8] ss:$16 sps:$4 sm:$0xff]   ;;  %v246_v43 = vsel %vm218_vm0, %v237_v12, %v245_v13  ;;  %v10019_v12 = vpack.c.bf16 %v240_v38, %v232_v49  ;;  %v8687_v52 = vld [vmem:[#allocation5 + $0x8c] ss:$16 sps:$4 sm:$0xff]  }
  0xed   :  { %2342 = vmatprep.subr.bf16.mxu1 %v8648_v2  ;;  %v242_v2 = vsel %vm218_vm0, %v233_v28, %v241_v8  ;;  %v247_v28 = vrot.slane %v9849_v61, 7  ;;  %v8700_v49 = vld [vmem:[#allocation5 + $0x248] ss:$16 sps:$4 sm:$0xff]   ;;  %v8705_v38 = vld [vmem:[#allocation5 + $0x2c] ss:$16 sps:$4 sm:$0xff]  }
  0xee   :  { %v9986_v20 = vpack.c.bf16 %v242_v2, %v234_v45 }
  0xef   :  { %2280 = vmatpush2.bf16.msra.mxu0 %v8643_v3  ;;  %v248_v45 = vsel %vm218_vm0, %v239_v54, %v247_v28  ;;  %v8693_v3 = vld [vmem:[#allocation5 + $0x6c] ss:$16 sps:$4 sm:$0xff]   ;;  %v8691_v54 = vld [vmem:[#allocation5 + $0x68] ss:$16 sps:$4 sm:$0xff]  }
  0xf0   :  { %2343 = vmatpush2.bf16.msra.mxu1 %v8646_v60  ;;  %2281 = vmatprep.subr.bf16.mxu0 %v8651_v0  ;;  %v243_v60 = vrot.slane %v9823_v39, 7  ;;  %v8667_v0 = vld [vmem:[#allocation5 + $0xe8] ss:$16 sps:$4 sm:$0xff]  }
  0xf1   :  { %2344 = vmatprep.subr.bf16.mxu1 %v8654_v5  ;;  %v8675_v5 = vld [vmem:[#allocation5 + $0xcc] ss:$16 sps:$4 sm:$0xff]  }
  0xf2   :  { %v244_v6 = vsel %vm218_vm0, %v235_v42, %v243_v60 }
  0xf3   :  { %2282 = vmatpush2.bf16.msra.mxu0 %v8649_v10  ;;  %v9981_v10 = vadd.s32 32, %v9877_v26 }
  0xf4   :  { %2345 = vmatpush2.bf16.msra.mxu1 %v8652_v16  ;;  %2283 = vmatprep.subr.bf16.mxu0 %v8657_v18  ;;  %v9984_v16 = vadd.s32 40, %v9877_v26  ;;  %v8678_v18 = vld [vmem:[#allocation5 + $0x2cc] ss:$16 sps:$4 sm:$0xff]  }
  0xf5   :  { %2346 = vmatprep.subr.bf16.mxu1 %v8660_v11  ;;  %v249_v11 = vrot.slane %v9837_v56, 7  ;;  %v8673_v56 = vld [vmem:[#allocation5 + $0xc8] ss:$16 sps:$4 sm:$0xff]   ;;  %v148_v59 = vand.u32 7, %v9981_v10 }
  0xf7   :  { %2284 = vmatpush2.bf16.msra.mxu0 %v8655_v23  ;;  %v253_v23 = vrot.slane %v9841_v58, 7  ;;  %v236_v58 = vsel %vm218_vm0, %v227_v25, %v235_v42  ;;  %v255_v25 = vrot.slane %v9851_v62, 7  ;;  %v250_v62 = vsel %vm218_vm0, %v241_v8, %v249_v11  ;;  %v8685_v8 = vld [vmem:[#allocation5 + $0x88] ss:$16 sps:$4 sm:$0xff]  }
  0xf8   :  { %2347 = vmatpush2.bf16.msra.mxu1 %v8658_v24  ;;  %2285 = vmatprep.subr.bf16.mxu0 %v8663_v53  ;;  %v11233_v24 = vmov 0  ;;  %v10003_v53 = vpack.c.bf16 %v246_v43, %v238_v47  ;;  %v10030_v61 = vpack.c.bf16 %v244_v6, %v236_v58  ;;  %vm8362_vm8 = vcmp.ne.s32.totalorder %v148_v59, 0  ;;  %v8696_v47 = vld [vmem:[#allocation5 + $0x26c] ss:$16 sps:$4 sm:$0xff]   ;;  %v8694_v43 = vld [vmem:[#allocation5 + $0x268] ss:$16 sps:$4 sm:$0xff]  }
  0xf9   :  { %2348 = vmatprep.subr.bf16.mxu1 %v8666_v27  ;;  %v11234_v24 = vsel %vm9999_vm6, 4294967295, %v11233_v24  ;;  %v155_v27 = vand.u32 7, %v9984_v16  ;;  %v254_v1 = vsel %vm218_vm0, %v245_v13, %v253_v23  ;;  %v262_v30 = vsel %vm218_vm0, %v253_v23, %v261_v4  ;;  %v8688_v13 = vld [vmem:[#allocation5 + $0x288] ss:$16 sps:$4 sm:$0xff]   ;;  %v8711_v4 = vld [vmem:[#allocation5 + $0xc] ss:$16 sps:$4 sm:$0xff]  }
  0xfa   :  { %11235 = vst [vmem:[#allocation17_spill] sm:$0xff] %v11234_v24  ;;  %v10046_v33 = vpack.c.bf16 %v262_v30, %v254_v1  ;;  %v11236_v42 = vmov 0  ;;  %v256_v2 = vsel %vm218_vm0, %v247_v28, %v255_v25  ;;  %v8706_v23 = vld [vmem:[#allocation5 + $0x228] ss:$16 sps:$4 sm:$0xff]   ;;  %v8717_v6 = vld [vmem:[#allocation5 + $0x1ec] ss:$16 sps:$4 sm:$0xff]  }
  0xfb   :  { %2286 = vmatpush2.bf16.msra.mxu0 %v8661_v40  ;;  %v8684_v40 = vld [vmem:[#allocation5 + $0x2ac] ss:$16 sps:$4 sm:$0xff]   ;;  %vm8361_vm7 = vcmp.ne.s32.totalorder %v155_v27, 0  ;;  %v10072_v36 = vpack.c.bf16 %v256_v2, %v248_v45  ;;  %v8712_v58 = vld [vmem:[#allocation5 + $0x208] ss:$16 sps:$4 sm:$0xff]   ;;  %vm10252_vm2 = vcmp.ne.s32.totalorder %v155_v27, 7 }
  0xfc   :  { %2349 = vmatpush2.bf16.msra.mxu1 %v8664_v41  ;;  %2381 = vmatprep.subr.bf16.mxu0 %v8669_v51  ;;  %v251_v41 = vrot.slane %v9853_v63, 7  ;;  %v8682_v51 = vld [vmem:[#allocation5 + $0x2a8] ss:$16 sps:$4 sm:$0xff]   ;;  %v258_v63 = vsel %vm218_vm0, %v249_v11, %v257_v22  ;;  %vm10054_vm9 = vmpackc.low %vm8361_vm7, %vm8362_vm8  ;;  %v8708_v11 = vld [vmem:[#allocation5 + $0x22c] ss:$16 sps:$4 sm:$0xff]   ;;  %vm10258_vm4 = vcmp.ne.s32.totalorder %v148_v59, 7 }
  0xfd   :  { %2444 = vmatprep.subr.bf16.mxu1 %v8672_v48  ;;  %v10044_v48 = vpack.c.bf16 %v258_v63, %v250_v62  ;;  %v11237_v42 = vsel %vm10054_vm9, 4294967295, %v11236_v42  ;;  %v8703_v22 = vld [vmem:[#allocation5 + $0x28] ss:$16 sps:$4 sm:$0xff]   ;;  %v8723_v28 = vld [vmem:[#allocation5 + $0x1cc] ss:$16 sps:$4 sm:$0xff]   ;;  %vm10292_vm5 = vmpackc.low %vm10252_vm2, %vm10258_vm4 }
  0xfe   :  { %7374 = vmatmul.mubr.msk.bf16.vlgmr.msra.gmra.mxu0 %vm9918_vm3, %v9954_v32  ;;  %11238 = vst [vmem:[#allocation18_spill] sm:$0xff] %v11237_v42  ;;  %v8721_v25 = vld [vmem:[#allocation5 + $0x1c8] ss:$16 sps:$4 sm:$0xff]   ;;  %v8735_v63 = vld [vmem:[#allocation5 + $0x18c] ss:$16 sps:$4 sm:$0xff]  }
  0xff   :  { %7404 = vmatmul.mubr.msk.bf16.vlgmr.msra.gmra.mxu1 %vm9918_vm3, %v9971_v35  ;;  %2382 = vmatpush1.bf16.msra.mxu0 %v8667_v0  ;;  %v252_v0 = vsel %vm218_vm0, %v243_v60, %v251_v41  ;;  %v8699_v60 = vld [vmem:[#allocation5 + $0x4c] ss:$16 sps:$4 sm:$0xff]   ;;  %v8730_v62 = vld [vmem:[#allocation5 + $0x3a8] ss:$16 sps:$4 sm:$0xff]  }
 0x100   :  { %2445 = vmatpush1.bf16.msra.mxu1 %v8670_v37  ;;  %2383 = vmatprep.subr.bf16.mxu0 %v8675_v5  ;;  %v260_v37 = vsel %vm218_vm0, %v251_v41, %v259_v34  ;;  %v8702_v5 = vld [vmem:[#allocation5 + $0x24c] ss:$16 sps:$4 sm:$0xff]   ;;  %v8724_v41 = vld [vmem:[#allocation5 + $0x3c8] ss:$16 sps:$4 sm:$0xff]  }
 0x101   :  { %2446 = vmatprep.subr.bf16.mxu1 %v8678_v18  ;;  %7379 = vmatprep.mubr.msk.bf16.mxu0 %vm9999_vm6, %v9986_v20  ;;  %v10074_v39 = vpack.c.bf16 %v260_v37, %v252_v0  ;;  %v8697_v18 = vld [vmem:[#allocation5 + $0x48] ss:$16 sps:$4 sm:$0xff]   ;;  %v8729_v34 = vld [vmem:[#allocation5 + $0x1ac] ss:$16 sps:$4 sm:$0xff]  }
 0x102   :  { %7409 = vmatprep.mubr.msk.bf16.mxu1 %vm9999_vm6, %v10003_v53  ;;  %v8738_v1 = vld [vmem:[#allocation5 + $0x38c] ss:$16 sps:$4 sm:$0xff]   ;;  %v8733_v30 = vld [vmem:[#allocation5 + $0x188] ss:$16 sps:$4 sm:$0xff]  }
 0x103   :  { %2384 = vmatpush1.bf16.msra.mxu0 %v8673_v56  ;;  %v8714_v56 = vld [vmem:[#allocation5 + $0x20c] ss:$16 sps:$4 sm:$0xff]   ;;  %v8742_v45 = vld [vmem:[#allocation5 + $0x368] ss:$16 sps:$4 sm:$0xff]  }
 0x104   :  { %2447 = vmatpush1.bf16.msra.mxu1 %v8676_v57  ;;  %2385 = vmatprep.subr.bf16.mxu0 %v8681_v7  ;;  %v8709_v57 = vld [vmem:[#allocation5 + $0x8] ss:$16 sps:$4 sm:$0xff]   ;;  %v8747_v2 = vld [vmem:[#allocation5 + $0x14c] ss:$16 sps:$4 sm:$0xff]  }
 0x105   :  { %2448 = vmatprep.subr.bf16.mxu1 %v8684_v40  ;;  %v8715_v7 = vld [vmem:[#allocation5 + $0x1e8] ss:$16 sps:$4 sm:$0xff]   ;;  %v8726_v40 = vld [vmem:[#allocation5 + $0x3cc] ss:$16 sps:$4 sm:$0xff]  }
 0x106   :  { %7384 = vmatmul.mubr.msk.bf16.gmra.mxu0 %vm9999_vm6, %v10019_v12  ;;  %v8745_v0 = vld [vmem:[#allocation5 + $0x148] ss:$16 sps:$4 sm:$0xff]  }
 0x107   :  { %7414 = vmatmul.mubr.msk.bf16.gmra.mxu1 %vm9999_vm6, %v10030_v61  ;;  %2386 = vmatpush1.bf16.msra.mxu0 %v8679_v44  ;;  %v8732_v44 = vld [vmem:[#allocation5 + $0x3ac] ss:$16 sps:$4 sm:$0xff]   ;;  %v8748_v37 = vld [vmem:[#allocation5 + $0x348] ss:$16 sps:$4 sm:$0xff]  }
 0x108   :  { %2449 = vmatpush1.bf16.msra.mxu1 %v8682_v51  ;;  %2387 = vmatprep.subr.bf16.mxu0 %v8687_v52  ;;  %v8727_v51 = vld [vmem:[#allocation5 + $0x1a8] ss:$16 sps:$4 sm:$0xff]  }
 0x109   :  { %2450 = vmatprep.subr.bf16.mxu1 %v8690_v31  ;;  %7389 = vmatprep.mubr.msk.bf16.mxu0 %vm10054_vm9, %v10044_v48  ;;  %v8736_v52 = vld [vmem:[#allocation5 + $0x388] ss:$16 sps:$4 sm:$0xff]   ;;  %v8741_v31 = vld [vmem:[#allocation5 + $0x16c] ss:$16 sps:$4 sm:$0xff]  }
 0x10a   :  { %7419 = vmatprep.mubr.msk.bf16.mxu1 %vm10054_vm9, %v10046_v33  ;;  %v9002_v42 = vld [vmem:[#allocation8 + $0x504] ss:$16 sps:$4 sm:$0xff]  }
 0x10b   :  { %2388 = vmatpush1.bf16.msra.mxu0 %v8685_v8  ;;  %v8744_v8 = vld [vmem:[#allocation5 + $0x36c] ss:$16 sps:$4 sm:$0xff]   ;;  %v9065_v24 = vld [vmem:[#allocation8 + $0x7a4] ss:$16 sps:$4 sm:$0xff]  }
 0x10c   :  { %2451 = vmatpush1.bf16.msra.mxu1 %v8688_v13  ;;  %2389 = vmatprep.subr.bf16.mxu0 %v8693_v3  ;;  %v8739_v13 = vld [vmem:[#allocation5 + $0x168] ss:$16 sps:$4 sm:$0xff]   ;;  %v8750_v3 = vld [vmem:[#allocation5 + $0x34c] ss:$16 sps:$4 sm:$0xff]  }
 0x10d   :  { %2452 = vmatprep.subr.bf16.mxu1 %v8696_v47  ;;  %v8753_v47 = vld [vmem:[#allocation5 + $0x12c] ss:$16 sps:$4 sm:$0xff]  }
 0x10e   :  { %7394 = vmatmul.mubr.msk.bf16.gmra.mxu0 %vm10054_vm9, %v10072_v36 }
 0x10f   :  { %7424 = vmatmul.mubr.msk.bf16.gmra.mxu1 %vm10054_vm9, %v10074_v39  ;;  %2390 = vmatpush1.bf16.msra.mxu0 %v8691_v54  ;;  %v8756_v54 = vld [vmem:[#allocation5 + $0x32c] ss:$16 sps:$4 sm:$0xff]  }
 0x110   :  { %2453 = vmatpush1.bf16.msra.mxu1 %v8694_v43  ;;  %2391 = vmatprep.subr.bf16.mxu0 %v8699_v60  ;;  %v8751_v43 = vld [vmem:[#allocation5 + $0x128] ss:$16 sps:$4 sm:$0xff]  }
 0x111   :  { %2454 = vmatprep.subr.bf16.mxu1 %v8702_v5  ;;  %7429 = vmatprep.mubr.msk.bf16.mxu0 %vm9918_vm3, %v9910_v14  ;;  %v8720_v14 = vld [vmem:[#allocation5 + $0x3ec] ss:$16 sps:$4 sm:$0xff]   ;;  %v8754_v60 = vld [vmem:[#allocation5 + $0x328] ss:$16 sps:$4 sm:$0xff]  }
 0x112   :  { %7459 = vmatprep.mubr.msk.bf16.mxu1 %vm9918_vm3, %v9912_v15  ;;  %v8718_v15 = vld [vmem:[#allocation5 + $0x3e8] ss:$16 sps:$4 sm:$0xff]   ;;  %v8759_v5 = vld [vmem:[#allocation5 + $0x10c] ss:$16 sps:$4 sm:$0xff]  }
 0x113   :  { %2392 = vmatpush1.bf16.msra.mxu0 %v8697_v18  ;;  %v8762_v18 = vld [vmem:[#allocation5 + $0x30c] ss:$16 sps:$4 sm:$0xff]  }
 0x114   :  { %2455 = vmatpush1.bf16.msra.mxu1 %v8700_v49  ;;  %2393 = vmatprep.subr.bf16.mxu0 %v8705_v38  ;;  %v8757_v49 = vld [vmem:[#allocation5 + $0x108] ss:$16 sps:$4 sm:$0xff]  }
 0x115   :  { %2456 = vmatprep.subr.bf16.mxu1 %v8708_v11  ;;  %v8760_v38 = vld [vmem:[#allocation5 + $0x308] ss:$16 sps:$4 sm:$0xff]   ;;  %v8765_v11 = vld [vmem:[#allocation5 + $0x8e4] ss:$16 sps:$4 sm:$0xff]  }
 0x117   :  { %2394 = vmatpush1.bf16.msra.mxu0 %v8703_v22  ;;  %v8768_v22 = vld [vmem:[#allocation5 + $0xae4] ss:$16 sps:$4 sm:$0xff]  }
 0x118   :  { %2457 = vmatpush1.bf16.msra.mxu1 %v8706_v23  ;;  %2395 = vmatprep.subr.bf16.mxu0 %v8711_v4  ;;  %v8763_v23 = vld [vmem:[#allocation5 + $0x8e0] ss:$16 sps:$4 sm:$0xff]  }
 0x119   :  { %2458 = vmatprep.subr.bf16.mxu1 %v8714_v56  ;;  %v8766_v4 = vld [vmem:[#allocation5 + $0xae0] ss:$16 sps:$4 sm:$0xff]   ;;  %v8771_v56 = vld [vmem:[#allocation5 + $0x8c4] ss:$16 sps:$4 sm:$0xff]  }
 0x11b   :  { %2396 = vmatpush1.bf16.msra.mxu0 %v8709_v57  ;;  %v8774_v57 = vld [vmem:[#allocation5 + $0xac4] ss:$16 sps:$4 sm:$0xff]  }
 0x11c   :  { %2459 = vmatpush1.bf16.msra.mxu1 %v8712_v58  ;;  %2397 = vmatprep.subr.bf16.mxu0 %v8717_v6 }
 0x11d   :  { %2460 = vmatprep.subr.bf16.mxu1 %v8720_v14  ;;  %v8769_v14 = vld [vmem:[#allocation5 + $0x8c0] ss:$16 sps:$4 sm:$0xff]  }
 0x11f   :  { %2398 = vmatpush2.bf16.msra.mxu0 %v8715_v7 }
 0x120   :  { %2461 = vmatpush2.bf16.msra.mxu1 %v8718_v15  ;;  %2399 = vmatprep.subr.bf16.mxu0 %v8723_v28  ;;  %v8772_v15 = vld [vmem:[#allocation5 + $0xac0] ss:$16 sps:$4 sm:$0xff]   ;;  %v8777_v28 = vld [vmem:[#allocation5 + $0x8a4] ss:$16 sps:$4 sm:$0xff]  }
 0x121   :  { %2462 = vmatprep.subr.bf16.mxu1 %v8726_v40 }
 0x123   :  { %2400 = vmatpush2.bf16.msra.mxu0 %v8721_v25 }
 0x124   :  { %2463 = vmatpush2.bf16.msra.mxu1 %v8724_v41  ;;  %2401 = vmatprep.subr.bf16.mxu0 %v8729_v34  ;;  %v8780_v41 = vld [vmem:[#allocation5 + $0xaa4] ss:$16 sps:$4 sm:$0xff]  }
 0x125   :  { %2464 = vmatprep.subr.bf16.mxu1 %v8732_v44  ;;  %v8775_v44 = vld [vmem:[#allocation5 + $0x8a0] ss:$16 sps:$4 sm:$0xff]  }
 0x127   :  { %2402 = vmatpush2.bf16.msra.mxu0 %v8727_v51  ;;  %v8778_v51 = vld [vmem:[#allocation5 + $0xaa0] ss:$16 sps:$4 sm:$0xff]  }
 0x128   :  { %2465 = vmatpush2.bf16.msra.mxu1 %v8730_v62  ;;  %2403 = vmatprep.subr.bf16.mxu0 %v8735_v63  ;;  %v8783_v63 = vld [vmem:[#allocation5 + $0x884] ss:$16 sps:$4 sm:$0xff]  }
 0x129   :  { %2466 = vmatprep.subr.bf16.mxu1 %v8738_v1 }
 0x12b   :  { %2404 = vmatpush2.bf16.msra.mxu0 %v8733_v30 }
 0x12c   :  { %2467 = vmatpush2.bf16.msra.mxu1 %v8736_v52  ;;  %2405 = vmatprep.subr.bf16.mxu0 %v8741_v31  ;;  %v8786_v52 = vld [vmem:[#allocation5 + $0xa84] ss:$16 sps:$4 sm:$0xff]   ;;  %v9532_v31 = vld [vmem:[#allocation2 + $0x28] sm:$0xff] }
 0x12d   :  { %2468 = vmatprep.subr.bf16.mxu1 %v8744_v8  ;;  %v338_v8 = vrot.slane %v9532_v31, 1  ;;  %v8816_v31 = vld [vmem:[#allocation5 + $0xbe4] ss:$16 sps:$4 sm:$0xff]  }
 0x12f   :  { %2406 = vmatpush2.bf16.msra.mxu0 %v8739_v13  ;;  %v9533_v13 = vld [vmem:[#allocation2 + $0x18] sm:$0xff] }
 0x130   :  { %2469 = vmatpush2.bf16.msra.mxu1 %v8742_v45  ;;  %2407 = vmatprep.subr.bf16.mxu0 %v8747_v2  ;;  %v343_v45 = vrot.slane %v9533_v13, 1  ;;  %v9534_v2 = vld [vmem:[#allocation2 + $0x38] sm:$0xff] }
 0x131   :  { %2470 = vmatprep.subr.bf16.mxu1 %v8750_v3  ;;  %v344_v3 = vrot.slane %v9534_v2, 1  ;;  %v8811_v2 = vld [vmem:[#allocation5 + $0x9e0] ss:$16 sps:$4 sm:$0xff]  }
 0x133   :  { %2408 = vmatpush2.bf16.msra.mxu0 %v8745_v0  ;;  %v10118_v0 = vld [vmem:[#allocation2 + $0x48] sm:$0xff] }
 0x134   :  { %2471 = vmatpush2.bf16.msra.mxu1 %v8748_v37  ;;  %2409 = vmatprep.subr.bf16.mxu0 %v8753_v47  ;;  %v348_v46 = vrot.slane %v10118_v0, 1  ;;  %v10121_v37 = vld [vmem:[#allocation2 + $0x58] sm:$0xff] }
 0x135   :  { %2472 = vmatprep.subr.bf16.mxu1 %v8756_v54  ;;  %v352_v47 = vrot.slane %v10121_v37, 1  ;;  %v8789_v54 = vld [vmem:[#allocation5 + $0x864] ss:$16 sps:$4 sm:$0xff]   ;;  %v8879_v0 = vld [vmem:[#allocation5 + $0x88c] ss:$16 sps:$4 sm:$0xff]  }
 0x137   :  { %2410 = vmatpush2.bf16.msra.mxu0 %v8751_v43  ;;  %v8792_v43 = vld [vmem:[#allocation5 + $0xa64] ss:$16 sps:$4 sm:$0xff]  }
 0x138   :  { %2473 = vmatpush2.bf16.msra.mxu1 %v8754_v60  ;;  %2411 = vmatprep.subr.bf16.mxu0 %v8759_v5  ;;  %v11243_v60 = vmov 0  ;;  %v8795_v5 = vld [vmem:[#allocation5 + $0x844] ss:$16 sps:$4 sm:$0xff]  }
 0x139   :  { %2474 = vmatprep.subr.bf16.mxu1 %v8762_v18  ;;  %v11244_v60 = vsel %vm10134_vm12, 4294967295, %v11243_v60  ;;  %v8798_v18 = vld [vmem:[#allocation5 + $0xa44] ss:$16 sps:$4 sm:$0xff]  }
 0x13a   :  { %11245 = vst [vmem:[#allocation19_spill] sm:$0xff] %v11244_v60  ;;  %v9059_v60 = vld [vmem:[#allocation8 + $0x7c4] ss:$16 sps:$4 sm:$0xff]  }
 0x13b   :  { %2412 = vmatpush2.bf16.msra.mxu0 %v8757_v49 }
 0x13c   :  { %2475 = vmatpush2.bf16.msra.mxu1 %v8760_v38  ;;  %3288 = vmatprep.subr.bf16.mxu0 %v8765_v11  ;;  %v349_v38 = vsel %vm333_vm13, %v338_v8, %v348_v46  ;;  %v345_v11 = vsel %vm333_vm13, %v343_v45, %v344_v3 }
 0x13d   :  { %3351 = vmatprep.subr.bf16.mxu1 %v8768_v22 }
 0x13e   :  { %v1397_v58 = vpop.f32.mrf.mxu0  ;;  %7434 = vmatmul.mubr.msk.bf16.vlgmr.msra.gmra.mxu0 %vm9918_vm3, %v9954_v32 }
 0x13f   :  { %v1460_v6 = vpop.f32.mrf.mxu1  ;;  %7464 = vmatmul.mubr.msk.bf16.vlgmr.msra.gmra.mxu1 %vm9918_vm3, %v9971_v35  ;;  %3289 = vmatpush1.bf16.msra.mxu0 %v8763_v23 }
 0x140   :  { %v10094_v7 = vadd.f32 %v1460_v6, %v1397_v58  ;;  %3352 = vmatpush1.bf16.msra.mxu1 %v8766_v4  ;;  %v1399_v40 = vpop.f32.mrf.mxu0  ;;  %3290 = vmatprep.subr.bf16.mxu0 %v8771_v56  ;;  %v8796_v4 = vld [vmem:[#allocation5 + $0xa40] ss:$16 sps:$4 sm:$0xff]   ;;  %v8801_v6 = vld [vmem:[#allocation5 + $0x824] ss:$16 sps:$4 sm:$0xff]  }
 0x141   :  { %v1462_v25 = vpop.f32.mrf.mxu1  ;;  %3353 = vmatprep.subr.bf16.mxu1 %v8774_v57  ;;  %7439 = vmatprep.mubr.msk.bf16.mxu0 %vm9999_vm6, %v9986_v20 }
 0x142   :  { %v10096_v34 = vadd.f32 %v1462_v25, %v1399_v40  ;;  %7469 = vmatprep.mubr.msk.bf16.mxu1 %vm9999_vm6, %v10003_v53  ;;  %v1401_v32 = vpop.f32.mrf.mxu0  ;;  %v9531_v53 = vld [vmem:[#allocation2 + $0x8] sm:$0xff] }
 0x143   :  { %v1464_v35 = vpop.f32.mrf.mxu1  ;;  %3291 = vmatpush1.bf16.msra.mxu0 %v8769_v14  ;;  %v337_v30 = vrot.slane %v9531_v53, 1  ;;  %v8804_v14 = vld [vmem:[#allocation5 + $0xa24] ss:$16 sps:$4 sm:$0xff]   ;;  %v8805_v53 = vld [vmem:[#allocation5 + $0x800] ss:$16 sps:$4 sm:$0xff]  }
 0x144   :  { %v10104_v62 = vadd.f32 %v1464_v35, %v1401_v32  ;;  %3354 = vmatpush1.bf16.msra.mxu1 %v8772_v15  ;;  %3292 = vmatprep.subr.bf16.mxu0 %v8777_v28  ;;  %v10152_v22 = vpop.f32.mrf.mxu0  ;;  %v8802_v32 = vld [vmem:[#allocation5 + $0xa20] ss:$16 sps:$4 sm:$0xff]  }
 0x145   :  { %3355 = vmatprep.subr.bf16.mxu1 %v8780_v41  ;;  %v339_v49 = vsel %vm333_vm13, %v337_v30, %v338_v8  ;;  %v10154_v23 = vpop.f32.mrf.mxu1  ;;  %v8799_v41 = vld [vmem:[#allocation5 + $0x820] ss:$16 sps:$4 sm:$0xff]  }
 0x146   :  { %7444 = vmatmul.mubr.msk.bf16.gmra.mxu0 %vm9999_vm6, %v10019_v12  ;;  %v8787_v12 = vld [vmem:[#allocation5 + $0x860] ss:$16 sps:$4 sm:$0xff]   ;;  %v1407_v56 = vpop.f32.mrf.mxu0  ;;  %v10156_v57 = vpack.c.bf16 %v349_v38, %v339_v49 }
 0x147   :  { %7474 = vmatmul.mubr.msk.bf16.gmra.mxu1 %vm9999_vm6, %v10030_v61  ;;  %3293 = vmatpush1.bf16.msra.mxu0 %v8775_v44  ;;  %v8790_v61 = vld [vmem:[#allocation5 + $0xa60] ss:$16 sps:$4 sm:$0xff]   ;;  %v1470_v15 = vpop.f32.mrf.mxu1  ;;  %v8810_v44 = vld [vmem:[#allocation5 + $0xa04] ss:$16 sps:$4 sm:$0xff]  }
 0x148   :  { %3356 = vmatpush1.bf16.msra.mxu1 %v8778_v51  ;;  %3294 = vmatprep.subr.bf16.mxu0 %v8783_v63  ;;  %v10166_v28 = vadd.f32 %v1470_v15, %v1407_v56  ;;  %v1409_v40 = vpop.f32.mrf.mxu0  ;;  %v8808_v30 = vld [vmem:[#allocation5 + $0xa00] ss:$16 sps:$4 sm:$0xff]   ;;  %v8831_v56 = vld [vmem:[#allocation5 + $0x984] ss:$16 sps:$4 sm:$0xff]  }
 0x149   :  { %3357 = vmatprep.subr.bf16.mxu1 %v8786_v52  ;;  %7449 = vmatprep.mubr.msk.bf16.mxu0 %vm10054_vm9, %v10044_v48  ;;  %v353_v48 = vsel %vm333_vm13, %v344_v3, %v352_v47  ;;  %v1472_v25 = vpop.f32.mrf.mxu1  ;;  %v8813_v52 = vld [vmem:[#allocation5 + $0x9e4] ss:$16 sps:$4 sm:$0xff]   ;;  %v8814_v3 = vld [vmem:[#allocation5 + $0xbe0] ss:$16 sps:$4 sm:$0xff]  }
 0x14a   :  { %7479 = vmatprep.mubr.msk.bf16.mxu1 %vm10054_vm9, %v10046_v33  ;;  %v8793_v33 = vld [vmem:[#allocation5 + $0x840] ss:$16 sps:$4 sm:$0xff]   ;;  %v10158_v58 = vpack.c.bf16 %v353_v48, %v345_v11  ;;  %v10168_v35 = vadd.f32 %v1472_v25, %v1409_v40  ;;  %v8825_v11 = vld [vmem:[#allocation5 + $0x9a4] ss:$16 sps:$4 sm:$0xff]  }
 0x14b   :  { %3295 = vmatpush1.bf16.msra.mxu0 %v8781_v29  ;;  %v1474_v51 = vpop.f32.mrf.mxu1  ;;  %v8817_v49 = vld [vmem:[#allocation5 + $0x9c0] ss:$16 sps:$4 sm:$0xff]   ;;  %v8828_v48 = vld [vmem:[#allocation5 + $0xba4] ss:$16 sps:$4 sm:$0xff]  }
 0x14c   :  { %3358 = vmatpush1.bf16.msra.mxu1 %v8784_v50  ;;  %3296 = vmatprep.subr.bf16.mxu0 %v8789_v54  ;;  %v8820_v38 = vld [vmem:[#allocation5 + $0xbc0] ss:$16 sps:$4 sm:$0xff]   ;;  %v8837_v40 = vld [vmem:[#allocation5 + $0x964] ss:$16 sps:$4 sm:$0xff]  }
 0x14d   :  { %3359 = vmatprep.subr.bf16.mxu1 %v8792_v43  ;;  %v10180_v20 = vpop.f32.mrf.mxu1  ;;  %v8819_v43 = vld [vmem:[#allocation5 + $0x9c4] ss:$16 sps:$4 sm:$0xff]   ;;  %v8832_v15 = vld [vmem:[#allocation5 + $0xb80] ss:$16 sps:$4 sm:$0xff]  }
 0x14e   :  { %7454 = vmatmul.mubr.msk.bf16.gmra.mxu0 %vm10054_vm9, %v10072_v36  ;;  %v1411_v36 = vpop.f32.mrf.mxu0  ;;  %v8840_v25 = vld [vmem:[#allocation5 + $0xb64] ss:$16 sps:$4 sm:$0xff]  }
 0x14f   :  { %7484 = vmatmul.mubr.msk.bf16.gmra.mxu1 %vm10054_vm9, %v10074_v39  ;;  %3297 = vmatpush1.bf16.msra.mxu0 %v8787_v12  ;;  %v8807_v39 = vld [vmem:[#allocation5 + $0x804] ss:$16 sps:$4 sm:$0xff]   ;;  %v10176_v63 = vadd.f32 %v1474_v51, %v1411_v36  ;;  %v1480_v13 = vpop.f32.mrf.mxu1  ;;  %v8844_v51 = vld [vmem:[#allocation5 + $0xb40] ss:$16 sps:$4 sm:$0xff]  }
 0x150   :  { %3360 = vmatpush1.bf16.msra.mxu1 %v8790_v61  ;;  %3298 = vmatprep.subr.bf16.mxu0 %v8795_v5  ;;  %v10178_v1 = vpop.f32.mrf.mxu0  ;;  %v8822_v12 = vld [vmem:[#allocation5 + $0xbc4] ss:$16 sps:$4 sm:$0xff]  }
 0x151   :  { %3361 = vmatprep.subr.bf16.mxu1 %v8798_v18  ;;  %7617 = vmatprep.mubr.msk.bf16.mxu0 %vm10134_vm12, %v10156_v57  ;;  %v1482_v50 = vpop.f32.mrf.mxu1  ;;  %v8843_v36 = vld [vmem:[#allocation5 + $0x944] ss:$16 sps:$4 sm:$0xff]  }
 0x152   :  { %7647 = vmatprep.mubr.msk.bf16.mxu1 %vm10134_vm12, %v10158_v58  ;;  %v1417_v8 = vpop.f32.mrf.mxu0 }
 0x153   :  { %3299 = vmatpush1.bf16.msra.mxu0 %v8793_v33  ;;  %v10182_v45 = vadd.f32 %v1480_v13, %v1417_v8  ;;  %v1484_v5 = vpop.f32.mrf.mxu1  ;;  %v8823_v33 = vld [vmem:[#allocation5 + $0x9a0] ss:$16 sps:$4 sm:$0xff]  }
 0x154   :  { %3362 = vmatpush1.bf16.msra.mxu1 %v8796_v4  ;;  %3300 = vmatprep.subr.bf16.mxu0 %v8801_v6  ;;  %v1419_v29 = vpop.f32.mrf.mxu0  ;;  %v8826_v4 = vld [vmem:[#allocation5 + $0xba0] ss:$16 sps:$4 sm:$0xff]   ;;  %v8834_v6 = vld [vmem:[#allocation5 + $0xb84] ss:$16 sps:$4 sm:$0xff]  }
 0x155   :  { %3363 = vmatprep.subr.bf16.mxu1 %v8804_v14  ;;  %v10184_v54 = vadd.f32 %v1482_v50, %v1419_v29  ;;  %v8829_v14 = vld [vmem:[#allocation5 + $0x980] ss:$16 sps:$4 sm:$0xff]  }
 0x156   :  { %v1421_v61 = vpop.f32.mrf.mxu0  ;;  %v9538_v8 = vld [vmem:[#allocation2 + $0x20] sm:$0xff]  ;;  %v9539_v29 = vld [vmem:[#allocation2 + $0x10] sm:$0xff] }
 0x157   :  { %3301 = vmatpush1.bf16.msra.mxu0 %v8799_v41  ;;  %v10186_v18 = vadd.f32 %v1484_v5, %v1421_v61  ;;  %v8835_v41 = vld [vmem:[#allocation5 + $0x960] ss:$16 sps:$4 sm:$0xff]   ;;  %v335_v13 = vrot.slane %v9538_v8, 1  ;;  %v340_v50 = vrot.slane %v9539_v29, 1 }
 0x158   :  { %3364 = vmatpush1.bf16.msra.mxu1 %v8802_v32  ;;  %3302 = vmatprep.subr.bf16.mxu0 %v8807_v39  ;;  %v8838_v32 = vld [vmem:[#allocation5 + $0xb60] ss:$16 sps:$4 sm:$0xff]   ;;  %v8846_v39 = vld [vmem:[#allocation5 + $0xb44] ss:$16 sps:$4 sm:$0xff]   ;;  %v10262_v37 = vpop.f32.mrf.mxu0 }
 0x159   :  { %3365 = vmatprep.subr.bf16.mxu1 %v8810_v44  ;;  %v8841_v44 = vld [vmem:[#allocation5 + $0x940] ss:$16 sps:$4 sm:$0xff]  }
 0x15a   :  { %v10188_v61 = vld [vmem:[#allocation2 + $0x40] sm:$0xff] }
 0x15b   :  { %3303 = vmatpush1.bf16.msra.mxu0 %v8805_v53  ;;  %v8849_v53 = vld [vmem:[#allocation5 + $0x924] ss:$16 sps:$4 sm:$0xff]   ;;  %v346_v5 = vrot.slane %v10188_v61, 1 }
 0x15c   :  { %3366 = vmatpush1.bf16.msra.mxu1 %v8808_v30  ;;  %3304 = vmatprep.subr.bf16.mxu0 %v8813_v52  ;;  %v8852_v30 = vld [vmem:[#allocation5 + $0xb24] ss:$16 sps:$4 sm:$0xff]  }
 0x15d   :  { %3367 = vmatprep.subr.bf16.mxu1 %v8816_v31  ;;  %v9537_v52 = vld [vmem:[#allocation2] sm:$0xff]  ;;  %v347_v19 = vsel %vm333_vm13, %v335_v13, %v346_v5 }
 0x15e   :  { %v334_v31 = vrot.slane %v9537_v52, 1 }
 0x15f   :  { %3305 = vmatpush2.bf16.msra.mxu0 %v8811_v2  ;;  %v9540_v2 = vld [vmem:[#allocation2 + $0x30] sm:$0xff] }
 0x160   :  { %3368 = vmatpush2.bf16.msra.mxu1 %v8814_v3  ;;  %3306 = vmatprep.subr.bf16.mxu0 %v8819_v43  ;;  %v341_v3 = vrot.slane %v9540_v2, 1  ;;  %v8847_v43 = vld [vmem:[#allocation5 + $0x920] ss:$16 sps:$4 sm:$0xff]  }
 0x161   :  { %3369 = vmatprep.subr.bf16.mxu1 %v8822_v12  ;;  %v8850_v12 = vld [vmem:[#allocation5 + $0xb20] ss:$16 sps:$4 sm:$0xff]  }
 0x163   :  { %3307 = vmatpush2.bf16.msra.mxu0 %v8817_v49  ;;  %v10191_v49 = vld [vmem:[#allocation2 + $0x50] sm:$0xff] }
 0x164   :  { %3370 = vmatpush2.bf16.msra.mxu1 %v8820_v38  ;;  %3308 = vmatprep.subr.bf16.mxu0 %v8825_v11  ;;  %v350_v38 = vrot.slane %v10191_v49, 1  ;;  %v8855_v11 = vld [vmem:[#allocation5 + $0x904] ss:$16 sps:$4 sm:$0xff]  }
 0x165   :  { %3371 = vmatprep.subr.bf16.mxu1 %v8828_v48  ;;  %v8858_v48 = vld [vmem:[#allocation5 + $0xb04] ss:$16 sps:$4 sm:$0xff]  }
 0x166   :  { %v351_v55 = vsel %vm333_vm13, %v341_v3, %v350_v38 }
 0x167   :  { %3309 = vmatpush2.bf16.msra.mxu0 %v8823_v33 }
 0x168   :  { %3372 = vmatpush2.bf16.msra.mxu1 %v8826_v4  ;;  %3310 = vmatprep.subr.bf16.mxu0 %v8831_v56  ;;  %v336_v56 = vsel %vm333_vm13, %v334_v31, %v335_v13  ;;  %v9548_v31 = vld [vmem:[#allocation2 + $0x70] sm:$0xff]  ;;  %v10228_v13 = vld [vmem:[#allocation2 + $0x80] sm:$0xff]  ;;  %v8867_v4 = vld [vmem:[#allocation5 + $0x8cc] ss:$16 sps:$4 sm:$0xff]  }
 0x169   :  { %3373 = vmatprep.subr.bf16.mxu1 %v8834_v6  ;;  %v342_v6 = vsel %vm333_vm13, %v340_v50, %v341_v3  ;;  %v358_v8 = vrot.slane %v9548_v31, 1  ;;  %v362_v29 = vrot.slane %v10228_v13, 1  ;;  %v10231_v50 = vld [vmem:[#allocation2 + $0x90] sm:$0xff]  ;;  %v10234_v3 = vpack.c.bf16 %v347_v19, %v336_v56  ;;  %v8876_v19 = vld [vmem:[#allocation5 + $0xaac] ss:$16 sps:$4 sm:$0xff]  }
 0x16a   :  { %v366_v2 = vrot.slane %v10231_v50, 1  ;;  %v10236_v33 = vpack.c.bf16 %v351_v55, %v342_v6  ;;  %v8865_v6 = vld [vmem:[#allocation5 + $0x8c8] ss:$16 sps:$4 sm:$0xff]  }
 0x16b   :  { %3311 = vmatpush2.bf16.msra.mxu0 %v8829_v14  ;;  %v9543_v14 = vld [vmem:[#allocation2 + $0x68] sm:$0xff]  ;;  %v359_v61 = vsel %vm333_vm13, %v350_v38, %v358_v8 }
 0x16c   :  { %3374 = vmatpush2.bf16.msra.mxu1 %v8832_v15  ;;  %3312 = vmatprep.subr.bf16.mxu0 %v8837_v40  ;;  %v356_v15 = vrot.slane %v9543_v14, 1  ;;  %v9544_v40 = vld [vmem:[#allocation2 + $0x78] sm:$0xff]  ;;  %v9551_v55 = vld [vmem:[#allocation2 + $0xa8] sm:$0xff] }
 0x16d   :  { %3375 = vmatprep.subr.bf16.mxu1 %v8840_v25  ;;  %v360_v21 = vrot.slane %v9544_v40, 1  ;;  %v8856_v25 = vld [vmem:[#allocation5 + $0xb00] ss:$16 sps:$4 sm:$0xff]   ;;  %v8870_v14 = vld [vmem:[#allocation5 + $0xacc] ss:$16 sps:$4 sm:$0xff]  }
 0x16e   :  { %v8886_v50 = vld [vmem:[#allocation5 + $0xa68] ss:$16 sps:$4 sm:$0xff]  }
 0x16f   :  { %3313 = vmatpush2.bf16.msra.mxu0 %v8835_v41  ;;  %v10214_v41 = vld [vmem:[#allocation2 + $0x88] sm:$0xff]  ;;  %v361_v40 = vsel %vm333_vm13, %v352_v47, %v360_v21  ;;  %v10264_v47 = vpop.f32.mrf.mxu1 }
 0x170   :  { %3376 = vmatpush2.bf16.msra.mxu1 %v8838_v32  ;;  %3314 = vmatprep.subr.bf16.mxu0 %v8843_v36  ;;  %v364_v32 = vrot.slane %v10214_v41, 1  ;;  %v10217_v36 = vld [vmem:[#allocation2 + $0x98] sm:$0xff] }
 0x171   :  { %3377 = vmatprep.subr.bf16.mxu1 %v8846_v39  ;;  %v368_v39 = vrot.slane %v10217_v36, 1  ;;  %v8877_v41 = vld [vmem:[#allocation5 + $0x888] ss:$16 sps:$4 sm:$0xff]  }
 0x173   :  { %3315 = vmatpush2.bf16.msra.mxu0 %v8841_v44  ;;  %v8861_v44 = vld [vmem:[#allocation5 + $0x8ec] ss:$16 sps:$4 sm:$0xff]   ;;  %v369_v56 = vsel %vm333_vm13, %v360_v21, %v368_v39 }
 0x174   :  { %3378 = vmatpush2.bf16.msra.mxu1 %v8844_v51  ;;  %3316 = vmatprep.subr.bf16.mxu0 %v8849_v53  ;;  %v8864_v51 = vld [vmem:[#allocation5 + $0xaec] ss:$16 sps:$4 sm:$0xff]   ;;  %v11250_v53 = vmov 0  ;;  %v10268_v16 = vpack.c.bf16 %v369_v56, %v361_v40  ;;  %v9553_v40 = vld [vmem:[#allocation2 + $0xa0] sm:$0xff] }
 0x175   :  { %3379 = vmatprep.subr.bf16.mxu1 %v8852_v30  ;;  %v11251_v53 = vsel %vm10224_vm1, 4294967295, %v11250_v53  ;;  %v9547_v30 = vld [vmem:[#allocation2 + $0x60] sm:$0xff]  ;;  %v370_v56 = vrot.slane %v9553_v40, 1 }
 0x176   :  { %11252 = vst [vmem:[#allocation20_spill] sm:$0xff] %v11251_v53  ;;  %v354_v52 = vrot.slane %v9547_v30, 1  ;;  %v9552_v30 = vld [vmem:[#allocation2 + $0xb8] sm:$0xff] }
 0x177   :  { %3317 = vmatpush2.bf16.msra.mxu0 %v8847_v43  ;;  %v8859_v43 = vld [vmem:[#allocation5 + $0x8e8] ss:$16 sps:$4 sm:$0xff]   ;;  %v376_v49 = vrot.slane %v9552_v30, 1 }
 0x178   :  { %3380 = vmatpush2.bf16.msra.mxu1 %v8850_v12  ;;  %3318 = vmatprep.subr.bf16.mxu0 %v8855_v11  ;;  %v8862_v12 = vld [vmem:[#allocation5 + $0xae8] ss:$16 sps:$4 sm:$0xff]   ;;  %v357_v11 = vsel %vm333_vm13, %v348_v46, %v356_v15  ;;  %v355_v10 = vsel %vm333_vm13, %v346_v5, %v354_v52  ;;  %v363_v59 = vsel %vm333_vm13, %v354_v52, %v362_v29  ;;  %v8882_v46 = vld [vmem:[#allocation5 + $0xa8c] ss:$16 sps:$4 sm:$0xff]  }
 0x179   :  { %3381 = vmatprep.subr.bf16.mxu1 %v8858_v48  ;;  %v365_v48 = vsel %vm333_vm13, %v356_v15, %v364_v32  ;;  %v8868_v15 = vld [vmem:[#allocation5 + $0xac8] ss:$16 sps:$4 sm:$0xff]   ;;  %v367_v5 = vsel %vm333_vm13, %v358_v8, %v366_v2 }
 0x17a   :  { %v10266_v21 = vpack.c.bf16 %v365_v48, %v357_v11  ;;  %v10306_v11 = vpack.c.bf16 %v363_v59, %v355_v10  ;;  %v10308_v48 = vpack.c.bf16 %v367_v5, %v359_v61  ;;  %v377_v10 = vsel %vm333_vm13, %v368_v39, %v376_v49  ;;  %v9554_v5 = vld [vmem:[#allocation2 + $0xb0] sm:$0xff]  ;;  %v8999_v53 = vld [vmem:[#allocation8 + $0x524] ss:$16 sps:$4 sm:$0xff]  }
 0x17b   :  { %3319 = vmatpush2.bf16.msra.mxu0 %v8853_v9  ;;  %v405_v59 = vsel %vm333_vm13, %v376_v49, 0.0  ;;  %v371_v39 = vsel %vm333_vm13, %v362_v29, %v370_v56  ;;  %v402_v49 = vsel %vm333_vm13, %v370_v56, 0.0 }
 0x17c   :  { %3382 = vmatpush2.bf16.msra.mxu1 %v8856_v25  ;;  %3414 = vmatprep.subr.bf16.mxu0 %v8861_v44  ;;  %v8873_v25 = vld [vmem:[#allocation5 + $0x8ac] ss:$16 sps:$4 sm:$0xff]   ;;  %v372_v44 = vrot.slane %v9551_v55, 1  ;;  %v374_v55 = vrot.slane %v9554_v5, 1  ;;  %v10326_v36 = vpack.c.bf16 %v405_v59, %v377_v10  ;;  %v8889_v5 = vld [vmem:[#allocation5 + $0x848] ss:$16 sps:$4 sm:$0xff]  }
 0x17d   :  { %3477 = vmatprep.subr.bf16.mxu1 %v8864_v51  ;;  %v11257_v51 = vmov 0 }
 0x17e   :  { %v1523_v27 = vpop.f32.mrf.mxu0  ;;  %7622 = vmatmul.mubr.msk.bf16.vlgmr.msra.gmra.mxu0 %vm10134_vm12, %v10234_v3  ;;  %v11258_v51 = vsel %vm10292_vm5, 4294967295, %v11257_v51  ;;  %v404_v40 = vsel %vm333_vm13, %v374_v55, 0.0 }
 0x17f   :  { %v1586_v9 = vpop.f32.mrf.mxu1  ;;  %7652 = vmatmul.mubr.msk.bf16.vlgmr.msra.gmra.mxu1 %vm10134_vm12, %v10236_v33  ;;  %11259 = vst [vmem:[#allocation21_spill] sm:$0xff] %v11258_v51  ;;  %3415 = vmatpush1.bf16.msra.mxu0 %v8859_v43  ;;  %v8871_v43 = vld [vmem:[#allocation5 + $0x8a8] ss:$16 sps:$4 sm:$0xff]  }
 0x180   :  { %v10296_v52 = vadd.f32 %v1586_v9, %v1523_v27  ;;  %3478 = vmatpush1.bf16.msra.mxu1 %v8862_v12  ;;  %v1525_v38 = vpop.f32.mrf.mxu0  ;;  %3416 = vmatprep.subr.bf16.mxu0 %v8867_v4  ;;  %v8874_v12 = vld [vmem:[#allocation5 + $0xaa8] ss:$16 sps:$4 sm:$0xff]   ;;  %v373_v27 = vsel %vm333_vm13, %v364_v32, %v372_v44  ;;  %v403_v9 = vsel %vm333_vm13, %v372_v44, 0.0 }
 0x181   :  { %v1588_v31 = vpop.f32.mrf.mxu1  ;;  %3479 = vmatprep.subr.bf16.mxu1 %v8870_v14  ;;  %7627 = vmatprep.mubr.msk.bf16.mxu0 %vm10224_vm1, %v10266_v21  ;;  %v8880_v32 = vld [vmem:[#allocation5 + $0xa88] ss:$16 sps:$4 sm:$0xff]   ;;  %v10324_v44 = vpack.c.bf16 %v403_v9, %v373_v27 }
 0x182   :  { %v10298_v8 = vadd.f32 %v1588_v31, %v1525_v38  ;;  %7657 = vmatprep.mubr.msk.bf16.mxu1 %vm10224_vm1, %v10268_v16  ;;  %v1527_v4 = vpop.f32.mrf.mxu0  ;;  %v375_v31 = vsel %vm333_vm13, %v366_v2, %v374_v55  ;;  %v10352_v2 = vpack.c.bf16 %v402_v49, %v371_v39  ;;  %v8892_v55 = vld [vmem:[#allocation5 + $0xa48] ss:$16 sps:$4 sm:$0xff]  }
 0x183   :  { %v1590_v14 = vpop.f32.mrf.mxu1  ;;  %3417 = vmatpush1.bf16.msra.mxu0 %v8865_v6  ;;  %v8885_v6 = vld [vmem:[#allocation5 + $0x86c] ss:$16 sps:$4 sm:$0xff]   ;;  %v10354_v56 = vpack.c.bf16 %v404_v40, %v375_v31  ;;  %v8895_v49 = vld [vmem:[#allocation5 + $0x828] ss:$16 sps:$4 sm:$0xff]  }
 0x184   :  { %v10318_v61 = vadd.f32 %v1590_v14, %v1527_v4  ;;  %3480 = vmatpush1.bf16.msra.mxu1 %v8868_v15  ;;  %v10320_v30 = vpop.f32.mrf.mxu0  ;;  %3418 = vmatprep.subr.bf16.mxu0 %v8873_v25  ;;  %v8888_v15 = vld [vmem:[#allocation5 + $0xa6c] ss:$16 sps:$4 sm:$0xff]   ;;  %v8898_v31 = vld [vmem:[#allocation5 + $0xa28] ss:$16 sps:$4 sm:$0xff]  }
 0x185   :  { %v10322_v38 = vpop.f32.mrf.mxu1  ;;  %3481 = vmatprep.subr.bf16.mxu1 %v8876_v19  ;;  %v8891_v14 = vld [vmem:[#allocation5 + $0x84c] ss:$16 sps:$4 sm:$0xff]   ;;  %v9053_v51 = vld [vmem:[#allocation8 + $0x7e4] ss:$16 sps:$4 sm:$0xff]  }
 0x186   :  { %7632 = vmatmul.mubr.msk.bf16.gmra.mxu0 %vm10224_vm1, %v10306_v11  ;;  %v1533_v25 = vpop.f32.mrf.mxu0 }
 0x187   :  { %7662 = vmatmul.mubr.msk.bf16.gmra.mxu1 %vm10224_vm1, %v10308_v48  ;;  %v1596_v19 = vpop.f32.mrf.mxu1  ;;  %3419 = vmatpush1.bf16.msra.mxu0 %v8871_v43  ;;  %v8883_v43 = vld [vmem:[#allocation5 + $0x868] ss:$16 sps:$4 sm:$0xff]  }
 0x188   :  { %3482 = vmatpush1.bf16.msra.mxu1 %v8874_v12  ;;  %v10342_v4 = vadd.f32 %v1596_v19, %v1533_v25  ;;  %3420 = vmatprep.subr.bf16.mxu0 %v8879_v0  ;;  %v1535_v13 = vpop.f32.mrf.mxu0  ;;  %v8894_v0 = vld [vmem:[#allocation5 + $0xa4c] ss:$16 sps:$4 sm:$0xff]  }
 0x189   :  { %3483 = vmatprep.subr.bf16.mxu1 %v8882_v46  ;;  %v1598_v29 = vpop.f32.mrf.mxu1  ;;  %7637 = vmatprep.mubr.msk.bf16.mxu0 %vm10292_vm5, %v10324_v44 }
 0x18a   :  { %7667 = vmatprep.mubr.msk.bf16.mxu1 %vm10292_vm5, %v10326_v36  ;;  %v10350_v12 = vadd.f32 %v1598_v29, %v1535_v13  ;;  %v1537_v46 = vpop.f32.mrf.mxu0  ;;  %v8903_v13 = vld [vmem:[#allocation5 + $0x80c] ss:$16 sps:$4 sm:$0xff]  }
 0x18b   :  { %v1600_v27 = vpop.f32.mrf.mxu1  ;;  %3421 = vmatpush1.bf16.msra.mxu0 %v8877_v41  ;;  %v8897_v41 = vld [vmem:[#allocation5 + $0x82c] ss:$16 sps:$4 sm:$0xff]  }
 0x18c   :  { %3484 = vmatpush1.bf16.msra.mxu1 %v8880_v32  ;;  %v10356_v9 = vadd.f32 %v1600_v27, %v1537_v46  ;;  %3422 = vmatprep.subr.bf16.mxu0 %v8885_v6  ;;  %v10358_v10 = vpop.f32.mrf.mxu0  ;;  %v8900_v32 = vld [vmem:[#allocation5 + $0xa2c] ss:$16 sps:$4 sm:$0xff]   ;;  %v8904_v46 = vld [vmem:[#allocation5 + $0xa08] ss:$16 sps:$4 sm:$0xff]  }
 0x18d   :  { %3485 = vmatprep.subr.bf16.mxu1 %v8888_v15  ;;  %v10360_v59 = vpop.f32.mrf.mxu1  ;;  %v8906_v29 = vld [vmem:[#allocation5 + $0xa0c] ss:$16 sps:$4 sm:$0xff]  }
 0x18e   :  { %7642 = vmatmul.mubr.msk.bf16.gmra.mxu0 %vm10292_vm5, %v10352_v2  ;;  %v1543_v39 = vpop.f32.mrf.mxu0  ;;  %v8912_v27 = vld [vmem:[#allocation5 + $0xbec] ss:$16 sps:$4 sm:$0xff]  }
 0x18f   :  { %7672 = vmatmul.mubr.msk.bf16.gmra.mxu1 %vm10292_vm5, %v10354_v56  ;;  %v1606_v25 = vpop.f32.mrf.mxu1  ;;  %3423 = vmatpush1.bf16.msra.mxu0 %v8883_v43 }
 0x190   :  { %3486 = vmatpush1.bf16.msra.mxu1 %v8886_v50  ;;  %v10368_v6 = vadd.f32 %v1606_v25, %v1543_v39  ;;  %3424 = vmatprep.subr.bf16.mxu0 %v8891_v14  ;;  %v1545_v15 = vpop.f32.mrf.mxu0  ;;  %v8910_v39 = vld [vmem:[#allocation5 + $0xbe8] ss:$16 sps:$4 sm:$0xff]  }
 0x191   :  { %3487 = vmatprep.subr.bf16.mxu1 %v8894_v0  ;;  %v1608_v19 = vpop.f32.mrf.mxu1  ;;  %7677 = vmatprep.mubr.msk.bf16.mxu0 %vm10134_vm12, %v10156_v57  ;;  %v8901_v0 = vld [vmem:[#allocation5 + $0x808] ss:$16 sps:$4 sm:$0xff]   ;;  %v8909_v57 = vld [vmem:[#allocation5 + $0x9ec] ss:$16 sps:$4 sm:$0xff]  }
 0x192   :  { %v10370_v40 = vadd.f32 %v1608_v19, %v1545_v15  ;;  %7707 = vmatprep.mubr.msk.bf16.mxu1 %vm10134_vm12, %v10158_v58  ;;  %v1547_v43 = vpop.f32.mrf.mxu0  ;;  %v8907_v58 = vld [vmem:[#allocation5 + $0x9e8] ss:$16 sps:$4 sm:$0xff]  }
 0x193   :  { %v1610_v50 = vpop.f32.mrf.mxu1  ;;  %3425 = vmatpush1.bf16.msra.mxu0 %v8889_v5  ;;  %v8915_v5 = vld [vmem:[#allocation5 + $0x9cc] ss:$16 sps:$4 sm:$0xff]   ;;  %v8913_v25 = vld [vmem:[#allocation5 + $0x9c8] ss:$16 sps:$4 sm:$0xff]  }
 0x194   :  { %3488 = vmatpush1.bf16.msra.mxu1 %v8892_v55  ;;  %v10378_v14 = vadd.f32 %v1610_v50, %v1547_v43  ;;  %3426 = vmatprep.subr.bf16.mxu0 %v8897_v41  ;;  %v8918_v55 = vld [vmem:[#allocation5 + $0xbcc] ss:$16 sps:$4 sm:$0xff]   ;;  %v8916_v15 = vld [vmem:[#allocation5 + $0xbc8] ss:$16 sps:$4 sm:$0xff]  }
 0x195   :  { %3489 = vmatprep.subr.bf16.mxu1 %v8900_v32  ;;  %v8921_v41 = vld [vmem:[#allocation5 + $0x9ac] ss:$16 sps:$4 sm:$0xff]   ;;  %v8919_v19 = vld [vmem:[#allocation5 + $0x9a8] ss:$16 sps:$4 sm:$0xff]  }
 0x196   :  { %v8924_v32 = vld [vmem:[#allocation5 + $0xbac] ss:$16 sps:$4 sm:$0xff]   ;;  %v8928_v43 = vld [vmem:[#allocation5 + $0xb88] ss:$16 sps:$4 sm:$0xff]  }
 0x197   :  { %3427 = vmatpush1.bf16.msra.mxu0 %v8895_v49  ;;  %v8922_v49 = vld [vmem:[#allocation5 + $0xba8] ss:$16 sps:$4 sm:$0xff]   ;;  %v8933_v50 = vld [vmem:[#allocation5 + $0x96c] ss:$16 sps:$4 sm:$0xff]  }
 0x198   :  { %3490 = vmatpush1.bf16.msra.mxu1 %v8898_v31  ;;  %3428 = vmatprep.subr.bf16.mxu0 %v8903_v13  ;;  %v8927_v31 = vld [vmem:[#allocation5 + $0x98c] ss:$16 sps:$4 sm:$0xff]  }
 0x199   :  { %3491 = vmatprep.subr.bf16.mxu1 %v8906_v29  ;;  %v8930_v13 = vld [vmem:[#allocation5 + $0xb8c] ss:$16 sps:$4 sm:$0xff]   ;;  %v8925_v29 = vld [vmem:[#allocation5 + $0x988] ss:$16 sps:$4 sm:$0xff]  }
 0x19b   :  { %3429 = vmatpush1.bf16.msra.mxu0 %v8901_v0  ;;  %v8936_v0 = vld [vmem:[#allocation5 + $0xb6c] ss:$16 sps:$4 sm:$0xff]  }
 0x19c   :  { %3492 = vmatpush1.bf16.msra.mxu1 %v8904_v46  ;;  %3430 = vmatprep.subr.bf16.mxu0 %v8909_v57  ;;  %v8931_v46 = vld [vmem:[#allocation5 + $0x968] ss:$16 sps:$4 sm:$0xff]  }
 0x19d   :  { %3493 = vmatprep.subr.bf16.mxu1 %v8912_v27  ;;  %v8934_v57 = vld [vmem:[#allocation5 + $0xb68] ss:$16 sps:$4 sm:$0xff]   ;;  %v8939_v27 = vld [vmem:[#allocation5 + $0x94c] ss:$16 sps:$4 sm:$0xff]  }
 0x19f   :  { %3431 = vmatpush2.bf16.msra.mxu0 %v8907_v58  ;;  %v8942_v58 = vld [vmem:[#allocation5 + $0xb4c] ss:$16 sps:$4 sm:$0xff]  }
 0x1a0   :  { %3494 = vmatpush2.bf16.msra.mxu1 %v8910_v39  ;;  %3432 = vmatprep.subr.bf16.mxu0 %v8915_v5  ;;  %v8937_v39 = vld [vmem:[#allocation5 + $0x948] ss:$16 sps:$4 sm:$0xff]  }
 0x1a1   :  { %3495 = vmatprep.subr.bf16.mxu1 %v8918_v55  ;;  %v8940_v5 = vld [vmem:[#allocation5 + $0xb48] ss:$16 sps:$4 sm:$0xff]   ;;  %v8945_v55 = vld [vmem:[#allocation5 + $0x92c] ss:$16 sps:$4 sm:$0xff]  }
 0x1a3   :  { %3433 = vmatpush2.bf16.msra.mxu0 %v8913_v25  ;;  %v8948_v25 = vld [vmem:[#allocation5 + $0xb2c] ss:$16 sps:$4 sm:$0xff]  }
 0x1a4   :  { %3496 = vmatpush2.bf16.msra.mxu1 %v8916_v15  ;;  %3434 = vmatprep.subr.bf16.mxu0 %v8921_v41  ;;  %v8943_v15 = vld [vmem:[#allocation5 + $0x928] ss:$16 sps:$4 sm:$0xff]  }
 0x1a5   :  { %3497 = vmatprep.subr.bf16.mxu1 %v8924_v32  ;;  %v8946_v41 = vld [vmem:[#allocation5 + $0xb28] ss:$16 sps:$4 sm:$0xff]   ;;  %v8951_v32 = vld [vmem:[#allocation5 + $0x90c] ss:$16 sps:$4 sm:$0xff]  }
 0x1a7   :  { %3435 = vmatpush2.bf16.msra.mxu0 %v8919_v19  ;;  %v8954_v19 = vld [vmem:[#allocation5 + $0xb0c] ss:$16 sps:$4 sm:$0xff]  }
 0x1a8   :  { %3498 = vmatpush2.bf16.msra.mxu1 %v8922_v49  ;;  %3436 = vmatprep.subr.bf16.mxu0 %v8927_v31  ;;  %v8949_v49 = vld [vmem:[#allocation5 + $0x908] ss:$16 sps:$4 sm:$0xff]  }
 0x1a9   :  { %3499 = vmatprep.subr.bf16.mxu1 %v8930_v13  ;;  %v8952_v31 = vld [vmem:[#allocation5 + $0xb08] ss:$16 sps:$4 sm:$0xff]  }
 0x1aa   :  { %v8957_v13 = vld [vmem:[#allocation8 + $0x4e4] ss:$16 sps:$4 sm:$0xff]  }
 0x1ab   :  { %3437 = vmatpush2.bf16.msra.mxu0 %v8925_v29  ;;  %v8955_v29 = vld [vmem:[#allocation8 + $0x4e0] ss:$16 sps:$4 sm:$0xff]  }
 0x1ac   :  { %3500 = vmatpush2.bf16.msra.mxu1 %v8928_v43  ;;  %3438 = vmatprep.subr.bf16.mxu0 %v8933_v50  ;;  %v8960_v43 = vld [vmem:[#allocation8 + $0x4c4] ss:$16 sps:$4 sm:$0xff]   ;;  %v8958_v50 = vld [vmem:[#allocation8 + $0x4c0] ss:$16 sps:$4 sm:$0xff]  }
 0x1ad   :  { %3501 = vmatprep.subr.bf16.mxu1 %v8936_v0  ;;  %v8963_v0 = vld [vmem:[#allocation8 + $0x4a4] ss:$16 sps:$4 sm:$0xff]  }
 0x1af   :  { %3439 = vmatpush2.bf16.msra.mxu0 %v8931_v46  ;;  %v8961_v46 = vld [vmem:[#allocation8 + $0x4a0] ss:$16 sps:$4 sm:$0xff]  }
 0x1b0   :  { %3502 = vmatpush2.bf16.msra.mxu1 %v8934_v57  ;;  %3440 = vmatprep.subr.bf16.mxu0 %v8939_v27  ;;  %v8966_v57 = vld [vmem:[#allocation8 + $0x484] ss:$16 sps:$4 sm:$0xff]  }
 0x1b1   :  { %3503 = vmatprep.subr.bf16.mxu1 %v8942_v58  ;;  %v9005_v27 = vld [vmem:[#allocation8 + $0x6e4] ss:$16 sps:$4 sm:$0xff]  }
 0x1b2   :  { %v8975_v58 = vld [vmem:[#allocation8 + $0x424] ss:$16 sps:$4 sm:$0xff]  }
 0x1b3   :  { %3441 = vmatpush2.bf16.msra.mxu0 %v8937_v39  ;;  %v9003_v39 = vld [vmem:[#allocation8 + $0x6e0] ss:$16 sps:$4 sm:$0xff]  }
 0x1b4   :  { %3504 = vmatpush2.bf16.msra.mxu1 %v8940_v5  ;;  %3442 = vmatprep.subr.bf16.mxu0 %v8945_v55 }
 0x1b5   :  { %3505 = vmatprep.subr.bf16.mxu1 %v8948_v25  ;;  %v9011_v25 = vld [vmem:[#allocation8 + $0x6c4] ss:$16 sps:$4 sm:$0xff]  }
 0x1b7   :  { %3443 = vmatpush2.bf16.msra.mxu0 %v8943_v15 }
 0x1b8   :  { %3506 = vmatpush2.bf16.msra.mxu1 %v8946_v41  ;;  %3444 = vmatprep.subr.bf16.mxu0 %v8951_v32  ;;  %v9009_v41 = vld [vmem:[#allocation8 + $0x6c0] ss:$16 sps:$4 sm:$0xff]  }
 0x1b9   :  { %3507 = vmatprep.subr.bf16.mxu1 %v8954_v19  ;;  %v8976_v19 = vld [vmem:[#allocation8 + $0x400] ss:$16 sps:$4 sm:$0xff]  }
 0x1bb   :  { %3445 = vmatpush2.bf16.msra.mxu0 %v8949_v49  ;;  %v8981_v49 = vld [vmem:[#allocation8 + $0x5e4] ss:$16 sps:$4 sm:$0xff]  }
 0x1bc   :  { %3508 = vmatpush2.bf16.msra.mxu1 %v8952_v31  ;;  %4771 = vmatprep.subr.bf16.mxu0 %v8957_v13  ;;  %v9017_v31 = vld [vmem:[#allocation8 + $0x6a4] ss:$16 sps:$4 sm:$0xff]  }
 0x1bd   :  { %4834 = vmatprep.subr.bf16.mxu1 %v9005_v27  ;;  %v9029_v27 = vld [vmem:[#allocation8 + $0x664] ss:$16 sps:$4 sm:$0xff]  }
 0x1be   :  { %7682 = vmatmul.mubr.msk.bf16.vlgmr.msra.gmra.mxu0 %vm10134_vm12, %v10234_v3  ;;  %v8964_v3 = vld [vmem:[#allocation8 + $0x480] ss:$16 sps:$4 sm:$0xff]  }
 0x1bf   :  { %7712 = vmatmul.mubr.msk.bf16.vlgmr.msra.gmra.mxu1 %vm10134_vm12, %v10236_v33  ;;  %7687 = vmatprep.mubr.msk.bf16.mxu0 %vm10224_vm1, %v10266_v21  ;;  %v8969_v33 = vld [vmem:[#allocation8 + $0x464] ss:$16 sps:$4 sm:$0xff]   ;;  %v8967_v21 = vld [vmem:[#allocation8 + $0x460] ss:$16 sps:$4 sm:$0xff]  }
 0x1c0   :  { %7717 = vmatprep.mubr.msk.bf16.mxu1 %vm10224_vm1, %v10268_v16  ;;  %4772 = vmatpush1.bf16.msra.mxu0 %v8955_v29  ;;  %v8972_v16 = vld [vmem:[#allocation8 + $0x444] ss:$16 sps:$4 sm:$0xff]   ;;  %v9015_v29 = vld [vmem:[#allocation8 + $0x6a0] ss:$16 sps:$4 sm:$0xff]  }
 0x1c1   :  { %4773 = vmatprep.subr.bf16.mxu0 %v8960_v43  ;;  %4835 = vmatpush1.bf16.msra.mxu1 %v9003_v39 }
 0x1c2   :  { %4836 = vmatprep.subr.bf16.mxu1 %v9011_v25  ;;  %v9033_v25 = vld [vmem:[#allocation8 + $0x640] ss:$16 sps:$4 sm:$0xff]  }
 0x1c4   :  { %4774 = vmatpush1.bf16.msra.mxu0 %v8958_v50  ;;  %v8979_v50 = vld [vmem:[#allocation8 + $0x5e0] ss:$16 sps:$4 sm:$0xff]  }
 0x1c5   :  { %4775 = vmatprep.subr.bf16.mxu0 %v8963_v0  ;;  %4837 = vmatpush1.bf16.msra.mxu1 %v9009_v41  ;;  %v8984_v0 = vld [vmem:[#allocation8 + $0x5c4] ss:$16 sps:$4 sm:$0xff]  }
 0x1c6   :  { %7692 = vmatmul.mubr.msk.bf16.gmra.mxu0 %vm10224_vm1, %v10306_v11  ;;  %v10404_v11 = vpop.f32.mrf.mxu0  ;;  %4838 = vmatprep.subr.bf16.mxu1 %v9017_v31  ;;  %v9035_v41 = vld [vmem:[#allocation8 + $0x644] ss:$16 sps:$4 sm:$0xff]  }
 0x1c7   :  { %7722 = vmatmul.mubr.msk.bf16.gmra.mxu1 %vm10224_vm1, %v10308_v48  ;;  %7697 = vmatprep.mubr.msk.bf16.mxu0 %vm10292_vm5, %v10324_v44  ;;  %v10412_v48 = vpop.f32.mrf.mxu1 }
 0x1c8   :  { %7727 = vmatprep.mubr.msk.bf16.mxu1 %vm10292_vm5, %v10326_v36  ;;  %4776 = vmatpush1.bf16.msra.mxu0 %v8961_v46  ;;  %v10414_v44 = vpop.f32.mrf.mxu0  ;;  %v8970_v36 = vld [vmem:[#allocation8 + $0x440] ss:$16 sps:$4 sm:$0xff]   ;;  %v9023_v46 = vld [vmem:[#allocation8 + $0x684] ss:$16 sps:$4 sm:$0xff]  }
 0x1c9   :  { %4777 = vmatprep.subr.bf16.mxu0 %v8966_v57  ;;  %v10416_v5 = vpop.f32.mrf.mxu1  ;;  %4839 = vmatpush1.bf16.msra.mxu1 %v9015_v29  ;;  %v8988_v29 = vld [vmem:[#allocation8 + $0x580] ss:$16 sps:$4 sm:$0xff]  }
 0x1ca   :  { %v10418_v55 = vpop.f32.mrf.mxu0  ;;  %4840 = vmatprep.subr.bf16.mxu1 %v9023_v46  ;;  %v8993_v46 = vld [vmem:[#allocation8 + $0x564] ss:$16 sps:$4 sm:$0xff]  }
 0x1cb   :  { %v10420_v15 = vpop.f32.mrf.mxu1 }
 0x1cc   :  { %4778 = vmatpush1.bf16.msra.mxu0 %v8964_v3  ;;  %v10422_v32 = vpop.f32.mrf.mxu0  ;;  %v9021_v3 = vld [vmem:[#allocation8 + $0x680] ss:$16 sps:$4 sm:$0xff]  }
 0x1cd   :  { %4779 = vmatprep.subr.bf16.mxu0 %v8969_v33  ;;  %v10424_v13 = vpop.f32.mrf.mxu1  ;;  %4841 = vmatpush1.bf16.msra.mxu1 %v9021_v3 }
 0x1ce   :  { %7702 = vmatmul.mubr.msk.bf16.gmra.mxu0 %vm10292_vm5, %v10352_v2  ;;  %v8973_v2 = vld [vmem:[#allocation8 + $0x420] ss:$16 sps:$4 sm:$0xff]   ;;  %v10426_v43 = vpop.f32.mrf.mxu0  ;;  %4842 = vmatprep.subr.bf16.mxu1 %v9029_v27 }
 0x1cf   :  { %7732 = vmatmul.mubr.msk.bf16.gmra.mxu1 %vm10292_vm5, %v10354_v56  ;;  %v8978_v56 = vld [vmem:[#allocation8 + $0x404] ss:$16 sps:$4 sm:$0xff]   ;;  %v10428_v57 = vpop.f32.mrf.mxu1  ;;  %v9045_v27 = vld [vmem:[#allocation8 + $0x600] ss:$16 sps:$4 sm:$0xff]  }
 0x1d0   :  { %4780 = vmatpush1.bf16.msra.mxu0 %v8967_v21  ;;  %v10430_v33 = vpop.f32.mrf.mxu0 }
 0x1d1   :  { %4781 = vmatprep.subr.bf16.mxu0 %v8972_v16  ;;  %v10432_v21 = vpop.f32.mrf.mxu1  ;;  %v8982_v16 = vld [vmem:[#allocation8 + $0x5c0] ss:$16 sps:$4 sm:$0xff]  }
 0x1d2   :  { %11260 = vst [vmem:[#allocation22_spill] sm:$0xff] %v10432_v21  ;;  %v10434_v39 = vpop.f32.mrf.mxu0 }
 0x1d4   :  { %4782 = vmatpush1.bf16.msra.mxu0 %v8970_v36  ;;  %v9027_v36 = vld [vmem:[#allocation8 + $0x660] ss:$16 sps:$4 sm:$0xff]  }
 0x1d5   :  { %4783 = vmatprep.subr.bf16.mxu0 %v8975_v58  ;;  %v8987_v58 = vld [vmem:[#allocation8 + $0x5a4] ss:$16 sps:$4 sm:$0xff]   ;;  %4843 = vmatpush1.bf16.msra.mxu1 %v9027_v36  ;;  %v8991_v36 = vld [vmem:[#allocation8 + $0x560] ss:$16 sps:$4 sm:$0xff]  }
 0x1d6   :  { %4844 = vmatprep.subr.bf16.mxu1 %v9035_v41  ;;  %v8996_v41 = vld [vmem:[#allocation8 + $0x544] ss:$16 sps:$4 sm:$0xff]  }
 0x1d8   :  { %4784 = vmatpush1.bf16.msra.mxu0 %v8973_v2  ;;  %v10436_v2 = vpop.f32.mrf.mxu1 }
 0x1d9   :  { %4785 = vmatprep.subr.bf16.mxu0 %v8978_v56  ;;  %11261 = vst [vmem:[#allocation23_spill] sm:$0xff] %v10436_v2  ;;  %v8985_v56 = vld [vmem:[#allocation8 + $0x5a0] ss:$16 sps:$4 sm:$0xff]   ;;  %4845 = vmatpush1.bf16.msra.mxu1 %v9033_v25 }
 0x1da   :  { %v10440_v31 = vpop.f32.mrf.mxu1 }
 0x1db   :  { %11262 = vst [vmem:[#allocation24_spill] sm:$0xff] %v10440_v31 }
 0x1dc   :  { %4786 = vmatpush1.bf16.msra.mxu0 %v8976_v19  ;;  %v8990_v19 = vld [vmem:[#allocation8 + $0x584] ss:$16 sps:$4 sm:$0xff]  }
 0x1dd   :  { %4787 = vmatprep.subr.bf16.mxu0 %v8981_v49  ;;  %v10438_v49 = vpop.f32.mrf.mxu0 }
 0x1df   :  { %v10442_v3 = vpop.f32.mrf.mxu0 }
 0x1e0   :  { %4788 = vmatpush2.bf16.msra.mxu0 %v8979_v50  ;;  %v9039_v50 = vld [vmem:[#allocation8 + $0x620] ss:$16 sps:$4 sm:$0xff]  }
 0x1e1   :  { %4789 = vmatprep.subr.bf16.mxu0 %v8984_v0  ;;  %v9041_v0 = vld [vmem:[#allocation8 + $0x624] ss:$16 sps:$4 sm:$0xff]  }
 0x1e2   :  { %4846 = vmatprep.subr.bf16.mxu1 %v9041_v0  ;;  %v9051_v0 = vld [vmem:[#allocation8 + $0x7e0] ss:$16 sps:$4 sm:$0xff]  }
 0x1e3   :  { %4847 = vmatpush1.bf16.msra.mxu1 %v9039_v50 }
 0x1e4   :  { %4790 = vmatpush2.bf16.msra.mxu0 %v8982_v16  ;;  %v10444_v16 = vpop.f32.mrf.mxu1 }
 0x1e5   :  { %4791 = vmatprep.subr.bf16.mxu0 %v8987_v58  ;;  %11263 = vst [vmem:[#allocation25_spill] sm:$0xff] %v10444_v16  ;;  %v9047_v58 = vld [vmem:[#allocation8 + $0x604] ss:$16 sps:$4 sm:$0xff]  }
 0x1e6   :  { %4848 = vmatprep.subr.bf16.mxu1 %v9047_v58  ;;  %v10448_v25 = vpop.f32.mrf.mxu1  ;;  %v9057_v58 = vld [vmem:[#allocation8 + $0x7c0] ss:$16 sps:$4 sm:$0xff]   ;;  %v9077_v16 = vld [vmem:[#allocation8 + $0x764] ss:$16 sps:$4 sm:$0xff]  }
 0x1e7   :  { %11264 = vst [vmem:[#allocation26_spill] sm:$0xff] %v10448_v25  ;;  %4849 = vmatpush1.bf16.msra.mxu1 %v9045_v27 }
 0x1e8   :  { %4792 = vmatpush2.bf16.msra.mxu0 %v8985_v56  ;;  %v10446_v56 = vpop.f32.mrf.mxu0  ;;  %4850 = vmatprep.subr.bf16.mxu1 %v9053_v51  ;;  %v10452_v50 = vpop.f32.mrf.mxu1  ;;  %v9063_v51 = vld [vmem:[#allocation8 + $0x7a0] ss:$16 sps:$4 sm:$0xff]  }
 0x1e9   :  { %4793 = vmatprep.subr.bf16.mxu0 %v8990_v19  ;;  %v8994_v19 = vld [vmem:[#allocation8 + $0x540] ss:$16 sps:$4 sm:$0xff]   ;;  %11265 = vst [vmem:[#allocation27_spill] sm:$0xff] %v10452_v50 }
 0x1ea   :  { %v10456_v27 = vpop.f32.mrf.mxu1 }
 0x1eb   :  { %4851 = vmatpush2.bf16.msra.mxu1 %v9051_v0  ;;  %11266 = vst [vmem:[#allocation28_spill] sm:$0xff] %v10456_v27 }
 0x1ec   :  { %4794 = vmatpush2.bf16.msra.mxu0 %v8988_v29  ;;  %v10450_v29 = vpop.f32.mrf.mxu0  ;;  %4852 = vmatprep.subr.bf16.mxu1 %v9059_v60  ;;  %v10460_v0 = vpop.f32.mrf.mxu1  ;;  %v9071_v60 = vld [vmem:[#allocation8 + $0x784] ss:$16 sps:$4 sm:$0xff]  }
 0x1ed   :  { %4795 = vmatprep.subr.bf16.mxu0 %v8993_v46  ;;  %v8997_v46 = vld [vmem:[#allocation8 + $0x520] ss:$16 sps:$4 sm:$0xff]   ;;  %11267 = vst [vmem:[#allocation29_spill] sm:$0xff] %v10460_v0 }
 0x1ef   :  { %4853 = vmatpush2.bf16.msra.mxu1 %v9057_v58 }
 0x1f0   :  { %4796 = vmatpush2.bf16.msra.mxu0 %v8991_v36  ;;  %v10454_v36 = vpop.f32.mrf.mxu0  ;;  %4854 = vmatprep.subr.bf16.mxu1 %v9065_v24 }
 0x1f1   :  { %4797 = vmatprep.subr.bf16.mxu0 %v8996_v41  ;;  %v9000_v41 = vld [vmem:[#allocation8 + $0x500] ss:$16 sps:$4 sm:$0xff]  }
 0x1f3   :  { %4855 = vmatpush2.bf16.msra.mxu1 %v9063_v51  ;;  %v1593_v51 = vadd.f32 %v10322_v38, %v10320_v30 }
 0x1f4   :  { %4798 = vmatpush2.bf16.msra.mxu0 %v8994_v19  ;;  %v10458_v19 = vpop.f32.mrf.mxu0  ;;  %4856 = vmatprep.subr.bf16.mxu1 %v9071_v60 }
 0x1f5   :  { %4799 = vmatprep.subr.bf16.mxu0 %v8999_v53  ;;  %v9069_v53 = vld [vmem:[#allocation8 + $0x780] ss:$16 sps:$4 sm:$0xff]  }
 0x1f7   :  { %4857 = vmatpush2.bf16.msra.mxu1 %v9069_v53 }
 0x1f8   :  { %4800 = vmatpush2.bf16.msra.mxu0 %v8997_v46  ;;  %4858 = vmatprep.subr.bf16.mxu1 %v9077_v16  ;;  %v9089_v16 = vld [vmem:[#allocation8 + $0x724] ss:$16 sps:$4 sm:$0xff]  }
 0x1f9   :  { %4801 = vmatprep.subr.bf16.mxu0 %v9002_v42 }
 0x1fc   :  { %4802 = vmatpush2.bf16.msra.mxu0 %v9000_v41  ;;  %v9075_v41 = vld [vmem:[#allocation8 + $0x760] ss:$16 sps:$4 sm:$0xff]  }
 0x1fd   :  { %4897 = vmatprep.subr.bf16.mxu0 %v9008_v17  ;;  %4859 = vmatpush2.bf16.msra.mxu1 %v9075_v41  ;;  %v1603_v41 = vadd.f32 %v10360_v59, %v10358_v10 }
 0x1fe   :  { %v2415_v50 = vpop.f32.mrf.mxu0 }
 0x1ff   :  { %v2478_v25 = vpop.f32.mrf.mxu1  ;;  %v2416_v46 = vadd.f32 %v2415_v50, %v10296_v52 }
 0x200   :  { %v2417_v58 = vpop.f32.mrf.mxu0 }
 0x201   :  { %v2480_v27 = vpop.f32.mrf.mxu1  ;;  %v10463_v42 = vadd.f32 %v2478_v25, %v2416_v46  ;;  %v2418_v24 = vadd.f32 %v2417_v58, %v10298_v8  ;;  %v9083_v46 = vld [vmem:[#allocation8 + $0x744] ss:$16 sps:$4 sm:$0xff]  }
 0x202   :  { %v2419_v31 = vpop.f32.mrf.mxu0  ;;  %4860 = vmatprep.subr.bf16.mxu1 %v9083_v46  ;;  %v9093_v46 = vld [vmem:[#allocation8 + $0x700] ss:$16 sps:$4 sm:$0xff]  }
 0x203   :  { %11268 = vst [vmem:[#allocation30_spill] sm:$0xff] %v10463_v42  ;;  %v2482_v0 = vpop.f32.mrf.mxu1  ;;  %v10468_v17 = vadd.f32 %v2480_v27, %v2418_v24  ;;  %v2420_v60 = vadd.f32 %v2419_v31, %v10318_v61  ;;  %v9081_v42 = vld [vmem:[#allocation8 + $0x740] ss:$16 sps:$4 sm:$0xff]  }
 0x204   :  { %v2421_v52 = vpop.f32.mrf.mxu0  ;;  %4861 = vmatpush2.bf16.msra.mxu1 %v9081_v42  ;;  %v9087_v24 = vld [vmem:[#allocation8 + $0x720] ss:$16 sps:$4 sm:$0xff]  }
 0x205   :  { %v2484_v50 = vpop.f32.mrf.mxu1  ;;  %v10471_v53 = vadd.f32 %v2482_v0, %v2420_v60  ;;  %v2422_v25 = vadd.f32 %v2421_v52, %v1593_v51  ;;  %4862 = vmatprep.subr.bf16.mxu1 %v9089_v16 }
 0x206   :  { %v2425_v8 = vpop.f32.mrf.mxu0 }
 0x207   :  { %v2488_v58 = vpop.f32.mrf.mxu1  ;;  %v10473_v2 = vadd.f32 %v2484_v50, %v2422_v25  ;;  %v2426_v21 = vadd.f32 %v2425_v8, %v10342_v4 }
 0x208   :  { %v2427_v30 = vpop.f32.mrf.mxu0  ;;  %4863 = vmatpush2.bf16.msra.mxu1 %v9087_v24 }
 0x209   :  { %v2490_v38 = vpop.f32.mrf.mxu1  ;;  %v2428_v61 = vadd.f32 %v2427_v30, %v10350_v12  ;;  %v10477_v31 = vadd.f32 %v2488_v58, %v2426_v21  ;;  %v9095_v12 = vld [vmem:[#allocation8 + $0x704] ss:$16 sps:$4 sm:$0xff]  }
 0x20a   :  { %v2429_v27 = vpop.f32.mrf.mxu0  ;;  %4864 = vmatprep.subr.bf16.mxu1 %v9095_v12  ;;  %v11222_v12 = vsub.s32 1, %v9877_v26 }
 0x20b   :  { %v2492_v0 = vpop.f32.mrf.mxu1  ;;  %v2430_v51 = vadd.f32 %v2429_v27, %v10356_v9  ;;  %v10482_v60 = vadd.f32 %v2490_v38, %v2428_v61  ;;  %v9101_v38 = vld [vmem:[#allocation8 + $0x6ec] ss:$16 sps:$4 sm:$0xff]   ;;  %v1613_v27 = vadd.f32 %v10412_v48, %v10404_v11  ;;  %v2292_v11 = vadd.f32 %v10418_v55, %v10096_v34 }
 0x20c   :  { %v2431_v4 = vpop.f32.mrf.mxu0  ;;  %4865 = vmatpush2.bf16.msra.mxu1 %v9093_v46  ;;  %v10506_v48 = vld [vmem:[#allocation7] sm:$0xf]  ;;  %v1477_v34 = vadd.f32 %v10180_v20, %v10178_v1  ;;  %v2300_v1 = vadd.f32 %v10430_v33, %v10166_v28  ;;  %v2302_v20 = vadd.f32 %v10434_v39, %v10168_v35  ;;  %v2312_v28 = vadd.f32 %v10450_v29, %v10184_v54 }
 0x20d   :  { %v2494_v52 = vpop.f32.mrf.mxu1  ;;  %v2432_v42 = vadd.f32 %v2431_v4, %v1603_v41  ;;  %v10484_v50 = vadd.f32 %v2492_v0, %v2430_v51  ;;  %4960 = vmatprep.subr.bf16.mxu1 %v9101_v38  ;;  %v2355_v55 = vadd.f32 %v10420_v15, %v2292_v11  ;;  %v2314_v35 = vadd.f32 %v10454_v36, %v10186_v18  ;;  %v11272_v11 = vld [vmem:[#allocation25_spill] sm:$0xff]  ;;  %v11273_v18 = vld [vmem:[#allocation26_spill] sm:$0xff] }
 0x20e   :  { %v2435_v21 = vpop.f32.mrf.mxu0 }
 0x20f   :  { %v2498_v25 = vpop.f32.mrf.mxu1  ;;  %v2436_v8 = vadd.f32 %v2435_v21, %v10368_v6  ;;  %v10487_v58 = vadd.f32 %v2494_v52, %v2432_v42  ;;  %v11223_v42 = vsub.s32 0, %v9877_v26  ;;  %v1467_v21 = vadd.f32 %v10154_v23, %v10152_v22 }
 0x210   :  { %v2437_v10 = vpop.f32.mrf.mxu0 }
 0x211   :  { %v2500_v9 = vpop.f32.mrf.mxu1  ;;  %v2438_v59 = vadd.f32 %v2437_v10, %v10370_v40  ;;  %v10490_v30 = vadd.f32 %v2498_v25, %v2436_v8  ;;  %v2290_v40 = vadd.f32 %v10414_v44, %v10094_v7  ;;  %v10517_v44 = vrot.slane %v10506_v48, %v11223_v42 }
 0x212   :  { %v2439_v61 = vpop.f32.mrf.mxu0  ;;  %v2296_v22 = vadd.f32 %v10426_v43, %v1467_v21  ;;  %v2310_v43 = vadd.f32 %v10446_v56, %v10182_v45 }
 0x213   :  { %v2502_v16 = vpop.f32.mrf.mxu1  ;;  %v2440_v0 = vadd.f32 %v2439_v61, %v10378_v14  ;;  %v10495_v24 = vadd.f32 %v2500_v9, %v2438_v59  ;;  %v2294_v14 = vadd.f32 %v10422_v32, %v10104_v62  ;;  %v2353_v8 = vadd.f32 %v10416_v5, %v2290_v40 }
 0x214   :  { %v2441_v6 = vpop.f32.mrf.mxu0  ;;  %v1487_v62 = vadd.f32 %v10264_v47, %v10262_v37  ;;  %v10529_v59 = vrot.slane %v10506_v48, %v11222_v12  ;;  %v2304_v37 = vadd.f32 %v10438_v49, %v10176_v63  ;;  %v2306_v47 = vadd.f32 %v10442_v3, %v1477_v34 }
 0x215   :  { %v2504_v41 = vpop.f32.mrf.mxu1  ;;  %v2442_v51 = vadd.f32 %v2441_v6, %v1613_v27  ;;  %v10497_v4 = vadd.f32 %v2502_v16, %v2440_v0  ;;  %v2357_v5 = vadd.f32 %v10424_v13, %v2294_v14  ;;  %v2359_v27 = vadd.f32 %v10428_v57, %v2296_v22  ;;  %v11269_v0 = vld [vmem:[#allocation22_spill] sm:$0xff]  ;;  %v11271_v57 = vld [vmem:[#allocation24_spill] sm:$0xff] }
 0x216   :  { %v2316_v63 = vadd.f32 %v10458_v19, %v1487_v62  ;;  %v2363_v6 = vadd.f32 %v11269_v0, %v2300_v1  ;;  %v2367_v40 = vadd.f32 %v11271_v57, %v2304_v37  ;;  %v2369_v54 = vadd.f32 %v11272_v11, %v2306_v47 }
 0x217   :  { %v10499_v52 = vadd.f32 %v2504_v41, %v2442_v51  ;;  %v11270_v41 = vld [vmem:[#allocation23_spill] sm:$0xff]  ;;  %v2373_v36 = vadd.f32 %v11273_v18, %v2310_v43 }
 0x218   :  { %v2365_v51 = vadd.f32 %v11270_v41, %v2302_v20 }
 0x23e   :  { %v3322_v25 = vpop.f32.mrf.mxu0 }
 0x23f   :  { %v3385_v46 = vpop.f32.mrf.mxu1 }
 0x240   :  { %v3386_v7 = vadd.f32 %v3385_v46, %v3322_v25  ;;  %v3324_v23 = vpop.f32.mrf.mxu0  ;;  %v11274_v46 = vld [vmem:[#allocation27_spill] sm:$0xff] }
 0x241   :  { %v3387_v32 = vpop.f32.mrf.mxu1 }
 0x242   :  { %v3540_v10 = vadd.f32 %v3386_v7, %v2353_v8  ;;  %v3388_v9 = vadd.f32 %v3387_v32, %v3324_v23  ;;  %v3326_v15 = vpop.f32.mrf.mxu0  ;;  %v10557_v8 = vadd.f32 %v11274_v46, %v2312_v28  ;;  %v11275_v7 = vld [vmem:[#allocation28_spill] sm:$0xff]  ;;  %v11276_v32 = vld [vmem:[#allocation29_spill] sm:$0xff] }
 0x243   :  { %v3389_v13 = vpop.f32.mrf.mxu1  ;;  %v10560_v34 = vadd.f32 %v11275_v7, %v2314_v35 }
 0x244   :  { %v3586_v38 = vadd.f32 %v10517_v44, %v3540_v10  ;;  %v3541_v61 = vadd.f32 %v3388_v9, %v2355_v55  ;;  %v3390_v16 = vadd.f32 %v3389_v13, %v3326_v15  ;;  %v3328_v33 = vpop.f32.mrf.mxu0 }
 0x245   :  { %v3391_v39 = vpop.f32.mrf.mxu1 }
 0x246   :  { %v3610_v49 = vmax.f32 %v3586_v38, 0.0  ;;  %v3587_v3 = vadd.f32 %v10529_v59, %v3541_v61  ;;  %v3544_v45 = vadd.f32 %v3390_v16, %v2357_v5  ;;  %v3392_v56 = vadd.f32 %v3391_v39, %v3328_v33  ;;  %v3332_v29 = vpop.f32.mrf.mxu0 }
 0x247   :  { %v3395_v14 = vpop.f32.mrf.mxu1  ;;  %v10563_v5 = vadd.f32 %v11276_v32, %v2316_v63 }
 0x248   :  { %v3658_v19 = vrot.slane %v3610_v49, 7  ;;  %v10553_v21 = vmax.f32 %v3587_v3, 0.0  ;;  %v3590_v25 = vadd.f32 %v10517_v44, %v3544_v45  ;;  %v3545_v62 = vadd.f32 %v3392_v56, %v2359_v27  ;;  %v3334_v22 = vpop.f32.mrf.mxu0 }
 0x249   :  { %v3396_v55 = vadd.f32 %v3395_v14, %v3332_v29  ;;  %v3397_v23 = vpop.f32.mrf.mxu1  ;;  %v3754_v9 = vrot.slane %v3610_v49, 1 }
 0x24a   :  { %v3726_v10 = vsel %vm218_vm0, 0.0, %v3658_v19  ;;  %v3614_v1 = vmax.f32 %v3590_v25, 0.0  ;;  %v3659_v20 = vrot.slane %v10553_v21, 7  ;;  %v3591_v37 = vadd.f32 %v10529_v59, %v3545_v62  ;;  %v3336_v13 = vpop.f32.mrf.mxu0  ;;  %v9006_v62 = vld [vmem:[#allocation8 + $0x4e8] ss:$16 sps:$4 sm:$0xff]  }
 0x24b   :  { %v3548_v47 = vadd.f32 %v3396_v55, %v2363_v6  ;;  %v3398_v15 = vadd.f32 %v3397_v23, %v3334_v22  ;;  %v3399_v43 = vpop.f32.mrf.mxu1  ;;  %v3757_v28 = vrot.slane %v10553_v21, 1 }
 0x24c   :  { %v3662_v38 = vrot.slane %v3614_v1, 7  ;;  %v3755_v61 = vrot.slane %v3614_v1, 1  ;;  %v10568_v16 = vpack.c.bf16 %v3614_v1, %v3610_v49  ;;  %v3400_v27 = vadd.f32 %v3399_v43, %v3336_v13  ;;  %v3338_v39 = vpop.f32.mrf.mxu0  ;;  %v9014_v1 = vld [vmem:[#allocation8 + $0x4cc] ss:$16 sps:$4 sm:$0xff]  }
 0x24d   :  { %v10571_v35 = vmax.f32 %v3591_v37, 0.0  ;;  %v3594_v63 = vadd.f32 %v10517_v44, %v3548_v47  ;;  %v3549_v33 = vadd.f32 %v3398_v15, %v2365_v51  ;;  %v3401_v3 = vpop.f32.mrf.mxu1  ;;  %v3727_v14 = vsel %vm218_vm0, 0.0, %v3659_v20 }
 0x24e   :  { %v3663_v45 = vsel %vm218_vm0, %v3658_v19, %v3662_v38  ;;  %v3756_v56 = vsel %vm333_vm13, %v3754_v9, %v3755_v61  ;;  %v3552_v0 = vadd.f32 %v3400_v27, %v2367_v40  ;;  %v3402_v6 = vadd.f32 %v3401_v3, %v3338_v39  ;;  %v3342_v11 = vpop.f32.mrf.mxu0 }
 0x24f   :  { %v10576_v41 = vpack.c.bf16 %v3663_v45, %v3726_v10  ;;  %v3664_v49 = vrot.slane %v10571_v35, 7  ;;  %v10579_v57 = vmax.f32 %v3594_v63, 0.0  ;;  %v3405_v29 = vpop.f32.mrf.mxu1  ;;  %v3595_v51 = vadd.f32 %v10529_v59, %v3549_v33 }
 0x250   :  { %v3598_v18 = vadd.f32 %v10517_v44, %v3552_v0  ;;  %v3553_v25 = vadd.f32 %v3402_v6, %v2369_v54  ;;  %v3406_v19 = vadd.f32 %v3405_v29, %v3342_v11  ;;  %v10588_v7 = vpack.c.bf16 %v10571_v35, %v10553_v21  ;;  %v3344_v55 = vpop.f32.mrf.mxu0  ;;  %v9012_v0 = vld [vmem:[#allocation8 + $0x4c8] ss:$16 sps:$4 sm:$0xff]   ;;  %v9020_v11 = vld [vmem:[#allocation8 + $0x4ac] ss:$16 sps:$4 sm:$0xff]  }
 0x251   :  { %v3670_v46 = vrot.slane %v10579_v57, 7  ;;  %v3766_v40 = vrot.slane %v10579_v57, 1  ;;  %v3407_v22 = vpop.f32.mrf.mxu1  ;;  %v3665_v23 = vsel %vm218_vm0, %v3659_v20, %v3664_v49  ;;  %v10591_v32 = vmax.f32 %v3595_v51, 0.0  ;;  %v9032_v21 = vld [vmem:[#allocation8 + $0x46c] ss:$16 sps:$4 sm:$0xff]  }
 0x252   :  { %v10593_v10 = vmax.f32 %v3598_v18, 0.0  ;;  %v3599_v54 = vadd.f32 %v10529_v59, %v3553_v25  ;;  %v3556_v9 = vadd.f32 %v3406_v19, %v2373_v36  ;;  %4803 = vmatprep.mubr.bf16.mxu0 %v10588_v7  ;;  %v3408_v47 = vadd.f32 %v3407_v22, %v3344_v55  ;;  %v3346_v15 = vpop.f32.mrf.mxu0 }
 0x253   :  { %v3767_v37 = vsel %vm333_vm13, %v3755_v61, %v3766_v40  ;;  %v3409_v13 = vpop.f32.mrf.mxu1  ;;  %v10600_v43 = vpack.c.bf16 %v3665_v23, %v3727_v14  ;;  %v3671_v20 = vsel %vm218_vm0, %v3662_v38, %v3670_v46  ;;  %v3758_v27 = vrot.slane %v10571_v35, 1  ;;  %4804 = vmatmul.mubr.bf16.vlgmr.msra.gmra.mxu0 %v10568_v16 }
 0x254   :  { %v10604_v63 = vpack.c.bf16 %v3767_v37, %v3756_v56  ;;  %v3672_v36 = vrot.slane %v10591_v32, 7  ;;  %v3678_v33 = vrot.slane %v10593_v10, 7  ;;  %v3768_v61 = vrot.slane %v10591_v32, 1  ;;  %4898 = vmatpush1.bf16.msra.mxu0 %v9006_v62  ;;  %v3348_v38 = vpop.f32.mrf.mxu0 }
 0x255   :  { %v3623_v39 = vmax.f32 %v3599_v54, 0.0  ;;  %v3602_v3 = vadd.f32 %v10517_v44, %v3556_v9  ;;  %v3557_v45 = vadd.f32 %v3408_v47, %v10557_v8  ;;  %v3411_v6 = vpop.f32.mrf.mxu1  ;;  %v3410_v35 = vadd.f32 %v3409_v13, %v3346_v15  ;;  %4899 = vmatprep.subr.bf16.mxu0 %v9014_v1 }
 0x256   :  { %v3412_v56 = vadd.f32 %v3411_v6, %v3348_v38  ;;  %v10614_v29 = vpack.c.bf16 %v10593_v10, %v10579_v57  ;;  %v3673_v14 = vsel %vm218_vm0, %v3664_v49, %v3672_v36  ;;  %v3774_v51 = vrot.slane %v10593_v10, 1  ;;  %v9018_v49 = vld [vmem:[#allocation8 + $0x4a8] ss:$16 sps:$4 sm:$0xff]  }
 0x257   :  { %v3680_v18 = vrot.slane %v3623_v39, 7  ;;  %v3626_v25 = vmax.f32 %v3602_v3, 0.0  ;;  %v3603_v8 = vadd.f32 %v10529_v59, %v3557_v45  ;;  %v3560_v19 = vadd.f32 %v3410_v35, %v10560_v34  ;;  %v9026_v34 = vld [vmem:[#allocation8 + $0x48c] ss:$16 sps:$4 sm:$0xff]  }
 0x258   :  { %v3561_v62 = vadd.f32 %v3412_v56, %v10563_v5  ;;  %v10622_v55 = vpack.c.bf16 %v3623_v39, %v10591_v32  ;;  %v3679_v22 = vsel %vm218_vm0, %v3670_v46, %v3678_v33  ;;  %v3776_v23 = vrot.slane %v3623_v39, 1  ;;  %4900 = vmatpush1.bf16.msra.mxu0 %v9012_v0 }
 0x259   :  { %v3686_v54 = vrot.slane %v3626_v25, 7  ;;  %v3627_v9 = vmax.f32 %v3603_v8, 0.0  ;;  %v3681_v10 = vsel %vm218_vm0, %v3672_v36, %v3680_v18  ;;  %v3782_v1 = vrot.slane %v3626_v25, 1  ;;  %4901 = vmatprep.subr.bf16.mxu0 %v9020_v11  ;;  %v9024_v36 = vld [vmem:[#allocation8 + $0x488] ss:$16 sps:$4 sm:$0xff]  }
 0x25a   :  { %v3606_v37 = vadd.f32 %v10517_v44, %v3560_v19  ;;  %v3607_v47 = vadd.f32 %v10529_v59, %v3561_v62  ;;  %4813 = vmatprep.mubr.bf16.mxu0 %v10622_v55  ;;  %v10629_v5 = vpack.c.bf16 %v3681_v10, %v3673_v14  ;;  %v10631_v15 = vpack.c.bf16 %v3679_v22, %v3671_v20  ;;  %v9030_v62 = vld [vmem:[#allocation8 + $0x468] ss:$16 sps:$4 sm:$0xff]  }
 0x25b   :  { %v3688_v32 = vrot.slane %v3627_v9, 7  ;;  %v3784_v46 = vrot.slane %v3627_v9, 1  ;;  %v3687_v13 = vsel %vm218_vm0, %v3678_v33, %v3686_v54  ;;  %4814 = vmatmul.mubr.bf16.gmra.mxu0 %v10614_v29  ;;  %v3759_v44 = vsel %vm333_vm13, %v3757_v28, %v3758_v27  ;;  %v9036_v10 = vld [vmem:[#allocation8 + $0x448] ss:$16 sps:$4 sm:$0xff]  }
 0x25c   :  { %v3630_v39 = vmax.f32 %v3606_v37, 0.0  ;;  %v3631_v3 = vmax.f32 %v3607_v47, 0.0  ;;  %v3769_v59 = vsel %vm333_vm13, %v3758_v27, %v3768_v61  ;;  %4902 = vmatpush1.bf16.msra.mxu0 %v9018_v49  ;;  %v3777_v20 = vsel %vm333_vm13, %v3768_v61, %v3776_v23  ;;  %v9044_v37 = vld [vmem:[#allocation8 + $0x42c] ss:$16 sps:$4 sm:$0xff]   ;;  %v9042_v47 = vld [vmem:[#allocation8 + $0x428] ss:$16 sps:$4 sm:$0xff]  }
 0x25d   :  { %v3689_v45 = vsel %vm218_vm0, %v3680_v18, %v3688_v32  ;;  %v10640_v0 = vpack.c.bf16 %v3769_v59, %v3759_v44  ;;  %v3785_v33 = vsel %vm333_vm13, %v3776_v23, %v3784_v46  ;;  %4903 = vmatprep.subr.bf16.mxu0 %v9026_v34  ;;  %v3775_v14 = vsel %vm333_vm13, %v3766_v40, %v3774_v51  ;;  %v9038_v40 = vld [vmem:[#allocation8 + $0x44c] ss:$16 sps:$4 sm:$0xff]  }
 0x25e   :  { %v3694_v38 = vrot.slane %v3630_v39, 7  ;;  %v3790_v6 = vrot.slane %v3630_v39, 1  ;;  %v3696_v35 = vrot.slane %v3631_v3, 7  ;;  %v3792_v56 = vrot.slane %v3631_v3, 1  ;;  %v9050_v34 = vld [vmem:[#allocation8 + $0x40c] ss:$16 sps:$4 sm:$0xff]  }
 0x25f   :  { %v10644_v11 = vpack.c.bf16 %v3631_v3, %v3627_v9  ;;  %v10646_v28 = vpack.c.bf16 %v3630_v39, %v3626_v25  ;;  %v10648_v27 = vpack.c.bf16 %v3785_v33, %v3777_v20  ;;  %v3783_v19 = vsel %vm333_vm13, %v3774_v51, %v3782_v1  ;;  %v9060_v39 = vld [vmem:[#allocation8 + $0x5c8] ss:$16 sps:$4 sm:$0xff]   ;;  %v9068_v3 = vld [vmem:[#allocation8 + $0x5ac] ss:$16 sps:$4 sm:$0xff]  }
 0x260   :  { %v3822_v61 = vsel %vm333_vm13, %v3790_v6, 0.0  ;;  %v3697_v18 = vsel %vm218_vm0, %v3688_v32, %v3696_v35  ;;  %v3695_v8 = vsel %vm218_vm0, %v3686_v54, %v3694_v38  ;;  %4904 = vmatpush1.bf16.msra.mxu0 %v9024_v36  ;;  %v10662_v23 = vpack.c.bf16 %v3783_v19, %v3775_v14  ;;  %v9048_v32 = vld [vmem:[#allocation8 + $0x408] ss:$16 sps:$4 sm:$0xff]   ;;  %v9074_v44 = vld [vmem:[#allocation8 + $0x58c] ss:$16 sps:$4 sm:$0xff]  }
 0x261   :  { %4823 = vmatprep.mubr.bf16.mxu0 %v10644_v11  ;;  %v10658_v25 = vpack.c.bf16 %v3697_v18, %v3689_v45  ;;  %v10660_v22 = vpack.c.bf16 %v3695_v8, %v3687_v13  ;;  %v3823_v57 = vsel %vm333_vm13, %v3792_v56, 0.0  ;;  %4905 = vmatprep.subr.bf16.mxu0 %v9032_v21  ;;  %v3793_v9 = vsel %vm333_vm13, %v3784_v46, %v3792_v56  ;;  %v9054_v46 = vld [vmem:[#allocation8 + $0x5e8] ss:$16 sps:$4 sm:$0xff]   ;;  %v9062_v13 = vld [vmem:[#allocation8 + $0x5cc] ss:$16 sps:$4 sm:$0xff]  }
 0x262   :  { %v3791_v54 = vsel %vm333_vm13, %v3782_v1, %v3790_v6  ;;  %v10667_v49 = vpack.c.bf16 %v3823_v57, %v3793_v9  ;;  %v9056_v1 = vld [vmem:[#allocation8 + $0x5ec] ss:$16 sps:$4 sm:$0xff]   ;;  %v11221_v59 = vsub.s32 2, %v9877_v26  ;;  %v9072_v36 = vld [vmem:[#allocation8 + $0x588] ss:$16 sps:$4 sm:$0xff]   ;;  %v11220_v20 = vsub.s32 3, %v9877_v26 }
 0x263   :  { %v10669_v51 = vpack.c.bf16 %v3822_v61, %v3791_v54  ;;  %4824 = vmatmul.mubr.bf16.gmra.mxu0 %v10646_v28  ;;  %v9080_v45 = vld [vmem:[#allocation8 + $0x56c] ss:$16 sps:$4 sm:$0xff]   ;;  %v9078_v56 = vld [vmem:[#allocation8 + $0x568] ss:$16 sps:$4 sm:$0xff]  }
 0x264   :  { %4906 = vmatpush1.bf16.msra.mxu0 %v9030_v62  ;;  %4929 = vmatprep.mubr.bf16.mxu0 %v10588_v7  ;;  %v9066_v7 = vld [vmem:[#allocation8 + $0x5a8] ss:$16 sps:$4 sm:$0xff]   ;;  %v10678_v35 = vrot.slane %v10506_v48, %v11221_v59  ;;  %v10684_v19 = vrot.slane %v10506_v48, %v11220_v20  ;;  %v9086_v62 = vld [vmem:[#allocation8 + $0x54c] ss:$16 sps:$4 sm:$0xff]  }
 0x265   :  { %4907 = vmatprep.subr.bf16.mxu0 %v9038_v40  ;;  %v11277_v61 = vld [vmem:[#allocation30_spill] sm:$0xff] }
 0x268   :  { %4908 = vmatpush1.bf16.msra.mxu0 %v9036_v10 }
 0x269   :  { %4909 = vmatprep.subr.bf16.mxu0 %v9044_v37  ;;  %v9084_v37 = vld [vmem:[#allocation8 + $0x548] ss:$16 sps:$4 sm:$0xff]  }
 0x26c   :  { %4910 = vmatpush1.bf16.msra.mxu0 %v9042_v47 }
 0x26d   :  { %4911 = vmatprep.subr.bf16.mxu0 %v9050_v34 }
 0x270   :  { %4912 = vmatpush1.bf16.msra.mxu0 %v9048_v32 }
 0x271   :  { %4913 = vmatprep.subr.bf16.mxu0 %v9056_v1 }
 0x274   :  { %4914 = vmatpush2.bf16.msra.mxu0 %v9054_v46 }
 0x275   :  { %4915 = vmatprep.subr.bf16.mxu0 %v9062_v13  ;;  %v9092_v13 = vld [vmem:[#allocation8 + $0x52c] ss:$16 sps:$4 sm:$0xff]  }
 0x278   :  { %4916 = vmatpush2.bf16.msra.mxu0 %v9060_v39 }
 0x279   :  { %4917 = vmatprep.subr.bf16.mxu0 %v9068_v3 }
 0x27c   :  { %4918 = vmatpush2.bf16.msra.mxu0 %v9066_v7 }
 0x27d   :  { %4919 = vmatprep.subr.bf16.mxu0 %v9074_v44 }
 0x27e   :  { %v3448_v33 = vpop.f32.mrf.mxu0 }
 0x27f   :  { %v3511_v38 = vpop.f32.mrf.mxu1 }
 0x280   :  { %v3512_v6 = vadd.f32 %v3511_v38, %v3448_v33  ;;  %4920 = vmatpush2.bf16.msra.mxu0 %v9072_v36  ;;  %v3450_v21 = vpop.f32.mrf.mxu0  ;;  %v9090_v33 = vld [vmem:[#allocation8 + $0x528] ss:$16 sps:$4 sm:$0xff]  }
 0x281   :  { %v3513_v14 = vpop.f32.mrf.mxu1  ;;  %4921 = vmatprep.subr.bf16.mxu0 %v9080_v45 }
 0x282   :  { %v3542_v18 = vadd.f32 %v3512_v6, %v11277_v61  ;;  %v3514_v8 = vadd.f32 %v3513_v14, %v3450_v21  ;;  %v3452_v57 = vpop.f32.mrf.mxu0 }
 0x283   :  { %v3515_v40 = vpop.f32.mrf.mxu1 }
 0x284   :  { %v3588_v9 = vadd.f32 %v10678_v35, %v3542_v18  ;;  %v3543_v54 = vadd.f32 %v3514_v8, %v10468_v17  ;;  %v3516_v10 = vadd.f32 %v3515_v40, %v3452_v57  ;;  %4922 = vmatpush2.bf16.msra.mxu0 %v9078_v56  ;;  %v3454_v47 = vpop.f32.mrf.mxu0 }
 0x285   :  { %v3517_v34 = vpop.f32.mrf.mxu1  ;;  %4923 = vmatprep.subr.bf16.mxu0 %v9086_v62 }
 0x286   :  { %v3612_v32 = vmax.f32 %v3588_v9, 0.0  ;;  %v3589_v1 = vadd.f32 %v10684_v19, %v3543_v54  ;;  %v3546_v46 = vadd.f32 %v3516_v10, %v10471_v53  ;;  %v3518_v48 = vadd.f32 %v3517_v34, %v3454_v47  ;;  %v3458_v39 = vpop.f32.mrf.mxu0  ;;  %v9098_v53 = vld [vmem:[#allocation8 + $0x50c] ss:$16 sps:$4 sm:$0xff]  }
 0x287   :  { %v3521_v3 = vpop.f32.mrf.mxu1 }
 0x288   :  { %v10690_v7 = vmax.f32 %v3589_v1, 0.0  ;;  %v3592_v44 = vadd.f32 %v10678_v35, %v3546_v46  ;;  %v3660_v17 = vrot.slane %v3612_v32, 7  ;;  %v3547_v36 = vadd.f32 %v3518_v48, %v10473_v2  ;;  %4924 = vmatpush2.bf16.msra.mxu0 %v9084_v37  ;;  %v3460_v38 = vpop.f32.mrf.mxu0  ;;  %v9096_v1 = vld [vmem:[#allocation8 + $0x508] ss:$16 sps:$4 sm:$0xff]  }
 0x289   :  { %v3522_v45 = vadd.f32 %v3521_v3, %v3458_v39  ;;  %v3523_v6 = vpop.f32.mrf.mxu1  ;;  %v3760_v56 = vrot.slane %v3612_v32, 1  ;;  %4925 = vmatprep.subr.bf16.mxu0 %v9092_v13  ;;  %v9104_v3 = vld [vmem:[#allocation8 + $0xe4] ss:$16 sps:$4 sm:$0xff]  }
 0x28a   :  { %v3616_v21 = vmax.f32 %v3592_v44, 0.0  ;;  %v3661_v14 = vrot.slane %v10690_v7, 7  ;;  %v3593_v61 = vadd.f32 %v10684_v19, %v3547_v36  ;;  %v3524_v8 = vadd.f32 %v3523_v6, %v3460_v38  ;;  %v3462_v62 = vpop.f32.mrf.mxu0 }
 0x28b   :  { %v3550_v18 = vadd.f32 %v3522_v45, %v10477_v31  ;;  %v3525_v57 = vpop.f32.mrf.mxu1  ;;  %v3728_v10 = vsel %vm218_vm0, 0.0, %v3660_v17 }
 0x28c   :  { %v3666_v40 = vrot.slane %v3616_v21, 7  ;;  %v3761_v2 = vrot.slane %v3616_v21, 1  ;;  %v10697_v9 = vpack.c.bf16 %v3616_v21, %v3612_v32  ;;  %v3526_v54 = vadd.f32 %v3525_v57, %v3462_v62  ;;  %4926 = vmatpush2.bf16.msra.mxu0 %v9090_v33  ;;  %v3464_v46 = vpop.f32.mrf.mxu0 }
 0x28d   :  { %v10700_v37 = vmax.f32 %v3593_v61, 0.0  ;;  %v3596_v47 = vadd.f32 %v10678_v35, %v3550_v18  ;;  %v3551_v34 = vadd.f32 %v3524_v8, %v10482_v60  ;;  %v3527_v31 = vpop.f32.mrf.mxu1  ;;  %4927 = vmatprep.subr.bf16.mxu0 %v9098_v53  ;;  %v3729_v38 = vsel %vm218_vm0, 0.0, %v3661_v14  ;;  %v9099_v18 = vld [vmem:[#allocation8 + $0x6e8] ss:$16 sps:$4 sm:$0xff]  }
 0x28e   :  { %v3667_v48 = vsel %vm218_vm0, %v3660_v17, %v3666_v40  ;;  %v3762_v13 = vsel %vm333_vm13, %v3760_v56, %v3761_v2  ;;  %v3554_v32 = vadd.f32 %v3526_v54, %v10484_v50  ;;  %v3528_v39 = vadd.f32 %v3527_v31, %v3464_v46  ;;  %v3468_v60 = vpop.f32.mrf.mxu0 }
 0x28f   :  { %v10707_v44 = vpack.c.bf16 %v3667_v48, %v3728_v10  ;;  %v3668_v36 = vrot.slane %v10700_v37, 7  ;;  %v10710_v45 = vmax.f32 %v3596_v47, 0.0  ;;  %v3531_v33 = vpop.f32.mrf.mxu1  ;;  %v3597_v6 = vadd.f32 %v10684_v19, %v3551_v34  ;;  %v9102_v34 = vld [vmem:[#allocation8 + $0xe0] ss:$16 sps:$4 sm:$0xff]  }
 0x290   :  { %v3600_v17 = vadd.f32 %v10678_v35, %v3554_v32  ;;  %v3555_v56 = vadd.f32 %v3528_v39, %v10487_v58  ;;  %v3532_v50 = vadd.f32 %v3531_v33, %v3468_v60  ;;  %4928 = vmatpush2.bf16.msra.mxu0 %v9096_v1  ;;  %v10720_v61 = vpack.c.bf16 %v10700_v37, %v10690_v7  ;;  %v3470_v8 = vpop.f32.mrf.mxu0  ;;  %v9107_v1 = vld [vmem:[#allocation8 + $0x6cc] ss:$16 sps:$4 sm:$0xff]   ;;  %v9110_v32 = vld [vmem:[#allocation8 + $0xc4] ss:$16 sps:$4 sm:$0xff]  }
 0x291   :  { %v3674_v21 = vrot.slane %v10710_v45, 7  ;;  %v3770_v53 = vrot.slane %v10710_v45, 1  ;;  %v3533_v62 = vpop.f32.mrf.mxu1  ;;  %v3669_v57 = vsel %vm218_vm0, %v3661_v14, %v3668_v36  ;;  %v10725_v54 = vmax.f32 %v3597_v6, 0.0  ;;  %5663 = vmatprep.subr.bf16.mxu0 %v9104_v3 }
 0x292   :  { %v10727_v58 = vmax.f32 %v3600_v17, 0.0  ;;  %v3601_v10 = vadd.f32 %v10684_v19, %v3555_v56  ;;  %v3558_v47 = vadd.f32 %v3532_v50, %v10490_v30  ;;  %4866 = vmatprep.mubr.bf16.mxu1 %v10720_v61  ;;  %v3534_v31 = vadd.f32 %v3533_v62, %v3470_v8  ;;  %v3472_v48 = vpop.f32.mrf.mxu0  ;;  %v9108_v50 = vld [vmem:[#allocation8 + $0xc0] ss:$16 sps:$4 sm:$0xff]   ;;  %v9113_v62 = vld [vmem:[#allocation8 + $0x6ac] ss:$16 sps:$4 sm:$0xff]  }
 0x293   :  { %v3771_v46 = vsel %vm333_vm13, %v3761_v2, %v3770_v53  ;;  %v3535_v14 = vpop.f32.mrf.mxu1  ;;  %v10735_v39 = vpack.c.bf16 %v3669_v57, %v3729_v38  ;;  %v3675_v60 = vsel %vm218_vm0, %v3666_v40, %v3674_v21  ;;  %v3763_v30 = vrot.slane %v10690_v7, 1  ;;  %4930 = vmatmul.mubr.bf16.vlgmr.msra.gmra.mxu0 %v10568_v16  ;;  %4867 = vmatmul.mubr.bf16.vlgmr.msra.gmra.mxu1 %v10697_v9  ;;  %v9105_v7 = vld [vmem:[#allocation8 + $0x6c8] ss:$16 sps:$4 sm:$0xff]  }
 0x294   :  { %v10741_v3 = vpack.c.bf16 %v3771_v46, %v3762_v13  ;;  %v3676_v33 = vrot.slane %v10725_v54, 7  ;;  %v3764_v2 = vrot.slane %v10700_v37, 1  ;;  %v10747_v6 = vmax.f32 %v3601_v10, 0.0  ;;  %4939 = vmatprep.mubr.bf16.mxu0 %v10622_v55  ;;  %4961 = vmatpush1.bf16.msra.mxu1 %v9099_v18  ;;  %v3474_v40 = vpop.f32.mrf.mxu0  ;;  %v9114_v37 = vld [vmem:[#allocation8 + $0xa0] ss:$16 sps:$4 sm:$0xff]  }
 0x295   :  { %v3604_v38 = vadd.f32 %v10678_v35, %v3558_v47  ;;  %v3559_v17 = vadd.f32 %v3534_v31, %v10495_v24  ;;  %v3537_v13 = vpop.f32.mrf.mxu1  ;;  %v3772_v56 = vrot.slane %v10725_v54, 1  ;;  %5664 = vmatpush1.bf16.msra.mxu0 %v9102_v34  ;;  %v3536_v16 = vadd.f32 %v3535_v14, %v3472_v48  ;;  %4962 = vmatprep.subr.bf16.mxu1 %v9107_v1  ;;  %v9116_v47 = vld [vmem:[#allocation8 + $0xa4] ss:$16 sps:$4 sm:$0xff]  }
 0x296   :  { %v3538_v8 = vadd.f32 %v3537_v13, %v3474_v40  ;;  %v10755_v57 = vpack.c.bf16 %v10727_v58, %v10710_v45  ;;  %v3682_v24 = vrot.slane %v10727_v58, 7  ;;  %v3684_v55 = vrot.slane %v10747_v6, 7  ;;  %5665 = vmatprep.subr.bf16.mxu0 %v9110_v32  ;;  %v9111_v32 = vld [vmem:[#allocation8 + $0x6a8] ss:$16 sps:$4 sm:$0xff]  }
 0x297   :  { %v10759_v18 = vmax.f32 %v3604_v38, 0.0  ;;  %v3605_v10 = vadd.f32 %v10684_v19, %v3559_v17  ;;  %v3562_v34 = vadd.f32 %v3536_v16, %v10497_v4  ;;  %v10766_v46 = vpack.c.bf16 %v10747_v6, %v10725_v54 }
 0x298   :  { %v3563_v1 = vadd.f32 %v3538_v8, %v10499_v52  ;;  %v3677_v31 = vsel %vm218_vm0, %v3668_v36, %v3676_v33  ;;  %v3780_v48 = vrot.slane %v10747_v6, 1  ;;  %4963 = vmatpush1.bf16.msra.mxu1 %v9105_v7  ;;  %v3685_v4 = vsel %vm218_vm0, %v3676_v33, %v3684_v55  ;;  %v9119_v36 = vld [vmem:[#allocation8 + $0x68c] ss:$16 sps:$4 sm:$0xff]   ;;  %v9122_v33 = vld [vmem:[#allocation8 + $0x84] ss:$16 sps:$4 sm:$0xff]  }
 0x299   :  { %v3690_v14 = vrot.slane %v10759_v18, 7  ;;  %v10773_v38 = vmax.f32 %v3605_v10, 0.0  ;;  %v3778_v52 = vrot.slane %v10727_v58, 1  ;;  %v3608_v17 = vadd.f32 %v10678_v35, %v3562_v34  ;;  %5666 = vmatpush1.bf16.msra.mxu0 %v9108_v50  ;;  %4876 = vmatprep.mubr.bf16.mxu1 %v10766_v46  ;;  %v9120_v10 = vld [vmem:[#allocation8 + $0x80] ss:$16 sps:$4 sm:$0xff]  }
 0x29a   :  { %v3609_v54 = vadd.f32 %v10684_v19, %v3563_v1  ;;  %v10780_v6 = vpack.c.bf16 %v3685_v4, %v3677_v31  ;;  %4964 = vmatprep.subr.bf16.mxu1 %v9113_v62  ;;  %5667 = vmatprep.subr.bf16.mxu0 %v9116_v47  ;;  %v3683_v35 = vsel %vm218_vm0, %v3674_v21, %v3682_v24  ;;  %v3786_v8 = vrot.slane %v10759_v18, 1  ;;  %v9117_v62 = vld [vmem:[#allocation8 + $0x688] ss:$16 sps:$4 sm:$0xff]  }
 0x29b   :  { %v3692_v40 = vrot.slane %v10773_v38, 7  ;;  %v3788_v7 = vrot.slane %v10773_v38, 1  ;;  %v3691_v19 = vsel %vm218_vm0, %v3682_v24, %v3690_v14  ;;  %v3632_v58 = vmax.f32 %v3608_v17, 0.0  ;;  %4940 = vmatmul.mubr.bf16.gmra.mxu0 %v10614_v29  ;;  %4877 = vmatmul.mubr.bf16.gmra.mxu1 %v10755_v57 }
 0x29c   :  { %v3633_v13 = vmax.f32 %v3609_v54, 0.0  ;;  %v10790_v16 = vpack.c.bf16 %v3683_v35, %v3675_v60  ;;  %v3765_v50 = vsel %vm333_vm13, %v3763_v30, %v3764_v2  ;;  %4949 = vmatprep.mubr.bf16.mxu0 %v10644_v11  ;;  %4965 = vmatpush1.bf16.msra.mxu1 %v9111_v32  ;;  %v3773_v24 = vsel %vm333_vm13, %v3764_v2, %v3772_v56  ;;  %v9125_v30 = vld [vmem:[#allocation8 + $0x66c] ss:$16 sps:$4 sm:$0xff]   ;;  %v9128_v11 = vld [vmem:[#allocation8 + $0x64] ss:$16 sps:$4 sm:$0xff]  }
 0x29d   :  { %v3693_v21 = vsel %vm218_vm0, %v3684_v55, %v3692_v40  ;;  %v3781_v47 = vsel %vm333_vm13, %v3772_v56, %v3780_v48  ;;  %v3698_v29 = vrot.slane %v3632_v58, 7  ;;  %v3794_v34 = vrot.slane %v3632_v58, 1  ;;  %5668 = vmatpush1.bf16.msra.mxu0 %v9114_v37  ;;  %4966 = vmatprep.subr.bf16.mxu1 %v9119_v36 }
 0x29e   :  { %v3700_v1 = vrot.slane %v3633_v13, 7  ;;  %v3796_v60 = vrot.slane %v3633_v13, 1  ;;  %5669 = vmatprep.subr.bf16.mxu0 %v9122_v33  ;;  %v10799_v31 = vpack.c.bf16 %v3633_v13, %v10773_v38  ;;  %v10802_v32 = vpack.c.bf16 %v3632_v58, %v10759_v18  ;;  %v9123_v38 = vld [vmem:[#allocation8 + $0x668] ss:$16 sps:$4 sm:$0xff]   ;;  %v9131_v58 = vld [vmem:[#allocation8 + $0x64c] ss:$16 sps:$4 sm:$0xff]  }
 0x29f   :  { %v10804_v55 = vpack.c.bf16 %v3773_v24, %v3765_v50  ;;  %v3789_v2 = vsel %vm333_vm13, %v3780_v48, %v3788_v7  ;;  %v3824_v56 = vsel %vm333_vm13, %v3794_v34, 0.0  ;;  %v3699_v17 = vsel %vm218_vm0, %v3690_v14, %v3698_v29  ;;  %v9134_v13 = vld [vmem:[#allocation8 + $0x44] ss:$16 sps:$4 sm:$0xff]   ;;  %v9144_v29 = vld [vmem:[#allocation8] ss:$16 sps:$4 sm:$0xff]  }
 0x2a0   :  { %v3701_v4 = vsel %vm218_vm0, %v3692_v40, %v3700_v1  ;;  %v10810_v54 = vpack.c.bf16 %v3789_v2, %v3781_v47  ;;  %4967 = vmatpush1.bf16.msra.mxu1 %v9117_v62  ;;  %4886 = vmatprep.mubr.bf16.mxu1 %v10799_v31  ;;  %v10815_v18 = vpack.c.bf16 %v3699_v17, %v3691_v19  ;;  %v3825_v36 = vsel %vm333_vm13, %v3796_v60, 0.0  ;;  %v9126_v40 = vld [vmem:[#allocation8 + $0x60] ss:$16 sps:$4 sm:$0xff]   ;;  %v9140_v62 = vld [vmem:[#allocation8 + $0x24] ss:$16 sps:$4 sm:$0xff]  }
 0x2a1   :  { %v10813_v37 = vpack.c.bf16 %v3701_v4, %v3693_v21  ;;  %v3779_v48 = vsel %vm333_vm13, %v3770_v53, %v3778_v52  ;;  %5670 = vmatpush1.bf16.msra.mxu0 %v9120_v10  ;;  %4968 = vmatprep.subr.bf16.mxu1 %v9125_v30  ;;  %v3787_v14 = vsel %vm333_vm13, %v3778_v52, %v3786_v8  ;;  %v9129_v52 = vld [vmem:[#allocation8 + $0x648] ss:$16 sps:$4 sm:$0xff]   ;;  %v9143_v21 = vld [vmem:[#allocation8 + $0x60c] ss:$16 sps:$4 sm:$0xff]   ;;  %v9146_v24 = vld [vmem:[#allocation8 + $0x4] ss:$16 sps:$4 sm:$0xff]  }
 0x2a2   :  { %v3797_v33 = vsel %vm333_vm13, %v3788_v7, %v3796_v60  ;;  %v3795_v35 = vsel %vm333_vm13, %v3786_v8, %v3794_v34  ;;  %5671 = vmatprep.subr.bf16.mxu0 %v9128_v11  ;;  %v10824_v19 = vpack.c.bf16 %v3787_v14, %v3779_v48  ;;  %v9132_v7 = vld [vmem:[#allocation8 + $0x40] ss:$16 sps:$4 sm:$0xff]   ;;  %v9137_v8 = vld [vmem:[#allocation8 + $0x62c] ss:$16 sps:$4 sm:$0xff]   ;;  %v9135_v10 = vld [vmem:[#allocation8 + $0x628] ss:$16 sps:$4 sm:$0xff]  }
 0x2a3   :  { %v10826_v50 = vpack.c.bf16 %v3825_v36, %v3797_v33  ;;  %v10828_v45 = vpack.c.bf16 %v3824_v56, %v3795_v35  ;;  %4950 = vmatmul.mubr.bf16.gmra.mxu0 %v10646_v28  ;;  %4887 = vmatmul.mubr.bf16.gmra.mxu1 %v10802_v32  ;;  %v9138_v28 = vld [vmem:[#allocation8 + $0x20] ss:$16 sps:$4 sm:$0xff]   ;;  %v9141_v47 = vld [vmem:[#allocation8 + $0x608] ss:$16 sps:$4 sm:$0xff]   ;;  %v9149_v34 = vld [vmem:[#allocation8 + $0x7ec] ss:$16 sps:$4 sm:$0xff]  }
 0x2a4   :  { %4969 = vmatpush1.bf16.msra.mxu1 %v9123_v38  ;;  %7993 = vmatprep.mubr.msk.bf16.mxu0 %vm9918_vm3, %v10600_v43  ;;  %v9147_v1 = vld [vmem:[#allocation8 + $0x7e8] ss:$16 sps:$4 sm:$0xff]   ;;  %v9150_v60 = vld [vmem:[#allocation8 + $0x1e0] ss:$16 sps:$4 sm:$0xff]   ;;  %v9155_v30 = vld [vmem:[#allocation8 + $0x7cc] ss:$16 sps:$4 sm:$0xff]  }
 0x2a5   :  { %5672 = vmatpush1.bf16.msra.mxu0 %v9126_v40  ;;  %4992 = vmatprep.mubr.bf16.mxu1 %v10720_v61  ;;  %v9152_v61 = vld [vmem:[#allocation8 + $0x1e4] ss:$16 sps:$4 sm:$0xff]   ;;  %v9153_v2 = vld [vmem:[#allocation8 + $0x7c8] ss:$16 sps:$4 sm:$0xff]   ;;  %v9156_v56 = vld [vmem:[#allocation8 + $0x1c0] ss:$16 sps:$4 sm:$0xff]  }
 0x2a6   :  { %4970 = vmatprep.subr.bf16.mxu1 %v9131_v58  ;;  %5673 = vmatprep.subr.bf16.mxu0 %v9134_v13  ;;  %v9158_v11 = vld [vmem:[#allocation8 + $0x1c4] ss:$16 sps:$4 sm:$0xff]   ;;  %v9161_v4 = vld [vmem:[#allocation8 + $0x7ac] ss:$16 sps:$4 sm:$0xff]   ;;  %v9159_v38 = vld [vmem:[#allocation8 + $0x7a8] ss:$16 sps:$4 sm:$0xff]  }
 0x2a7   :  { %v9164_v17 = vld [vmem:[#allocation8 + $0x1a4] ss:$16 sps:$4 sm:$0xff]   ;;  %v9162_v48 = vld [vmem:[#allocation8 + $0x1a0] ss:$16 sps:$4 sm:$0xff]   ;;  %v9167_v36 = vld [vmem:[#allocation8 + $0x78c] ss:$16 sps:$4 sm:$0xff]  }
 0x2a8   :  { %4971 = vmatpush1.bf16.msra.mxu1 %v9129_v52  ;;  %v9170_v40 = vld [vmem:[#allocation8 + $0x184] ss:$16 sps:$4 sm:$0xff]   ;;  %v9165_v14 = vld [vmem:[#allocation8 + $0x788] ss:$16 sps:$4 sm:$0xff]   ;;  %v9168_v33 = vld [vmem:[#allocation8 + $0x180] ss:$16 sps:$4 sm:$0xff]  }
 0x2a9   :  { %5674 = vmatpush1.bf16.msra.mxu0 %v9132_v7  ;;  %4972 = vmatprep.subr.bf16.mxu1 %v9137_v8  ;;  %v9173_v35 = vld [vmem:[#allocation8 + $0x76c] ss:$16 sps:$4 sm:$0xff]   ;;  %v9176_v58 = vld [vmem:[#allocation8 + $0x164] ss:$16 sps:$4 sm:$0xff]   ;;  %v9171_v13 = vld [vmem:[#allocation8 + $0x768] ss:$16 sps:$4 sm:$0xff]  }
 0x2aa   :  { %5675 = vmatprep.subr.bf16.mxu0 %v9140_v62  ;;  %v9174_v52 = vld [vmem:[#allocation8 + $0x160] ss:$16 sps:$4 sm:$0xff]   ;;  %v9179_v7 = vld [vmem:[#allocation8 + $0x74c] ss:$16 sps:$4 sm:$0xff]   ;;  %v9182_v8 = vld [vmem:[#allocation8 + $0x144] ss:$16 sps:$4 sm:$0xff]  }
 0x2ab   :  { %v9177_v62 = vld [vmem:[#allocation8 + $0x748] ss:$16 sps:$4 sm:$0xff]  }
 0x2ac   :  { %4973 = vmatpush1.bf16.msra.mxu1 %v9135_v10  ;;  %v9180_v10 = vld [vmem:[#allocation8 + $0x140] ss:$16 sps:$4 sm:$0xff]  }
 0x2ad   :  { %5676 = vmatpush1.bf16.msra.mxu0 %v9138_v28  ;;  %4974 = vmatprep.subr.bf16.mxu1 %v9143_v21  ;;  %v9185_v28 = vld [vmem:[#allocation8 + $0x72c] ss:$16 sps:$4 sm:$0xff]   ;;  %v9188_v21 = vld [vmem:[#allocation8 + $0x124] ss:$16 sps:$4 sm:$0xff]  }
 0x2ae   :  { %5677 = vmatprep.subr.bf16.mxu0 %v9146_v24  ;;  %v9183_v24 = vld [vmem:[#allocation8 + $0x728] ss:$16 sps:$4 sm:$0xff]  }
 0x2b0   :  { %4975 = vmatpush1.bf16.msra.mxu1 %v9141_v47  ;;  %v9186_v47 = vld [vmem:[#allocation8 + $0x120] ss:$16 sps:$4 sm:$0xff]  }
 0x2b1   :  { %5678 = vmatpush1.bf16.msra.mxu0 %v9144_v29  ;;  %4976 = vmatprep.subr.bf16.mxu1 %v9149_v34  ;;  %v9191_v29 = vld [vmem:[#allocation8 + $0x70c] ss:$16 sps:$4 sm:$0xff]   ;;  %v9194_v34 = vld [vmem:[#allocation8 + $0x104] ss:$16 sps:$4 sm:$0xff]  }
 0x2b2   :  { %5679 = vmatprep.subr.bf16.mxu0 %v9152_v61  ;;  %v9189_v61 = vld [vmem:[#allocation8 + $0x708] ss:$16 sps:$4 sm:$0xff]  }
 0x2b4   :  { %4977 = vmatpush2.bf16.msra.mxu1 %v9147_v1  ;;  %v9192_v1 = vld [vmem:[#allocation8 + $0x100] ss:$16 sps:$4 sm:$0xff]  }
 0x2b5   :  { %5680 = vmatpush2.bf16.msra.mxu0 %v9150_v60  ;;  %4978 = vmatprep.subr.bf16.mxu1 %v9155_v30  ;;  %v9197_v60 = vld [vmem:[#allocation8 + $0x2e4] ss:$16 sps:$4 sm:$0xff]   ;;  %v9200_v30 = vld [vmem:[#allocation8 + $0xec] ss:$16 sps:$4 sm:$0xff]  }
 0x2b6   :  { %5681 = vmatprep.subr.bf16.mxu0 %v9158_v11  ;;  %v9195_v11 = vld [vmem:[#allocation8 + $0x2e0] ss:$16 sps:$4 sm:$0xff]  }
 0x2b8   :  { %4979 = vmatpush2.bf16.msra.mxu1 %v9153_v2  ;;  %v9198_v2 = vld [vmem:[#allocation8 + $0xe8] ss:$16 sps:$4 sm:$0xff]  }
 0x2b9   :  { %5682 = vmatpush2.bf16.msra.mxu0 %v9156_v56  ;;  %4980 = vmatprep.subr.bf16.mxu1 %v9161_v4  ;;  %v9203_v56 = vld [vmem:[#allocation8 + $0x2c4] ss:$16 sps:$4 sm:$0xff]   ;;  %v9206_v4 = vld [vmem:[#allocation8 + $0xcc] ss:$16 sps:$4 sm:$0xff]  }
 0x2ba   :  { %5683 = vmatprep.subr.bf16.mxu0 %v9164_v17  ;;  %v9405_v17 = vld [vmem:[#allocation8 + $0xa80] ss:$16 sps:$4 sm:$0xff]  }
 0x2bc   :  { %4981 = vmatpush2.bf16.msra.mxu1 %v9159_v38  ;;  %v9201_v38 = vld [vmem:[#allocation8 + $0x2c0] ss:$16 sps:$4 sm:$0xff]  }
 0x2bd   :  { %5684 = vmatpush2.bf16.msra.mxu0 %v9162_v48  ;;  %4982 = vmatprep.subr.bf16.mxu1 %v9167_v36  ;;  %v9204_v48 = vld [vmem:[#allocation8 + $0xc8] ss:$16 sps:$4 sm:$0xff]   ;;  %v9209_v36 = vld [vmem:[#allocation8 + $0x2a4] ss:$16 sps:$4 sm:$0xff]  }
 0x2be   :  { %5685 = vmatprep.subr.bf16.mxu0 %v9170_v40  ;;  %v9212_v40 = vld [vmem:[#allocation8 + $0xac] ss:$16 sps:$4 sm:$0xff]  }
 0x2c0   :  { %4983 = vmatpush2.bf16.msra.mxu1 %v9165_v14  ;;  %v9210_v14 = vld [vmem:[#allocation8 + $0xa8] ss:$16 sps:$4 sm:$0xff]  }
 0x2c1   :  { %5686 = vmatpush2.bf16.msra.mxu0 %v9168_v33  ;;  %4984 = vmatprep.subr.bf16.mxu1 %v9173_v35  ;;  %v9215_v33 = vld [vmem:[#allocation8 + $0x284] ss:$16 sps:$4 sm:$0xff]   ;;  %v9417_v35 = vld [vmem:[#allocation8 + $0xa40] ss:$16 sps:$4 sm:$0xff]  }
 0x2c2   :  { %5687 = vmatprep.subr.bf16.mxu0 %v9176_v58  ;;  %v9213_v58 = vld [vmem:[#allocation8 + $0x280] ss:$16 sps:$4 sm:$0xff]  }
 0x2c4   :  { %4985 = vmatpush2.bf16.msra.mxu1 %v9171_v13  ;;  %v9216_v13 = vld [vmem:[#allocation8 + $0x88] ss:$16 sps:$4 sm:$0xff]  }
 0x2c5   :  { %5688 = vmatpush2.bf16.msra.mxu0 %v9174_v52  ;;  %4986 = vmatprep.subr.bf16.mxu1 %v9179_v7  ;;  %v9221_v52 = vld [vmem:[#allocation8 + $0x264] ss:$16 sps:$4 sm:$0xff]   ;;  %v9219_v7 = vld [vmem:[#allocation8 + $0x260] ss:$16 sps:$4 sm:$0xff]  }
 0x2c6   :  { %5689 = vmatprep.subr.bf16.mxu0 %v9182_v8  ;;  %v9222_v8 = vld [vmem:[#allocation8 + $0x68] ss:$16 sps:$4 sm:$0xff]  }
 0x2c8   :  { %4987 = vmatpush2.bf16.msra.mxu1 %v9177_v62  ;;  %v9227_v62 = vld [vmem:[#allocation8 + $0x244] ss:$16 sps:$4 sm:$0xff]  }
 0x2c9   :  { %5690 = vmatpush2.bf16.msra.mxu0 %v9180_v10  ;;  %4988 = vmatprep.subr.bf16.mxu1 %v9185_v28  ;;  %v9225_v10 = vld [vmem:[#allocation8 + $0x240] ss:$16 sps:$4 sm:$0xff]   ;;  %v9228_v28 = vld [vmem:[#allocation8 + $0x48] ss:$16 sps:$4 sm:$0xff]  }
 0x2ca   :  { %5691 = vmatprep.subr.bf16.mxu0 %v9188_v21  ;;  %v9236_v21 = vld [vmem:[#allocation8 + $0x2c] ss:$16 sps:$4 sm:$0xff]  }
 0x2cc   :  { %4989 = vmatpush2.bf16.msra.mxu1 %v9183_v24  ;;  %v9231_v24 = vld [vmem:[#allocation8 + $0x220] ss:$16 sps:$4 sm:$0xff]  }
 0x2cd   :  { %5692 = vmatpush2.bf16.msra.mxu0 %v9186_v47  ;;  %4990 = vmatprep.subr.bf16.mxu1 %v9191_v29  ;;  %v9234_v47 = vld [vmem:[#allocation8 + $0x28] ss:$16 sps:$4 sm:$0xff]   ;;  %v9239_v29 = vld [vmem:[#allocation8 + $0x204] ss:$16 sps:$4 sm:$0xff]  }
 0x2ce   :  { %5693 = vmatprep.subr.bf16.mxu0 %v9194_v34  ;;  %v9242_v34 = vld [vmem:[#allocation8 + $0xc] ss:$16 sps:$4 sm:$0xff]  }
 0x2d0   :  { %4991 = vmatpush2.bf16.msra.mxu1 %v9189_v61  ;;  %v9237_v61 = vld [vmem:[#allocation8 + $0x200] ss:$16 sps:$4 sm:$0xff]  }
 0x2d1   :  { %5694 = vmatpush2.bf16.msra.mxu0 %v9192_v1  ;;  %5726 = vmatprep.subr.bf16.mxu1 %v9197_v60  ;;  %v9245_v1 = vld [vmem:[#allocation8 + $0x3e4] ss:$16 sps:$4 sm:$0xff]   ;;  %v9248_v60 = vld [vmem:[#allocation8 + $0x1ec] ss:$16 sps:$4 sm:$0xff]  }
 0x2d2   :  { %5789 = vmatprep.subr.bf16.mxu0 %v9200_v30  ;;  %v9243_v30 = vld [vmem:[#allocation8 + $0x3e0] ss:$16 sps:$4 sm:$0xff]  }
 0x2d3   :  { %4993 = vmatmul.mubr.bf16.vlgmr.msra.gmra.mxu1 %v10697_v9  ;;  %v9207_v9 = vld [vmem:[#allocation8 + $0x2a0] ss:$16 sps:$4 sm:$0xff]  }
 0x2d4   :  { %7998 = vmatmul.mubr.msk.bf16.vlgmr.msra.gmra.mxu0 %vm9918_vm3, %v10576_v41  ;;  %5002 = vmatprep.mubr.bf16.mxu1 %v10766_v46  ;;  %v9218_v46 = vld [vmem:[#allocation8 + $0x8c] ss:$16 sps:$4 sm:$0xff]  }
 0x2d5   :  { %8003 = vmatprep.mubr.msk.bf16.mxu0 %vm9999_vm6, %v10629_v5  ;;  %5727 = vmatpush1.bf16.msra.mxu1 %v9195_v11  ;;  %v9246_v11 = vld [vmem:[#allocation8 + $0x1e8] ss:$16 sps:$4 sm:$0xff]  }
 0x2d6   :  { %5790 = vmatpush1.bf16.msra.mxu0 %v9198_v2  ;;  %5728 = vmatprep.subr.bf16.mxu1 %v9203_v56  ;;  %v9251_v2 = vld [vmem:[#allocation8 + $0x3c4] ss:$16 sps:$4 sm:$0xff]   ;;  %v9254_v56 = vld [vmem:[#allocation8 + $0x1cc] ss:$16 sps:$4 sm:$0xff]  }
 0x2d7   :  { %5791 = vmatprep.subr.bf16.mxu0 %v9206_v4  ;;  %v9249_v4 = vld [vmem:[#allocation8 + $0x3c0] ss:$16 sps:$4 sm:$0xff]  }
 0x2d9   :  { %5729 = vmatpush1.bf16.msra.mxu1 %v9201_v38  ;;  %v9252_v38 = vld [vmem:[#allocation8 + $0x1c8] ss:$16 sps:$4 sm:$0xff]  }
 0x2da   :  { %5792 = vmatpush1.bf16.msra.mxu0 %v9204_v48  ;;  %5730 = vmatprep.subr.bf16.mxu1 %v9209_v36  ;;  %v9257_v48 = vld [vmem:[#allocation8 + $0x3a4] ss:$16 sps:$4 sm:$0xff]   ;;  %v9260_v36 = vld [vmem:[#allocation8 + $0x1ac] ss:$16 sps:$4 sm:$0xff]  }
 0x2db   :  { %5003 = vmatmul.mubr.bf16.gmra.mxu1 %v10755_v57  ;;  %5793 = vmatprep.subr.bf16.mxu0 %v9212_v40  ;;  %v9224_v57 = vld [vmem:[#allocation8 + $0x6c] ss:$16 sps:$4 sm:$0xff]   ;;  %v9255_v40 = vld [vmem:[#allocation8 + $0x3a0] ss:$16 sps:$4 sm:$0xff]  }
 0x2dc   :  { %8008 = vmatmul.mubr.msk.bf16.gmra.mxu0 %vm9999_vm6, %v10631_v15  ;;  %5012 = vmatprep.mubr.bf16.mxu1 %v10799_v31  ;;  %v9230_v31 = vld [vmem:[#allocation8 + $0x4c] ss:$16 sps:$4 sm:$0xff]  }
 0x2dd   :  { %8013 = vmatprep.mubr.msk.bf16.mxu0 %vm10054_vm9, %v10658_v25  ;;  %5731 = vmatpush1.bf16.msra.mxu1 %v9207_v9  ;;  %v9258_v9 = vld [vmem:[#allocation8 + $0x1a8] ss:$16 sps:$4 sm:$0xff]  }
 0x2de   :  { %5794 = vmatpush1.bf16.msra.mxu0 %v9210_v14  ;;  %5732 = vmatprep.subr.bf16.mxu1 %v9215_v33  ;;  %v9263_v14 = vld [vmem:[#allocation8 + $0x384] ss:$16 sps:$4 sm:$0xff]   ;;  %v9266_v33 = vld [vmem:[#allocation8 + $0x18c] ss:$16 sps:$4 sm:$0xff]  }
 0x2df   :  { %5795 = vmatprep.subr.bf16.mxu0 %v9218_v46  ;;  %v9261_v46 = vld [vmem:[#allocation8 + $0x380] ss:$16 sps:$4 sm:$0xff]  }
 0x2e1   :  { %5733 = vmatpush1.bf16.msra.mxu1 %v9213_v58  ;;  %v9264_v58 = vld [vmem:[#allocation8 + $0x188] ss:$16 sps:$4 sm:$0xff]  }
 0x2e2   :  { %5796 = vmatpush1.bf16.msra.mxu0 %v9216_v13  ;;  %5734 = vmatprep.subr.bf16.mxu1 %v9221_v52  ;;  %v9269_v13 = vld [vmem:[#allocation8 + $0x364] ss:$16 sps:$4 sm:$0xff]   ;;  %v9272_v52 = vld [vmem:[#allocation8 + $0x16c] ss:$16 sps:$4 sm:$0xff]  }
 0x2e3   :  { %5013 = vmatmul.mubr.bf16.gmra.mxu1 %v10802_v32  ;;  %5797 = vmatprep.subr.bf16.mxu0 %v9224_v57  ;;  %v9233_v32 = vld [vmem:[#allocation8 + $0x224] ss:$16 sps:$4 sm:$0xff]   ;;  %v9267_v57 = vld [vmem:[#allocation8 + $0x360] ss:$16 sps:$4 sm:$0xff]  }
 0x2e4   :  { %8018 = vmatmul.mubr.msk.bf16.gmra.mxu0 %vm10054_vm9, %v10660_v22  ;;  %8023 = vmatprep.mubr.msk.bf16.mxu1 %vm9918_vm3, %v10735_v39 }
 0x2e5   :  { %5735 = vmatpush1.bf16.msra.mxu1 %v9219_v7  ;;  %8053 = vmatprep.mubr.msk.bf16.mxu0 %vm9918_vm3, %v10600_v43  ;;  %v9240_v43 = vld [vmem:[#allocation8 + $0x8] ss:$16 sps:$4 sm:$0xff]  }
 0x2e6   :  { %5798 = vmatpush1.bf16.msra.mxu0 %v9222_v8  ;;  %5736 = vmatprep.subr.bf16.mxu1 %v9227_v62  ;;  %v9270_v7 = vld [vmem:[#allocation8 + $0x168] ss:$16 sps:$4 sm:$0xff]   ;;  %v9275_v8 = vld [vmem:[#allocation8 + $0x344] ss:$16 sps:$4 sm:$0xff]   ;;  %v9278_v62 = vld [vmem:[#allocation8 + $0x14c] ss:$16 sps:$4 sm:$0xff]  }
 0x2e7   :  { %5799 = vmatprep.subr.bf16.mxu0 %v9230_v31  ;;  %v9273_v31 = vld [vmem:[#allocation8 + $0x340] ss:$16 sps:$4 sm:$0xff]  }
 0x2e9   :  { %5737 = vmatpush1.bf16.msra.mxu1 %v9225_v10  ;;  %v9276_v10 = vld [vmem:[#allocation8 + $0x148] ss:$16 sps:$4 sm:$0xff]  }
 0x2ea   :  { %5800 = vmatpush1.bf16.msra.mxu0 %v9228_v28  ;;  %5738 = vmatprep.subr.bf16.mxu1 %v9233_v32  ;;  %v9281_v28 = vld [vmem:[#allocation8 + $0x324] ss:$16 sps:$4 sm:$0xff]   ;;  %v9284_v32 = vld [vmem:[#allocation8 + $0x12c] ss:$16 sps:$4 sm:$0xff]  }
 0x2eb   :  { %5801 = vmatprep.subr.bf16.mxu0 %v9236_v21  ;;  %v9279_v21 = vld [vmem:[#allocation8 + $0x320] ss:$16 sps:$4 sm:$0xff]  }
 0x2ed   :  { %5739 = vmatpush1.bf16.msra.mxu1 %v9231_v24  ;;  %v9282_v24 = vld [vmem:[#allocation8 + $0x128] ss:$16 sps:$4 sm:$0xff]  }
 0x2ee   :  { %5802 = vmatpush1.bf16.msra.mxu0 %v9234_v47  ;;  %5740 = vmatprep.subr.bf16.mxu1 %v9239_v29  ;;  %v9287_v47 = vld [vmem:[#allocation8 + $0x304] ss:$16 sps:$4 sm:$0xff]   ;;  %v9290_v29 = vld [vmem:[#allocation8 + $0x10c] ss:$16 sps:$4 sm:$0xff]  }
 0x2ef   :  { %5803 = vmatprep.subr.bf16.mxu0 %v9242_v34  ;;  %v9285_v34 = vld [vmem:[#allocation8 + $0x300] ss:$16 sps:$4 sm:$0xff]  }
 0x2f1   :  { %5741 = vmatpush1.bf16.msra.mxu1 %v9237_v61  ;;  %v9288_v61 = vld [vmem:[#allocation8 + $0x108] ss:$16 sps:$4 sm:$0xff]  }
 0x2f2   :  { %5804 = vmatpush1.bf16.msra.mxu0 %v9240_v43  ;;  %5742 = vmatprep.subr.bf16.mxu1 %v9245_v1  ;;  %v9293_v43 = vld [vmem:[#allocation8 + $0x2ec] ss:$16 sps:$4 sm:$0xff]   ;;  %v9296_v1 = vld [vmem:[#allocation8 + $0x8e4] ss:$16 sps:$4 sm:$0xff]  }
 0x2f3   :  { %5805 = vmatprep.subr.bf16.mxu0 %v9248_v60  ;;  %v9291_v60 = vld [vmem:[#allocation8 + $0x2e8] ss:$16 sps:$4 sm:$0xff]  }
 0x2f5   :  { %5743 = vmatpush2.bf16.msra.mxu1 %v9243_v30  ;;  %v9294_v30 = vld [vmem:[#allocation8 + $0x8e0] ss:$16 sps:$4 sm:$0xff]  }
 0x2f6   :  { %5806 = vmatpush2.bf16.msra.mxu0 %v9246_v11  ;;  %5744 = vmatprep.subr.bf16.mxu1 %v9251_v2  ;;  %v9299_v11 = vld [vmem:[#allocation8 + $0x2cc] ss:$16 sps:$4 sm:$0xff]   ;;  %v9302_v2 = vld [vmem:[#allocation8 + $0x8c4] ss:$16 sps:$4 sm:$0xff]  }
 0x2f7   :  { %5807 = vmatprep.subr.bf16.mxu0 %v9254_v56  ;;  %v9297_v56 = vld [vmem:[#allocation8 + $0x2c8] ss:$16 sps:$4 sm:$0xff]  }
 0x2f9   :  { %5745 = vmatpush2.bf16.msra.mxu1 %v9249_v4  ;;  %v9300_v4 = vld [vmem:[#allocation8 + $0x8c0] ss:$16 sps:$4 sm:$0xff]  }
 0x2fa   :  { %5808 = vmatpush2.bf16.msra.mxu0 %v9252_v38  ;;  %5746 = vmatprep.subr.bf16.mxu1 %v9257_v48  ;;  %v9305_v38 = vld [vmem:[#allocation8 + $0x2ac] ss:$16 sps:$4 sm:$0xff]   ;;  %v9308_v48 = vld [vmem:[#allocation8 + $0x8a4] ss:$16 sps:$4 sm:$0xff]  }
 0x2fb   :  { %5809 = vmatprep.subr.bf16.mxu0 %v9260_v36  ;;  %v9303_v36 = vld [vmem:[#allocation8 + $0x2a8] ss:$16 sps:$4 sm:$0xff]  }
 0x2fd   :  { %5747 = vmatpush2.bf16.msra.mxu1 %v9255_v40  ;;  %v9311_v40 = vld [vmem:[#allocation8 + $0x28c] ss:$16 sps:$4 sm:$0xff]  }
 0x2fe   :  { %5810 = vmatpush2.bf16.msra.mxu0 %v9258_v9  ;;  %5748 = vmatprep.subr.bf16.mxu1 %v9263_v14  ;;  %v9309_v9 = vld [vmem:[#allocation8 + $0x288] ss:$16 sps:$4 sm:$0xff]   ;;  %v9312_v14 = vld [vmem:[#allocation8 + $0x880] ss:$16 sps:$4 sm:$0xff]  }
 0x2ff   :  { %5811 = vmatprep.subr.bf16.mxu0 %v9266_v33  ;;  %v9317_v33 = vld [vmem:[#allocation8 + $0x26c] ss:$16 sps:$4 sm:$0xff]  }
 0x301   :  { %5749 = vmatpush2.bf16.msra.mxu1 %v9261_v46  ;;  %v9320_v46 = vld [vmem:[#allocation8 + $0x864] ss:$16 sps:$4 sm:$0xff]  }
 0x302   :  { %5812 = vmatpush2.bf16.msra.mxu0 %v9264_v58  ;;  %5750 = vmatprep.subr.bf16.mxu1 %v9269_v13  ;;  %v9315_v58 = vld [vmem:[#allocation8 + $0x268] ss:$16 sps:$4 sm:$0xff]   ;;  %v9323_v13 = vld [vmem:[#allocation8 + $0x24c] ss:$16 sps:$4 sm:$0xff]  }
 0x303   :  { %5813 = vmatprep.subr.bf16.mxu0 %v9272_v52 }
 0x305   :  { %5751 = vmatpush2.bf16.msra.mxu1 %v9267_v57  ;;  %v9321_v57 = vld [vmem:[#allocation8 + $0x248] ss:$16 sps:$4 sm:$0xff]  }
 0x306   :  { %5814 = vmatpush2.bf16.msra.mxu0 %v9270_v7  ;;  %5752 = vmatprep.subr.bf16.mxu1 %v9275_v8  ;;  %v9324_v7 = vld [vmem:[#allocation8 + $0x840] ss:$16 sps:$4 sm:$0xff]   ;;  %v9329_v8 = vld [vmem:[#allocation8 + $0x22c] ss:$16 sps:$4 sm:$0xff]  }
 0x307   :  { %5815 = vmatprep.subr.bf16.mxu0 %v9278_v62  ;;  %v9332_v62 = vld [vmem:[#allocation8 + $0x824] ss:$16 sps:$4 sm:$0xff]  }
 0x309   :  { %5753 = vmatpush2.bf16.msra.mxu1 %v9273_v31  ;;  %v9327_v31 = vld [vmem:[#allocation8 + $0x228] ss:$16 sps:$4 sm:$0xff]  }
 0x30a   :  { %5816 = vmatpush2.bf16.msra.mxu0 %v9276_v10  ;;  %5754 = vmatprep.subr.bf16.mxu1 %v9281_v28  ;;  %v9335_v10 = vld [vmem:[#allocation8 + $0x20c] ss:$16 sps:$4 sm:$0xff]   ;;  %v9333_v28 = vld [vmem:[#allocation8 + $0x208] ss:$16 sps:$4 sm:$0xff]  }
 0x30b   :  { %5817 = vmatprep.subr.bf16.mxu0 %v9284_v32  ;;  %v9336_v32 = vld [vmem:[#allocation8 + $0x800] ss:$16 sps:$4 sm:$0xff]  }
 0x30d   :  { %5755 = vmatpush2.bf16.msra.mxu1 %v9279_v21  ;;  %v9341_v21 = vld [vmem:[#allocation8 + $0x3ec] ss:$16 sps:$4 sm:$0xff]  }
 0x30e   :  { %5818 = vmatpush2.bf16.msra.mxu0 %v9282_v24  ;;  %5756 = vmatprep.subr.bf16.mxu1 %v9287_v47  ;;  %v9344_v24 = vld [vmem:[#allocation8 + $0x9e4] ss:$16 sps:$4 sm:$0xff]   ;;  %v9339_v47 = vld [vmem:[#allocation8 + $0x3e8] ss:$16 sps:$4 sm:$0xff]  }
 0x30f   :  { %5819 = vmatprep.subr.bf16.mxu0 %v9290_v29  ;;  %v9342_v29 = vld [vmem:[#allocation8 + $0x9e0] ss:$16 sps:$4 sm:$0xff]  }
 0x311   :  { %5757 = vmatpush2.bf16.msra.mxu1 %v9285_v34  ;;  %v9347_v34 = vld [vmem:[#allocation8 + $0x3cc] ss:$16 sps:$4 sm:$0xff]  }
 0x312   :  { %5820 = vmatpush2.bf16.msra.mxu0 %v9288_v61  ;;  %5852 = vmatprep.subr.bf16.mxu1 %v9293_v43  ;;  %v9350_v61 = vld [vmem:[#allocation8 + $0x9c4] ss:$16 sps:$4 sm:$0xff]   ;;  %v9345_v43 = vld [vmem:[#allocation8 + $0x3c8] ss:$16 sps:$4 sm:$0xff]  }
 0x313   :  { %6696 = vmatprep.subr.bf16.mxu0 %v9296_v1  ;;  %v9348_v1 = vld [vmem:[#allocation8 + $0x9c0] ss:$16 sps:$4 sm:$0xff]  }
 0x314   :  { %8028 = vmatmul.mubr.msk.bf16.vlgmr.msra.gmra.mxu1 %vm9918_vm3, %v10707_v44 }
 0x315   :  { %8058 = vmatmul.mubr.msk.bf16.vlgmr.msra.gmra.mxu0 %vm9918_vm3, %v10576_v41  ;;  %8033 = vmatprep.mubr.msk.bf16.mxu1 %vm9999_vm6, %v10780_v6  ;;  %v9306_v41 = vld [vmem:[#allocation8 + $0x8a0] ss:$16 sps:$4 sm:$0xff]  }
 0x316   :  { %8063 = vmatprep.mubr.msk.bf16.mxu0 %vm9999_vm6, %v10629_v5  ;;  %5853 = vmatpush1.bf16.msra.mxu1 %v9291_v60  ;;  %v9314_v5 = vld [vmem:[#allocation8 + $0x884] ss:$16 sps:$4 sm:$0xff]   ;;  %v9353_v60 = vld [vmem:[#allocation8 + $0x3ac] ss:$16 sps:$4 sm:$0xff]  }
 0x317   :  { %6697 = vmatpush1.bf16.msra.mxu0 %v9294_v30  ;;  %5854 = vmatprep.subr.bf16.mxu1 %v9299_v11  ;;  %v9356_v30 = vld [vmem:[#allocation8 + $0x9a4] ss:$16 sps:$4 sm:$0xff]   ;;  %v9351_v11 = vld [vmem:[#allocation8 + $0x3a8] ss:$16 sps:$4 sm:$0xff]  }
 0x318   :  { %6698 = vmatprep.subr.bf16.mxu0 %v9302_v2  ;;  %v9354_v2 = vld [vmem:[#allocation8 + $0x9a0] ss:$16 sps:$4 sm:$0xff]  }
 0x31a   :  { %5855 = vmatpush1.bf16.msra.mxu1 %v9297_v56  ;;  %v9359_v56 = vld [vmem:[#allocation8 + $0x38c] ss:$16 sps:$4 sm:$0xff]  }
 0x31b   :  { %6699 = vmatpush1.bf16.msra.mxu0 %v9300_v4  ;;  %5856 = vmatprep.subr.bf16.mxu1 %v9305_v38  ;;  %v9362_v4 = vld [vmem:[#allocation8 + $0x984] ss:$16 sps:$4 sm:$0xff]   ;;  %v4805_v38 = vpop.f32.mrf.mxu0 }
 0x31c   :  { %8038 = vmatmul.mubr.msk.bf16.gmra.mxu1 %vm9999_vm6, %v10790_v16  ;;  %6700 = vmatprep.subr.bf16.mxu0 %v9308_v48  ;;  %v9357_v48 = vld [vmem:[#allocation8 + $0x388] ss:$16 sps:$4 sm:$0xff]  }
 0x31d   :  { %8068 = vmatmul.mubr.msk.bf16.gmra.mxu0 %vm9999_vm6, %v10631_v15  ;;  %8043 = vmatprep.mubr.msk.bf16.mxu1 %vm10054_vm9, %v10813_v37  ;;  %v9318_v15 = vld [vmem:[#allocation8 + $0x860] ss:$16 sps:$4 sm:$0xff]  }
 0x31e   :  { %8073 = vmatprep.mubr.msk.bf16.mxu0 %vm10054_vm9, %v10658_v25  ;;  %5857 = vmatpush1.bf16.msra.mxu1 %v9303_v36  ;;  %v9326_v25 = vld [vmem:[#allocation8 + $0x844] ss:$16 sps:$4 sm:$0xff]   ;;  %v9360_v36 = vld [vmem:[#allocation8 + $0x980] ss:$16 sps:$4 sm:$0xff]  }
 0x31f   :  { %6701 = vmatpush1.bf16.msra.mxu0 %v9306_v41  ;;  %5858 = vmatprep.subr.bf16.mxu1 %v9311_v40  ;;  %v9365_v41 = vld [vmem:[#allocation8 + $0x36c] ss:$16 sps:$4 sm:$0xff]   ;;  %v9368_v40 = vld [vmem:[#allocation8 + $0x964] ss:$16 sps:$4 sm:$0xff]  }
 0x320   :  { %6702 = vmatprep.subr.bf16.mxu0 %v9314_v5  ;;  %v4807_v5 = vpop.f32.mrf.mxu0 }
 0x322   :  { %5859 = vmatpush1.bf16.msra.mxu1 %v9309_v9  ;;  %v9363_v9 = vld [vmem:[#allocation8 + $0x368] ss:$16 sps:$4 sm:$0xff]  }
 0x323   :  { %6703 = vmatpush1.bf16.msra.mxu0 %v9312_v14  ;;  %5860 = vmatprep.subr.bf16.mxu1 %v9317_v33  ;;  %v9366_v14 = vld [vmem:[#allocation8 + $0x960] ss:$16 sps:$4 sm:$0xff]   ;;  %v9371_v33 = vld [vmem:[#allocation8 + $0x34c] ss:$16 sps:$4 sm:$0xff]  }
 0x324   :  { %8048 = vmatmul.mubr.msk.bf16.gmra.mxu1 %vm10054_vm9, %v10815_v18  ;;  %6704 = vmatprep.subr.bf16.mxu0 %v9320_v46  ;;  %v9374_v46 = vld [vmem:[#allocation8 + $0x944] ss:$16 sps:$4 sm:$0xff]  }
 0x325   :  { %8078 = vmatmul.mubr.msk.bf16.gmra.mxu0 %vm10054_vm9, %v10660_v22  ;;  %8083 = vmatprep.mubr.msk.bf16.mxu1 %vm9918_vm3, %v10735_v39  ;;  %v9330_v22 = vld [vmem:[#allocation8 + $0x820] ss:$16 sps:$4 sm:$0xff]   ;;  %v9338_v39 = vld [vmem:[#allocation8 + $0x804] ss:$16 sps:$4 sm:$0xff]  }
 0x326   :  { %5861 = vmatpush1.bf16.msra.mxu1 %v9315_v58  ;;  %8241 = vmatprep.mubr.msk.bf16.mxu0 %vm10134_vm12, %v10640_v0  ;;  %v4809_v58 = vpop.f32.mrf.mxu0 }
 0x327   :  { %6705 = vmatpush1.bf16.msra.mxu0 %v9318_v15  ;;  %5862 = vmatprep.subr.bf16.mxu1 %v9323_v13  ;;  %v9369_v15 = vld [vmem:[#allocation8 + $0x348] ss:$16 sps:$4 sm:$0xff]   ;;  %v9372_v13 = vld [vmem:[#allocation8 + $0x940] ss:$16 sps:$4 sm:$0xff]  }
 0x328   :  { %6706 = vmatprep.subr.bf16.mxu0 %v9326_v25  ;;  %v9377_v25 = vld [vmem:[#allocation8 + $0x32c] ss:$16 sps:$4 sm:$0xff]  }
 0x32a   :  { %5863 = vmatpush1.bf16.msra.mxu1 %v9321_v57  ;;  %v9380_v57 = vld [vmem:[#allocation8 + $0x924] ss:$16 sps:$4 sm:$0xff]  }
 0x32b   :  { %6707 = vmatpush1.bf16.msra.mxu0 %v9324_v7  ;;  %5864 = vmatprep.subr.bf16.mxu1 %v9329_v8  ;;  %v4811_v7 = vpop.f32.mrf.mxu0  ;;  %v9375_v8 = vld [vmem:[#allocation8 + $0x328] ss:$16 sps:$4 sm:$0xff]  }
 0x32c   :  { %6708 = vmatprep.subr.bf16.mxu0 %v9332_v62  ;;  %v9378_v62 = vld [vmem:[#allocation8 + $0x920] ss:$16 sps:$4 sm:$0xff]  }
 0x32e   :  { %5865 = vmatpush1.bf16.msra.mxu1 %v9327_v31  ;;  %v9383_v31 = vld [vmem:[#allocation8 + $0x30c] ss:$16 sps:$4 sm:$0xff]  }
 0x32f   :  { %6709 = vmatpush1.bf16.msra.mxu0 %v9330_v22  ;;  %5866 = vmatprep.subr.bf16.mxu1 %v9335_v10  ;;  %v9386_v22 = vld [vmem:[#allocation8 + $0x904] ss:$16 sps:$4 sm:$0xff]   ;;  %v4815_v10 = vpop.f32.mrf.mxu0 }
 0x330   :  { %6710 = vmatprep.subr.bf16.mxu0 %v9338_v39  ;;  %v9381_v39 = vld [vmem:[#allocation8 + $0x308] ss:$16 sps:$4 sm:$0xff]  }
 0x332   :  { %5867 = vmatpush1.bf16.msra.mxu1 %v9333_v28  ;;  %v9384_v28 = vld [vmem:[#allocation8 + $0x900] ss:$16 sps:$4 sm:$0xff]  }
 0x333   :  { %6711 = vmatpush1.bf16.msra.mxu0 %v9336_v32  ;;  %5868 = vmatprep.subr.bf16.mxu1 %v9341_v21  ;;  %v9389_v32 = vld [vmem:[#allocation8 + $0xae4] ss:$16 sps:$4 sm:$0xff]   ;;  %v9392_v21 = vld [vmem:[#allocation8 + $0x8ec] ss:$16 sps:$4 sm:$0xff]  }
 0x334   :  { %6712 = vmatprep.subr.bf16.mxu0 %v9344_v24  ;;  %v4817_v24 = vpop.f32.mrf.mxu0 }
 0x336   :  { %5869 = vmatpush2.bf16.msra.mxu1 %v9339_v47  ;;  %v9387_v47 = vld [vmem:[#allocation8 + $0xae0] ss:$16 sps:$4 sm:$0xff]  }
 0x337   :  { %6713 = vmatpush2.bf16.msra.mxu0 %v9342_v29  ;;  %5870 = vmatprep.subr.bf16.mxu1 %v9347_v34  ;;  %v9390_v34 = vld [vmem:[#allocation8 + $0x8e8] ss:$16 sps:$4 sm:$0xff]  }
 0x338   :  { %6714 = vmatprep.subr.bf16.mxu0 %v9350_v61 }
 0x33a   :  { %5871 = vmatpush2.bf16.msra.mxu1 %v9345_v43  ;;  %v9395_v43 = vld [vmem:[#allocation8 + $0xac4] ss:$16 sps:$4 sm:$0xff]  }
 0x33b   :  { %6715 = vmatpush2.bf16.msra.mxu0 %v9348_v1  ;;  %5872 = vmatprep.subr.bf16.mxu1 %v9353_v60  ;;  %v4819_v1 = vpop.f32.mrf.mxu0 }
 0x33c   :  { %6716 = vmatprep.subr.bf16.mxu0 %v9356_v30  ;;  %v9398_v30 = vld [vmem:[#allocation8 + $0x8cc] ss:$16 sps:$4 sm:$0xff]  }
 0x33e   :  { %5873 = vmatpush2.bf16.msra.mxu1 %v9351_v11 }
 0x33f   :  { %6717 = vmatpush2.bf16.msra.mxu0 %v9354_v2  ;;  %5874 = vmatprep.subr.bf16.mxu1 %v9359_v56  ;;  %v9393_v56 = vld [vmem:[#allocation8 + $0xac0] ss:$16 sps:$4 sm:$0xff]  }
 0x340   :  { %6718 = vmatprep.subr.bf16.mxu0 %v9362_v4 }
 0x342   :  { %5875 = vmatpush2.bf16.msra.mxu1 %v9357_v48  ;;  %v4821_v48 = vpop.f32.mrf.mxu0 }
 0x343   :  { %6719 = vmatpush2.bf16.msra.mxu0 %v9360_v36  ;;  %5876 = vmatprep.subr.bf16.mxu1 %v9365_v41  ;;  %v9404_v41 = vld [vmem:[#allocation8 + $0x8ac] ss:$16 sps:$4 sm:$0xff]  }
 0x344   :  { %6720 = vmatprep.subr.bf16.mxu0 %v9368_v40  ;;  %v9399_v40 = vld [vmem:[#allocation8 + $0xaa0] ss:$16 sps:$4 sm:$0xff]  }
 0x346   :  { %5877 = vmatpush2.bf16.msra.mxu1 %v9363_v9  ;;  %v9402_v9 = vld [vmem:[#allocation8 + $0x8a8] ss:$16 sps:$4 sm:$0xff]  }
 0x347   :  { %6721 = vmatpush2.bf16.msra.mxu0 %v9366_v14  ;;  %5878 = vmatprep.subr.bf16.mxu1 %v9371_v33  ;;  %v9407_v33 = vld [vmem:[#allocation8 + $0xa84] ss:$16 sps:$4 sm:$0xff]  }
 0x348   :  { %6722 = vmatprep.subr.bf16.mxu0 %v9374_v46  ;;  %v4825_v46 = vpop.f32.mrf.mxu0 }
 0x34a   :  { %5879 = vmatpush2.bf16.msra.mxu1 %v9369_v15  ;;  %v9410_v15 = vld [vmem:[#allocation8 + $0x88c] ss:$16 sps:$4 sm:$0xff]  }
 0x34b   :  { %6723 = vmatpush2.bf16.msra.mxu0 %v9372_v13  ;;  %5880 = vmatprep.subr.bf16.mxu1 %v9377_v25 }
 0x34c   :  { %6724 = vmatprep.subr.bf16.mxu0 %v9380_v57  ;;  %v9408_v57 = vld [vmem:[#allocation8 + $0x888] ss:$16 sps:$4 sm:$0xff]  }
 0x34e   :  { %5881 = vmatpush2.bf16.msra.mxu1 %v9375_v8  ;;  %v9413_v8 = vld [vmem:[#allocation8 + $0xa64] ss:$16 sps:$4 sm:$0xff]  }
 0x34f   :  { %6725 = vmatpush2.bf16.msra.mxu0 %v9378_v62  ;;  %5882 = vmatprep.subr.bf16.mxu1 %v9383_v31  ;;  %v4827_v62 = vpop.f32.mrf.mxu0 }
 0x350   :  { %6726 = vmatprep.subr.bf16.mxu0 %v9386_v22  ;;  %v9416_v22 = vld [vmem:[#allocation8 + $0x86c] ss:$16 sps:$4 sm:$0xff]  }
 0x352   :  { %5883 = vmatpush2.bf16.msra.mxu1 %v9381_v39 }
 0x353   :  { %6727 = vmatpush2.bf16.msra.mxu0 %v9384_v28  ;;  %6759 = vmatprep.subr.bf16.mxu1 %v9389_v32  ;;  %v4868_v29 = vpop.f32.mrf.mxu1  ;;  %v9414_v28 = vld [vmem:[#allocation8 + $0x868] ss:$16 sps:$4 sm:$0xff]  }
 0x354   :  { %6822 = vmatprep.subr.bf16.mxu0 %v9392_v21  ;;  %v10898_v61 = vadd.f32 %v4868_v29, %v4805_v38  ;;  %v9401_v38 = vld [vmem:[#allocation8 + $0xaa4] ss:$16 sps:$4 sm:$0xff]   ;;  %v9422_v29 = vld [vmem:[#allocation8 + $0x84c] ss:$16 sps:$4 sm:$0xff]  }
 0x355   :  { %8088 = vmatmul.mubr.msk.bf16.vlgmr.msra.gmra.mxu1 %vm9918_vm3, %v10707_v44  ;;  %v4870_v60 = vpop.f32.mrf.mxu1  ;;  %v9396_v44 = vld [vmem:[#allocation8 + $0x8c8] ss:$16 sps:$4 sm:$0xff]   ;;  %v9419_v21 = vld [vmem:[#allocation8 + $0xa44] ss:$16 sps:$4 sm:$0xff]  }
 0x356   :  { %8246 = vmatmul.mubr.msk.bf16.vlgmr.msra.gmra.mxu0 %vm10134_vm12, %v10604_v63  ;;  %8093 = vmatprep.mubr.msk.bf16.mxu1 %vm9999_vm6, %v10780_v6  ;;  %v10909_v11 = vadd.f32 %v4870_v60, %v4807_v5  ;;  %v9425_v60 = vld [vmem:[#allocation8 + $0xa24] ss:$16 sps:$4 sm:$0xff]  }
 0x357   :  { %8251 = vmatprep.mubr.msk.bf16.mxu0 %vm10224_vm1, %v10648_v27  ;;  %6760 = vmatpush1.bf16.msra.mxu1 %v9387_v47  ;;  %v4872_v53 = vpop.f32.mrf.mxu1 }
 0x358   :  { %6823 = vmatpush1.bf16.msra.mxu0 %v9390_v34  ;;  %6761 = vmatprep.subr.bf16.mxu1 %v9395_v43  ;;  %v10914_v4 = vadd.f32 %v4872_v53, %v4809_v58  ;;  %v9420_v43 = vld [vmem:[#allocation8 + $0x848] ss:$16 sps:$4 sm:$0xff]   ;;  %v9428_v53 = vld [vmem:[#allocation8 + $0x82c] ss:$16 sps:$4 sm:$0xff]  }
 0x359   :  { %6824 = vmatprep.subr.bf16.mxu0 %v9398_v30  ;;  %v4874_v36 = vpop.f32.mrf.mxu1 }
 0x35a   :  { %v10916_v6 = vadd.f32 %v4874_v36, %v4811_v7  ;;  %v9434_v36 = vld [vmem:[#allocation8 + $0x80c] ss:$16 sps:$4 sm:$0xff]  }
 0x35b   :  { %6762 = vmatpush1.bf16.msra.mxu1 %v9393_v56  ;;  %v4878_v5 = vpop.f32.mrf.mxu1 }
 0x35c   :  { %6825 = vmatpush1.bf16.msra.mxu0 %v9396_v44  ;;  %6763 = vmatprep.subr.bf16.mxu1 %v9401_v38  ;;  %v10918_v14 = vadd.f32 %v4878_v5, %v4815_v10  ;;  %v9411_v10 = vld [vmem:[#allocation8 + $0xa60] ss:$16 sps:$4 sm:$0xff]   ;;  %v9437_v5 = vld [vmem:[#allocation8 + $0xbe4] ss:$16 sps:$4 sm:$0xff]  }
 0x35d   :  { %8098 = vmatmul.mubr.msk.bf16.gmra.mxu1 %vm9999_vm6, %v10790_v16  ;;  %6826 = vmatprep.subr.bf16.mxu0 %v9404_v41  ;;  %v4880_v58 = vpop.f32.mrf.mxu1  ;;  %v9423_v38 = vld [vmem:[#allocation8 + $0xa20] ss:$16 sps:$4 sm:$0xff]  }
 0x35e   :  { %8256 = vmatmul.mubr.msk.bf16.gmra.mxu0 %vm10224_vm1, %v10662_v23  ;;  %8103 = vmatprep.mubr.msk.bf16.mxu1 %vm10054_vm9, %v10813_v37  ;;  %v10929_v13 = vadd.f32 %v4880_v58, %v4817_v24  ;;  %v4829_v24 = vpop.f32.mrf.mxu0  ;;  %v9429_v41 = vld [vmem:[#allocation8 + $0xa00] ss:$16 sps:$4 sm:$0xff]   ;;  %v9443_v58 = vld [vmem:[#allocation8 + $0xbc4] ss:$16 sps:$4 sm:$0xff]  }
 0x35f   :  { %8261 = vmatprep.mubr.msk.bf16.mxu0 %vm10292_vm5, %v10667_v49  ;;  %6764 = vmatpush1.bf16.msra.mxu1 %v9399_v40  ;;  %v4882_v16 = vpop.f32.mrf.mxu1  ;;  %v9432_v40 = vld [vmem:[#allocation8 + $0x808] ss:$16 sps:$4 sm:$0xff]  }
 0x360   :  { %6827 = vmatpush1.bf16.msra.mxu0 %v9402_v9  ;;  %6765 = vmatprep.subr.bf16.mxu1 %v9407_v33  ;;  %v10934_v7 = vadd.f32 %v4882_v16, %v4819_v1  ;;  %v4831_v30 = vpop.f32.mrf.mxu0  ;;  %v9440_v9 = vld [vmem:[#allocation8 + $0x9ec] ss:$16 sps:$4 sm:$0xff]   ;;  %v9435_v33 = vld [vmem:[#allocation8 + $0xbe0] ss:$16 sps:$4 sm:$0xff]   ;;  %v9444_v16 = vld [vmem:[#allocation8 + $0x9c8] ss:$16 sps:$4 sm:$0xff]  }
 0x361   :  { %6828 = vmatprep.subr.bf16.mxu0 %v9410_v15  ;;  %v4884_v31 = vpop.f32.mrf.mxu1  ;;  %v9446_v15 = vld [vmem:[#allocation8 + $0x9cc] ss:$16 sps:$4 sm:$0xff]  }
 0x362   :  { %v10936_v37 = vadd.f32 %v4884_v31, %v4821_v48  ;;  %v9426_v48 = vld [vmem:[#allocation8 + $0x828] ss:$16 sps:$4 sm:$0xff]   ;;  %v9447_v31 = vld [vmem:[#allocation8 + $0xba0] ss:$16 sps:$4 sm:$0xff]  }
 0x363   :  { %6766 = vmatpush1.bf16.msra.mxu1 %v9405_v17  ;;  %v4888_v39 = vpop.f32.mrf.mxu1  ;;  %v9441_v17 = vld [vmem:[#allocation8 + $0xbc0] ss:$16 sps:$4 sm:$0xff]  }
 0x364   :  { %6829 = vmatpush1.bf16.msra.mxu0 %v9408_v57  ;;  %6767 = vmatprep.subr.bf16.mxu1 %v9413_v8  ;;  %v10938_v32 = vadd.f32 %v4888_v39, %v4825_v46  ;;  %v9438_v46 = vld [vmem:[#allocation8 + $0x9e8] ss:$16 sps:$4 sm:$0xff]   ;;  %v9449_v57 = vld [vmem:[#allocation8 + $0xba4] ss:$16 sps:$4 sm:$0xff]   ;;  %v4931_v8 = vpop.f32.mrf.mxu0 }
 0x365   :  { %8108 = vmatmul.mubr.msk.bf16.gmra.mxu1 %vm10054_vm9, %v10815_v18  ;;  %6830 = vmatprep.subr.bf16.mxu0 %v9416_v22  ;;  %v4890_v47 = vpop.f32.mrf.mxu1  ;;  %v9450_v22 = vld [vmem:[#allocation8 + $0x9a8] ss:$16 sps:$4 sm:$0xff]  }
 0x366   :  { %8266 = vmatmul.mubr.msk.bf16.gmra.mxu0 %vm10292_vm5, %v10669_v51  ;;  %8271 = vmatprep.mubr.msk.bf16.mxu1 %vm10134_vm12, %v10804_v55  ;;  %v10949_v34 = vadd.f32 %v4890_v47, %v4827_v62  ;;  %v9452_v62 = vld [vmem:[#allocation8 + $0x9ac] ss:$16 sps:$4 sm:$0xff]   ;;  %v4933_v39 = vpop.f32.mrf.mxu0  ;;  %v9461_v47 = vld [vmem:[#allocation8 + $0xb64] ss:$16 sps:$4 sm:$0xff]  }
 0x367   :  { %6768 = vmatpush1.bf16.msra.mxu1 %v9411_v10  ;;  %8301 = vmatprep.mubr.msk.bf16.mxu0 %vm10134_vm12, %v10640_v0  ;;  %v4892_v18 = vpop.f32.mrf.mxu1  ;;  %v9431_v0 = vld [vmem:[#allocation8 + $0xa04] ss:$16 sps:$4 sm:$0xff]  }
 0x368   :  { %6831 = vmatpush1.bf16.msra.mxu0 %v9414_v28  ;;  %6769 = vmatprep.subr.bf16.mxu1 %v9419_v21  ;;  %v10954_v1 = vadd.f32 %v4892_v18, %v4829_v24  ;;  %v9455_v10 = vld [vmem:[#allocation8 + $0xb84] ss:$16 sps:$4 sm:$0xff]   ;;  %v9458_v28 = vld [vmem:[#allocation8 + $0x98c] ss:$16 sps:$4 sm:$0xff]   ;;  %v9453_v21 = vld [vmem:[#allocation8 + $0xb80] ss:$16 sps:$4 sm:$0xff]  }
 0x369   :  { %6832 = vmatprep.subr.bf16.mxu0 %v9422_v29  ;;  %v4894_v56 = vpop.f32.mrf.mxu1  ;;  %v9456_v24 = vld [vmem:[#allocation8 + $0x988] ss:$16 sps:$4 sm:$0xff]   ;;  %v4935_v29 = vpop.f32.mrf.mxu0  ;;  %v9459_v18 = vld [vmem:[#allocation8 + $0xb60] ss:$16 sps:$4 sm:$0xff]  }
 0x36a   :  { %v10956_v44 = vadd.f32 %v4894_v56, %v4831_v30  ;;  %v9470_v56 = vld [vmem:[#allocation8 + $0x94c] ss:$16 sps:$4 sm:$0xff]  }
 0x36b   :  { %6770 = vmatpush1.bf16.msra.mxu1 %v9417_v35  ;;  %v9464_v35 = vld [vmem:[#allocation8 + $0x96c] ss:$16 sps:$4 sm:$0xff]   ;;  %v4937_v30 = vpop.f32.mrf.mxu0 }
 0x36c   :  { %6833 = vmatpush1.bf16.msra.mxu0 %v9420_v43  ;;  %6771 = vmatprep.subr.bf16.mxu1 %v9425_v60  ;;  %v9462_v43 = vld [vmem:[#allocation8 + $0x968] ss:$16 sps:$4 sm:$0xff]   ;;  %v9467_v60 = vld [vmem:[#allocation8 + $0xb44] ss:$16 sps:$4 sm:$0xff]  }
 0x36d   :  { %6834 = vmatprep.subr.bf16.mxu0 %v9428_v53  ;;  %v9465_v53 = vld [vmem:[#allocation8 + $0xb40] ss:$16 sps:$4 sm:$0xff]  }
 0x36f   :  { %6772 = vmatpush1.bf16.msra.mxu1 %v9423_v38  ;;  %v9468_v38 = vld [vmem:[#allocation8 + $0x948] ss:$16 sps:$4 sm:$0xff]  }
 0x370   :  { %6835 = vmatpush1.bf16.msra.mxu0 %v9426_v48  ;;  %6773 = vmatprep.subr.bf16.mxu1 %v9431_v0  ;;  %v9473_v48 = vld [vmem:[#allocation8 + $0xb24] ss:$16 sps:$4 sm:$0xff]   ;;  %v4941_v0 = vpop.f32.mrf.mxu0 }
 0x371   :  { %6836 = vmatprep.subr.bf16.mxu0 %v9434_v36  ;;  %v9476_v36 = vld [vmem:[#allocation8 + $0x92c] ss:$16 sps:$4 sm:$0xff]  }
 0x373   :  { %6774 = vmatpush1.bf16.msra.mxu1 %v9429_v41  ;;  %v9471_v41 = vld [vmem:[#allocation8 + $0xb20] ss:$16 sps:$4 sm:$0xff]  }
 0x374   :  { %6837 = vmatpush1.bf16.msra.mxu0 %v9432_v40  ;;  %6775 = vmatprep.subr.bf16.mxu1 %v9437_v5  ;;  %v9474_v40 = vld [vmem:[#allocation8 + $0x928] ss:$16 sps:$4 sm:$0xff]   ;;  %v9479_v5 = vld [vmem:[#allocation8 + $0xb04] ss:$16 sps:$4 sm:$0xff]  }
 0x375   :  { %6838 = vmatprep.subr.bf16.mxu0 %v9440_v9  ;;  %v4943_v9 = vpop.f32.mrf.mxu0 }
 0x377   :  { %6776 = vmatpush2.bf16.msra.mxu1 %v9435_v33  ;;  %v9482_v33 = vld [vmem:[#allocation8 + $0x90c] ss:$16 sps:$4 sm:$0xff]  }
 0x378   :  { %6839 = vmatpush2.bf16.msra.mxu0 %v9438_v46  ;;  %6777 = vmatprep.subr.bf16.mxu1 %v9443_v58  ;;  %v9477_v46 = vld [vmem:[#allocation8 + $0xb00] ss:$16 sps:$4 sm:$0xff]   ;;  %v9480_v58 = vld [vmem:[#allocation8 + $0x908] ss:$16 sps:$4 sm:$0xff]  }
 0x379   :  { %6840 = vmatprep.subr.bf16.mxu0 %v9446_v15  ;;  %v9485_v15 = vld [vmem:[#allocation8 + $0xaec] ss:$16 sps:$4 sm:$0xff]  }
 0x37b   :  { %6778 = vmatpush2.bf16.msra.mxu1 %v9441_v17  ;;  %v4945_v17 = vpop.f32.mrf.mxu0 }
 0x37c   :  { %6841 = vmatpush2.bf16.msra.mxu0 %v9444_v16  ;;  %6779 = vmatprep.subr.bf16.mxu1 %v9449_v57 }
 0x37d   :  { %6842 = vmatprep.subr.bf16.mxu0 %v9452_v62  ;;  %v9483_v62 = vld [vmem:[#allocation8 + $0xae8] ss:$16 sps:$4 sm:$0xff]  }
 0x37f   :  { %6780 = vmatpush2.bf16.msra.mxu1 %v9447_v31  ;;  %v4947_v31 = vpop.f32.mrf.mxu0 }
 0x380   :  { %6843 = vmatpush2.bf16.msra.mxu0 %v9450_v22  ;;  %6781 = vmatprep.subr.bf16.mxu1 %v9455_v10  ;;  %v9488_v10 = vld [vmem:[#allocation8 + $0xacc] ss:$16 sps:$4 sm:$0xff]  }
 0x381   :  { %6844 = vmatprep.subr.bf16.mxu0 %v9458_v28 }
 0x383   :  { %6782 = vmatpush2.bf16.msra.mxu1 %v9453_v21 }
 0x384   :  { %6845 = vmatpush2.bf16.msra.mxu0 %v9456_v24  ;;  %6783 = vmatprep.subr.bf16.mxu1 %v9461_v47  ;;  %v9486_v24 = vld [vmem:[#allocation8 + $0xac8] ss:$16 sps:$4 sm:$0xff]   ;;  %v4951_v47 = vpop.f32.mrf.mxu0 }
 0x385   :  { %6846 = vmatprep.subr.bf16.mxu0 %v9464_v35  ;;  %v9491_v35 = vld [vmem:[#allocation8 + $0xaac] ss:$16 sps:$4 sm:$0xff]  }
 0x387   :  { %6784 = vmatpush2.bf16.msra.mxu1 %v9459_v18 }
 0x388   :  { %6847 = vmatpush2.bf16.msra.mxu0 %v9462_v43  ;;  %6785 = vmatprep.subr.bf16.mxu1 %v9467_v60  ;;  %v9489_v60 = vld [vmem:[#allocation8 + $0xaa8] ss:$16 sps:$4 sm:$0xff]  }
 0x389   :  { %6848 = vmatprep.subr.bf16.mxu0 %v9470_v56  ;;  %v4953_v56 = vpop.f32.mrf.mxu0 }
 0x38b   :  { %6786 = vmatpush2.bf16.msra.mxu1 %v9465_v53 }
 0x38c   :  { %6849 = vmatpush2.bf16.msra.mxu0 %v9468_v38  ;;  %6787 = vmatprep.subr.bf16.mxu1 %v9473_v48  ;;  %v9494_v38 = vld [vmem:[#allocation8 + $0xa8c] ss:$16 sps:$4 sm:$0xff]   ;;  %v9492_v48 = vld [vmem:[#allocation8 + $0xa88] ss:$16 sps:$4 sm:$0xff]  }
 0x38d   :  { %6850 = vmatprep.subr.bf16.mxu0 %v9476_v36 }
 0x38f   :  { %6788 = vmatpush2.bf16.msra.mxu1 %v9471_v41  ;;  %v9497_v41 = vld [vmem:[#allocation8 + $0xa6c] ss:$16 sps:$4 sm:$0xff]  }
 0x390   :  { %6851 = vmatpush2.bf16.msra.mxu0 %v9474_v40  ;;  %6789 = vmatprep.subr.bf16.mxu1 %v9479_v5 }
 0x391   :  { %6852 = vmatprep.subr.bf16.mxu0 %v9482_v33 }
 0x393   :  { %6790 = vmatpush2.bf16.msra.mxu1 %v9477_v46  ;;  %v4994_v16 = vpop.f32.mrf.mxu1 }
 0x394   :  { %6853 = vmatpush2.bf16.msra.mxu0 %v9480_v58  ;;  %v10958_v57 = vadd.f32 %v4994_v16, %v4931_v8  ;;  %6885 = vmatprep.subr.bf16.mxu1 %v9485_v15  ;;  %v9500_v58 = vld [vmem:[#allocation8 + $0xa4c] ss:$16 sps:$4 sm:$0xff]  }
 0x395   :  { %v4996_v22 = vpop.f32.mrf.mxu1 }
 0x396   :  { %8276 = vmatmul.mubr.msk.bf16.vlgmr.msra.gmra.mxu1 %vm10134_vm12, %v10741_v3  ;;  %v10963_v28 = vadd.f32 %v4996_v22, %v4933_v39  ;;  %v9503_v22 = vld [vmem:[#allocation8 + $0xa2c] ss:$16 sps:$4 sm:$0xff]  }
 0x397   :  { %8306 = vmatmul.mubr.msk.bf16.vlgmr.msra.gmra.mxu0 %vm10134_vm12, %v10604_v63  ;;  %8281 = vmatprep.mubr.msk.bf16.mxu1 %vm10224_vm1, %v10810_v54  ;;  %v4998_v8 = vpop.f32.mrf.mxu1 }
 0x398   :  { %8311 = vmatprep.mubr.msk.bf16.mxu0 %vm10224_vm1, %v10648_v27  ;;  %6886 = vmatpush1.bf16.msra.mxu1 %v9483_v62  ;;  %v10974_v21 = vadd.f32 %v4998_v8, %v4935_v29  ;;  %v9498_v62 = vld [vmem:[#allocation8 + $0xa48] ss:$16 sps:$4 sm:$0xff]  }
 0x399   :  { %6887 = vmatprep.subr.bf16.mxu1 %v9488_v10  ;;  %v5000_v39 = vpop.f32.mrf.mxu1 }
 0x39a   :  { %v10976_v18 = vadd.f32 %v5000_v39, %v4937_v30  ;;  %v9509_v39 = vld [vmem:[#allocation8 + $0xbec] ss:$16 sps:$4 sm:$0xff]  }
 0x39b   :  { %v5004_v63 = vpop.f32.mrf.mxu1 }
 0x39c   :  { %6888 = vmatpush1.bf16.msra.mxu1 %v9486_v24  ;;  %v10978_v43 = vadd.f32 %v5004_v63, %v4941_v0  ;;  %v4955_v0 = vpop.f32.mrf.mxu0  ;;  %v9501_v24 = vld [vmem:[#allocation8 + $0xa28] ss:$16 sps:$4 sm:$0xff]  }
 0x39d   :  { %6889 = vmatprep.subr.bf16.mxu1 %v9491_v35  ;;  %v5006_v53 = vpop.f32.mrf.mxu1  ;;  %v9507_v63 = vld [vmem:[#allocation8 + $0xbe8] ss:$16 sps:$4 sm:$0xff]  }
 0x39e   :  { %8286 = vmatmul.mubr.msk.bf16.gmra.mxu1 %vm10224_vm1, %v10824_v19  ;;  %v10983_v27 = vadd.f32 %v5006_v53, %v4943_v9  ;;  %v9495_v9 = vld [vmem:[#allocation8 + $0xa68] ss:$16 sps:$4 sm:$0xff]   ;;  %v4957_v33 = vpop.f32.mrf.mxu0 }
 0x39f   :  { %8316 = vmatmul.mubr.msk.bf16.gmra.mxu0 %vm10224_vm1, %v10662_v23  ;;  %8291 = vmatprep.mubr.msk.bf16.mxu1 %vm10292_vm5, %v10826_v50  ;;  %v5008_v29 = vpop.f32.mrf.mxu1  ;;  %v9510_v53 = vld [vmem:[#allocation8 + $0xbc8] ss:$16 sps:$4 sm:$0xff]  }
 0x3a0   :  { %8321 = vmatprep.mubr.msk.bf16.mxu0 %vm10292_vm5, %v10667_v49  ;;  %6890 = vmatpush1.bf16.msra.mxu1 %v9489_v60  ;;  %v10994_v30 = vadd.f32 %v5008_v29, %v4945_v17  ;;  %v11005_v15 = vpop.f32.mrf.mxu0  ;;  %v9512_v60 = vld [vmem:[#allocation8 + $0xbcc] ss:$16 sps:$4 sm:$0xff]  }
 0x3a1   :  { %6891 = vmatprep.subr.bf16.mxu1 %v9494_v38  ;;  %v5010_v36 = vpop.f32.mrf.mxu1  ;;  %v9515_v38 = vld [vmem:[#allocation8 + $0xbac] ss:$16 sps:$4 sm:$0xff]  }
 0x3a2   :  { %v10996_v40 = vadd.f32 %v5010_v36, %v4947_v31  ;;  %v11017_v8 = vpop.f32.mrf.mxu0 }
 0x3a3   :  { %v5014_v23 = vpop.f32.mrf.mxu1 }
 0x3a4   :  { %6892 = vmatpush1.bf16.msra.mxu1 %v9492_v48  ;;  %v10998_v5 = vadd.f32 %v5014_v23, %v4951_v47  ;;  %v11019_v47 = vpop.f32.mrf.mxu0  ;;  %v9513_v48 = vld [vmem:[#allocation8 + $0xba8] ss:$16 sps:$4 sm:$0xff]   ;;  %v9521_v23 = vld [vmem:[#allocation8 + $0xb6c] ss:$16 sps:$4 sm:$0xff]  }
 0x3a5   :  { %6893 = vmatprep.subr.bf16.mxu1 %v9497_v41  ;;  %v5016_v46 = vpop.f32.mrf.mxu1  ;;  %v9516_v41 = vld [vmem:[#allocation8 + $0xb88] ss:$16 sps:$4 sm:$0xff]  }
 0x3a6   :  { %8296 = vmatmul.mubr.msk.bf16.gmra.mxu1 %vm10292_vm5, %v10828_v45  ;;  %v11003_v49 = vadd.f32 %v5016_v46, %v4953_v56  ;;  %v11021_v35 = vpop.f32.mrf.mxu0  ;;  %v9524_v46 = vld [vmem:[#allocation8 + $0xb4c] ss:$16 sps:$4 sm:$0xff]  }
 0x3a7   :  { %8326 = vmatmul.mubr.msk.bf16.gmra.mxu0 %vm10292_vm5, %v10669_v51  ;;  %8331 = vmatprep.mubr.msk.bf16.mxu1 %vm10134_vm12, %v10804_v55  ;;  %v5018_v17 = vpop.f32.mrf.mxu1  ;;  %v9506_v51 = vld [vmem:[#allocation8 + $0xa0c] ss:$16 sps:$4 sm:$0xff]   ;;  %v9504_v55 = vld [vmem:[#allocation8 + $0xa08] ss:$16 sps:$4 sm:$0xff]  }
 0x3a8   :  { %6894 = vmatpush1.bf16.msra.mxu1 %v9495_v9  ;;  %v11013_v16 = vadd.f32 %v5018_v17, %v4955_v0  ;;  %v11023_v56 = vpop.f32.mrf.mxu0  ;;  %v9518_v0 = vld [vmem:[#allocation8 + $0xb8c] ss:$16 sps:$4 sm:$0xff]   ;;  %v9522_v17 = vld [vmem:[#allocation8 + $0xb48] ss:$16 sps:$4 sm:$0xff]  }
 0x3a9   :  { %6895 = vmatprep.subr.bf16.mxu1 %v9500_v58  ;;  %v5020_v31 = vpop.f32.mrf.mxu1 }
 0x3aa   :  { %v11015_v10 = vadd.f32 %v5020_v31, %v4957_v33  ;;  %v11025_v29 = vpop.f32.mrf.mxu0  ;;  %v9519_v33 = vld [vmem:[#allocation8 + $0xb68] ss:$16 sps:$4 sm:$0xff]  }
 0x3ac   :  { %6896 = vmatpush1.bf16.msra.mxu1 %v9498_v62  ;;  %v11027_v36 = vpop.f32.mrf.mxu0  ;;  %v9527_v62 = vld [vmem:[#allocation8 + $0xb2c] ss:$16 sps:$4 sm:$0xff]  }
 0x3ad   :  { %6897 = vmatprep.subr.bf16.mxu1 %v9503_v22  ;;  %v9525_v22 = vld [vmem:[#allocation8 + $0xb28] ss:$16 sps:$4 sm:$0xff]  }
 0x3ae   :  { %v11029_v9 = vpop.f32.mrf.mxu0 }
 0x3b0   :  { %6898 = vmatpush1.bf16.msra.mxu1 %v9501_v24  ;;  %v11031_v58 = vpop.f32.mrf.mxu0  ;;  %v9530_v24 = vld [vmem:[#allocation8 + $0xb0c] ss:$16 sps:$4 sm:$0xff]  }
 0x3b1   :  { %6899 = vmatprep.subr.bf16.mxu1 %v9506_v51 }
 0x3b2   :  { %v11033_v31 = vpop.f32.mrf.mxu0 }
 0x3b4   :  { %6900 = vmatpush1.bf16.msra.mxu1 %v9504_v55  ;;  %v11035_v51 = vpop.f32.mrf.mxu0  ;;  %v9528_v55 = vld [vmem:[#allocation8 + $0xb08] ss:$16 sps:$4 sm:$0xff]  }
 0x3b5   :  { %6901 = vmatprep.subr.bf16.mxu1 %v9509_v39 }
 0x3b6   :  { %v11037_v39 = vpop.f32.mrf.mxu0 }
 0x3b8   :  { %6902 = vmatpush2.bf16.msra.mxu1 %v9507_v63 }
 0x3b9   :  { %6903 = vmatprep.subr.bf16.mxu1 %v9512_v60 }
 0x3bc   :  { %6904 = vmatpush2.bf16.msra.mxu1 %v9510_v53 }
 0x3bd   :  { %6905 = vmatprep.subr.bf16.mxu1 %v9515_v38 }
 0x3c0   :  { %6906 = vmatpush2.bf16.msra.mxu1 %v9513_v48 }
 0x3c1   :  { %6907 = vmatprep.subr.bf16.mxu1 %v9518_v0 }
 0x3c4   :  { %6908 = vmatpush2.bf16.msra.mxu1 %v9516_v41 }
 0x3c5   :  { %6909 = vmatprep.subr.bf16.mxu1 %v9521_v23 }
 0x3c8   :  { %6910 = vmatpush2.bf16.msra.mxu1 %v9519_v33 }
 0x3c9   :  { %6911 = vmatprep.subr.bf16.mxu1 %v9524_v46 }
 0x3cc   :  { %6912 = vmatpush2.bf16.msra.mxu1 %v9522_v17 }
 0x3cd   :  { %6913 = vmatprep.subr.bf16.mxu1 %v9527_v62 }
 0x3d0   :  { %6914 = vmatpush2.bf16.msra.mxu1 %v9525_v22 }
 0x3d1   :  { %6915 = vmatprep.subr.bf16.mxu1 %v9530_v24 }
 0x3d4   :  { %6916 = vmatpush2.bf16.msra.mxu1 %v9528_v55  ;;  %v5760_v17 = vpop.f32.mrf.mxu1 }
 0x3d5   :  { %v5823_v63 = vpop.f32.mrf.mxu0 }
 0x3d6   :  { %v5824_v60 = vadd.f32 %v5823_v63, %v10958_v57  ;;  %v5762_v62 = vpop.f32.mrf.mxu1 }
 0x3d7   :  { %8336 = vmatmul.mubr.msk.bf16.vlgmr.msra.gmra.mxu1 %vm10134_vm12, %v10741_v3  ;;  %v5825_v53 = vpop.f32.mrf.mxu0 }
 0x3d8   :  { %8341 = vmatprep.mubr.msk.bf16.mxu1 %vm10224_vm1, %v10810_v54  ;;  %v5826_v38 = vadd.f32 %v5825_v53, %v10963_v28  ;;  %v5764_v24 = vpop.f32.mrf.mxu1 }
 0x3d9   :  { %v5827_v48 = vpop.f32.mrf.mxu0 }
 0x3da   :  { %v5828_v0 = vadd.f32 %v5827_v48, %v10974_v21 }
 0x3db   :  { %v5829_v41 = vpop.f32.mrf.mxu0 }
 0x3dc   :  { %v5830_v23 = vadd.f32 %v5829_v41, %v10976_v18 }
 0x3dd   :  { %v5833_v33 = vpop.f32.mrf.mxu0 }
 0x3de   :  { %v5834_v57 = vadd.f32 %v5833_v33, %v10978_v43 }
 0x3df   :  { %8346 = vmatmul.mubr.msk.bf16.gmra.mxu1 %vm10224_vm1, %v10824_v19  ;;  %v5835_v3 = vpop.f32.mrf.mxu0 }
 0x3e0   :  { %8351 = vmatprep.mubr.msk.bf16.mxu1 %vm10292_vm5, %v10826_v50  ;;  %v5836_v54 = vadd.f32 %v5835_v3, %v10983_v27 }
 0x3e1   :  { %v5837_v52 = vpop.f32.mrf.mxu0 }
 0x3e2   :  { %v5838_v28 = vadd.f32 %v5837_v52, %v10994_v30 }
 0x3e3   :  { %v5839_v21 = vpop.f32.mrf.mxu0 }
 0x3e4   :  { %v5840_v18 = vadd.f32 %v5839_v21, %v10996_v40  ;;  %v5766_v40 = vpop.f32.mrf.mxu1 }
 0x3e5   :  { %v5843_v46 = vpop.f32.mrf.mxu0 }
 0x3e6   :  { %v5844_v43 = vadd.f32 %v5843_v46, %v10998_v5  ;;  %v11066_v55 = vpop.f32.mrf.mxu1 }
 0x3e7   :  { %8356 = vmatmul.mubr.msk.bf16.gmra.mxu1 %vm10292_vm5, %v10828_v45  ;;  %v5845_v19 = vpop.f32.mrf.mxu0 }
 0x3e8   :  { %v5846_v2 = vadd.f32 %v5845_v19, %v11003_v49  ;;  %v11068_v5 = vpop.f32.mrf.mxu1 }
 0x3e9   :  { %v5847_v50 = vpop.f32.mrf.mxu0 }
 0x3ea   :  { %v5848_v27 = vadd.f32 %v5847_v50, %v11013_v16  ;;  %v11070_v63 = vpop.f32.mrf.mxu1 }
 0x3eb   :  { %v5849_v22 = vpop.f32.mrf.mxu0 }
 0x3ec   :  { %v5850_v30 = vadd.f32 %v5849_v22, %v11015_v10  ;;  %v11072_v25 = vpop.f32.mrf.mxu1 }
 0x3ee   :  { %v11074_v45 = vpop.f32.mrf.mxu1 }
 0x3f0   :  { %v11076_v49 = vpop.f32.mrf.mxu1 }
 0x3f2   :  { %v11078_v53 = vpop.f32.mrf.mxu1 }
 0x3f4   :  { %v11080_v16 = vpop.f32.mrf.mxu1 }
 0x415   :  { %v5886_v48 = vpop.f32.mrf.mxu1 }
 0x416   :  { %v11082_v10 = vadd.f32 %v5886_v48, %v5824_v60 }
 0x417   :  { %v5888_v41 = vpop.f32.mrf.mxu1 }
 0x418   :  { %v11084_v33 = vadd.f32 %v5888_v41, %v5826_v38 }
 0x419   :  { %v5890_v3 = vpop.f32.mrf.mxu1 }
 0x41a   :  { %v11086_v52 = vadd.f32 %v5890_v3, %v5828_v0 }
 0x41b   :  { %v5892_v21 = vpop.f32.mrf.mxu1 }
 0x41c   :  { %v11088_v46 = vadd.f32 %v5892_v21, %v5830_v23 }
 0x41d   :  { %v5896_v19 = vpop.f32.mrf.mxu1 }
 0x41e   :  { %v11090_v50 = vadd.f32 %v5896_v19, %v5834_v57 }
 0x41f   :  { %v5898_v22 = vpop.f32.mrf.mxu1 }
 0x420   :  { %v11092_v20 = vadd.f32 %v5898_v22, %v5836_v54  ;;  %v6730_v54 = vpop.f32.mrf.mxu0 }
 0x421   :  { %v5900_v59 = vpop.f32.mrf.mxu1 }
 0x422   :  { %v11094_v12 = vadd.f32 %v5900_v59, %v5838_v28  ;;  %v6732_v22 = vpop.f32.mrf.mxu0 }
 0x423   :  { %v5902_v60 = vpop.f32.mrf.mxu1 }
 0x424   :  { %11284 = vst [vmem:[#allocation22_spill] sm:$0xff] %v11094_v12  ;;  %v11096_v48 = vadd.f32 %v5902_v60, %v5840_v18  ;;  %v6734_v42 = vpop.f32.mrf.mxu0  ;;  %v11106_v18 = vld [vmem:[#allocation10] sm:$0xf] }
 0x425   :  { %v5906_v38 = vpop.f32.mrf.mxu1 }
 0x426   :  { %v11098_v41 = vadd.f32 %v5906_v38, %v5844_v43  ;;  %v6736_v59 = vpop.f32.mrf.mxu0  ;;  %v5698_v43 = vadd.f32 %v11005_v15, %v10898_v61  ;;  %v11290_v61 = vsub.s32 1, %v9877_v26 }
 0x427   :  { %v5908_v0 = vpop.f32.mrf.mxu1 }
 0x428   :  { %11285 = vst [vmem:[#allocation23_spill] sm:$0xff] %v11098_v41  ;;  %v11100_v3 = vadd.f32 %v5908_v0, %v5846_v2  ;;  %v6740_v28 = vpop.f32.mrf.mxu0  ;;  %v5700_v2 = vadd.f32 %v11017_v8, %v10909_v11  ;;  %v11122_v15 = vrot.slane %v11106_v18, %v11290_v61  ;;  %v5704_v11 = vadd.f32 %v11021_v35, %v10916_v6 }
 0x429   :  { %v5910_v23 = vpop.f32.mrf.mxu1  ;;  %v5710_v6 = vadd.f32 %v11025_v29, %v10929_v13 }
 0x42a   :  { %11286 = vst [vmem:[#allocation24_spill] sm:$0xff] %v11100_v3  ;;  %v11102_v21 = vadd.f32 %v5910_v23, %v5848_v27  ;;  %v6742_v12 = vpop.f32.mrf.mxu0  ;;  %v5761_v27 = vadd.f32 %v5760_v17, %v5698_v43  ;;  %v5702_v23 = vadd.f32 %v11019_v47, %v10914_v4  ;;  %v5767_v4 = vadd.f32 %v5766_v40, %v5704_v11 }
 0x42b   :  { %v5912_v57 = vpop.f32.mrf.mxu1 }
 0x42c   :  { %11287 = vst [vmem:[#allocation25_spill] sm:$0xff] %v11102_v21  ;;  %v11104_v19 = vadd.f32 %v5912_v57, %v5850_v30  ;;  %v11289_v30 = vsub.s32 0, %v9877_v26  ;;  %v6744_v57 = vpop.f32.mrf.mxu0  ;;  %v5763_v21 = vadd.f32 %v5762_v62, %v5700_v2  ;;  %v5765_v17 = vadd.f32 %v5764_v24, %v5702_v23  ;;  %v9555_v24 = vld [vmem:[#allocation2] sm:$0xff] }
 0x42e   :  { %11288 = vst [vmem:[#allocation26_spill] sm:$0xff] %v11104_v19  ;;  %v11115_v0 = vrot.slane %v11106_v18, %v11289_v30  ;;  %v6746_v47 = vpop.f32.mrf.mxu0 }
 0x430   :  { %v6750_v23 = vpop.f32.mrf.mxu0 }
 0x456   :  { %v6793_v60 = vpop.f32.mrf.mxu1 }
 0x457   :  { %v6794_v38 = vadd.f32 %v6793_v60, %v6730_v54 }
 0x458   :  { %v6795_v19 = vpop.f32.mrf.mxu1 }
 0x459   :  { %v6948_v3 = vadd.f32 %v6794_v38, %v5761_v27  ;;  %v6796_v41 = vadd.f32 %v6795_v19, %v6732_v22  ;;  %v5708_v27 = vadd.f32 %v11023_v56, %v10918_v14  ;;  %v9556_v56 = vld [vmem:[#allocation2 + $0x8] sm:$0xff] }
 0x45a   :  { %v6797_v8 = vpop.f32.mrf.mxu1 }
 0x45b   :  { %v6994_v54 = vadd.f32 %v11115_v0, %v6948_v3  ;;  %v6949_v43 = vadd.f32 %v6796_v41, %v5763_v21  ;;  %v6798_v60 = vadd.f32 %v6797_v8, %v6734_v42  ;;  %v5712_v41 = vadd.f32 %v11027_v36, %v10934_v7 }
 0x45c   :  { %v6799_v30 = vpop.f32.mrf.mxu1  ;;  %v5771_v21 = vadd.f32 %v11066_v55, %v5708_v27  ;;  %v9557_v55 = vld [vmem:[#allocation2 + $0x20] sm:$0xff] }
 0x45d   :  { %v7018_v62 = vmax.f32 %v6994_v54, 0.0  ;;  %v6995_v19 = vadd.f32 %v11122_v15, %v6949_v43  ;;  %v6952_v22 = vadd.f32 %v6798_v60, %v5765_v17  ;;  %v6800_v2 = vadd.f32 %v6799_v30, %v6736_v59 }
 0x45e   :  { %v6803_v35 = vpop.f32.mrf.mxu1  ;;  %v5773_v59 = vadd.f32 %v11068_v5, %v5710_v6  ;;  %v5714_v17 = vadd.f32 %v11029_v9, %v10936_v37  ;;  %v5775_v54 = vadd.f32 %v11070_v63, %v5712_v41  ;;  %v9558_v37 = vld [vmem:[#allocation2 + $0x28] sm:$0xff] }
 0x45f   :  { %v7042_v38 = vadd.f32 %v9555_v24, %v7018_v62  ;;  %v7019_v3 = vmax.f32 %v6995_v19, 0.0  ;;  %v6998_v42 = vadd.f32 %v11115_v0, %v6952_v22  ;;  %v6953_v40 = vadd.f32 %v6800_v2, %v5767_v4  ;;  %v6752_v62 = vpop.f32.mrf.mxu0  ;;  %v9560_v41 = vld [vmem:[#allocation2 + $0x48] sm:$0xff] }
 0x460   :  { %v6804_v61 = vadd.f32 %v6803_v35, %v6740_v28  ;;  %v6805_v14 = vpop.f32.mrf.mxu1  ;;  %v5718_v4 = vadd.f32 %v11031_v58, %v10938_v32  ;;  %v5777_v30 = vadd.f32 %v11072_v25, %v5714_v17  ;;  %v5720_v24 = vadd.f32 %v11033_v31, %v10949_v34 }
 0x461   :  { %7066 = vst [vmem:[#allocation11] sm:$0xff] %v7042_v38  ;;  %v7043_v13 = vadd.f32 %v9556_v56, %v7019_v3  ;;  %v7022_v29 = vmax.f32 %v6998_v42, 0.0  ;;  %v6999_v11 = vadd.f32 %v11122_v15, %v6953_v40  ;;  %v6806_v8 = vadd.f32 %v6805_v14, %v6742_v12  ;;  %v6754_v3 = vpop.f32.mrf.mxu0  ;;  %v9559_v42 = vld [vmem:[#allocation2 + $0x40] sm:$0xff] }
 0x462   :  { %v6956_v7 = vadd.f32 %v6804_v61, %v5771_v21  ;;  %v6807_v36 = vpop.f32.mrf.mxu1  ;;  %v5781_v27 = vadd.f32 %v11074_v45, %v5718_v4  ;;  %v5722_v38 = vadd.f32 %v11035_v51, %v10954_v1  ;;  %v5724_v14 = vadd.f32 %v11037_v39, %v10956_v44  ;;  %v9561_v51 = vld [vmem:[#allocation2 + $0x60] sm:$0xff]  ;;  %v9562_v44 = vld [vmem:[#allocation2 + $0x68] sm:$0xff] }
 0x463   :  { %7067 = vst [vmem:[#allocation11 + $0x8] sm:$0xff] %v7043_v13  ;;  %v7046_v5 = vadd.f32 %v9557_v55, %v7022_v29  ;;  %v7023_v43 = vmax.f32 %v6999_v11, 0.0  ;;  %v6957_v28 = vadd.f32 %v6806_v8, %v5773_v59  ;;  %v6808_v60 = vadd.f32 %v6807_v36, %v6744_v57  ;;  %v6756_v17 = vpop.f32.mrf.mxu0 }
 0x464   :  { %v7002_v12 = vadd.f32 %v11115_v0, %v6956_v7  ;;  %v6809_v19 = vpop.f32.mrf.mxu1  ;;  %v5785_v34 = vadd.f32 %v11078_v53, %v5722_v38  ;;  %v5787_v8 = vadd.f32 %v11080_v16, %v5724_v14 }
 0x465   :  { %7070 = vst [vmem:[#allocation11 + $0x20] sm:$0xff] %v7046_v5  ;;  %v7047_v9 = vadd.f32 %v9558_v37, %v7023_v43  ;;  %v7003_v63 = vadd.f32 %v11122_v15, %v6957_v28  ;;  %v6960_v22 = vadd.f32 %v6808_v60, %v5775_v54  ;;  %v6810_v2 = vadd.f32 %v6809_v19, %v6746_v47  ;;  %v9563_v5 = vld [vmem:[#allocation2 + $0x80] sm:$0xff] }
 0x466   :  { %v7026_v6 = vmax.f32 %v7002_v12, 0.0  ;;  %v6813_v57 = vpop.f32.mrf.mxu1  ;;  %v9565_v19 = vld [vmem:[#allocation2 + $0xa0] sm:$0xff] }
 0x467   :  { %7071 = vst [vmem:[#allocation11 + $0x28] sm:$0xff] %v7047_v9  ;;  %v7027_v35 = vmax.f32 %v7003_v63, 0.0  ;;  %v7006_v32 = vadd.f32 %v11115_v0, %v6960_v22  ;;  %v6961_v58 = vadd.f32 %v6810_v2, %v5777_v30  ;;  %v6814_v25 = vadd.f32 %v6813_v57, %v6750_v23  ;;  %v9566_v63 = vld [vmem:[#allocation2 + $0xa8] sm:$0xff]  ;;  %v6856_v2 = vpop.f32.mrf.mxu0 }
 0x468   :  { %v7050_v40 = vadd.f32 %v9559_v42, %v7026_v6  ;;  %v6815_v47 = vpop.f32.mrf.mxu1  ;;  %v5783_v23 = vadd.f32 %v11076_v49, %v5720_v24 }
 0x469   :  { %v7051_v45 = vadd.f32 %v9560_v41, %v7027_v35  ;;  %v7030_v21 = vmax.f32 %v7006_v32, 0.0  ;;  %v7007_v59 = vadd.f32 %v11122_v15, %v6961_v58  ;;  %v6964_v61 = vadd.f32 %v6814_v25, %v5781_v27  ;;  %v6858_v27 = vpop.f32.mrf.mxu0 }
 0x46a   :  { %7074 = vst [vmem:[#allocation11 + $0x40] sm:$0xff] %v7050_v40  ;;  %v6816_v31 = vadd.f32 %v6815_v47, %v6752_v62  ;;  %v6817_v1 = vpop.f32.mrf.mxu1  ;;  %v9564_v62 = vld [vmem:[#allocation2 + $0x88] sm:$0xff]  ;;  %v11292_v40 = vsub.s32 3, %v9877_v26 }
 0x46b   :  { %7075 = vst [vmem:[#allocation11 + $0x48] sm:$0xff] %v7051_v45  ;;  %v7054_v56 = vadd.f32 %v9561_v51, %v7030_v21  ;;  %v7031_v13 = vmax.f32 %v7007_v59, 0.0  ;;  %v7010_v29 = vadd.f32 %v11115_v0, %v6964_v61  ;;  %v6818_v11 = vadd.f32 %v6817_v1, %v6754_v3  ;;  %v6860_v6 = vpop.f32.mrf.mxu0  ;;  %v9567_v51 = vld [vmem:[#allocation2 + $0x10] sm:$0xff] }
 0x46c   :  { %v6965_v54 = vadd.f32 %v6816_v31, %v5783_v23  ;;  %v6819_v7 = vpop.f32.mrf.mxu1  ;;  %v11171_v47 = vrot.slane %v11106_v18, %v11292_v40 }
 0x46d   :  { %7078 = vst [vmem:[#allocation11 + $0x60] sm:$0xff] %v7054_v56  ;;  %v7055_v39 = vadd.f32 %v9562_v44, %v7031_v13  ;;  %v7034_v49 = vmax.f32 %v7010_v29, 0.0  ;;  %v6968_v53 = vadd.f32 %v6818_v11, %v5785_v34  ;;  %v6820_v36 = vadd.f32 %v6819_v7, %v6756_v17 }
 0x46e   :  { %v7011_v55 = vadd.f32 %v11122_v15, %v6965_v54 }
 0x46f   :  { %7079 = vst [vmem:[#allocation11 + $0x68] sm:$0xff] %v7055_v39  ;;  %v7058_v43 = vadd.f32 %v9563_v5, %v7034_v49  ;;  %v7014_v28 = vadd.f32 %v11115_v0, %v6968_v53  ;;  %v6969_v60 = vadd.f32 %v6820_v36, %v5787_v8  ;;  %v6862_v0 = vpop.f32.mrf.mxu0  ;;  %v9568_v8 = vld [vmem:[#allocation2 + $0x18] sm:$0xff]  ;;  %v9569_v49 = vld [vmem:[#allocation2 + $0x30] sm:$0xff] }
 0x470   :  { %v7035_v4 = vmax.f32 %v7011_v55, 0.0 }
 0x471   :  { %7082 = vst [vmem:[#allocation11 + $0x80] sm:$0xff] %v7058_v43  ;;  %v7038_v16 = vmax.f32 %v7014_v28, 0.0  ;;  %v7015_v30 = vadd.f32 %v11122_v15, %v6969_v60  ;;  %v6866_v57 = vpop.f32.mrf.mxu0  ;;  %v11291_v15 = vsub.s32 2, %v9877_v26  ;;  %v9570_v60 = vld [vmem:[#allocation2 + $0x38] sm:$0xff] }
 0x472   :  { %v7059_v12 = vadd.f32 %v9564_v62, %v7035_v4 }
 0x473   :  { %v7062_v37 = vadd.f32 %v9565_v19, %v7038_v16  ;;  %v7039_v9 = vmax.f32 %v7015_v30, 0.0  ;;  %v6868_v35 = vpop.f32.mrf.mxu0  ;;  %v11165_v25 = vrot.slane %v11106_v18, %v11291_v15  ;;  %v11293_v30 = vld [vmem:[#allocation22_spill] sm:$0xff] }
 0x474   :  { %7083 = vst [vmem:[#allocation11 + $0x88] sm:$0xff] %v7059_v12 }
 0x475   :  { %7086 = vst [vmem:[#allocation11 + $0xa0] sm:$0xff] %v7062_v37  ;;  %v7063_v22 = vadd.f32 %v9566_v63, %v7039_v9  ;;  %v6870_v24 = vpop.f32.mrf.mxu0 }
 0x477   :  { %7087 = vst [vmem:[#allocation11 + $0xa8] sm:$0xff] %v7063_v22  ;;  %v6872_v61 = vpop.f32.mrf.mxu0 }
 0x479   :  { %v6876_v29 = vpop.f32.mrf.mxu0 }
 0x47b   :  { %v6878_v5 = vpop.f32.mrf.mxu0 }
 0x47d   :  { %v6880_v22 = vpop.f32.mrf.mxu0 }
 0x497   :  { %v6919_v32 = vpop.f32.mrf.mxu1 }
 0x498   :  { %v6920_v58 = vadd.f32 %v6919_v32, %v6856_v2  ;;  %v9571_v2 = vld [vmem:[#allocation2 + $0x50] sm:$0xff] }
 0x499   :  { %v6921_v38 = vpop.f32.mrf.mxu1 }
 0x49a   :  { %v6950_v3 = vadd.f32 %v6920_v58, %v11082_v10  ;;  %v6922_v42 = vadd.f32 %v6921_v38, %v6858_v27  ;;  %v11294_v58 = vld [vmem:[#allocation23_spill] sm:$0xff] }
 0x49b   :  { %v6923_v41 = vpop.f32.mrf.mxu1 }
 0x49c   :  { %v6996_v45 = vadd.f32 %v11165_v25, %v6950_v3  ;;  %v6951_v21 = vadd.f32 %v6922_v42, %v11084_v33  ;;  %v6924_v59 = vadd.f32 %v6923_v41, %v6860_v6  ;;  %v9573_v3 = vld [vmem:[#allocation2 + $0x70] sm:$0xff] }
 0x49d   :  { %v6925_v14 = vpop.f32.mrf.mxu1 }
 0x49e   :  { %v7020_v23 = vmax.f32 %v6996_v45, 0.0  ;;  %v6997_v34 = vadd.f32 %v11171_v47, %v6951_v21  ;;  %v6954_v31 = vadd.f32 %v6924_v59, %v11086_v52  ;;  %v6926_v10 = vadd.f32 %v6925_v14, %v6862_v0  ;;  %v9572_v0 = vld [vmem:[#allocation2 + $0x58] sm:$0xff]  ;;  %v6882_v45 = vpop.f32.mrf.mxu0  ;;  %v11295_v21 = vld [vmem:[#allocation24_spill] sm:$0xff] }
 0x49f   :  { %v6929_v1 = vpop.f32.mrf.mxu1  ;;  %v9574_v14 = vld [vmem:[#allocation2 + $0x78] sm:$0xff] }
 0x4a0   :  { %v7044_v26 = vadd.f32 %v9567_v51, %v7020_v23  ;;  %v7021_v56 = vmax.f32 %v6997_v34, 0.0  ;;  %v7000_v18 = vadd.f32 %v11165_v25, %v6954_v31  ;;  %v6955_v13 = vadd.f32 %v6926_v10, %v11088_v46  ;;  %v11296_v31 = vld [vmem:[#allocation25_spill] sm:$0xff] }
 0x4a1   :  { %v6930_v11 = vadd.f32 %v6929_v1, %v6866_v57  ;;  %v6931_v33 = vpop.f32.mrf.mxu1 }
 0x4a2   :  { %7068 = vst [vmem:[#allocation11 + $0x10] sm:$0xff] %v7044_v26  ;;  %v7045_v17 = vadd.f32 %v9568_v8, %v7021_v56  ;;  %v7024_v54 = vmax.f32 %v7000_v18, 0.0  ;;  %v7001_v7 = vadd.f32 %v11171_v47, %v6955_v13  ;;  %v6932_v44 = vadd.f32 %v6931_v33, %v6868_v35  ;;  %v9575_v26 = vld [vmem:[#allocation2 + $0x90] sm:$0xff]  ;;  %v11297_v13 = vld [vmem:[#allocation26_spill] sm:$0xff] }
 0x4a3   :  { %v6958_v52 = vadd.f32 %v6930_v11, %v11090_v50  ;;  %v6933_v39 = vpop.f32.mrf.mxu1 }
 0x4a4   :  { %7069 = vst [vmem:[#allocation11 + $0x18] sm:$0xff] %v7045_v17  ;;  %v7048_v53 = vadd.f32 %v9569_v49, %v7024_v54  ;;  %v7025_v36 = vmax.f32 %v7001_v7, 0.0  ;;  %v6959_v55 = vadd.f32 %v6932_v44, %v11092_v20  ;;  %v6934_v46 = vadd.f32 %v6933_v39, %v6870_v24  ;;  %v9576_v17 = vld [vmem:[#allocation2 + $0x98] sm:$0xff]  ;;  %v9577_v7 = vld [vmem:[#allocation2 + $0xb0] sm:$0xff] }
 0x4a5   :  { %v7004_v43 = vadd.f32 %v11165_v25, %v6958_v52  ;;  %v6935_v28 = vpop.f32.mrf.mxu1  ;;  %v9578_v39 = vld [vmem:[#allocation2 + $0xb8] sm:$0xff] }
 0x4a6   :  { %7072 = vst [vmem:[#allocation11 + $0x30] sm:$0xff] %v7048_v53  ;;  %v7049_v4 = vadd.f32 %v9570_v60, %v7025_v36  ;;  %v7005_v16 = vadd.f32 %v11171_v47, %v6959_v55  ;;  %v6962_v62 = vadd.f32 %v6934_v46, %v11293_v30  ;;  %v6936_v50 = vadd.f32 %v6935_v28, %v6872_v61 }
 0x4a7   :  { %v7028_v12 = vmax.f32 %v7004_v43, 0.0  ;;  %v6939_v19 = vpop.f32.mrf.mxu1 }
 0x4a8   :  { %7073 = vst [vmem:[#allocation11 + $0x38] sm:$0xff] %v7049_v4  ;;  %v7029_v37 = vmax.f32 %v7005_v16, 0.0  ;;  %v7008_v9 = vadd.f32 %v11165_v25, %v6962_v62  ;;  %v6963_v20 = vadd.f32 %v6936_v50, %v11096_v48  ;;  %v6940_v63 = vadd.f32 %v6939_v19, %v6876_v29 }
 0x4a9   :  { %v7052_v27 = vadd.f32 %v9571_v2, %v7028_v12  ;;  %v6941_v6 = vpop.f32.mrf.mxu1 }
 0x4aa   :  { %v7053_v57 = vadd.f32 %v9572_v0, %v7029_v37  ;;  %v7032_v35 = vmax.f32 %v7008_v9, 0.0  ;;  %v7009_v32 = vadd.f32 %v11171_v47, %v6963_v20  ;;  %v6966_v15 = vadd.f32 %v6940_v63, %v11294_v58 }
 0x4ab   :  { %7076 = vst [vmem:[#allocation11 + $0x50] sm:$0xff] %v7052_v27  ;;  %v6942_v24 = vadd.f32 %v6941_v6, %v6878_v5  ;;  %v6943_v38 = vpop.f32.mrf.mxu1 }
 0x4ac   :  { %7077 = vst [vmem:[#allocation11 + $0x58] sm:$0xff] %v7053_v57  ;;  %v7056_v42 = vadd.f32 %v9573_v3, %v7032_v35  ;;  %v7033_v40 = vmax.f32 %v7009_v32, 0.0  ;;  %v7012_v48 = vadd.f32 %v11165_v25, %v6966_v15  ;;  %v6944_v41 = vadd.f32 %v6943_v38, %v6880_v22 }
 0x4ad   :  { %v6967_v59 = vadd.f32 %v6942_v24, %v11295_v21  ;;  %v6945_v61 = vpop.f32.mrf.mxu1 }
 0x4ae   :  { %7080 = vst [vmem:[#allocation11 + $0x70] sm:$0xff] %v7056_v42  ;;  %v7057_v23 = vadd.f32 %v9574_v14, %v7033_v40  ;;  %v7036_v34 = vmax.f32 %v7012_v48, 0.0  ;;  %v6970_v10 = vadd.f32 %v6944_v41, %v11296_v31  ;;  %v6946_v1 = vadd.f32 %v6945_v61, %v6882_v45 }
 0x4af   :  { %v7013_v51 = vadd.f32 %v11171_v47, %v6967_v59 }
 0x4b0   :  { %7081 = vst [vmem:[#allocation11 + $0x78] sm:$0xff] %v7057_v23  ;;  %v7060_v56 = vadd.f32 %v9575_v26, %v7036_v34  ;;  %v7016_v18 = vadd.f32 %v11165_v25, %v6970_v10  ;;  %v6971_v29 = vadd.f32 %v6946_v1, %v11297_v13 }
 0x4b1   :  { %v7037_v11 = vmax.f32 %v7013_v51, 0.0 }
 0x4b2   :  { %7084 = vst [vmem:[#allocation11 + $0x90] sm:$0xff] %v7060_v56  ;;  %v7040_v33 = vmax.f32 %v7016_v18, 0.0  ;;  %v7017_v8 = vadd.f32 %v11171_v47, %v6971_v29 }
 0x4b3   :  { %v7061_v54 = vadd.f32 %v9576_v17, %v7037_v11 }
 0x4b4   :  { %v7064_v44 = vadd.f32 %v9577_v7, %v7040_v33  ;;  %v7041_v52 = vmax.f32 %v7017_v8, 0.0 }
 0x4b5   :  { %7085 = vst [vmem:[#allocation11 + $0x98] sm:$0xff] %v7061_v54 }
 0x4b6   :  { %7088 = vst [vmem:[#allocation11 + $0xb0] sm:$0xff] %v7064_v44  ;;  %v7065_v49 = vadd.f32 %v9578_v39, %v7041_v52 }
 0x4b8   :  { %7089 = vst [vmem:[#allocation11 + $0xb8] sm:$0xff] %v7065_v49 }
 0x4b9   :  { %9690 = shalt.err (!%p9687_p1)
}
 0x4ba   :  { %7101 = dma.vmem_to_hbm [thread:$0]  %s7096_s4, 3072, %s11207_s5, [#allocation4], %s9712_s1, %s9712_s1, %s9713_s8  }
 0x4bb   :  { %9705 = dma.done.wait [#allocation4], 3072  }
 0x4bc   :  { %9706 = vsyncadd [#allocation4], 4294964224 }
 0x4bd   :  { %7105 = vsyncpa [#allocation3], 1 }
 0x4be   :  { %7106 = vsyncpa [#allocation6], 1 }
 0x4bf   :  { %7107 = vsyncpa [#allocation9], 1 }
 0x4c0   :  { %7108 = vsyncpa [#allocation4], 1 }

</bundles_post_ra>
